<compile_context>
chip_gen: v5e
topology: v5e:2x2
jax: 0.10.0
libtpu: 0.0.40
codegen_flags: <defaults>
</compile_context>

<pallas_src>
import functools

import jax
import jax.numpy as jnp
from jax import lax
from jax.experimental import pallas as pl
from jax.experimental.pallas import tpu as pltpu


# ----------------------------------------------------------------------------
# Helpers
# ----------------------------------------------------------------------------
def _round_up(x, m):
    return ((x + m - 1) // m) * m


def _vmem_limit_bytes():
    # Generation-aware scoped-VMEM budget (v7x: 64 MiB/TC, v5e/v6e: 128 MiB).
    try:
        cap = int(pltpu.get_tpu_info().vmem_capacity_bytes)
        return int(min(max(cap // 2, 32 * 1024 * 1024), 100 * 1024 * 1024))
    except Exception:
        return 48 * 1024 * 1024


_VMEM_LIMIT = _vmem_limit_bytes()


# ----------------------------------------------------------------------------
# Pallas kernel 1: tiled matmul + bias + activation (all convs go through it)
# ----------------------------------------------------------------------------
def _make_mm_kernel(act):
    def kernel(x_ref, w_ref, b_ref, o_ref, acc_ref):
        @pl.when(pl.program_id(2) == 0)
        def _init():
            acc_ref[...] = jnp.zeros_like(acc_ref)

        acc_ref[...] += jnp.dot(x_ref[...], w_ref[...],
                                preferred_element_type=jnp.float32)

        @pl.when(pl.program_id(2) == pl.num_programs(2) - 1)
        def _finalize():
            y = acc_ref[...] + b_ref[...]
            if act == "relu":
                y = jnp.maximum(y, 0.0)
            elif act == "sigmoid":
                y = jax.nn.sigmoid(y)
            elif act == "tanh":
                y = jnp.tanh(y)
            o_ref[...] = y.astype(o_ref.dtype)

    return kernel


def _mm_tiles(M, K, N):
    # M (sublane) tile.
    if M <= 512:
        Mp = _round_up(M, 16)
        tm = Mp
    else:
        tm = 512
        Mp = _round_up(M, tm)
    # K tile (lanes of x / sublanes of w).
    Kp = _round_up(K, 128)
    tk = min(Kp, 768)
    while Kp % tk:
        tk -= 128
    # N (lane) tile.
    Np = _round_up(N, 128)
    tn = min(Np, 512)
    while Np % tn:
        tn -= 128
    return tm, tk, tn, Mp, Kp, Np


def _matmul_pallas(x, w, b, act):
    M, K = x.shape
    N = w.shape[1]
    tm, tk, tn, Mp, Kp, Np = _mm_tiles(M, K, N)
    x = x.astype(jnp.bfloat16)
    w = w.astype(jnp.bfloat16)
    b = b.astype(jnp.float32)
    if (Mp, Kp) != (M, K):
        x = jnp.pad(x, ((0, Mp - M), (0, Kp - K)))
    if (Kp, Np) != (K, N):
        w = jnp.pad(w, ((0, Kp - K), (0, Np - N)))
    if Np != N:
        b = jnp.pad(b, ((0, 0), (0, Np - N)))
    out = pl.pallas_call(
        _make_mm_kernel(act),
        out_shape=jax.ShapeDtypeStruct((Mp, Np), jnp.bfloat16),
        grid=(Mp // tm, Np // tn, Kp // tk),
        in_specs=[
            pl.BlockSpec((tm, tk), lambda i, j, k: (i, k)),
            pl.BlockSpec((tk, tn), lambda i, j, k: (k, j)),
            pl.BlockSpec((1, tn), lambda i, j, k: (0, j)),
        ],
        out_specs=pl.BlockSpec((tm, tn), lambda i, j, k: (i, j)),
        scratch_shapes=[pltpu.VMEM((tm, tn), jnp.float32)],
        compiler_params=pltpu.CompilerParams(
            dimension_semantics=("parallel", "parallel", "arbitrary"),
            vmem_limit_bytes=_VMEM_LIMIT),
    )(x, w, b)
    if (Mp, Np) != (M, N):
        out = out[:M, :N]
    return out


# ----------------------------------------------------------------------------
# Pallas kernel 2: batched, row-tiled generate_attention hot path
# ----------------------------------------------------------------------------
def _attn_kernel(ex_ref, q_ref, wt_ref, g_ref, o_ref):
    ex = ex_ref[0]                                   # (tj, C) exemplar rows
    q = q_ref[0]                                     # (N,  C) full query
    # exemplar_corr = exemplar_rows @ W_e^T
    corr = jnp.dot(ex, wt_ref[...], preferred_element_type=jnp.float32)
    # A[i, j] = sum_c corr[i, c] * q[j, c]            -> (tj, N)
    a = lax.dot_general(corr.astype(jnp.bfloat16), q,
                        (((1,), (1,)), ((), ())),
                        preferred_element_type=jnp.float32)
    a = a - jnp.max(a, axis=-1, keepdims=True)
    p = jnp.exp(a)
    sm = p * pl.reciprocal(jnp.sum(p, axis=-1, keepdims=True), approx=True)
    # exemplar_att rows = sm @ q                      -> (tj, C)
    att = jnp.dot(sm.astype(jnp.bfloat16), q, preferred_element_type=jnp.float32)
    # 1x1 gate conv (no bias) + sigmoid, then mask multiply
    mask = jax.nn.sigmoid(jnp.sum(att * g_ref[...], axis=-1, keepdims=True))
    o_ref[0] = (att * mask).astype(o_ref.dtype)


def _attn_row_tile(n, cap=512):
    if n <= cap:
        return n
    t = cap - cap % 16
    while t >= 16:
        if n % t == 0:
            return t
        t -= 16
    t = cap - cap % 8
    while t >= 8:
        if n % t == 0:
            return t
        t -= 8
    return n


def _attention_pallas(ex, q, wt, gate_w):
    # ex, q: (G, N, C) pairs; returns the (attention * sigmoid-gate) maps.
    G, N, C = ex.shape
    tj = _attn_row_tile(N)
    return pl.pallas_call(
        _attn_kernel,
        out_shape=jax.ShapeDtypeStruct((G, N, C), jnp.bfloat16),
        grid=(G, N // tj),
        in_specs=[
            pl.BlockSpec((1, tj, C), lambda g, j: (g, j, 0)),
            pl.BlockSpec((1, N, C), lambda g, j: (g, 0, 0)),
            pl.BlockSpec((C, C), lambda g, j: (0, 0)),
            pl.BlockSpec((1, C), lambda g, j: (0, 0)),
        ],
        out_specs=pl.BlockSpec((1, tj, C), lambda g, j: (g, j, 0)),
        compiler_params=pltpu.CompilerParams(
            dimension_semantics=("parallel", "parallel"),
            vmem_limit_bytes=_VMEM_LIMIT),
    )(ex.astype(jnp.bfloat16), q.astype(jnp.bfloat16),
      wt.astype(jnp.bfloat16), gate_w.astype(jnp.float32))


# ----------------------------------------------------------------------------
# Convolution wrappers (NHWC, im2col glue in JAX, matmul in Pallas)
# ----------------------------------------------------------------------------
def _im2col3x3(x):
    # TODO(synk): the 3x3 tap reduction is still an im2col materialization in
    # HBM; folding the 9 taps into the kernel K-axis with halo tiles would cut
    # activation read traffic ~9x.
    B, H, W, Cin = x.shape
    xp = jnp.pad(x, ((0, 0), (1, 1), (1, 1), (0, 0)))
    cols = jnp.concatenate(
        [xp[:, ky:ky + H, kx:kx + W, :] for ky in range(3) for kx in range(3)],
        axis=-1)
    return cols.reshape(B * H * W, 9 * Cin)


def conv3x3(x, wm, b, act="none", out_ch=None):
    B, H, W, _ = x.shape
    y = _matmul_pallas(_im2col3x3(x), wm, b, act).reshape(B, H, W, wm.shape[1])
    if out_ch is not None:
        y = y[..., :out_ch]
    return y


def conv3x3_multi(xs, wm, b, act="none"):
    # Same-weight 3x3 conv applied to several NHWC tensors with ONE matmul.
    cols, shapes = [], []
    for x in xs:
        cols.append(_im2col3x3(x))
        shapes.append(x.shape[:3])
    y = _matmul_pallas(jnp.concatenate(cols, axis=0), wm, b, act)
    outs, off = [], 0
    for (B, H, W) in shapes:
        n = B * H * W
        outs.append(y[off:off + n].reshape(B, H, W, wm.shape[1]))
        off += n
    return outs


def conv1x1(x, wm, b, act="none"):
    B, H, W, Cin = x.shape
    y = _matmul_pallas(x.reshape(B * H * W, Cin), wm, b, act)
    return y.reshape(B, H, W, wm.shape[1])


def conv_gru(x, h, w_ur, b_ur, w_cand, b_cand):
    # TODO(synk): ConvGRU.ConvGRUCell source was not provided; a standard
    # ConvGRU (sigmoid update/reset, tanh candidate, 1x1 convs) is used, with
    # the update and reset gates fused into one Cout=2C matmul.
    C = h.shape[-1]
    stacked = jnp.concatenate([x, h], axis=-1)
    ur = conv1x1(stacked, w_ur, b_ur, act="sigmoid")
    update, reset = ur[..., :C], ur[..., C:]
    cand = conv1x1(jnp.concatenate([x, h * reset], axis=-1),
                   w_cand, b_cand, act="tanh")
    return h * (1.0 - update) + cand * update


def upsample_bilinear(x, out_hw):
    # F.upsample(mode='bilinear', align_corners=True) on NHWC; gather/lerp
    # glue kept in plain JAX.
    B, H, W, C = x.shape
    oh, ow = int(out_hw[0]), int(out_hw[1])
    if (oh, ow) == (H, W):
        return x

    def src(o, i):
        if o == 1:
            return jnp.zeros((o,), jnp.float32)
        return jnp.arange(o, dtype=jnp.float32) * ((i - 1) / (o - 1))

    ys, xs = src(oh, H), src(ow, W)
    y0 = jnp.clip(jnp.floor(ys).astype(jnp.int32), 0, H - 1)
    y1 = jnp.clip(y0 + 1, 0, H - 1)
    x0 = jnp.clip(jnp.floor(xs).astype(jnp.int32), 0, W - 1)
    x1 = jnp.clip(x0 + 1, 0, W - 1)
    wy = (ys - y0.astype(jnp.float32))[None, :, None, None]
    wx = (xs - x0.astype(jnp.float32))[None, None, :, None]
    xf = x.astype(jnp.float32)
    r0 = jnp.take(xf, y0, axis=1)
    r1 = jnp.take(xf, y1, axis=1)
    v00 = jnp.take(r0, x0, axis=2)
    v01 = jnp.take(r0, x1, axis=2)
    v10 = jnp.take(r1, x0, axis=2)
    v11 = jnp.take(r1, x1, axis=2)
    out = (1 - wy) * ((1 - wx) * v00 + wx * v01) + wy * ((1 - wx) * v10 + wx * v11)
    return out.astype(x.dtype)


# ----------------------------------------------------------------------------
# Jitted composite stages (weights passed as pytree args)
# ----------------------------------------------------------------------------
_conv3x3_jit = jax.jit(conv3x3, static_argnames=("act", "out_ch"))

# For nodes = (exemplar, query, query1, query2): the 12 (anchor, other) pairs
# whose attention maps feed the 4 conv_fusion inputs of one propagation step.
_ANCHOR_IDX = (0, 0, 0, 1, 1, 1, 2, 2, 2, 3, 3, 3)
_OTHER_IDX = (1, 2, 3, 0, 2, 3, 0, 1, 3, 0, 1, 2)


@jax.jit
def _propagate_step(nodes, wt_e, gate_w, fusion_wb, gru_wb):
    # nodes: (4, B, H, W, C).  All 12*B attention maps -> one pallas_call,
    # the 4 fusion convs and 4 GRU cells are batched along the row axis.
    _, B, H, W, C = nodes.shape
    N = H * W
    flat = nodes.reshape(4, B, N, C)
    ex = flat[jnp.array(_ANCHOR_IDX)].reshape(12 * B, N, C)
    qr = flat[jnp.array(_OTHER_IDX)].reshape(12 * B, N, C)
    att = _attention_pallas(ex, qr, wt_e, gate_w)          # (12B, N, C)
    att = att.reshape(4, 3, B, N, C)
    fuse_in = jnp.moveaxis(att, 1, 3).reshape(4 * B, H, W, 3 * C)
    fused = conv3x3(fuse_in, fusion_wb[0], fusion_wb[1], act="none")
    prev = nodes.reshape(4 * B, H, W, C)
    h = conv_gru(fused, prev, *gru_wb)
    return h.reshape(4, B, H, W, C)


@functools.partial(jax.jit, static_argnames=("x_size",))
def _sal_gen_jit(h1_o, h1_m, h1_s, ex_o, ex_m, ex_s, f1, f2a, f2b, x_size):
    x1, s, t = conv3x3_multi(
        [jnp.concatenate([h1_o, ex_o], -1),
         jnp.concatenate([h1_m, ex_m], -1),
         jnp.concatenate([h1_s, ex_s], -1)], f1[0], f1[1], act="relu")
    x1_size = (x1.shape[1], x1.shape[2])
    out_c = jnp.concatenate(
        [x1, upsample_bilinear(s, x1_size), upsample_bilinear(t, x1_size)], -1)
    out_c = conv3x3(out_c, f2a[0], f2a[1], act="relu")
    out_c = conv3x3(out_c, f2b[0], f2b[1], act="none", out_ch=1)
    return upsample_bilinear(out_c, x_size)


@functools.partial(jax.jit, static_argnames=("x_size",))
def _dis_gen_jit(h2, q, h3, q1, h4, q2, c1, c1a, c1b, c2, c2a, c2b,
                 c3, c3a, c3b, c4a, c4b, head, x_size):
    # h2/q/... are (ori, mid, sml) triples of NHWC tensors.
    def branch(h, qq, conv, conv_a, conv_b):
        a, a_s, a_t = conv3x3_multi(
            [jnp.concatenate([h[0], qq[0]], -1),
             jnp.concatenate([h[1], qq[1]], -1),
             jnp.concatenate([h[2], qq[2]], -1)], conv[0], conv[1], act="relu")
        size = (a.shape[1], a.shape[2])
        f = jnp.concatenate(
            [a, upsample_bilinear(a_s, size), upsample_bilinear(a_t, size)], -1)
        f = conv3x3(f, conv_a[0], conv_a[1], act="relu")
        return conv3x3(f, conv_b[0], conv_b[1], act="relu")

    h2_f = branch(h2, q, c1, c1a, c1b)
    h3_f = branch(h3, q1, c2, c2a, c2b)
    h4_f = branch(h4, q2, c3, c3a, c3b)
    hf = jnp.concatenate([h2_f, h3_f, h4_f], -1)
    hf = conv3x3(hf, c4a[0], c4a[1], act="relu")
    hf = conv3x3(hf, c4b[0], c4b[1], act="relu")
    # dis_sod + dis_dis fused into one lane-padded head (real columns 0, 1).
    heads = conv3x3(hf, head[0], head[1], act="none", out_ch=2)
    return (upsample_bilinear(heads[..., 0:1], x_size),
            upsample_bilinear(heads[..., 1:2], x_size))


# ----------------------------------------------------------------------------
# GeoModel
# ----------------------------------------------------------------------------
class GeoModelPallas:
    def __init__(self, key, all_channel=256, all_dim=60):
        self.channel = all_channel
        self.dim = all_dim * all_dim
        self.propagate_layers = 5
        C = all_channel
        keys = iter(jax.random.split(key, 64))

        def conv_w(cin, cout, k=3):
            # deterministic N(0, 0.01) init, matching the PyTorch module init
            w = jax.random.normal(next(keys), (k * k * cin, cout),
                                  jnp.float32) * 0.01
            return w.astype(jnp.bfloat16), jnp.zeros((1, cout), jnp.float32)

        def padded_head(cin, n_real, k=3):
            # Tiny-Cout heads padded to 128 lanes so stores are lane-dense.
            cols = [jax.random.normal(next(keys), (k * k * cin, 1),
                                      jnp.float32) * 0.01 for _ in range(n_real)]
            w = jnp.concatenate(
                cols + [jnp.zeros((k * k * cin, 128 - n_real), jnp.float32)], 1)
            return w.astype(jnp.bfloat16), jnp.zeros((1, 128), jnp.float32)

        # linear_e stored pre-transposed (corr = exemplar_rows @ W_e^T) + gate.
        self.w_linear_e_t = (jax.random.normal(next(keys), (C, C), jnp.float32)
                             * 0.01).astype(jnp.bfloat16)
        self.w_gate = jax.random.normal(next(keys), (1, C), jnp.float32) * 0.01

        self.conv1 = conv_w(2 * C, C)
        self.conv_fusion = conv_w(3 * C, C)

        # ConvGRU (update + reset gates fused into one Cout=2C 1x1 conv).
        self.gru_ur = conv_w(2 * C, 2 * C, k=1)
        self.gru_cand = conv_w(2 * C, C, k=1)

        self.sal_conv_f1 = conv_w(512, 256)
        self.sal_conv_f2_a = conv_w(768, 256)
        self.sal_conv_f2_b = padded_head(256, 1)

        self.dis_conv1 = conv_w(512, 256)
        self.dis_conv1_h2_a = conv_w(768, 512)
        self.dis_conv1_h2_b = conv_w(512, 256)
        self.dis_conv2 = conv_w(512, 256)
        self.dis_conv2_h3_a = conv_w(768, 512)
        self.dis_conv2_h3_b = conv_w(512, 256)
        self.dis_conv3 = conv_w(512, 256)
        self.dis_conv3_h4_a = conv_w(768, 512)
        self.dis_conv3_h4_b = conv_w(512, 256)
        self.dis_conv4_f_a = conv_w(768, 512)
        self.dis_conv4_f_b = conv_w(512, 256)
        self.head_sod_dis = padded_head(256, 2)
        # bn1 / relu_fusion / prelu / relu_m are defined in the reference but
        # never used in forward().

    # -- forward --------------------------------------------------------------
    def forward(self, list_x1_ori, list_x1_mid, list_x1_sml, list_x2, list_x3,
                list_x4, list_x5, list_x6, list_x7, list_x8, list_x9, list_x10,
                x_size):
        C = self.channel

        def prep(t):  # NCHW f32 -> NHWC bf16
            return jnp.transpose(t, (0, 2, 3, 1)).astype(jnp.bfloat16)

        groups = {
            "ori": [list_x1_ori[4], list_x2[4], list_x3[4], list_x4[4]],
            "mid": [list_x1_mid[4], list_x5[4], list_x6[4], list_x7[4]],
            "sml": [list_x1_sml[4], list_x8[4], list_x9[4], list_x10[4]],
        }
        B = int(list_x1_ori[4].shape[0])

        # conv1 over (exemplar, query, query1, query2), batched per scale.
        init_nodes = {}
        for name, xs in groups.items():
            stack = jnp.concatenate([prep(t) for t in xs], axis=0)
            feats = _conv3x3_jit(stack, self.conv1[0], self.conv1[1], act="relu")
            H, W = int(feats.shape[1]), int(feats.shape[2])
            init_nodes[name] = feats.reshape(4, B, H, W, C)

        nodes = dict(init_nodes)
        gru_wb = (self.gru_ur[0], self.gru_ur[1],
                  self.gru_cand[0], self.gru_cand[1])
        for _ in range(self.propagate_layers):
            for name in ("ori", "mid", "sml"):
                nodes[name] = _propagate_step(nodes[name], self.w_linear_e_t,
                                              self.w_gate, self.conv_fusion,
                                              gru_wb)

        h_o, h_m, h_s = nodes["ori"], nodes["mid"], nodes["sml"]
        e_o, e_m, e_s = init_nodes["ori"], init_nodes["mid"], init_nodes["sml"]
        xsz = (int(x_size[0]), int(x_size[1]))

        x1 = _sal_gen_jit(h_o[0], h_m[0], h_s[0], e_o[0], e_m[0], e_s[0],
                          self.sal_conv_f1, self.sal_conv_f2_a,
                          self.sal_conv_f2_b, x_size=xsz)
        # TODO(synk): the reference passes full-batch querys/query1s/query2s to
        # dis_gen (only shape-valid for batch=1); here it is vectorized over the
        # batch so batch>1 works.
        x2, x3 = _dis_gen_jit(
            (h_o[1], h_m[1], h_s[1]), (e_o[1], e_m[1], e_s[1]),
            (h_o[2], h_m[2], h_s[2]), (e_o[2], e_m[2], e_s[2]),
            (h_o[3], h_m[3], h_s[3]), (e_o[3], e_m[3], e_s[3]),
            self.dis_conv1, self.dis_conv1_h2_a, self.dis_conv1_h2_b,
            self.dis_conv2, self.dis_conv2_h3_a, self.dis_conv2_h3_b,
            self.dis_conv3, self.dis_conv3_h4_a, self.dis_conv3_h4_b,
            self.dis_conv4_f_a, self.dis_conv4_f_b, self.head_sod_dis,
            x_size=xsz)

        to_nchw = lambda t: jnp.transpose(t, (0, 3, 1, 2)).astype(jnp.float32)
        return to_nchw(x1), to_nchw(x2), to_nchw(x3)


# ----------------------------------------------------------------------------
if __name__ == "__main__":
    key = jax.random.PRNGKey(0)
    k_param, k_in = jax.random.split(key)
    model = GeoModelPallas(k_param, all_channel=256)

    # Small, shape-consistent inputs: the forward only uses index [4] of every
    # list; conv1 expects 2*all_channel = 512 input channels.
    batch = 2
    ori_hw, mid_hw, sml_hw = (8, 8), (4, 4), (4, 4)
    x_size = (16, 16)
    in_keys = jax.random.split(k_in, 12)

    def feat(k, hw):
        return jax.random.normal(k, (batch, 512, hw[0], hw[1]), jnp.float32) * 0.1

    mk = lambda t: [None, None, None, None, t]
    list_x1_ori = mk(feat(in_keys[0], ori_hw))
    list_x2 = mk(feat(in_keys[1], ori_hw))
    list_x3 = mk(feat(in_keys[2], ori_hw))
    list_x4 = mk(feat(in_keys[3], ori_hw))
    list_x1_mid = mk(feat(in_keys[4], mid_hw))
    list_x5 = mk(feat(in_keys[5], mid_hw))
    list_x6 = mk(feat(in_keys[6], mid_hw))
    list_x7 = mk(feat(in_keys[7], mid_hw))
    list_x1_sml = mk(feat(in_keys[8], sml_hw))
    list_x8 = mk(feat(in_keys[9], sml_hw))
    list_x9 = mk(feat(in_keys[10], sml_hw))
    list_x10 = mk(feat(in_keys[11], sml_hw))

    x1s, x2s, x3s = model.forward(
        list_x1_ori, list_x1_mid, list_x1_sml, list_x2, list_x3, list_x4,
        list_x5, list_x6, list_x7, list_x8, list_x9, list_x10, x_size)
    jax.block_until_ready((x1s, x2s, x3s))

    assert x1s.shape == (batch, 1, x_size[0], x_size[1])
    assert x2s.shape == (batch, 1, x_size[0], x_size[1])
    assert x3s.shape == (batch, 1, x_size[0], x_size[1])
    print("KERNEL_OK")
</pallas_src>

<mosaic_0001>
module attributes {stable_mosaic.version = 11 : i64} {
  func.func @kernel(%arg0: i32, %arg1: i32, %arg2: i32, %arg3: memref<512x768xbf16, #tpu.memory_space<vmem>>, %arg4: memref<768x256xbf16, #tpu.memory_space<vmem>>, %arg5: memref<1x256xf32, #tpu.memory_space<vmem>>, %arg6: memref<512x256xbf16, #tpu.memory_space<vmem>>, %arg7: memref<512x256xf32, #tpu.memory_space<vmem>>) attributes {dimension_semantics = [#tpu.dimension_semantics<parallel>, #tpu.dimension_semantics<parallel>, #tpu.dimension_semantics<arbitrary>], iteration_bounds = array<i64: 1, 1, 6>, scalar_prefetch = 0 : i64, scratch_operands = 1 : i64, tpu.core_type = #tpu.core_type<tc>, window_params = [{transform_indices = @transform_0, window_bounds = array<i64: 512, 768>}, {transform_indices = @transform_1, window_bounds = array<i64: 768, 256>}, {transform_indices = @transform_2, window_bounds = array<i64: 1, 256>}, {transform_indices = @transform_3, window_bounds = array<i64: 512, 256>}]} {
    %c0_i32 = arith.constant 0 : i32
    %0 = arith.cmpi eq, %arg2, %c0_i32 : i32
    %1 = arith.extui %0 : i1 to i32
    %c0_i32_0 = arith.constant 0 : i32
    %2 = arith.cmpi ne, %1, %c0_i32_0 : i32
    scf.if %2 {
      %cst_9 = arith.constant 0.000000e+00 : f32
      %12 = vector.broadcast %cst_9 : f32 to vector<512x256xf32>
      %c0_10 = arith.constant 0 : index
      %c0_11 = arith.constant 0 : index
      %13 = vector.load %arg7[%c0_10, %c0_11] : memref<512x256xf32, #tpu.memory_space<vmem>>, vector<512x256xf32>
      tpu.vector_store %arg7[%c0_10, %c0_11], %12 {strides = array<i32>} : memref<512x256xf32, #tpu.memory_space<vmem>>, vector<512x256xf32>,
    } else {
    }
    %c0 = arith.constant 0 : index
    %c0_1 = arith.constant 0 : index
    %3 = vector.load %arg7[%c0, %c0_1] : memref<512x256xf32, #tpu.memory_space<vmem>>, vector<512x256xf32>
    %c0_2 = arith.constant 0 : index
    %c0_3 = arith.constant 0 : index
    %4 = vector.load %arg3[%c0_2, %c0_3] : memref<512x768xbf16, #tpu.memory_space<vmem>>, vector<512x768xbf16>
    %c0_4 = arith.constant 0 : index
    %c0_5 = arith.constant 0 : index
    %5 = vector.load %arg4[%c0_4, %c0_5] : memref<768x256xbf16, #tpu.memory_space<vmem>>, vector<768x256xbf16>
    %cst = arith.constant dense<0.000000e+00> : vector<512x256xf32>
    %6 = tpu.matmul %4, %5, %cst {dimension_numbers = #tpu.dot_dimension_numbers<[1], [0], [0], [1], [0, 0, 1, 1], [], []>} : vector<512x768xbf16>, vector<768x256xbf16>, vector<512x256xf32> -> vector<512x256xf32>
    %7 = arith.addf %3, %6 : vector<512x256xf32>
    %c0_6 = arith.constant 0 : index
    %c0_7 = arith.constant 0 : index
    %8 = vector.load %arg7[%c0_6, %c0_7] : memref<512x256xf32, #tpu.memory_space<vmem>>, vector<512x256xf32>
    tpu.vector_store %arg7[%c0_6, %c0_7], %7 {strides = array<i32>} : memref<512x256xf32, #tpu.memory_space<vmem>>, vector<512x256xf32>,
    %c5_i32 = arith.constant 5 : i32
    %9 = arith.cmpi eq, %arg2, %c5_i32 : i32
    %10 = arith.extui %9 : i1 to i32
    %c0_i32_8 = arith.constant 0 : i32
    %11 = arith.cmpi ne, %10, %c0_i32_8 : i32
    scf.if %11 {
      %c0_9 = arith.constant 0 : index
      %c0_10 = arith.constant 0 : index
      %12 = vector.load %arg7[%c0_9, %c0_10] : memref<512x256xf32, #tpu.memory_space<vmem>>, vector<512x256xf32>
      %c0_11 = arith.constant 0 : index
      %c0_12 = arith.constant 0 : index
      %13 = vector.load %arg5[%c0_11, %c0_12] : memref<1x256xf32, #tpu.memory_space<vmem>>, vector<1x256xf32>
      %14 = vector.broadcast %13 : vector<1x256xf32> to vector<512x256xf32>
      %15 = arith.addf %12, %14 : vector<512x256xf32>
      %cst_13 = arith.constant 0.000000e+00 : f32
      %16 = vector.broadcast %cst_13 : f32 to vector<512x256xf32>
      %17 = arith.maximumf %15, %16 : vector<512x256xf32>
      %18 = arith.truncf %17 : vector<512x256xf32> to vector<512x256xbf16>
      %c0_14 = arith.constant 0 : index
      %c0_15 = arith.constant 0 : index
      %19 = vector.load %arg6[%c0_14, %c0_15] : memref<512x256xbf16, #tpu.memory_space<vmem>>, vector<512x256xbf16>
      tpu.vector_store %arg6[%c0_14, %c0_15], %18 {strides = array<i32>} : memref<512x256xbf16, #tpu.memory_space<vmem>>, vector<512x256xbf16>,
    } else {
    }
    return
  }
  func.func @transform_0(%arg0: i32, %arg1: i32, %arg2: i32) -> (i32, i32) {
    %c0_i32 = arith.constant 0 : i32
    return %arg0, %arg2 : i32, i32
  }
  func.func @transform_1(%arg0: i32, %arg1: i32, %arg2: i32) -> (i32, i32) {
    %c0_i32 = arith.constant 0 : i32
    return %arg2, %arg1 : i32, i32
  }
  func.func @transform_2(%arg0: i32, %arg1: i32, %arg2: i32) -> (i32, i32) {
    %c0_i32 = arith.constant 0 : i32
    %c0_i32_0 = arith.constant 0 : i32
    return %c0_i32, %arg1 : i32, i32
  }
  func.func @transform_3(%arg0: i32, %arg1: i32, %arg2: i32) -> (i32, i32) {
    %c0_i32 = arith.constant 0 : i32
    return %arg0, %arg1 : i32, i32
  }
}

</mosaic_0001>

<bundles_post_ra>
// kernel: conv3x3.1
= control target key start
LH: loop header
LB: loop body
LE: loop exit
PB: predicated region body
PF: predicated region fallthrough
CT: control target
= control target key end

     0   :  { %8 = vsyncpa [#allocation5], 0  ;;  %s7164_s12 = smov 0   ;;  %s7166_s13 = smov 0   ;;  %s9620_s0 = inlined_call_operand.vmem [shape: bf16[512,4608], index: 0, kind: input, shape index: {}]   ;;  %s9621_s1 = inlined_call_operand.vmem [shape: bf16[4608,256], index: 1, kind: input, shape index: {}]   ;;  %s9622_s2 = inlined_call_operand.vmem [shape: f32[1,256], index: 2, kind: input, shape index: {}]   ;;  %s9623_s3 = inlined_call_operand.hbm [shape: bf16[512,256], index: 3, kind: output, shape index: {}]  }
   0x1   :  { %s7168_s14 = smov 0   ;;  %s7170_s15 = smov 0  }
   0x2   :  { %s7172_s16 = smov 0  }
   0x3 LB: > { %s5560_s17 = sadd.s32 4294967295, %s7138_s16   ;;  %s26_s18 = sadd.s32 1, %s7134_s15  ;;  %s7138_s16 = sphi %s7172_s16, %s14_s16   ;;  %s7134_s15 = sphi %s7170_s15, %s10200_s15   ;;  %s7130_s14 = sphi %s7168_s14, %s10199_s14   ;;  %s7126_s13 = sphi %s7166_s13, %s10198_s13   ;;  %s7122_s12 = sphi %s7164_s12, %s10197_s12  }
   0x4   : > { %p27_p0 = scmp.ge.s32.totalorder %s26_s18, 6  ;;  %p49_p1 = scmp.ne.s32.totalorder %s7126_s13, %s7122_s12 }
   0x5   : > { %p50_p2 = scmp.eq.s32.totalorder %s7138_s16, 0  ;;  %s42_s20 = sadd.s32 1, %s7126_s13 }
   0x6   : > { %s10202_s18 = smov (%p27_p0, %s26_s18), 0  ;;  %p5563_p5 = scmp.ge.s32.totalorder %s7138_s16, 6 }
   0x7   : > { %p51_p3 = por %p50_p2, %p49_p1  ;;  %s38_s19 = ssub.s32 %s7134_s15, %s10202_s18 }
   0x8   : > { %p40_p4 = scmp.eq.s32.totalorder %s38_s19, 0  ;;  %165 = sbr.rel (%p5563_p5) target bundleno = 210 (0xd2), region = 20 }
   0xa   : > { %s7200_s21 = scalar_select %p40_p4, %s7126_s13, %s42_s20  }
   0xd   : > { %168 = sbr.rel (!%p51_p3) target bundleno = 210 (0xd2), region = 24  ;;  %s170_s22 = sand.u32 (%p51_p3), 1, %s7126_s13  }
   0xe   : > { %s6726_s23 = smul.u32 (%p51_p3), 24, %s7134_s15 }
   0xf   : > { %s7016_s24 = smul.u32 (%p51_p3), 1536, %s170_s22 }
  0x10   : > { %s7208_s27 = scalar_lea.vmem (%p51_p3), %s9620_s0, %s6726_s23 }
  0x11   : > { %v191_v0 = vld [vmem:[%s7208_s27] sm:$0xff] (%p51_p3)  ;;  %v193_v1 = vld [vmem:[%s7208_s27 + $0x8] sm:$0xff] (%p51_p3)  ;;  %v195_v2 = vld [vmem:[%s7208_s27 + $0x10] sm:$0xff] (%p51_p3)  ;;  %s7213_s28 = scalar_lea.vmem (%p51_p3), [#allocation3], %s7016_s24 }
  0x12   : > { %192 = vst [vmem:[%s7213_s28] sm:$0xff] %v191_v0  ;;  %v197_v3 = vld [vmem:[%s7208_s27 + $0x90] sm:$0xff]  ;;  %v199_v4 = vld [vmem:[%s7208_s27 + $0x98] sm:$0xff]  ;;  %v201_v5 = vld [vmem:[%s7208_s27 + $0xa0] sm:$0xff] }
  0x13   : > { %194 = vst [vmem:[%s7213_s28 + $0x8] sm:$0xff] %v193_v1  ;;  %v203_v6 = vld [vmem:[%s7208_s27 + $0x120] sm:$0xff]  ;;  %v205_v7 = vld [vmem:[%s7208_s27 + $0x128] sm:$0xff]  ;;  %v207_v8 = vld [vmem:[%s7208_s27 + $0x130] sm:$0xff] }
  0x14   : > { %196 = vst [vmem:[%s7213_s28 + $0x10] sm:$0xff] %v195_v2  ;;  %v209_v9 = vld [vmem:[%s7208_s27 + $0x1b0] sm:$0xff]  ;;  %v211_v10 = vld [vmem:[%s7208_s27 + $0x1b8] sm:$0xff]  ;;  %v213_v11 = vld [vmem:[%s7208_s27 + $0x1c0] sm:$0xff] }
  0x15   : > { %198 = vst [vmem:[%s7213_s28 + $0x18] sm:$0xff] %v197_v3  ;;  %v215_v12 = vld [vmem:[%s7208_s27 + $0x240] sm:$0xff]  ;;  %v217_v13 = vld [vmem:[%s7208_s27 + $0x248] sm:$0xff]  ;;  %v219_v14 = vld [vmem:[%s7208_s27 + $0x250] sm:$0xff] }
  0x16   : > { %200 = vst [vmem:[%s7213_s28 + $0x20] sm:$0xff] %v199_v4  ;;  %v221_v15 = vld [vmem:[%s7208_s27 + $0x2d0] sm:$0xff]  ;;  %v223_v16 = vld [vmem:[%s7208_s27 + $0x2d8] sm:$0xff]  ;;  %v225_v17 = vld [vmem:[%s7208_s27 + $0x2e0] sm:$0xff] }
  0x17   : > { %202 = vst [vmem:[%s7213_s28 + $0x28] sm:$0xff] %v201_v5  ;;  %v227_v18 = vld [vmem:[%s7208_s27 + $0x360] sm:$0xff]  ;;  %v229_v19 = vld [vmem:[%s7208_s27 + $0x368] sm:$0xff]  ;;  %v231_v20 = vld [vmem:[%s7208_s27 + $0x370] sm:$0xff] }
  0x18   : > { %204 = vst [vmem:[%s7213_s28 + $0x30] sm:$0xff] %v203_v6  ;;  %v233_v21 = vld [vmem:[%s7208_s27 + $0x3f0] sm:$0xff]  ;;  %v235_v22 = vld [vmem:[%s7208_s27 + $0x3f8] sm:$0xff]  ;;  %v237_v23 = vld [vmem:[%s7208_s27 + $0x400] sm:$0xff] }
  0x19   : > { %206 = vst [vmem:[%s7213_s28 + $0x38] sm:$0xff] %v205_v7  ;;  %v239_v24 = vld [vmem:[%s7208_s27 + $0x480] sm:$0xff]  ;;  %v241_v25 = vld [vmem:[%s7208_s27 + $0x488] sm:$0xff]  ;;  %v243_v26 = vld [vmem:[%s7208_s27 + $0x490] sm:$0xff] }
  0x1a   : > { %208 = vst [vmem:[%s7213_s28 + $0x40] sm:$0xff] %v207_v8  ;;  %v245_v27 = vld [vmem:[%s7208_s27 + $0x510] sm:$0xff]  ;;  %v247_v28 = vld [vmem:[%s7208_s27 + $0x518] sm:$0xff]  ;;  %v249_v29 = vld [vmem:[%s7208_s27 + $0x520] sm:$0xff] }
  0x1b   : > { %210 = vst [vmem:[%s7213_s28 + $0x48] sm:$0xff] %v209_v9  ;;  %v251_v30 = vld [vmem:[%s7208_s27 + $0x5a0] sm:$0xff]  ;;  %v253_v31 = vld [vmem:[%s7208_s27 + $0x5a8] sm:$0xff]  ;;  %v255_v32 = vld [vmem:[%s7208_s27 + $0x5b0] sm:$0xff] }
  0x1c   : > { %212 = vst [vmem:[%s7213_s28 + $0x50] sm:$0xff] %v211_v10  ;;  %v257_v33 = vld [vmem:[%s7208_s27 + $0x630] sm:$0xff]  ;;  %v259_v34 = vld [vmem:[%s7208_s27 + $0x638] sm:$0xff]  ;;  %v261_v35 = vld [vmem:[%s7208_s27 + $0x640] sm:$0xff] }
  0x1d   : > { %214 = vst [vmem:[%s7213_s28 + $0x58] sm:$0xff] %v213_v11  ;;  %v263_v36 = vld [vmem:[%s7208_s27 + $0x6c0] sm:$0xff]  ;;  %v265_v37 = vld [vmem:[%s7208_s27 + $0x6c8] sm:$0xff]  ;;  %v267_v38 = vld [vmem:[%s7208_s27 + $0x6d0] sm:$0xff] }
  0x1e   : > { %216 = vst [vmem:[%s7213_s28 + $0x60] sm:$0xff] %v215_v12  ;;  %v269_v39 = vld [vmem:[%s7208_s27 + $0x750] sm:$0xff]  ;;  %v271_v40 = vld [vmem:[%s7208_s27 + $0x758] sm:$0xff]  ;;  %v273_v41 = vld [vmem:[%s7208_s27 + $0x760] sm:$0xff] }
  0x1f   : > { %218 = vst [vmem:[%s7213_s28 + $0x68] sm:$0xff] %v217_v13  ;;  %v275_v42 = vld [vmem:[%s7208_s27 + $0x7e0] sm:$0xff]  ;;  %v277_v43 = vld [vmem:[%s7208_s27 + $0x7e8] sm:$0xff]  ;;  %v279_v44 = vld [vmem:[%s7208_s27 + $0x7f0] sm:$0xff] }
  0x20   : > { %220 = vst [vmem:[%s7213_s28 + $0x70] sm:$0xff] %v219_v14  ;;  %v281_v45 = vld [vmem:[%s7208_s27 + $0x870] sm:$0xff]  ;;  %v283_v46 = vld [vmem:[%s7208_s27 + $0x878] sm:$0xff]  ;;  %v285_v47 = vld [vmem:[%s7208_s27 + $0x880] sm:$0xff] }
  0x21   : > { %222 = vst [vmem:[%s7213_s28 + $0x78] sm:$0xff] %v221_v15  ;;  %v287_v48 = vld [vmem:[%s7208_s27 + $0x900] sm:$0xff]  ;;  %v289_v49 = vld [vmem:[%s7208_s27 + $0x908] sm:$0xff]  ;;  %v291_v50 = vld [vmem:[%s7208_s27 + $0x910] sm:$0xff] }
  0x22   : > { %224 = vst [vmem:[%s7213_s28 + $0x80] sm:$0xff] %v223_v16  ;;  %v293_v51 = vld [vmem:[%s7208_s27 + $0x990] sm:$0xff]  ;;  %v295_v52 = vld [vmem:[%s7208_s27 + $0x998] sm:$0xff]  ;;  %v297_v53 = vld [vmem:[%s7208_s27 + $0x9a0] sm:$0xff] }
  0x23   : > { %226 = vst [vmem:[%s7213_s28 + $0x88] sm:$0xff] %v225_v17  ;;  %v299_v54 = vld [vmem:[%s7208_s27 + $0xa20] sm:$0xff]  ;;  %v301_v55 = vld [vmem:[%s7208_s27 + $0xa28] sm:$0xff]  ;;  %v303_v56 = vld [vmem:[%s7208_s27 + $0xa30] sm:$0xff] }
  0x24   : > { %228 = vst [vmem:[%s7213_s28 + $0x90] sm:$0xff] %v227_v18  ;;  %v305_v57 = vld [vmem:[%s7208_s27 + $0xab0] sm:$0xff]  ;;  %v307_v58 = vld [vmem:[%s7208_s27 + $0xab8] sm:$0xff]  ;;  %v309_v59 = vld [vmem:[%s7208_s27 + $0xac0] sm:$0xff] }
  0x25   : > { %230 = vst [vmem:[%s7213_s28 + $0x98] sm:$0xff] %v229_v19  ;;  %v311_v60 = vld [vmem:[%s7208_s27 + $0xb40] sm:$0xff]  ;;  %v313_v61 = vld [vmem:[%s7208_s27 + $0xb48] sm:$0xff]  ;;  %v315_v62 = vld [vmem:[%s7208_s27 + $0xb50] sm:$0xff] }
  0x26   : > { %232 = vst [vmem:[%s7213_s28 + $0xa0] sm:$0xff] %v231_v20  ;;  %v317_v63 = vld [vmem:[%s7208_s27 + $0xbd0] sm:$0xff]  ;;  %v319_v0 = vld [vmem:[%s7208_s27 + $0xbd8] sm:$0xff]  ;;  %v321_v1 = vld [vmem:[%s7208_s27 + $0xbe0] sm:$0xff] }
  0x27   : > { %234 = vst [vmem:[%s7213_s28 + $0xa8] sm:$0xff] %v233_v21  ;;  %v323_v2 = vld [vmem:[%s7208_s27 + $0xc60] sm:$0xff]  ;;  %v325_v3 = vld [vmem:[%s7208_s27 + $0xc68] sm:$0xff]  ;;  %v327_v4 = vld [vmem:[%s7208_s27 + $0xc70] sm:$0xff] }
  0x28   : > { %236 = vst [vmem:[%s7213_s28 + $0xb0] sm:$0xff] %v235_v22  ;;  %v329_v5 = vld [vmem:[%s7208_s27 + $0xcf0] sm:$0xff]  ;;  %v331_v6 = vld [vmem:[%s7208_s27 + $0xcf8] sm:$0xff]  ;;  %v333_v7 = vld [vmem:[%s7208_s27 + $0xd00] sm:$0xff] }
  0x29   : > { %238 = vst [vmem:[%s7213_s28 + $0xb8] sm:$0xff] %v237_v23  ;;  %v335_v8 = vld [vmem:[%s7208_s27 + $0xd80] sm:$0xff]  ;;  %v337_v9 = vld [vmem:[%s7208_s27 + $0xd88] sm:$0xff]  ;;  %v339_v10 = vld [vmem:[%s7208_s27 + $0xd90] sm:$0xff] }
  0x2a   : > { %240 = vst [vmem:[%s7213_s28 + $0xc0] sm:$0xff] %v239_v24  ;;  %v341_v11 = vld [vmem:[%s7208_s27 + $0xe10] sm:$0xff]  ;;  %v343_v12 = vld [vmem:[%s7208_s27 + $0xe18] sm:$0xff]  ;;  %v345_v13 = vld [vmem:[%s7208_s27 + $0xe20] sm:$0xff] }
  0x2b   : > { %242 = vst [vmem:[%s7213_s28 + $0xc8] sm:$0xff] %v241_v25  ;;  %v347_v14 = vld [vmem:[%s7208_s27 + $0xea0] sm:$0xff]  ;;  %v349_v15 = vld [vmem:[%s7208_s27 + $0xea8] sm:$0xff]  ;;  %v351_v16 = vld [vmem:[%s7208_s27 + $0xeb0] sm:$0xff] }
  0x2c   : > { %244 = vst [vmem:[%s7213_s28 + $0xd0] sm:$0xff] %v243_v26  ;;  %v353_v17 = vld [vmem:[%s7208_s27 + $0xf30] sm:$0xff]  ;;  %v355_v18 = vld [vmem:[%s7208_s27 + $0xf38] sm:$0xff]  ;;  %v357_v19 = vld [vmem:[%s7208_s27 + $0xf40] sm:$0xff] }
  0x2d   : > { %246 = vst [vmem:[%s7213_s28 + $0xd8] sm:$0xff] %v245_v27  ;;  %v359_v20 = vld [vmem:[%s7208_s27 + $0xfc0] sm:$0xff]  ;;  %v361_v21 = vld [vmem:[%s7208_s27 + $0xfc8] sm:$0xff]  ;;  %v363_v22 = vld [vmem:[%s7208_s27 + $0xfd0] sm:$0xff] }
  0x2e   : > { %248 = vst [vmem:[%s7213_s28 + $0xe0] sm:$0xff] %v247_v28  ;;  %v365_v23 = vld [vmem:[%s7208_s27 + $0x1050] sm:$0xff]  ;;  %v367_v24 = vld [vmem:[%s7208_s27 + $0x1058] sm:$0xff]  ;;  %v369_v25 = vld [vmem:[%s7208_s27 + $0x1060] sm:$0xff] }
  0x2f   : > { %250 = vst [vmem:[%s7213_s28 + $0xe8] sm:$0xff] %v249_v29  ;;  %v371_v26 = vld [vmem:[%s7208_s27 + $0x10e0] sm:$0xff]  ;;  %v373_v27 = vld [vmem:[%s7208_s27 + $0x10e8] sm:$0xff]  ;;  %v375_v28 = vld [vmem:[%s7208_s27 + $0x10f0] sm:$0xff] }
  0x30   : > { %252 = vst [vmem:[%s7213_s28 + $0xf0] sm:$0xff] %v251_v30  ;;  %v377_v29 = vld [vmem:[%s7208_s27 + $0x1170] sm:$0xff]  ;;  %v379_v30 = vld [vmem:[%s7208_s27 + $0x1178] sm:$0xff] }
  0x31   : > { %254 = vst [vmem:[%s7213_s28 + $0xf8] sm:$0xff] %v253_v31  ;;  %v381_v31 = vld [vmem:[%s7208_s27 + $0x1180] sm:$0xff] }
  0x32   : > { %256 = vst [vmem:[%s7213_s28 + $0x100] sm:$0xff] %v255_v32  ;;  %v383_v32 = vld [vmem:[%s7208_s27 + $0x1200] sm:$0xff] }
  0x33   : > { %258 = vst [vmem:[%s7213_s28 + $0x108] sm:$0xff] %v257_v33  ;;  %v385_v33 = vld [vmem:[%s7208_s27 + $0x1208] sm:$0xff] }
  0x34   : > { %260 = vst [vmem:[%s7213_s28 + $0x110] sm:$0xff] %v259_v34  ;;  %v387_v34 = vld [vmem:[%s7208_s27 + $0x1210] sm:$0xff] }
  0x35   : > { %262 = vst [vmem:[%s7213_s28 + $0x118] sm:$0xff] %v261_v35  ;;  %v389_v35 = vld [vmem:[%s7208_s27 + $0x1290] sm:$0xff] }
  0x36   : > { %264 = vst [vmem:[%s7213_s28 + $0x120] sm:$0xff] %v263_v36  ;;  %v391_v36 = vld [vmem:[%s7208_s27 + $0x1298] sm:$0xff] }
  0x37   : > { %266 = vst [vmem:[%s7213_s28 + $0x128] sm:$0xff] %v265_v37  ;;  %v393_v37 = vld [vmem:[%s7208_s27 + $0x12a0] sm:$0xff] }
  0x38   : > { %268 = vst [vmem:[%s7213_s28 + $0x130] sm:$0xff] %v267_v38  ;;  %v395_v38 = vld [vmem:[%s7208_s27 + $0x1320] sm:$0xff] }
  0x39   : > { %270 = vst [vmem:[%s7213_s28 + $0x138] sm:$0xff] %v269_v39  ;;  %v397_v39 = vld [vmem:[%s7208_s27 + $0x1328] sm:$0xff] }
  0x3a   : > { %272 = vst [vmem:[%s7213_s28 + $0x140] sm:$0xff] %v271_v40  ;;  %v399_v40 = vld [vmem:[%s7208_s27 + $0x1330] sm:$0xff] }
  0x3b   : > { %274 = vst [vmem:[%s7213_s28 + $0x148] sm:$0xff] %v273_v41  ;;  %v401_v41 = vld [vmem:[%s7208_s27 + $0x13b0] sm:$0xff] }
  0x3c   : > { %276 = vst [vmem:[%s7213_s28 + $0x150] sm:$0xff] %v275_v42  ;;  %v403_v42 = vld [vmem:[%s7208_s27 + $0x13b8] sm:$0xff] }
  0x3d   : > { %278 = vst [vmem:[%s7213_s28 + $0x158] sm:$0xff] %v277_v43  ;;  %v405_v43 = vld [vmem:[%s7208_s27 + $0x13c0] sm:$0xff] }
  0x3e   : > { %280 = vst [vmem:[%s7213_s28 + $0x160] sm:$0xff] %v279_v44  ;;  %v407_v44 = vld [vmem:[%s7208_s27 + $0x1440] sm:$0xff] }
  0x3f   : > { %282 = vst [vmem:[%s7213_s28 + $0x168] sm:$0xff] %v281_v45  ;;  %v409_v45 = vld [vmem:[%s7208_s27 + $0x1448] sm:$0xff] }
  0x40   : > { %284 = vst [vmem:[%s7213_s28 + $0x170] sm:$0xff] %v283_v46  ;;  %v411_v46 = vld [vmem:[%s7208_s27 + $0x1450] sm:$0xff] }
  0x41   : > { %286 = vst [vmem:[%s7213_s28 + $0x178] sm:$0xff] %v285_v47  ;;  %v413_v47 = vld [vmem:[%s7208_s27 + $0x14d0] sm:$0xff] }
  0x42   : > { %288 = vst [vmem:[%s7213_s28 + $0x180] sm:$0xff] %v287_v48  ;;  %v415_v48 = vld [vmem:[%s7208_s27 + $0x14d8] sm:$0xff] }
  0x43   : > { %290 = vst [vmem:[%s7213_s28 + $0x188] sm:$0xff] %v289_v49  ;;  %v417_v49 = vld [vmem:[%s7208_s27 + $0x14e0] sm:$0xff] }
  0x44   : > { %292 = vst [vmem:[%s7213_s28 + $0x190] sm:$0xff] %v291_v50  ;;  %v419_v50 = vld [vmem:[%s7208_s27 + $0x1560] sm:$0xff] }
  0x45   : > { %294 = vst [vmem:[%s7213_s28 + $0x198] sm:$0xff] %v293_v51  ;;  %v421_v51 = vld [vmem:[%s7208_s27 + $0x1568] sm:$0xff] }
  0x46   : > { %296 = vst [vmem:[%s7213_s28 + $0x1a0] sm:$0xff] %v295_v52  ;;  %v423_v52 = vld [vmem:[%s7208_s27 + $0x1570] sm:$0xff] }
  0x47   : > { %298 = vst [vmem:[%s7213_s28 + $0x1a8] sm:$0xff] %v297_v53  ;;  %v425_v53 = vld [vmem:[%s7208_s27 + $0x15f0] sm:$0xff] }
  0x48   : > { %300 = vst [vmem:[%s7213_s28 + $0x1b0] sm:$0xff] %v299_v54  ;;  %v427_v54 = vld [vmem:[%s7208_s27 + $0x15f8] sm:$0xff] }
  0x49   : > { %302 = vst [vmem:[%s7213_s28 + $0x1b8] sm:$0xff] %v301_v55  ;;  %v429_v55 = vld [vmem:[%s7208_s27 + $0x1600] sm:$0xff] }
  0x4a   : > { %304 = vst [vmem:[%s7213_s28 + $0x1c0] sm:$0xff] %v303_v56  ;;  %v431_v56 = vld [vmem:[%s7208_s27 + $0x1680] sm:$0xff] }
  0x4b   : > { %306 = vst [vmem:[%s7213_s28 + $0x1c8] sm:$0xff] %v305_v57  ;;  %v433_v57 = vld [vmem:[%s7208_s27 + $0x1688] sm:$0xff] }
  0x4c   : > { %308 = vst [vmem:[%s7213_s28 + $0x1d0] sm:$0xff] %v307_v58  ;;  %v435_v58 = vld [vmem:[%s7208_s27 + $0x1690] sm:$0xff] }
  0x4d   : > { %310 = vst [vmem:[%s7213_s28 + $0x1d8] sm:$0xff] %v309_v59  ;;  %v437_v59 = vld [vmem:[%s7208_s27 + $0x1710] sm:$0xff] }
  0x4e   : > { %312 = vst [vmem:[%s7213_s28 + $0x1e0] sm:$0xff] %v311_v60  ;;  %v439_v60 = vld [vmem:[%s7208_s27 + $0x1718] sm:$0xff] }
  0x4f   : > { %314 = vst [vmem:[%s7213_s28 + $0x1e8] sm:$0xff] %v313_v61  ;;  %v441_v61 = vld [vmem:[%s7208_s27 + $0x1720] sm:$0xff] }
  0x50   : > { %316 = vst [vmem:[%s7213_s28 + $0x1f0] sm:$0xff] %v315_v62  ;;  %v443_v62 = vld [vmem:[%s7208_s27 + $0x17a0] sm:$0xff] }
  0x51   : > { %318 = vst [vmem:[%s7213_s28 + $0x1f8] sm:$0xff] %v317_v63  ;;  %v445_v63 = vld [vmem:[%s7208_s27 + $0x17a8] sm:$0xff] }
  0x52   : > { %320 = vst [vmem:[%s7213_s28 + $0x200] sm:$0xff] %v319_v0  ;;  %v447_v0 = vld [vmem:[%s7208_s27 + $0x17b0] sm:$0xff] }
  0x53   : > { %322 = vst [vmem:[%s7213_s28 + $0x208] sm:$0xff] %v321_v1  ;;  %v449_v1 = vld [vmem:[%s7208_s27 + $0x1830] sm:$0xff] }
  0x54   : > { %324 = vst [vmem:[%s7213_s28 + $0x210] sm:$0xff] %v323_v2  ;;  %v451_v2 = vld [vmem:[%s7208_s27 + $0x1838] sm:$0xff] }
  0x55   : > { %326 = vst [vmem:[%s7213_s28 + $0x218] sm:$0xff] %v325_v3  ;;  %v453_v3 = vld [vmem:[%s7208_s27 + $0x1840] sm:$0xff] }
  0x56   : > { %328 = vst [vmem:[%s7213_s28 + $0x220] sm:$0xff] %v327_v4  ;;  %v455_v4 = vld [vmem:[%s7208_s27 + $0x18c0] sm:$0xff] }
  0x57   : > { %330 = vst [vmem:[%s7213_s28 + $0x228] sm:$0xff] %v329_v5  ;;  %v457_v5 = vld [vmem:[%s7208_s27 + $0x18c8] sm:$0xff] }
  0x58   : > { %332 = vst [vmem:[%s7213_s28 + $0x230] sm:$0xff] %v331_v6  ;;  %v459_v6 = vld [vmem:[%s7208_s27 + $0x18d0] sm:$0xff] }
  0x59   : > { %334 = vst [vmem:[%s7213_s28 + $0x238] sm:$0xff] %v333_v7  ;;  %v461_v7 = vld [vmem:[%s7208_s27 + $0x1950] sm:$0xff] }
  0x5a   : > { %336 = vst [vmem:[%s7213_s28 + $0x240] sm:$0xff] %v335_v8  ;;  %v463_v8 = vld [vmem:[%s7208_s27 + $0x1958] sm:$0xff] }
  0x5b   : > { %338 = vst [vmem:[%s7213_s28 + $0x248] sm:$0xff] %v337_v9  ;;  %v465_v9 = vld [vmem:[%s7208_s27 + $0x1960] sm:$0xff] }
  0x5c   : > { %340 = vst [vmem:[%s7213_s28 + $0x250] sm:$0xff] %v339_v10  ;;  %v467_v10 = vld [vmem:[%s7208_s27 + $0x19e0] sm:$0xff] }
  0x5d   : > { %342 = vst [vmem:[%s7213_s28 + $0x258] sm:$0xff] %v341_v11  ;;  %v469_v11 = vld [vmem:[%s7208_s27 + $0x19e8] sm:$0xff] }
  0x5e   : > { %344 = vst [vmem:[%s7213_s28 + $0x260] sm:$0xff] %v343_v12  ;;  %v471_v12 = vld [vmem:[%s7208_s27 + $0x19f0] sm:$0xff] }
  0x5f   : > { %346 = vst [vmem:[%s7213_s28 + $0x268] sm:$0xff] %v345_v13  ;;  %v473_v13 = vld [vmem:[%s7208_s27 + $0x1a70] sm:$0xff] }
  0x60   : > { %348 = vst [vmem:[%s7213_s28 + $0x270] sm:$0xff] %v347_v14  ;;  %v475_v14 = vld [vmem:[%s7208_s27 + $0x1a78] sm:$0xff] }
  0x61   : > { %350 = vst [vmem:[%s7213_s28 + $0x278] sm:$0xff] %v349_v15  ;;  %v477_v15 = vld [vmem:[%s7208_s27 + $0x1a80] sm:$0xff] }
  0x62   : > { %352 = vst [vmem:[%s7213_s28 + $0x280] sm:$0xff] %v351_v16  ;;  %v479_v16 = vld [vmem:[%s7208_s27 + $0x1b00] sm:$0xff] }
  0x63   : > { %354 = vst [vmem:[%s7213_s28 + $0x288] sm:$0xff] %v353_v17  ;;  %v481_v17 = vld [vmem:[%s7208_s27 + $0x1b08] sm:$0xff] }
  0x64   : > { %356 = vst [vmem:[%s7213_s28 + $0x290] sm:$0xff] %v355_v18  ;;  %v483_v18 = vld [vmem:[%s7208_s27 + $0x1b10] sm:$0xff] }
  0x65   : > { %358 = vst [vmem:[%s7213_s28 + $0x298] sm:$0xff] %v357_v19  ;;  %v485_v19 = vld [vmem:[%s7208_s27 + $0x1b90] sm:$0xff] }
  0x66   : > { %360 = vst [vmem:[%s7213_s28 + $0x2a0] sm:$0xff] %v359_v20  ;;  %v487_v20 = vld [vmem:[%s7208_s27 + $0x1b98] sm:$0xff] }
  0x67   : > { %362 = vst [vmem:[%s7213_s28 + $0x2a8] sm:$0xff] %v361_v21  ;;  %v489_v21 = vld [vmem:[%s7208_s27 + $0x1ba0] sm:$0xff] }
  0x68   : > { %364 = vst [vmem:[%s7213_s28 + $0x2b0] sm:$0xff] %v363_v22  ;;  %v491_v22 = vld [vmem:[%s7208_s27 + $0x1c20] sm:$0xff] }
  0x69   : > { %366 = vst [vmem:[%s7213_s28 + $0x2b8] sm:$0xff] %v365_v23  ;;  %v493_v23 = vld [vmem:[%s7208_s27 + $0x1c28] sm:$0xff] }
  0x6a   : > { %368 = vst [vmem:[%s7213_s28 + $0x2c0] sm:$0xff] %v367_v24  ;;  %v495_v24 = vld [vmem:[%s7208_s27 + $0x1c30] sm:$0xff] }
  0x6b   : > { %370 = vst [vmem:[%s7213_s28 + $0x2c8] sm:$0xff] %v369_v25  ;;  %v497_v25 = vld [vmem:[%s7208_s27 + $0x1cb0] sm:$0xff] }
  0x6c   : > { %372 = vst [vmem:[%s7213_s28 + $0x2d0] sm:$0xff] %v371_v26  ;;  %v499_v26 = vld [vmem:[%s7208_s27 + $0x1cb8] sm:$0xff] }
  0x6d   : > { %374 = vst [vmem:[%s7213_s28 + $0x2d8] sm:$0xff] %v373_v27  ;;  %v501_v27 = vld [vmem:[%s7208_s27 + $0x1cc0] sm:$0xff] }
  0x6e   : > { %376 = vst [vmem:[%s7213_s28 + $0x2e0] sm:$0xff] %v375_v28  ;;  %v503_v28 = vld [vmem:[%s7208_s27 + $0x1d40] sm:$0xff] }
  0x6f   : > { %378 = vst [vmem:[%s7213_s28 + $0x2e8] sm:$0xff] %v377_v29  ;;  %v505_v29 = vld [vmem:[%s7208_s27 + $0x1d48] sm:$0xff] }
  0x70   : > { %380 = vst [vmem:[%s7213_s28 + $0x2f0] sm:$0xff] %v379_v30  ;;  %v507_v30 = vld [vmem:[%s7208_s27 + $0x1d50] sm:$0xff] }
  0x71   : > { %382 = vst [vmem:[%s7213_s28 + $0x2f8] sm:$0xff] %v381_v31  ;;  %v509_v31 = vld [vmem:[%s7208_s27 + $0x1dd0] sm:$0xff] }
  0x72   : > { %384 = vst [vmem:[%s7213_s28 + $0x300] sm:$0xff] %v383_v32  ;;  %v511_v32 = vld [vmem:[%s7208_s27 + $0x1dd8] sm:$0xff] }
  0x73   : > { %386 = vst [vmem:[%s7213_s28 + $0x308] sm:$0xff] %v385_v33  ;;  %v513_v33 = vld [vmem:[%s7208_s27 + $0x1de0] sm:$0xff] }
  0x74   : > { %388 = vst [vmem:[%s7213_s28 + $0x310] sm:$0xff] %v387_v34  ;;  %v515_v34 = vld [vmem:[%s7208_s27 + $0x1e60] sm:$0xff] }
  0x75   : > { %390 = vst [vmem:[%s7213_s28 + $0x318] sm:$0xff] %v389_v35  ;;  %v517_v35 = vld [vmem:[%s7208_s27 + $0x1e68] sm:$0xff] }
  0x76   : > { %392 = vst [vmem:[%s7213_s28 + $0x320] sm:$0xff] %v391_v36  ;;  %v519_v36 = vld [vmem:[%s7208_s27 + $0x1e70] sm:$0xff] }
  0x77   : > { %394 = vst [vmem:[%s7213_s28 + $0x328] sm:$0xff] %v393_v37  ;;  %v521_v37 = vld [vmem:[%s7208_s27 + $0x1ef0] sm:$0xff] }
  0x78   : > { %396 = vst [vmem:[%s7213_s28 + $0x330] sm:$0xff] %v395_v38  ;;  %v523_v38 = vld [vmem:[%s7208_s27 + $0x1ef8] sm:$0xff] }
  0x79   : > { %398 = vst [vmem:[%s7213_s28 + $0x338] sm:$0xff] %v397_v39  ;;  %v525_v39 = vld [vmem:[%s7208_s27 + $0x1f00] sm:$0xff] }
  0x7a   : > { %400 = vst [vmem:[%s7213_s28 + $0x340] sm:$0xff] %v399_v40  ;;  %v527_v40 = vld [vmem:[%s7208_s27 + $0x1f80] sm:$0xff] }
  0x7b   : > { %402 = vst [vmem:[%s7213_s28 + $0x348] sm:$0xff] %v401_v41  ;;  %v529_v41 = vld [vmem:[%s7208_s27 + $0x1f88] sm:$0xff] }
  0x7c   : > { %404 = vst [vmem:[%s7213_s28 + $0x350] sm:$0xff] %v403_v42  ;;  %v531_v42 = vld [vmem:[%s7208_s27 + $0x1f90] sm:$0xff] }
  0x7d   : > { %406 = vst [vmem:[%s7213_s28 + $0x358] sm:$0xff] %v405_v43  ;;  %v533_v43 = vld [vmem:[%s7208_s27 + $0x2010] sm:$0xff] }
  0x7e   : > { %408 = vst [vmem:[%s7213_s28 + $0x360] sm:$0xff] %v407_v44  ;;  %v535_v44 = vld [vmem:[%s7208_s27 + $0x2018] sm:$0xff] }
  0x7f   : > { %410 = vst [vmem:[%s7213_s28 + $0x368] sm:$0xff] %v409_v45  ;;  %v537_v45 = vld [vmem:[%s7208_s27 + $0x2020] sm:$0xff] }
  0x80   : > { %412 = vst [vmem:[%s7213_s28 + $0x370] sm:$0xff] %v411_v46  ;;  %v539_v46 = vld [vmem:[%s7208_s27 + $0x20a0] sm:$0xff] }
  0x81   : > { %414 = vst [vmem:[%s7213_s28 + $0x378] sm:$0xff] %v413_v47  ;;  %v541_v47 = vld [vmem:[%s7208_s27 + $0x20a8] sm:$0xff] }
  0x82   : > { %416 = vst [vmem:[%s7213_s28 + $0x380] sm:$0xff] %v415_v48  ;;  %v543_v48 = vld [vmem:[%s7208_s27 + $0x20b0] sm:$0xff] }
  0x83   : > { %418 = vst [vmem:[%s7213_s28 + $0x388] sm:$0xff] %v417_v49  ;;  %v545_v49 = vld [vmem:[%s7208_s27 + $0x2130] sm:$0xff] }
  0x84   : > { %420 = vst [vmem:[%s7213_s28 + $0x390] sm:$0xff] %v419_v50  ;;  %v547_v50 = vld [vmem:[%s7208_s27 + $0x2138] sm:$0xff] }
  0x85   : > { %422 = vst [vmem:[%s7213_s28 + $0x398] sm:$0xff] %v421_v51  ;;  %v549_v51 = vld [vmem:[%s7208_s27 + $0x2140] sm:$0xff] }
  0x86   : > { %424 = vst [vmem:[%s7213_s28 + $0x3a0] sm:$0xff] %v423_v52  ;;  %v551_v52 = vld [vmem:[%s7208_s27 + $0x21c0] sm:$0xff] }
  0x87   : > { %426 = vst [vmem:[%s7213_s28 + $0x3a8] sm:$0xff] %v425_v53  ;;  %v553_v53 = vld [vmem:[%s7208_s27 + $0x21c8] sm:$0xff] }
  0x88   : > { %428 = vst [vmem:[%s7213_s28 + $0x3b0] sm:$0xff] %v427_v54  ;;  %v555_v54 = vld [vmem:[%s7208_s27 + $0x21d0] sm:$0xff] }
  0x89   : > { %430 = vst [vmem:[%s7213_s28 + $0x3b8] sm:$0xff] %v429_v55  ;;  %v557_v55 = vld [vmem:[%s7208_s27 + $0x2250] sm:$0xff] }
  0x8a   : > { %432 = vst [vmem:[%s7213_s28 + $0x3c0] sm:$0xff] %v431_v56  ;;  %v559_v56 = vld [vmem:[%s7208_s27 + $0x2258] sm:$0xff] }
  0x8b   : > { %434 = vst [vmem:[%s7213_s28 + $0x3c8] sm:$0xff] %v433_v57  ;;  %v561_v57 = vld [vmem:[%s7208_s27 + $0x2260] sm:$0xff] }
  0x8c   : > { %436 = vst [vmem:[%s7213_s28 + $0x3d0] sm:$0xff] %v435_v58  ;;  %v563_v58 = vld [vmem:[%s7208_s27 + $0x22e0] sm:$0xff] }
  0x8d   : > { %438 = vst [vmem:[%s7213_s28 + $0x3d8] sm:$0xff] %v437_v59  ;;  %v565_v59 = vld [vmem:[%s7208_s27 + $0x22e8] sm:$0xff] }
  0x8e   : > { %440 = vst [vmem:[%s7213_s28 + $0x3e0] sm:$0xff] %v439_v60  ;;  %v567_v60 = vld [vmem:[%s7208_s27 + $0x22f0] sm:$0xff] }
  0x8f   : > { %442 = vst [vmem:[%s7213_s28 + $0x3e8] sm:$0xff] %v441_v61  ;;  %v569_v61 = vld [vmem:[%s7208_s27 + $0x2370] sm:$0xff] }
  0x90   : > { %444 = vst [vmem:[%s7213_s28 + $0x3f0] sm:$0xff] %v443_v62  ;;  %v571_v62 = vld [vmem:[%s7208_s27 + $0x2378] sm:$0xff] }
  0x91   : > { %446 = vst [vmem:[%s7213_s28 + $0x3f8] sm:$0xff] %v445_v63  ;;  %v573_v63 = vld [vmem:[%s7208_s27 + $0x2380] sm:$0xff] }
  0x92   : > { %448 = vst [vmem:[%s7213_s28 + $0x400] sm:$0xff] %v447_v0 }
  0x93   : > { %450 = vst [vmem:[%s7213_s28 + $0x408] sm:$0xff] %v449_v1 }
  0x94   : > { %452 = vst [vmem:[%s7213_s28 + $0x410] sm:$0xff] %v451_v2 }
  0x95   : > { %454 = vst [vmem:[%s7213_s28 + $0x418] sm:$0xff] %v453_v3 }
  0x96   : > { %456 = vst [vmem:[%s7213_s28 + $0x420] sm:$0xff] %v455_v4 }
  0x97   : > { %458 = vst [vmem:[%s7213_s28 + $0x428] sm:$0xff] %v457_v5 }
  0x98   : > { %460 = vst [vmem:[%s7213_s28 + $0x430] sm:$0xff] %v459_v6 }
  0x99   : > { %462 = vst [vmem:[%s7213_s28 + $0x438] sm:$0xff] %v461_v7 }
  0x9a   : > { %464 = vst [vmem:[%s7213_s28 + $0x440] sm:$0xff] %v463_v8 }
  0x9b   : > { %466 = vst [vmem:[%s7213_s28 + $0x448] sm:$0xff] %v465_v9 }
  0x9c   : > { %468 = vst [vmem:[%s7213_s28 + $0x450] sm:$0xff] %v467_v10 }
  0x9d   : > { %470 = vst [vmem:[%s7213_s28 + $0x458] sm:$0xff] %v469_v11 }
  0x9e   : > { %472 = vst [vmem:[%s7213_s28 + $0x460] sm:$0xff] %v471_v12 }
  0x9f   : > { %474 = vst [vmem:[%s7213_s28 + $0x468] sm:$0xff] %v473_v13 }
  0xa0   : > { %476 = vst [vmem:[%s7213_s28 + $0x470] sm:$0xff] %v475_v14 }
  0xa1   : > { %478 = vst [vmem:[%s7213_s28 + $0x478] sm:$0xff] %v477_v15 }
  0xa2   : > { %480 = vst [vmem:[%s7213_s28 + $0x480] sm:$0xff] %v479_v16 }
  0xa3   : > { %482 = vst [vmem:[%s7213_s28 + $0x488] sm:$0xff] %v481_v17 }
  0xa4   : > { %484 = vst [vmem:[%s7213_s28 + $0x490] sm:$0xff] %v483_v18 }
  0xa5   : > { %486 = vst [vmem:[%s7213_s28 + $0x498] sm:$0xff] %v485_v19 }
  0xa6   : > { %488 = vst [vmem:[%s7213_s28 + $0x4a0] sm:$0xff] %v487_v20 }
  0xa7   : > { %490 = vst [vmem:[%s7213_s28 + $0x4a8] sm:$0xff] %v489_v21 }
  0xa8   : > { %492 = vst [vmem:[%s7213_s28 + $0x4b0] sm:$0xff] %v491_v22 }
  0xa9   : > { %494 = vst [vmem:[%s7213_s28 + $0x4b8] sm:$0xff] %v493_v23 }
  0xaa   : > { %496 = vst [vmem:[%s7213_s28 + $0x4c0] sm:$0xff] %v495_v24 }
  0xab   : > { %498 = vst [vmem:[%s7213_s28 + $0x4c8] sm:$0xff] %v497_v25 }
  0xac   : > { %500 = vst [vmem:[%s7213_s28 + $0x4d0] sm:$0xff] %v499_v26 }
  0xad   : > { %502 = vst [vmem:[%s7213_s28 + $0x4d8] sm:$0xff] %v501_v27 }
  0xae   : > { %504 = vst [vmem:[%s7213_s28 + $0x4e0] sm:$0xff] %v503_v28 }
  0xaf   : > { %506 = vst [vmem:[%s7213_s28 + $0x4e8] sm:$0xff] %v505_v29 }
  0xb0   : > { %508 = vst [vmem:[%s7213_s28 + $0x4f0] sm:$0xff] %v507_v30 }
  0xb1   : > { %510 = vst [vmem:[%s7213_s28 + $0x4f8] sm:$0xff] %v509_v31 }
  0xb2   : > { %512 = vst [vmem:[%s7213_s28 + $0x500] sm:$0xff] %v511_v32 }
  0xb3   : > { %514 = vst [vmem:[%s7213_s28 + $0x508] sm:$0xff] %v513_v33 }
  0xb4   : > { %516 = vst [vmem:[%s7213_s28 + $0x510] sm:$0xff] %v515_v34 }
  0xb5   : > { %518 = vst [vmem:[%s7213_s28 + $0x518] sm:$0xff] %v517_v35 }
  0xb6   : > { %520 = vst [vmem:[%s7213_s28 + $0x520] sm:$0xff] %v519_v36 }
  0xb7   : > { %522 = vst [vmem:[%s7213_s28 + $0x528] sm:$0xff] %v521_v37 }
  0xb8   : > { %524 = vst [vmem:[%s7213_s28 + $0x530] sm:$0xff] %v523_v38 }
  0xb9   : > { %526 = vst [vmem:[%s7213_s28 + $0x538] sm:$0xff] %v525_v39 }
  0xba   : > { %528 = vst [vmem:[%s7213_s28 + $0x540] sm:$0xff] %v527_v40 }
  0xbb   : > { %530 = vst [vmem:[%s7213_s28 + $0x548] sm:$0xff] %v529_v41 }
  0xbc   : > { %532 = vst [vmem:[%s7213_s28 + $0x550] sm:$0xff] %v531_v42 }
  0xbd   : > { %534 = vst [vmem:[%s7213_s28 + $0x558] sm:$0xff] %v533_v43 }
  0xbe   : > { %536 = vst [vmem:[%s7213_s28 + $0x560] sm:$0xff] %v535_v44 }
  0xbf   : > { %538 = vst [vmem:[%s7213_s28 + $0x568] sm:$0xff] %v537_v45 }
  0xc0   : > { %540 = vst [vmem:[%s7213_s28 + $0x570] sm:$0xff] %v539_v46 }
  0xc1   : > { %542 = vst [vmem:[%s7213_s28 + $0x578] sm:$0xff] %v541_v47 }
  0xc2   : > { %544 = vst [vmem:[%s7213_s28 + $0x580] sm:$0xff] %v543_v48 }
  0xc3   : > { %546 = vst [vmem:[%s7213_s28 + $0x588] sm:$0xff] %v545_v49 }
  0xc4   : > { %548 = vst [vmem:[%s7213_s28 + $0x590] sm:$0xff] %v547_v50 }
  0xc5   : > { %550 = vst [vmem:[%s7213_s28 + $0x598] sm:$0xff] %v549_v51 }
  0xc6   : > { %552 = vst [vmem:[%s7213_s28 + $0x5a0] sm:$0xff] %v551_v52 }
  0xc7   : > { %554 = vst [vmem:[%s7213_s28 + $0x5a8] sm:$0xff] %v553_v53 }
  0xc8   : > { %556 = vst [vmem:[%s7213_s28 + $0x5b0] sm:$0xff] %v555_v54 }
  0xc9   : > { %558 = vst [vmem:[%s7213_s28 + $0x5b8] sm:$0xff] %v557_v55 }
  0xca   : > { %560 = vst [vmem:[%s7213_s28 + $0x5c0] sm:$0xff] %v559_v56 }
  0xcb   : > { %562 = vst [vmem:[%s7213_s28 + $0x5c8] sm:$0xff] %v561_v57 }
  0xcc   : > { %564 = vst [vmem:[%s7213_s28 + $0x5d0] sm:$0xff] %v563_v58 }
  0xcd   : > { %566 = vst [vmem:[%s7213_s28 + $0x5d8] sm:$0xff] %v565_v59 }
  0xce   : > { %568 = vst [vmem:[%s7213_s28 + $0x5e0] sm:$0xff] %v567_v60 }
  0xcf   : > { %570 = vst [vmem:[%s7213_s28 + $0x5e8] sm:$0xff] %v569_v61 }
  0xd0   : > { %572 = vst [vmem:[%s7213_s28 + $0x5f0] sm:$0xff] %v571_v62 }
  0xd1   : > { %574 = vst [vmem:[%s7213_s28 + $0x5f8] sm:$0xff] %v573_v63 }
  0xd2 PF: > { %p5565_p6 = scmp.ge.s32.totalorder %s7138_s16, 1  ;;  %p594_p7 = scmp.lt.s32.totalorder %s7138_s16, 7 }
  0xd4   : > { %p595_p8 = pnand %p5565_p6, %p594_p7 }
  0xd6   : > { %598 = sbr.rel (%p595_p8) target bundleno = 2152 (0x868), region = 51 }
  0xdb   : > { %s601_s29 = sand.u32 1, %s7122_s12   ;;  %s635_s30 = smul.u32 96, %s7130_s14 }
  0xdc   : > { %s7017_s4 = smul.u32 1536, %s601_s29  ;;  %p5568_p10 = scmp.ne.s32.totalorder %s7130_s14, 0 }
  0xdd   : > { %p637_p9 = scmp.lt.s32.totalorder %s635_s30, 575 }
  0xde   : > { %s7605_s9 = scalar_lea.vmem [#allocation3], %s7017_s4  ;;  %657 = sbr.rel (%p5568_p10) target bundleno = 356 (0x164), region = 59 }
  0xdf   : > { %s10204_s30 = smov (!%p637_p9, %s635_s30), 575 }
  0xe0   : > { %s6727_s5 = sshll.u32 %s10204_s30, 3 }
  0xe1   : > { %s7603_s8 = scalar_lea.vmem %s9621_s1, %s6727_s5 }
  0xe3   : > { %v7140_v0 = vmov 0.0  }
  0xe4   : > { %658 = vst [vmem:[#allocation2 + $0x2b0] sm:$0xff] %v7140_v0 }
  0xe5   : > { %659 = vst [vmem:[#allocation2 + $0x3b0] sm:$0xff] %v7140_v0 }
  0xe6   : > { %660 = vst [vmem:[#allocation2 + $0xd8] sm:$0xff] %v7140_v0 }
  0xe7   : > { %661 = vst [vmem:[#allocation2 + $0x18] sm:$0xff] %v7140_v0 }
  0xe8   : > { %662 = vst [vmem:[#allocation2 + $0x50] sm:$0xff] %v7140_v0 }
  0xe9   : > { %663 = vst [vmem:[#allocation2 + $0x368] sm:$0xff] %v7140_v0 }
  0xea   : > { %664 = vst [vmem:[#allocation2 + $0x330] sm:$0xff] %v7140_v0 }
  0xeb   : > { %665 = vst [vmem:[#allocation2 + $0x48] sm:$0xff] %v7140_v0 }
  0xec   : > { %666 = vst [vmem:[#allocation2 + $0x380] sm:$0xff] %v7140_v0 }
  0xed   : > { %667 = vst [vmem:[#allocation2 + $0x110] sm:$0xff] %v7140_v0 }
  0xee   : > { %668 = vst [vmem:[#allocation2 + $0x118] sm:$0xff] %v7140_v0 }
  0xef   : > { %669 = vst [vmem:[#allocation2 + $0x98] sm:$0xff] %v7140_v0 }
  0xf0   : > { %670 = vst [vmem:[#allocation2 + $0x320] sm:$0xff] %v7140_v0 }
  0xf1   : > { %671 = vst [vmem:[#allocation2 + $0x150] sm:$0xff] %v7140_v0 }
  0xf2   : > { %672 = vst [vmem:[#allocation2 + $0x108] sm:$0xff] %v7140_v0 }
  0xf3   : > { %673 = vst [vmem:[#allocation2 + $0x60] sm:$0xff] %v7140_v0 }
  0xf4   : > { %674 = vst [vmem:[#allocation2 + $0x2e0] sm:$0xff] %v7140_v0 }
  0xf5   : > { %675 = vst [vmem:[#allocation2 + $0x388] sm:$0xff] %v7140_v0 }
  0xf6   : > { %676 = vst [vmem:[#allocation2 + $0x338] sm:$0xff] %v7140_v0 }
  0xf7   : > { %677 = vst [vmem:[#allocation2 + $0x340] sm:$0xff] %v7140_v0 }
  0xf8   : > { %678 = vst [vmem:[#allocation2 + $0x80] sm:$0xff] %v7140_v0 }
  0xf9   : > { %679 = vst [vmem:[#allocation2 + $0x1a8] sm:$0xff] %v7140_v0 }
  0xfa   : > { %680 = vst [vmem:[#allocation2 + $0x1b8] sm:$0xff] %v7140_v0 }
  0xfb   : > { %681 = vst [vmem:[#allocation2 + $0x168] sm:$0xff] %v7140_v0 }
  0xfc   : > { %682 = vst [vmem:[#allocation2 + $0x3e8] sm:$0xff] %v7140_v0 }
  0xfd   : > { %683 = vst [vmem:[#allocation2 + $0x2f8] sm:$0xff] %v7140_v0 }
  0xfe   : > { %684 = vst [vmem:[#allocation2 + $0x290] sm:$0xff] %v7140_v0 }
  0xff   : > { %685 = vst [vmem:[#allocation2 + $0x28] sm:$0xff] %v7140_v0 }
 0x100   : > { %686 = vst [vmem:[#allocation2 + $0x138] sm:$0xff] %v7140_v0 }
 0x101   : > { %687 = vst [vmem:[#allocation2 + $0xc0] sm:$0xff] %v7140_v0 }
 0x102   : > { %688 = vst [vmem:[#allocation2 + $0x1c0] sm:$0xff] %v7140_v0 }
 0x103   : > { %689 = vst [vmem:[#allocation2 + $0x280] sm:$0xff] %v7140_v0 }
 0x104   : > { %690 = vst [vmem:[#allocation2 + $0x100] sm:$0xff] %v7140_v0 }
 0x105   : > { %691 = vst [vmem:[#allocation2 + $0x3c0] sm:$0xff] %v7140_v0 }
 0x106   : > { %692 = vst [vmem:[#allocation2 + $0x158] sm:$0xff] %v7140_v0 }
 0x107   : > { %693 = vst [vmem:[#allocation2 + $0x3e0] sm:$0xff] %v7140_v0 }
 0x108   : > { %694 = vst [vmem:[#allocation2 + $0x218] sm:$0xff] %v7140_v0 }
 0x109   : > { %695 = vst [vmem:[#allocation2 + $0x3f8] sm:$0xff] %v7140_v0 }
 0x10a   : > { %696 = vst [vmem:[#allocation2 + $0x8] sm:$0xff] %v7140_v0 }
 0x10b   : > { %697 = vst [vmem:[#allocation2 + $0x128] sm:$0xff] %v7140_v0 }
 0x10c   : > { %698 = vst [vmem:[#allocation2 + $0x2a0] sm:$0xff] %v7140_v0 }
 0x10d   : > { %699 = vst [vmem:[#allocation2 + $0x3f0] sm:$0xff] %v7140_v0 }
 0x10e   : > { %700 = vst [vmem:[#allocation2 + $0xa0] sm:$0xff] %v7140_v0 }
 0x10f   : > { %701 = vst [vmem:[#allocation2 + $0x2c0] sm:$0xff] %v7140_v0 }
 0x110   : > { %702 = vst [vmem:[#allocation2 + $0xb0] sm:$0xff] %v7140_v0 }
 0x111   : > { %703 = vst [vmem:[#allocation2 + $0x1e0] sm:$0xff] %v7140_v0 }
 0x112   : > { %704 = vst [vmem:[#allocation2 + $0x1f0] sm:$0xff] %v7140_v0 }
 0x113   : > { %705 = vst [vmem:[#allocation2 + $0x10] sm:$0xff] %v7140_v0 }
 0x114   : > { %706 = vst [vmem:[#allocation2 + $0x230] sm:$0xff] %v7140_v0 }
 0x115   : > { %707 = vst [vmem:[#allocation2 + $0x240] sm:$0xff] %v7140_v0 }
 0x116   : > { %708 = vst [vmem:[#allocation2 + $0x90] sm:$0xff] %v7140_v0 }
 0x117   : > { %709 = vst [vmem:[#allocation2 + $0x3a0] sm:$0xff] %v7140_v0 }
 0x118   : > { %710 = vst [vmem:[#allocation2 + $0x208] sm:$0xff] %v7140_v0 }
 0x119   : > { %711 = vst [vmem:[#allocation2 + $0xd0] sm:$0xff] %v7140_v0 }
 0x11a   : > { %712 = vst [vmem:[#allocation2 + $0x88] sm:$0xff] %v7140_v0 }
 0x11b   : > { %713 = vst [vmem:[#allocation2 + $0x2f0] sm:$0xff] %v7140_v0 }
 0x11c   : > { %714 = vst [vmem:[#allocation2 + $0x358] sm:$0xff] %v7140_v0 }
 0x11d   : > { %715 = vst [vmem:[#allocation2 + $0x268] sm:$0xff] %v7140_v0 }
 0x11e   : > { %716 = vst [vmem:[#allocation2 + $0x350] sm:$0xff] %v7140_v0 }
 0x11f   : > { %717 = vst [vmem:[#allocation2 + $0x188] sm:$0xff] %v7140_v0 }
 0x120   : > { %718 = vst [vmem:[#allocation2 + $0x1d8] sm:$0xff] %v7140_v0 }
 0x121   : > { %719 = vst [vmem:[#allocation2 + $0x30] sm:$0xff] %v7140_v0 }
 0x122   : > { %720 = vst [vmem:[#allocation2 + $0x140] sm:$0xff] %v7140_v0 }
 0x123   : > { %721 = vst [vmem:[#allocation2 + $0x2a8] sm:$0xff] %v7140_v0 }
 0x124   : > { %722 = vst [vmem:[#allocation2 + $0x130] sm:$0xff] %v7140_v0 }
 0x125   : > { %723 = vst [vmem:[#allocation2 + $0x200] sm:$0xff] %v7140_v0 }
 0x126   : > { %724 = vst [vmem:[#allocation2 + $0x318] sm:$0xff] %v7140_v0 }
 0x127   : > { %725 = vst [vmem:[#allocation2 + $0x220] sm:$0xff] %v7140_v0 }
 0x128   : > { %726 = vst [vmem:[#allocation2 + $0x70] sm:$0xff] %v7140_v0 }
 0x129   : > { %727 = vst [vmem:[#allocation2 + $0x300] sm:$0xff] %v7140_v0 }
 0x12a   : > { %728 = vst [vmem:[#allocation2 + $0xe0] sm:$0xff] %v7140_v0 }
 0x12b   : > { %729 = vst [vmem:[#allocation2 + $0x178] sm:$0xff] %v7140_v0 }
 0x12c   : > { %730 = vst [vmem:[#allocation2 + $0x328] sm:$0xff] %v7140_v0 }
 0x12d   : > { %731 = vst [vmem:[#allocation2 + $0x260] sm:$0xff] %v7140_v0 }
 0x12e   : > { %732 = vst [vmem:[#allocation2 + $0x3b8] sm:$0xff] %v7140_v0 }
 0x12f   : > { %733 = vst [vmem:[#allocation2 + $0x2b8] sm:$0xff] %v7140_v0 }
 0x130   : > { %734 = vst [vmem:[#allocation2 + $0x248] sm:$0xff] %v7140_v0 }
 0x131   : > { %735 = vst [vmem:[#allocation2 + $0x40] sm:$0xff] %v7140_v0 }
 0x132   : > { %736 = vst [vmem:[#allocation2 + $0x20] sm:$0xff] %v7140_v0 }
 0x133   : > { %737 = vst [vmem:[#allocation2 + $0xe8] sm:$0xff] %v7140_v0 }
 0x134   : > { %738 = vst [vmem:[#allocation2 + $0x288] sm:$0xff] %v7140_v0 }
 0x135   : > { %739 = vst [vmem:[#allocation2 + $0x3a8] sm:$0xff] %v7140_v0 }
 0x136   : > { %740 = vst [vmem:[#allocation2 + $0x3c8] sm:$0xff] %v7140_v0 }
 0x137   : > { %741 = vst [vmem:[#allocation2 + $0x160] sm:$0xff] %v7140_v0 }
 0x138   : > { %742 = vst [vmem:[#allocation2 + $0x2c8] sm:$0xff] %v7140_v0 }
 0x139   : > { %743 = vst [vmem:[#allocation2 + $0x210] sm:$0xff] %v7140_v0 }
 0x13a   : > { %744 = vst [vmem:[#allocation2 + $0x3d8] sm:$0xff] %v7140_v0 }
 0x13b   : > { %745 = vst [vmem:[#allocation2 + $0x1e8] sm:$0xff] %v7140_v0 }
 0x13c   : > { %746 = vst [vmem:[#allocation2 + $0x1b0] sm:$0xff] %v7140_v0 }
 0x13d   : > { %747 = vst [vmem:[#allocation2 + $0x1c8] sm:$0xff] %v7140_v0 }
 0x13e   : > { %748 = vst [vmem:[#allocation2 + $0x2d0] sm:$0xff] %v7140_v0 }
 0x13f   : > { %749 = vst [vmem:[#allocation2 + $0x1d0] sm:$0xff] %v7140_v0 }
 0x140   : > { %750 = vst [vmem:[#allocation2 + $0x58] sm:$0xff] %v7140_v0 }
 0x141   : > { %751 = vst [vmem:[#allocation2 + $0x120] sm:$0xff] %v7140_v0 }
 0x142   : > { %752 = vst [vmem:[#allocation2 + $0x198] sm:$0xff] %v7140_v0 }
 0x143   : > { %753 = vst [vmem:[#allocation2 + $0x2e8] sm:$0xff] %v7140_v0 }
 0x144   : > { %754 = vst [vmem:[#allocation2 + $0x1f8] sm:$0xff] %v7140_v0 }
 0x145   : > { %755 = vst [vmem:[#allocation2 + $0x238] sm:$0xff] %v7140_v0 }
 0x146   : > { %756 = vst [vmem:[#allocation2 + $0x398] sm:$0xff] %v7140_v0 }
 0x147   : > { %757 = vst [vmem:[#allocation2 + $0x390] sm:$0xff] %v7140_v0 }
 0x148   : > { %758 = vst [vmem:[#allocation2 + $0x1a0] sm:$0xff] %v7140_v0 }
 0x149   : > { %759 = vst [vmem:[#allocation2 + $0xa8] sm:$0xff] %v7140_v0 }
 0x14a   : > { %760 = vst [vmem:[#allocation2 + $0x258] sm:$0xff] %v7140_v0 }
 0x14b   : > { %761 = vst [vmem:[#allocation2 + $0x2d8] sm:$0xff] %v7140_v0 }
 0x14c   : > { %762 = vst [vmem:[#allocation2 + $0xf0] sm:$0xff] %v7140_v0 }
 0x14d   : > { %763 = vst [vmem:[#allocation2 + $0x180] sm:$0xff] %v7140_v0 }
 0x14e   : > { %764 = vst [vmem:[#allocation2 + $0x170] sm:$0xff] %v7140_v0 }
 0x14f   : > { %765 = vst [vmem:[#allocation2 + $0x3d0] sm:$0xff] %v7140_v0 }
 0x150   : > { %766 = vst [vmem:[#allocation2 + $0x250] sm:$0xff] %v7140_v0 }
 0x151   : > { %767 = vst [vmem:[#allocation2 + $0x378] sm:$0xff] %v7140_v0 }
 0x152   : > { %768 = vst [vmem:[#allocation2 + $0xb8] sm:$0xff] %v7140_v0 }
 0x153   : > { %769 = vst [vmem:[#allocation2 + $0x38] sm:$0xff] %v7140_v0 }
 0x154   : > { %770 = vst [vmem:[#allocation2 + $0x78] sm:$0xff] %v7140_v0 }
 0x155   : > { %771 = vst [vmem:[#allocation2 + $0x308] sm:$0xff] %v7140_v0 }
 0x156   : > { %772 = vst [vmem:[#allocation2 + $0x370] sm:$0xff] %v7140_v0 }
 0x157   : > { %773 = vst [vmem:[#allocation2 + $0xc8] sm:$0xff] %v7140_v0 }
 0x158   : > { %774 = vst [vmem:[#allocation2 + $0x278] sm:$0xff] %v7140_v0 }
 0x159   : > { %775 = vst [vmem:[#allocation2 + $0x360] sm:$0xff] %v7140_v0 }
 0x15a   : > { %776 = vst [vmem:[#allocation2 + $0x228] sm:$0xff] %v7140_v0 }
 0x15b   : > { %777 = vst [vmem:[#allocation2 + $0x348] sm:$0xff] %v7140_v0 }
 0x15c   : > { %778 = vst [vmem:[#allocation2 + $0x148] sm:$0xff] %v7140_v0 }
 0x15d   : > { %779 = vst [vmem:[#allocation2 + $0xf8] sm:$0xff] %v7140_v0 }
 0x15e   : > { %780 = vst [vmem:[#allocation2 + $0x68] sm:$0xff] %v7140_v0 }
 0x15f   : > { %781 = vst [vmem:[#allocation2] sm:$0xff] %v7140_v0 }
 0x160   : > { %782 = vst [vmem:[#allocation2 + $0x298] sm:$0xff] %v7140_v0 }
 0x161   : > { %783 = vst [vmem:[#allocation2 + $0x270] sm:$0xff] %v7140_v0 }
 0x162   : > { %784 = vst [vmem:[#allocation2 + $0x310] sm:$0xff] %v7140_v0 }
 0x163   : > { %785 = vst [vmem:[#allocation2 + $0x190] sm:$0xff] %v7140_v0 }
 0x164 PF: > { %v6395_v1 = vld [vmem:[%s7603_s8 + $0x70] sm:$0xf]  ;;  %v6935_v2 = vld [vmem:[%s7603_s8 + $0x74] sm:$0xf0]  ;;  %v6387_v12 = vld [vmem:[%s7603_s8 + $0x60] sm:$0xf] }
 0x165   : > { %v6459_v3 = vld [vmem:[%s7603_s8 + $0xf0] sm:$0xf]  ;;  %v6396_v4 = vor.u32 %v6935_v2, %v6395_v1  ;;  %v6951_v5 = vld [vmem:[%s7603_s8 + $0xf4] sm:$0xf0]  ;;  %v6933_v14 = vld [vmem:[%s7603_s8 + $0x64] sm:$0xf0] }
 0x166   : > { %v6523_v6 = vld [vmem:[%s7603_s8 + $0x170] sm:$0xf]  ;;  %v6967_v7 = vld [vmem:[%s7603_s8 + $0x174] sm:$0xf0]  ;;  %v6460_v8 = vor.u32 %v6951_v5, %v6459_v3  ;;  %v6451_v15 = vld [vmem:[%s7603_s8 + $0xe0] sm:$0xf]  ;;  %v6388_v17 = vor.u32 %v6933_v14, %v6387_v12 }
 0x167   : > { %v6524_v9 = vor.u32 %v6967_v7, %v6523_v6  ;;  %v6587_v10 = vld [vmem:[%s7603_s8 + $0x1f0] sm:$0xf]  ;;  %v6983_v11 = vld [vmem:[%s7603_s8 + $0x1f4] sm:$0xf0]  ;;  %2642 = vmatpush.bf16.msra.mxu0 %v6396_v4  ;;  %v6949_v16 = vld [vmem:[%s7603_s8 + $0xe4] sm:$0xf0] }
 0x168   : > { %v6588_v13 = vor.u32 %v6983_v11, %v6587_v10  ;;  %2811 = vmatpush.bf16.msra.mxu1 %v6460_v8  ;;  %v6452_v18 = vor.u32 %v6949_v16, %v6451_v15  ;;  %v6515_v19 = vld [vmem:[%s7603_s8 + $0x160] sm:$0xf]  ;;  %v6965_v20 = vld [vmem:[%s7603_s8 + $0x164] sm:$0xf0]  ;;  %v6379_v24 = vld [vmem:[%s7603_s8 + $0x50] sm:$0xf] }
 0x169   : > { %2980 = vmatpush.bf16.msra.mxu2 %v6524_v9  ;;  %v6579_v21 = vld [vmem:[%s7603_s8 + $0x1e0] sm:$0xf]  ;;  %v6516_v22 = vor.u32 %v6965_v20, %v6515_v19  ;;  %v6981_v23 = vld [vmem:[%s7603_s8 + $0x1e4] sm:$0xf0]  ;;  %v6931_v25 = vld [vmem:[%s7603_s8 + $0x54] sm:$0xf0] }
 0x16a   : > { %3149 = vmatpush.bf16.msra.mxu3 %v6588_v13  ;;  %v6580_v26 = vor.u32 %v6981_v23, %v6579_v21  ;;  %v6443_v27 = vld [vmem:[%s7603_s8 + $0xd0] sm:$0xf]  ;;  %v6947_v28 = vld [vmem:[%s7603_s8 + $0xd4] sm:$0xf0]  ;;  %v6380_v30 = vor.u32 %v6931_v25, %v6379_v24  ;;  %v6371_v36 = vld [vmem:[%s7603_s8 + $0x40] sm:$0xf] }
 0x16b   : > { %v6507_v29 = vld [vmem:[%s7603_s8 + $0x150] sm:$0xf]  ;;  %2643 = vmatpush.bf16.msra.mxu0 %v6388_v17  ;;  %v6963_v31 = vld [vmem:[%s7603_s8 + $0x154] sm:$0xf0]  ;;  %v6444_v34 = vor.u32 %v6947_v28, %v6443_v27  ;;  %v6929_v37 = vld [vmem:[%s7603_s8 + $0x44] sm:$0xf0] }
 0x16c   : > { %v6571_v32 = vld [vmem:[%s7603_s8 + $0x1d0] sm:$0xf]  ;;  %v6979_v33 = vld [vmem:[%s7603_s8 + $0x1d4] sm:$0xf0]  ;;  %2812 = vmatpush.bf16.msra.mxu1 %v6452_v18  ;;  %v6508_v35 = vor.u32 %v6963_v31, %v6507_v29  ;;  %v6435_v38 = vld [vmem:[%s7603_s8 + $0xc0] sm:$0xf]  ;;  %v6372_v45 = vor.u32 %v6929_v37, %v6371_v36 }
 0x16d   : > { %2981 = vmatpush.bf16.msra.mxu2 %v6516_v22  ;;  %v6572_v39 = vor.u32 %v6979_v33, %v6571_v32  ;;  %v6945_v40 = vld [vmem:[%s7603_s8 + $0xc4] sm:$0xf0]  ;;  %v6499_v41 = vld [vmem:[%s7603_s8 + $0x140] sm:$0xf]  ;;  %v6363_v48 = vld [vmem:[%s7603_s8 + $0x30] sm:$0xf] }
 0x16e   : > { %3150 = vmatpush.bf16.msra.mxu3 %v6580_v26  ;;  %v6961_v42 = vld [vmem:[%s7603_s8 + $0x144] sm:$0xf0]  ;;  %v6563_v43 = vld [vmem:[%s7603_s8 + $0x1c0] sm:$0xf]  ;;  %v6436_v46 = vor.u32 %v6945_v40, %v6435_v38  ;;  %v6927_v49 = vld [vmem:[%s7603_s8 + $0x34] sm:$0xf0] }
 0x16f   : > { %v6977_v44 = vld [vmem:[%s7603_s8 + $0x1c4] sm:$0xf0]  ;;  %2644 = vmatpush.bf16.msra.mxu0 %v6380_v30  ;;  %v6500_v47 = vor.u32 %v6961_v42, %v6499_v41  ;;  %v6427_v50 = vld [vmem:[%s7603_s8 + $0xb0] sm:$0xf]  ;;  %v6943_v52 = vld [vmem:[%s7603_s8 + $0xb4] sm:$0xf0]  ;;  %v6364_v57 = vor.u32 %v6927_v49, %v6363_v48 }
 0x170   : > { %2813 = vmatpush.bf16.msra.mxu1 %v6444_v34  ;;  %v6564_v51 = vor.u32 %v6977_v44, %v6563_v43  ;;  %v6491_v53 = vld [vmem:[%s7603_s8 + $0x130] sm:$0xf]  ;;  %v6959_v54 = vld [vmem:[%s7603_s8 + $0x134] sm:$0xf0]  ;;  %v6428_v58 = vor.u32 %v6943_v52, %v6427_v50  ;;  %v6355_v60 = vld [vmem:[%s7603_s8 + $0x20] sm:$0xf] }
 0x171   : > { %2982 = vmatpush.bf16.msra.mxu2 %v6508_v35  ;;  %v6555_v55 = vld [vmem:[%s7603_s8 + $0x1b0] sm:$0xf]  ;;  %v6975_v56 = vld [vmem:[%s7603_s8 + $0x1b4] sm:$0xf0]  ;;  %v6492_v59 = vor.u32 %v6959_v54, %v6491_v53  ;;  %v6925_v61 = vld [vmem:[%s7603_s8 + $0x24] sm:$0xf0] }
 0x172   : > { %3151 = vmatpush.bf16.msra.mxu3 %v6572_v39  ;;  %v6419_v62 = vld [vmem:[%s7603_s8 + $0xa0] sm:$0xf]  ;;  %v6556_v63 = vor.u32 %v6975_v56, %v6555_v55  ;;  %v6941_v0 = vld [vmem:[%s7603_s8 + $0xa4] sm:$0xf0]  ;;  %v6356_v5 = vor.u32 %v6925_v61, %v6355_v60  ;;  %v6347_v8 = vld [vmem:[%s7603_s8 + $0x10] sm:$0xf] }
 0x173   : > { %2645 = vmatpush.bf16.msra.mxu0 %v6372_v45  ;;  %v6483_v1 = vld [vmem:[%s7603_s8 + $0x120] sm:$0xf]  ;;  %v6957_v2 = vld [vmem:[%s7603_s8 + $0x124] sm:$0xf0]  ;;  %v6420_v6 = vor.u32 %v6941_v0, %v6419_v62  ;;  %v6923_v9 = vld [vmem:[%s7603_s8 + $0x14] sm:$0xf0] }
 0x174   : > { %2814 = vmatpush.bf16.msra.mxu1 %v6436_v46  ;;  %v6547_v3 = vld [vmem:[%s7603_s8 + $0x1a0] sm:$0xf]  ;;  %v6973_v4 = vld [vmem:[%s7603_s8 + $0x1a4] sm:$0xf0]  ;;  %v6484_v7 = vor.u32 %v6957_v2, %v6483_v1  ;;  %v6411_v10 = vld [vmem:[%s7603_s8 + $0x90] sm:$0xf]  ;;  %v6348_v18 = vor.u32 %v6923_v9, %v6347_v8 }
 0x175   : > { %2983 = vmatpush.bf16.msra.mxu2 %v6500_v47  ;;  %v6548_v11 = vor.u32 %v6973_v4, %v6547_v3  ;;  %v6939_v12 = vld [vmem:[%s7603_s8 + $0x94] sm:$0xf0]  ;;  %v6475_v13 = vld [vmem:[%s7603_s8 + $0x110] sm:$0xf]  ;;  %v6339_v17 = vld [vmem:[%s7603_s8] sm:$0xf] }
 0x176   : > { %3152 = vmatpush.bf16.msra.mxu3 %v6564_v51  ;;  %v6955_v14 = vld [vmem:[%s7603_s8 + $0x114] sm:$0xf0]  ;;  %v6539_v15 = vld [vmem:[%s7603_s8 + $0x190] sm:$0xf]  ;;  %v6921_v19 = vld [vmem:[%s7603_s8 + $0x4] sm:$0xf0]  ;;  %v6412_v22 = vor.u32 %v6939_v12, %v6411_v10 }
 0x177   : > { %2646 = vmatpush.bf16.msra.mxu0 %v6364_v57  ;;  %v6971_v16 = vld [vmem:[%s7603_s8 + $0x194] sm:$0xf0]  ;;  %v6403_v20 = vld [vmem:[%s7603_s8 + $0x80] sm:$0xf]  ;;  %v6937_v21 = vld [vmem:[%s7603_s8 + $0x84] sm:$0xf0]  ;;  %v6476_v23 = vor.u32 %v6955_v14, %v6475_v13  ;;  %v6340_v34 = vor.u32 %v6921_v19, %v6339_v17 }
 0x178   : > { %2815 = vmatpush.bf16.msra.mxu1 %v6428_v58  ;;  %v6467_v24 = vld [vmem:[%s7603_s8 + $0x100] sm:$0xf]  ;;  %v6953_v25 = vld [vmem:[%s7603_s8 + $0x104] sm:$0xf0]  ;;  %v6540_v27 = vor.u32 %v6971_v16, %v6539_v15  ;;  %v6731_v30 = vld [vmem:[%s7605_s9 + $0x14] sm:$0xf0]  ;;  %v6404_v38 = vor.u32 %v6937_v21, %v6403_v20 }
 0x179   : > { %2984 = vmatpush.bf16.msra.mxu2 %v6492_v59  ;;  %v6531_v26 = vld [vmem:[%s7603_s8 + $0x180] sm:$0xf]  ;;  %v6969_v28 = vld [vmem:[%s7603_s8 + $0x184] sm:$0xf0]  ;;  %v6728_v31 = vld [vmem:[%s7605_s9 + $0x4] sm:$0xf]  ;;  %v6468_v39 = vor.u32 %v6953_v25, %v6467_v24 }
 0x17a   : > { %3153 = vmatpush.bf16.msra.mxu3 %v6556_v63  ;;  %v5571_v29 = vld [vmem:[%s7605_s9] sm:$0xf]  ;;  %v6934_v32 = vld [vmem:[%s7603_s8 + $0x74] sm:$0xf]  ;;  %v6397_v33 = vld [vmem:[%s7603_s8 + $0x78] sm:$0xf0]  ;;  %v6532_v43 = vor.u32 %v6969_v28, %v6531_v26 }
 0x17b   : > { %2647 = vmatpush.bf16.msra.mxu0 %v6356_v5  ;;  %v5573_v35 = vld [vmem:[%s7605_s9 + $0x18] sm:$0xf0]  ;;  %v6950_v36 = vld [vmem:[%s7603_s8 + $0xf4] sm:$0xf]  ;;  %v5579_v40 = vld [vmem:[%s7605_s9 + $0x8] sm:$0xf]  ;;  %v6400_v45 = vor.u32 %v6934_v32, %v6397_v33  ;;  %v7814_v48 = vor.u32 %v6731_v30, %v5571_v29 }
 0x17c   : > { %2816 = vmatpush.bf16.msra.mxu1 %v6420_v6  ;;  %v6461_v37 = vld [vmem:[%s7603_s8 + $0xf8] sm:$0xf0]  ;;  %v6732_v41 = vld [vmem:[%s7605_s9 + $0x1c] sm:$0xf0]  ;;  %v6729_v42 = vld [vmem:[%s7605_s9 + $0xc] sm:$0xf]  ;;  %v7818_v52 = vor.u32 %v6728_v31, %v5573_v35 }
 0x17d   : > { %2985 = vmatpush.bf16.msra.mxu2 %v6484_v7  ;;  %v5581_v44 = vld [vmem:[%s7605_s9 + $0x20] sm:$0xf0]  ;;  %v6651_v46 = vld [vmem:[%s7603_s8 + $0x270] sm:$0xf]  ;;  %v6999_v47 = vld [vmem:[%s7603_s8 + $0x274] sm:$0xf0]  ;;  %v6464_v49 = vor.u32 %v6950_v36, %v6461_v37  ;;  %v7820_v53 = vor.u32 %v6732_v41, %v5579_v40 }
 0x17e   : > { %3154 = vmatpush.bf16.msra.mxu3 %v6548_v11  ;;  %v6715_v50 = vld [vmem:[%s7603_s8 + $0x2f0] sm:$0xf]  ;;  %v7015_v51 = vld [vmem:[%s7603_s8 + $0x2f4] sm:$0xf0]  ;;  %v7822_v54 = vor.u32 %v6729_v42, %v5581_v44  ;;  %v6652_v55 = vor.u32 %v6999_v47, %v6651_v46  ;;  %v6737_v58 = vld [vmem:[%s7605_s9 + $0x44] sm:$0xf0] }
 0x17f   : > { %2648 = vmatpush.bf16.msra.mxu0 %v6348_v18  ;;  %9769 = vst [vmem:[#allocation7_spill] sm:$0xff] %v7820_v53  ;;  %v6716_v56 = vor.u32 %v7015_v51, %v6715_v50  ;;  %v5595_v57 = vld [vmem:[%s7605_s9 + $0x30] sm:$0xf]  ;;  %v6734_v59 = vld [vmem:[%s7605_s9 + $0x34] sm:$0xf]  ;;  %p6721_p11 = scmp.ne.s32.totalorder %s7130_s14, 5 }
 0x180   : > { %2817 = vmatpush.bf16.msra.mxu1 %v6412_v22  ;;  %9770 = vst [vmem:[#allocation8_spill] sm:$0xff] %v7822_v54  ;;  %v5597_v60 = vld [vmem:[%s7605_s9 + $0x48] sm:$0xf0]  ;;  %v5603_v61 = vld [vmem:[%s7605_s9 + $0x38] sm:$0xf]  ;;  %v7836_v1 = vor.u32 %v6737_v58, %v5595_v57 }
 0x181   : > { %2986 = vmatpush.bf16.msra.mxu2 %v6476_v23  ;;  %v6738_v62 = vld [vmem:[%s7605_s9 + $0x4c] sm:$0xf0]  ;;  %v6735_v63 = vld [vmem:[%s7605_s9 + $0x3c] sm:$0xf]  ;;  %v5605_v0 = vld [vmem:[%s7605_s9 + $0x50] sm:$0xf0]  ;;  %v7838_v2 = vor.u32 %v6734_v59, %v5597_v60 }
 0x182   : > { %3155 = vmatpush.bf16.msra.mxu3 %v6540_v27  ;;  %v7840_v3 = vor.u32 %v6738_v62, %v5603_v61  ;;  %v7842_v4 = vor.u32 %v6735_v63, %v5605_v0  ;;  %v5619_v5 = vld [vmem:[%s7605_s9 + $0x60] sm:$0xf]  ;;  %v6743_v6 = vld [vmem:[%s7605_s9 + $0x74] sm:$0xf0]  ;;  %v6740_v7 = vld [vmem:[%s7605_s9 + $0x64] sm:$0xf] }
 0x183   : > { %2649 = vmatpush.bf16.msra.mxu0 %v6340_v34  ;;  %v5621_v8 = vld [vmem:[%s7605_s9 + $0x78] sm:$0xf0]  ;;  %v5627_v9 = vld [vmem:[%s7605_s9 + $0x68] sm:$0xf]  ;;  %v6744_v10 = vld [vmem:[%s7605_s9 + $0x7c] sm:$0xf0]  ;;  %v7856_v13 = vor.u32 %v6743_v6, %v5619_v5 }
 0x184   : > { %2818 = vmatpush.bf16.msra.mxu1 %v6404_v38  ;;  %9771 = vst [vmem:[#allocation9_spill] sm:$0xff] %v7840_v3  ;;  %v6741_v11 = vld [vmem:[%s7605_s9 + $0x6c] sm:$0xf]  ;;  %v5629_v12 = vld [vmem:[%s7605_s9 + $0x80] sm:$0xf0]  ;;  %v7858_v14 = vor.u32 %v6740_v7, %v5621_v8  ;;  %v7860_v15 = vor.u32 %v6744_v10, %v5627_v9 }
 0x185   : > { %2987 = vmatpush.bf16.msra.mxu2 %v6468_v39  ;;  %9772 = vst [vmem:[#allocation10_spill] sm:$0xff] %v7842_v4  ;;  %v7862_v16 = vor.u32 %v6741_v11, %v5629_v12  ;;  %v6932_v17 = vld [vmem:[%s7603_s8 + $0x64] sm:$0xf]  ;;  %v6389_v18 = vld [vmem:[%s7603_s8 + $0x68] sm:$0xf0] }
 0x186   : > { %3156 = vmatpush.bf16.msra.mxu3 %v6532_v43  ;;  %2650 = vmatmul.bf16.vlgmr.msra.gmra.mxu0 %v7814_v48  ;;  %9773 = vst [vmem:[#allocation11_spill] sm:$0xff] %v7860_v15  ;;  %v6643_v19 = vld [vmem:[%s7603_s8 + $0x260] sm:$0xf]  ;;  %v6392_v20 = vor.u32 %v6932_v17, %v6389_v18  ;;  %v6997_v21 = vld [vmem:[%s7603_s8 + $0x264] sm:$0xf0] }
 0x187   : > { %2819 = vmatmul.bf16.vlgmr.msra.gmra.mxu1 %v7818_v52  ;;  %3318 = vmatpush.bf16.msrb.mxu0 %v6652_v55  ;;  %9774 = vst [vmem:[#allocation12_spill] sm:$0xff] %v7862_v16  ;;  %v6948_v22 = vld [vmem:[%s7603_s8 + $0xe4] sm:$0xf]  ;;  %v6453_v23 = vld [vmem:[%s7603_s8 + $0xe8] sm:$0xf0]  ;;  %v6644_v24 = vor.u32 %v6997_v21, %v6643_v19 }
 0x188   : > { %2988 = vmatmul.bf16.vlgmr.msra.gmra.mxu2 %v7820_v53  ;;  %3487 = vmatpush.bf16.msrb.mxu1 %v6716_v56  ;;  %v6456_v25 = vor.u32 %v6948_v22, %v6453_v23  ;;  %v6707_v26 = vld [vmem:[%s7603_s8 + $0x2e0] sm:$0xf]  ;;  %v7013_v27 = vld [vmem:[%s7603_s8 + $0x2e4] sm:$0xf0]  ;;  %v5643_v29 = vld [vmem:[%s7605_s9 + $0x90] sm:$0xf] }
 0x189   : > { %3656 = vmatpush.bf16.msrb.mxu2 %v6400_v45  ;;  %3157 = vmatmul.bf16.vlgmr.msra.gmra.mxu3 %v7822_v54  ;;  %v6708_v28 = vor.u32 %v7013_v27, %v6707_v26  ;;  %v6749_v30 = vld [vmem:[%s7605_s9 + $0xa4] sm:$0xf0]  ;;  %v6746_v31 = vld [vmem:[%s7605_s9 + $0x94] sm:$0xf]  ;;  %v5645_v32 = vld [vmem:[%s7605_s9 + $0xa8] sm:$0xf0] }
 0x18a   : > { %3825 = vmatpush.bf16.msrb.mxu3 %v6464_v49  ;;  %v5651_v33 = vld [vmem:[%s7605_s9 + $0x98] sm:$0xf]  ;;  %v6750_v34 = vld [vmem:[%s7605_s9 + $0xac] sm:$0xf0]  ;;  %v6747_v35 = vld [vmem:[%s7605_s9 + $0x9c] sm:$0xf]  ;;  %v7884_v37 = vor.u32 %v6749_v30, %v5643_v29  ;;  %v7886_v38 = vor.u32 %v6746_v31, %v5645_v32 }
 0x18b   : > { %3319 = vmatpush.bf16.msrb.mxu0 %v6644_v24  ;;  %v5653_v36 = vld [vmem:[%s7605_s9 + $0xb0] sm:$0xf0]  ;;  %v7888_v39 = vor.u32 %v6750_v34, %v5651_v33  ;;  %v5667_v41 = vld [vmem:[%s7605_s9 + $0xc0] sm:$0xf]  ;;  %v6755_v42 = vld [vmem:[%s7605_s9 + $0xd4] sm:$0xf0] }
 0x18c   : > { %3488 = vmatpush.bf16.msrb.mxu1 %v6708_v28  ;;  %v7890_v40 = vor.u32 %v6747_v35, %v5653_v36  ;;  %v6752_v43 = vld [vmem:[%s7605_s9 + $0xc4] sm:$0xf]  ;;  %v5669_v44 = vld [vmem:[%s7605_s9 + $0xd8] sm:$0xf0]  ;;  %v5675_v45 = vld [vmem:[%s7605_s9 + $0xc8] sm:$0xf]  ;;  %v7904_v50 = vor.u32 %v6755_v42, %v5667_v41 }
 0x18d   : > { %3657 = vmatpush.bf16.msrb.mxu2 %v6392_v20  ;;  %9775 = vst [vmem:[#allocation13_spill] sm:$0xff] %v7888_v39  ;;  %v6756_v46 = vld [vmem:[%s7605_s9 + $0xdc] sm:$0xf0]  ;;  %v6753_v47 = vld [vmem:[%s7605_s9 + $0xcc] sm:$0xf]  ;;  %v7906_v51 = vor.u32 %v6752_v43, %v5669_v44 }
 0x18e   : > { %3826 = vmatpush.bf16.msrb.mxu3 %v6456_v25  ;;  %9776 = vst [vmem:[#allocation14_spill] sm:$0xff] %v7890_v40  ;;  %v5677_v49 = vld [vmem:[%s7605_s9 + $0xe0] sm:$0xf0]  ;;  %v7908_v55 = vor.u32 %v6756_v46, %v5675_v45  ;;  %v5691_v57 = vld [vmem:[%s7605_s9 + $0xf0] sm:$0xf] }
 0x18f   : > { %v7910_v56 = vor.u32 %v6753_v47, %v5677_v49  ;;  %v6761_v58 = vld [vmem:[%s7605_s9 + $0x104] sm:$0xf0]  ;;  %v6758_v59 = vld [vmem:[%s7605_s9 + $0xf4] sm:$0xf]  ;;  %v5693_v60 = vld [vmem:[%s7605_s9 + $0x108] sm:$0xf0] }
 0x190   : > { %9777 = vst [vmem:[#allocation15_spill] sm:$0xff] %v7908_v55  ;;  %v5699_v61 = vld [vmem:[%s7605_s9 + $0xf8] sm:$0xf]  ;;  %v6762_v62 = vld [vmem:[%s7605_s9 + $0x10c] sm:$0xf0]  ;;  %v7924_v5 = vor.u32 %v6761_v58, %v5691_v57  ;;  %v7926_v6 = vor.u32 %v6758_v59, %v5693_v60 }
 0x191   : > { %9778 = vst [vmem:[#allocation16_spill] sm:$0xff] %v7910_v56  ;;  %v6759_v63 = vld [vmem:[%s7605_s9 + $0xfc] sm:$0xf]  ;;  %v5701_v0 = vld [vmem:[%s7605_s9 + $0x110] sm:$0xf0]  ;;  %v7928_v7 = vor.u32 %v6762_v62, %v5699_v61 }
 0x192   : > { %v7930_v8 = vor.u32 %v6759_v63, %v5701_v0  ;;  %v5715_v9 = vld [vmem:[%s7605_s9 + $0x120] sm:$0xf]  ;;  %v6767_v10 = vld [vmem:[%s7605_s9 + $0x134] sm:$0xf0]  ;;  %v6764_v11 = vld [vmem:[%s7605_s9 + $0x124] sm:$0xf] }
 0x193   : > { %9779 = vst [vmem:[#allocation17_spill] sm:$0xff] %v7928_v7  ;;  %v5717_v12 = vld [vmem:[%s7605_s9 + $0x138] sm:$0xf0]  ;;  %v5723_v17 = vld [vmem:[%s7605_s9 + $0x128] sm:$0xf]  ;;  %v7944_v21 = vor.u32 %v6767_v10, %v5715_v9 }
 0x194   : > { %9780 = vst [vmem:[#allocation18_spill] sm:$0xff] %v7930_v8  ;;  %v6768_v18 = vld [vmem:[%s7605_s9 + $0x13c] sm:$0xf0]  ;;  %v6765_v19 = vld [vmem:[%s7605_s9 + $0x12c] sm:$0xf]  ;;  %v7946_v22 = vor.u32 %v6764_v11, %v5717_v12 }
 0x195   : > { %v5725_v20 = vld [vmem:[%s7605_s9 + $0x140] sm:$0xf0]  ;;  %v7948_v23 = vor.u32 %v6768_v18, %v5723_v17  ;;  %v6930_v25 = vld [vmem:[%s7603_s8 + $0x54] sm:$0xf]  ;;  %v6381_v26 = vld [vmem:[%s7603_s8 + $0x58] sm:$0xf0] }
 0x196   : > { %2655 = vmatmul.bf16.gmra.mxu0 %v7836_v1  ;;  %v7950_v24 = vor.u32 %v6765_v19, %v5725_v20  ;;  %v6635_v27 = vld [vmem:[%s7603_s8 + $0x250] sm:$0xf]  ;;  %v6384_v28 = vor.u32 %v6930_v25, %v6381_v26  ;;  %v6995_v29 = vld [vmem:[%s7603_s8 + $0x254] sm:$0xf0]  ;;  %v6946_v30 = vld [vmem:[%s7603_s8 + $0xd4] sm:$0xf] }
 0x197   : > { %2824 = vmatmul.bf16.gmra.mxu1 %v7838_v2  ;;  %9781 = vst [vmem:[#allocation19_spill] sm:$0xff] %v7948_v23  ;;  %v6445_v31 = vld [vmem:[%s7603_s8 + $0xd8] sm:$0xf0]  ;;  %v6636_v32 = vor.u32 %v6995_v29, %v6635_v27  ;;  %v6699_v34 = vld [vmem:[%s7603_s8 + $0x2d0] sm:$0xf] }
 0x198   : > { %2993 = vmatmul.bf16.gmra.mxu2 %v7840_v3  ;;  %9782 = vst [vmem:[#allocation20_spill] sm:$0xff] %v7950_v24  ;;  %v6448_v33 = vor.u32 %v6946_v30, %v6445_v31  ;;  %v7011_v35 = vld [vmem:[%s7603_s8 + $0x2d4] sm:$0xf0]  ;;  %v5739_v41 = vld [vmem:[%s7605_s9 + $0x150] sm:$0xf] }
 0x199   : > { %3162 = vmatmul.bf16.gmra.mxu3 %v7842_v4  ;;  %3658 = vmatpush.bf16.msrb.mxu2 %v6384_v28  ;;  %v6700_v36 = vor.u32 %v7011_v35, %v6699_v34  ;;  %v6773_v42 = vld [vmem:[%s7605_s9 + $0x164] sm:$0xf0]  ;;  %v6770_v43 = vld [vmem:[%s7605_s9 + $0x154] sm:$0xf]  ;;  %v5741_v44 = vld [vmem:[%s7605_s9 + $0x168] sm:$0xf0] }
 0x19a   : > { %3320 = vmatpush.bf16.msrb.mxu0 %v6636_v32  ;;  %3827 = vmatpush.bf16.msrb.mxu3 %v6448_v33  ;;  %v5747_v45 = vld [vmem:[%s7605_s9 + $0x158] sm:$0xf]  ;;  %v6774_v46 = vld [vmem:[%s7605_s9 + $0x16c] sm:$0xf0]  ;;  %v6771_v47 = vld [vmem:[%s7605_s9 + $0x15c] sm:$0xf]  ;;  %v7972_v57 = vor.u32 %v6773_v42, %v5739_v41  ;;  %v7974_v58 = vor.u32 %v6770_v43, %v5741_v44 }
 0x19b   : > { %3489 = vmatpush.bf16.msrb.mxu1 %v6700_v36  ;;  %v5749_v49 = vld [vmem:[%s7605_s9 + $0x170] sm:$0xf0]  ;;  %v7976_v59 = vor.u32 %v6774_v46, %v5747_v45  ;;  %v5763_v61 = vld [vmem:[%s7605_s9 + $0x180] sm:$0xf]  ;;  %v6779_v62 = vld [vmem:[%s7605_s9 + $0x194] sm:$0xf0] }
 0x19c   : > { %v7978_v60 = vor.u32 %v6771_v47, %v5749_v49  ;;  %v6776_v63 = vld [vmem:[%s7605_s9 + $0x184] sm:$0xf]  ;;  %v5765_v0 = vld [vmem:[%s7605_s9 + $0x198] sm:$0xf0]  ;;  %v5771_v9 = vld [vmem:[%s7605_s9 + $0x188] sm:$0xf]  ;;  %v7992_v17 = vor.u32 %v6779_v62, %v5763_v61 }
 0x19d   : > { %9783 = vst [vmem:[#allocation21_spill] sm:$0xff] %v7976_v59  ;;  %v6780_v10 = vld [vmem:[%s7605_s9 + $0x19c] sm:$0xf0]  ;;  %v6777_v11 = vld [vmem:[%s7605_s9 + $0x18c] sm:$0xf]  ;;  %v7994_v19 = vor.u32 %v6776_v63, %v5765_v0 }
 0x19e   : > { %9784 = vst [vmem:[#allocation22_spill] sm:$0xff] %v7978_v60  ;;  %v5773_v12 = vld [vmem:[%s7605_s9 + $0x1a0] sm:$0xf0]  ;;  %v7996_v20 = vor.u32 %v6780_v10, %v5771_v9  ;;  %v5787_v35 = vld [vmem:[%s7605_s9 + $0x1b0] sm:$0xf] }
 0x19f   : > { %v7998_v26 = vor.u32 %v6777_v11, %v5773_v12  ;;  %v6785_v36 = vld [vmem:[%s7605_s9 + $0x1c4] sm:$0xf0]  ;;  %v6782_v41 = vld [vmem:[%s7605_s9 + $0x1b4] sm:$0xf]  ;;  %v5789_v42 = vld [vmem:[%s7605_s9 + $0x1c8] sm:$0xf0] }
 0x1a0   : > { %9785 = vst [vmem:[#allocation23_spill] sm:$0xff] %v7996_v20  ;;  %v5795_v43 = vld [vmem:[%s7605_s9 + $0x1b8] sm:$0xf]  ;;  %v6786_v44 = vld [vmem:[%s7605_s9 + $0x1cc] sm:$0xf0]  ;;  %v8014_v49 = vor.u32 %v6785_v36, %v5787_v35  ;;  %v8016_v0 = vor.u32 %v6782_v41, %v5789_v42 }
 0x1a1   : > { %9786 = vst [vmem:[#allocation24_spill] sm:$0xff] %v7998_v26  ;;  %v6783_v45 = vld [vmem:[%s7605_s9 + $0x1bc] sm:$0xf]  ;;  %v5797_v46 = vld [vmem:[%s7605_s9 + $0x1d0] sm:$0xf0]  ;;  %v8018_v9 = vor.u32 %v6786_v44, %v5795_v43 }
 0x1a2   : > { %v8020_v11 = vor.u32 %v6783_v45, %v5797_v46  ;;  %v6791_v35 = vld [vmem:[%s7605_s9 + $0x1f4] sm:$0xf0]  ;;  %v6788_v36 = vld [vmem:[%s7605_s9 + $0x1e4] sm:$0xf]  ;;  %v5813_v41 = vld [vmem:[%s7605_s9 + $0x1f8] sm:$0xf0] }
 0x1a3   : > { %9787 = vst [vmem:[#allocation25_spill] sm:$0xff] %v8018_v9  ;;  %v5819_v42 = vld [vmem:[%s7605_s9 + $0x1e8] sm:$0xf]  ;;  %v6792_v43 = vld [vmem:[%s7605_s9 + $0x1fc] sm:$0xf0] }
 0x1a4   : > { %9788 = vst [vmem:[#allocation26_spill] sm:$0xff] %v8020_v11  ;;  %v6789_v44 = vld [vmem:[%s7605_s9 + $0x1ec] sm:$0xf]  ;;  %v5821_v45 = vld [vmem:[%s7605_s9 + $0x200] sm:$0xf0] }
 0x1a5   : > { %v6819_v4 = vld [vmem:[%s7605_s9 + $0x2dc] sm:$0xf]  ;;  %v5965_v53 = vld [vmem:[%s7605_s9 + $0x320] sm:$0xf0] }
 0x1a6   : > { %2660 = vmatmul.bf16.gmra.mxu0 %v7856_v13 }
 0x1a7   : > { %2829 = vmatmul.bf16.gmra.mxu1 %v7858_v14 }
 0x1a8   : > { %2998 = vmatmul.bf16.gmra.mxu2 %v7860_v15  ;;  %v6822_v15 = vld [vmem:[%s7605_s9 + $0x2ec] sm:$0xf0] }
 0x1a9   : > { %3167 = vmatmul.bf16.gmra.mxu3 %v7862_v16 }
 0x1b6   : > { %2665 = vmatmul.bf16.gmra.mxu0 %v7884_v37 }
 0x1b7   : > { %2834 = vmatmul.bf16.gmra.mxu1 %v7886_v38 }
 0x1b8   : > { %3003 = vmatmul.bf16.gmra.mxu2 %v7888_v39 }
 0x1b9   : > { %3172 = vmatmul.bf16.gmra.mxu3 %v7890_v40 }
 0x1c6   : > { %2670 = vmatmul.bf16.gmra.mxu0 %v7904_v50 }
 0x1c7   : > { %2839 = vmatmul.bf16.gmra.mxu1 %v7906_v51 }
 0x1c8   : > { %3008 = vmatmul.bf16.gmra.mxu2 %v7908_v55  ;;  %v5917_v55 = vld [vmem:[%s7605_s9 + $0x2c0] sm:$0xf0] }
 0x1c9   : > { %3177 = vmatmul.bf16.gmra.mxu3 %v7910_v56 }
 0x1d6   : > { %2675 = vmatmul.bf16.gmra.mxu0 %v7924_v5 }
 0x1d7   : > { %2844 = vmatmul.bf16.gmra.mxu1 %v7926_v6 }
 0x1d8   : > { %3013 = vmatmul.bf16.gmra.mxu2 %v7928_v7 }
 0x1d9   : > { %3182 = vmatmul.bf16.gmra.mxu3 %v7930_v8 }
 0x1e6   : > { %2680 = vmatmul.bf16.gmra.mxu0 %v7944_v21 }
 0x1e7   : > { %2849 = vmatmul.bf16.gmra.mxu1 %v7946_v22 }
 0x1e8   : > { %3018 = vmatmul.bf16.gmra.mxu2 %v7948_v23  ;;  %v5893_v23 = vld [vmem:[%s7605_s9 + $0x290] sm:$0xf0] }
 0x1e9   : > { %3187 = vmatmul.bf16.gmra.mxu3 %v7950_v24 }
 0x1f6   : > { %2685 = vmatmul.bf16.gmra.mxu0 %v7972_v57 }
 0x1f7   : > { %2854 = vmatmul.bf16.gmra.mxu1 %v7974_v58 }
 0x1f8   : > { %3023 = vmatmul.bf16.gmra.mxu2 %v7976_v59 }
 0x1f9   : > { %3192 = vmatmul.bf16.gmra.mxu3 %v7978_v60 }
 0x203   : > { %v2651_v18 = vpop.f32.mrf.mxu0 }
 0x204   : > { %v2820_v25 = vpop.f32.mrf.mxu1 }
 0x205   : > { %v2821_v27 = vadd.f32 %v2820_v25, %v2651_v18 }
 0x206   : > { %2690 = vmatmul.bf16.gmra.mxu0 %v7992_v17 }
 0x207   : > { %2859 = vmatmul.bf16.gmra.mxu1 %v7994_v19 }
 0x208   : > { %3028 = vmatmul.bf16.gmra.mxu2 %v7996_v20  ;;  %v5869_v20 = vld [vmem:[%s7605_s9 + $0x260] sm:$0xf0] }
 0x209   : > { %3197 = vmatmul.bf16.gmra.mxu3 %v7998_v26 }
 0x20b   : > { %v2989_v28 = vpop.f32.mrf.mxu2  ;;  %v2653_v31 = vpop.f32.mrf.mxu0 }
 0x20c   : > { %v2990_v29 = vadd.f32 %v2989_v28, %v2821_v27  ;;  %v3158_v30 = vpop.f32.mrf.mxu3  ;;  %v2822_v32 = vpop.f32.mrf.mxu1 }
 0x20d   : > { %v2823_v34 = vadd.f32 %v2822_v32, %v2653_v31 }
 0x20e   : > { %v8004_v33 = vadd.f32 %v3158_v30, %v2990_v29 }
 0x213   : > { %v2991_v47 = vpop.f32.mrf.mxu2  ;;  %v2656_v63 = vpop.f32.mrf.mxu0 }
 0x214   : > { %v2992_v61 = vadd.f32 %v2991_v47, %v2823_v34  ;;  %v3160_v62 = vpop.f32.mrf.mxu3  ;;  %v2825_v10 = vpop.f32.mrf.mxu1  ;;  %v5811_v34 = vld [vmem:[%s7605_s9 + $0x1e0] sm:$0xf] }
 0x215   : > { %v2826_v18 = vadd.f32 %v2825_v10, %v2656_v63  ;;  %v8038_v47 = vor.u32 %v6791_v35, %v5811_v34  ;;  %v8040_v10 = vor.u32 %v6788_v36, %v5813_v41  ;;  %v6627_v34 = vld [vmem:[%s7603_s8 + $0x240] sm:$0xf]  ;;  %v6993_v36 = vld [vmem:[%s7603_s8 + $0x244] sm:$0xf0]  ;;  %v6944_v41 = vld [vmem:[%s7603_s8 + $0xc4] sm:$0xf] }
 0x216   : > { %v8022_v12 = vadd.f32 %v3160_v62, %v2992_v61  ;;  %2695 = vmatmul.bf16.gmra.mxu0 %v8014_v49 }
 0x217   : > { %2864 = vmatmul.bf16.gmra.mxu1 %v8016_v0 }
 0x218   : > { %3033 = vmatmul.bf16.gmra.mxu2 %v8018_v9 }
 0x219   : > { %3202 = vmatmul.bf16.gmra.mxu3 %v8020_v11  ;;  %v6795_v11 = vld [vmem:[%s7605_s9 + $0x21c] sm:$0xf] }
 0x21b   : > { %v2994_v25 = vpop.f32.mrf.mxu2  ;;  %v2658_v29 = vpop.f32.mrf.mxu0 }
 0x21c   : > { %v2995_v27 = vadd.f32 %v2994_v25, %v2826_v18  ;;  %v3163_v28 = vpop.f32.mrf.mxu3  ;;  %v2827_v30 = vpop.f32.mrf.mxu1  ;;  %v8042_v18 = vor.u32 %v6792_v43, %v5819_v42  ;;  %v6437_v42 = vld [vmem:[%s7603_s8 + $0xc8] sm:$0xf0] }
 0x21d   : > { %v2828_v32 = vadd.f32 %v2827_v30, %v2658_v29  ;;  %v6928_v30 = vld [vmem:[%s7603_s8 + $0x44] sm:$0xf] }
 0x21e   : > { %v8028_v31 = vadd.f32 %v3163_v28, %v2995_v27  ;;  %9789 = vst [vmem:[#allocation27_spill] sm:$0xff] %v8042_v18  ;;  %v8044_v27 = vor.u32 %v6789_v44, %v5821_v45  ;;  %v6628_v44 = vor.u32 %v6993_v36, %v6627_v34  ;;  %v6440_v45 = vor.u32 %v6944_v41, %v6437_v42  ;;  %v5835_v36 = vld [vmem:[%s7605_s9 + $0x210] sm:$0xf]  ;;  %v6797_v41 = vld [vmem:[%s7605_s9 + $0x224] sm:$0xf0] }
 0x21f   : > { %v6794_v42 = vld [vmem:[%s7605_s9 + $0x214] sm:$0xf]  ;;  %v8070_v26 = vor.u32 %v6797_v41, %v5835_v36 }
 0x220   : > { %9790 = vst [vmem:[#allocation28_spill] sm:$0xff] %v8044_v27  ;;  %3321 = vmatpush.bf16.msrb.mxu0 %v6628_v44  ;;  %3828 = vmatpush.bf16.msrb.mxu3 %v6440_v45 }
 0x223   : > { %v2996_v46 = vpop.f32.mrf.mxu2  ;;  %v2661_v63 = vpop.f32.mrf.mxu0 }
 0x224   : > { %v2997_v61 = vadd.f32 %v2996_v46, %v2828_v32  ;;  %v3165_v62 = vpop.f32.mrf.mxu3  ;;  %v2830_v25 = vpop.f32.mrf.mxu1  ;;  %v6373_v32 = vld [vmem:[%s7603_s8 + $0x48] sm:$0xf0] }
 0x225   : > { %v2831_v29 = vadd.f32 %v2830_v25, %v2661_v63  ;;  %v6376_v35 = vor.u32 %v6928_v30, %v6373_v32  ;;  %v6691_v32 = vld [vmem:[%s7603_s8 + $0x2c0] sm:$0xf] }
 0x226   : > { %v8046_v28 = vadd.f32 %v3165_v62, %v2997_v61  ;;  %2700 = vmatmul.bf16.gmra.mxu0 %v8038_v47 }
 0x227   : > { %2869 = vmatmul.bf16.gmra.mxu1 %v8040_v10  ;;  %3659 = vmatpush.bf16.msrb.mxu2 %v6376_v35  ;;  %v5845_v35 = vld [vmem:[%s7605_s9 + $0x230] sm:$0xf0] }
 0x228   : > { %3038 = vmatmul.bf16.gmra.mxu2 %v8042_v18  ;;  %v6798_v18 = vld [vmem:[%s7605_s9 + $0x22c] sm:$0xf0] }
 0x229   : > { %3207 = vmatmul.bf16.gmra.mxu3 %v8044_v27  ;;  %v7009_v27 = vld [vmem:[%s7603_s8 + $0x2c4] sm:$0xf0] }
 0x22a   : > { %v6692_v34 = vor.u32 %v7009_v27, %v6691_v32 }
 0x22b   : > { %v2999_v43 = vpop.f32.mrf.mxu2  ;;  %v2663_v62 = vpop.f32.mrf.mxu0 }
 0x22c   : > { %v3000_v46 = vadd.f32 %v2999_v43, %v2831_v29  ;;  %v3168_v61 = vpop.f32.mrf.mxu3  ;;  %v2832_v63 = vpop.f32.mrf.mxu1  ;;  %v5837_v29 = vld [vmem:[%s7605_s9 + $0x228] sm:$0xf0]  ;;  %v5843_v43 = vld [vmem:[%s7605_s9 + $0x218] sm:$0xf]  ;;  %3490 = vmatpush.bf16.msrb.mxu1 %v6692_v34 }
 0x22d   : > { %v2833_v30 = vadd.f32 %v2832_v63, %v2663_v62  ;;  %v8074_v62 = vor.u32 %v6798_v18, %v5843_v43  ;;  %v8076_v63 = vor.u32 %v6795_v11, %v5845_v35  ;;  %v6803_v43 = vld [vmem:[%s7605_s9 + $0x254] sm:$0xf0]  ;;  %v6800_v35 = vld [vmem:[%s7605_s9 + $0x244] sm:$0xf] }
 0x22e   : > { %v8058_v25 = vadd.f32 %v3168_v61, %v3000_v46  ;;  %v8072_v61 = vor.u32 %v6794_v42, %v5837_v29  ;;  %v5859_v29 = vld [vmem:[%s7605_s9 + $0x240] sm:$0xf] }
 0x22f   : > { %9791 = vst [vmem:[#allocation29_spill] sm:$0xff] %v8074_v62  ;;  %v8094_v60 = vor.u32 %v6803_v43, %v5859_v29 }
 0x230   : > { %9792 = vst [vmem:[#allocation30_spill] sm:$0xff] %v8076_v63 }
 0x233   : > { %v3001_v9 = vpop.f32.mrf.mxu2  ;;  %v2666_v46 = vpop.f32.mrf.mxu0 }
 0x234   : > { %v3002_v44 = vadd.f32 %v3001_v9, %v2833_v30  ;;  %v3170_v45 = vpop.f32.mrf.mxu3  ;;  %v2835_v27 = vpop.f32.mrf.mxu1 }
 0x235   : > { %v2836_v34 = vadd.f32 %v2835_v27, %v2666_v46  ;;  %v6804_v46 = vld [vmem:[%s7605_s9 + $0x25c] sm:$0xf0]  ;;  %v6801_v27 = vld [vmem:[%s7605_s9 + $0x24c] sm:$0xf] }
 0x236   : > { %v8078_v32 = vadd.f32 %v3170_v45, %v3002_v44  ;;  %2705 = vmatmul.bf16.gmra.mxu0 %v8070_v26  ;;  %v5861_v44 = vld [vmem:[%s7605_s9 + $0x258] sm:$0xf0]  ;;  %v5867_v45 = vld [vmem:[%s7605_s9 + $0x248] sm:$0xf] }
 0x237   : > { %2874 = vmatmul.bf16.gmra.mxu1 %v8072_v61  ;;  %v8098_v24 = vor.u32 %v6804_v46, %v5867_v45  ;;  %v6806_v45 = vld [vmem:[%s7605_s9 + $0x274] sm:$0xf]  ;;  %v5885_v46 = vld [vmem:[%s7605_s9 + $0x288] sm:$0xf0] }
 0x238   : > { %3043 = vmatmul.bf16.gmra.mxu2 %v8074_v62 }
 0x239   : > { %3212 = vmatmul.bf16.gmra.mxu3 %v8076_v63  ;;  %9793 = vst [vmem:[#allocation31_spill] sm:$0xff] %v8098_v24 }
 0x23b   : > { %v3004_v9 = vpop.f32.mrf.mxu2  ;;  %v2668_v30 = vpop.f32.mrf.mxu0 }
 0x23c   : > { %v3005_v11 = vadd.f32 %v3004_v9, %v2836_v34  ;;  %v3173_v18 = vpop.f32.mrf.mxu3  ;;  %v2837_v36 = vpop.f32.mrf.mxu1  ;;  %v8096_v9 = vor.u32 %v6800_v35, %v5861_v44  ;;  %v5883_v35 = vld [vmem:[%s7605_s9 + $0x270] sm:$0xf]  ;;  %v6809_v44 = vld [vmem:[%s7605_s9 + $0x284] sm:$0xf0] }
 0x23d   : > { %v2838_v42 = vadd.f32 %v2837_v36, %v2668_v30  ;;  %v8118_v8 = vor.u32 %v6809_v44, %v5883_v35 }
 0x23e   : > { %v8084_v41 = vadd.f32 %v3173_v18, %v3005_v11  ;;  %v8100_v18 = vor.u32 %v6801_v27, %v5869_v20  ;;  %v5891_v27 = vld [vmem:[%s7605_s9 + $0x278] sm:$0xf] }
 0x240   : > { %9794 = vst [vmem:[#allocation32_spill] sm:$0xff] %v8100_v18 }
 0x243   : > { %v3006_v62 = vpop.f32.mrf.mxu2  ;;  %v2671_v34 = vpop.f32.mrf.mxu0 }
 0x244   : > { %v3007_v63 = vadd.f32 %v3006_v62, %v2838_v42  ;;  %v3175_v59 = vpop.f32.mrf.mxu3  ;;  %v2840_v11 = vpop.f32.mrf.mxu1 }
 0x245   : > { %v2841_v36 = vadd.f32 %v2840_v11, %v2671_v34  ;;  %v6810_v34 = vld [vmem:[%s7605_s9 + $0x28c] sm:$0xf0]  ;;  %v6807_v11 = vld [vmem:[%s7605_s9 + $0x27c] sm:$0xf] }
 0x246   : > { %v8102_v30 = vadd.f32 %v3175_v59, %v3007_v63  ;;  %2710 = vmatmul.bf16.gmra.mxu0 %v8094_v60  ;;  %v8122_v56 = vor.u32 %v6810_v34, %v5891_v27  ;;  %v6812_v27 = vld [vmem:[%s7605_s9 + $0x2a4] sm:$0xf]  ;;  %v5909_v34 = vld [vmem:[%s7605_s9 + $0x2b8] sm:$0xf0] }
 0x247   : > { %2879 = vmatmul.bf16.gmra.mxu1 %v8096_v9 }
 0x248   : > { %3048 = vmatmul.bf16.gmra.mxu2 %v8098_v24  ;;  %9795 = vst [vmem:[#allocation33_spill] sm:$0xff] %v8122_v56 }
 0x249   : > { %3217 = vmatmul.bf16.gmra.mxu3 %v8100_v18 }
 0x24b   : > { %v3009_v62 = vpop.f32.mrf.mxu2  ;;  %v2673_v29 = vpop.f32.mrf.mxu0 }
 0x24c   : > { %v3010_v20 = vadd.f32 %v3009_v62, %v2841_v36  ;;  %v3178_v42 = vpop.f32.mrf.mxu3  ;;  %v2842_v59 = vpop.f32.mrf.mxu1  ;;  %v8120_v62 = vor.u32 %v6806_v45, %v5885_v46  ;;  %v5907_v45 = vld [vmem:[%s7605_s9 + $0x2a0] sm:$0xf]  ;;  %v6815_v46 = vld [vmem:[%s7605_s9 + $0x2b4] sm:$0xf0] }
 0x24d   : > { %v2843_v43 = vadd.f32 %v2842_v59, %v2673_v29 }
 0x24e   : > { %v8108_v63 = vadd.f32 %v3178_v42, %v3010_v20  ;;  %v8124_v42 = vor.u32 %v6807_v11, %v5893_v23  ;;  %v5915_v11 = vld [vmem:[%s7605_s9 + $0x2a8] sm:$0xf] }
 0x250   : > { %9796 = vst [vmem:[#allocation34_spill] sm:$0xff] %v8124_v42 }
 0x253   : > { %v3011_v24 = vpop.f32.mrf.mxu2  ;;  %v2676_v36 = vpop.f32.mrf.mxu0 }
 0x254   : > { %v3012_v18 = vadd.f32 %v3011_v24, %v2843_v43  ;;  %v3180_v7 = vpop.f32.mrf.mxu3  ;;  %v2845_v20 = vpop.f32.mrf.mxu1 }
 0x255   : > { %v2846_v59 = vadd.f32 %v2845_v20, %v2676_v36  ;;  %v6816_v36 = vld [vmem:[%s7605_s9 + $0x2bc] sm:$0xf0]  ;;  %v6813_v20 = vld [vmem:[%s7605_s9 + $0x2ac] sm:$0xf] }
 0x256   : > { %v8126_v29 = vadd.f32 %v3180_v7, %v3012_v18  ;;  %2715 = vmatmul.bf16.gmra.mxu0 %v8118_v8  ;;  %v8148_v40 = vor.u32 %v6813_v20, %v5917_v55  ;;  %v6942_v55 = vld [vmem:[%s7603_s8 + $0xb4] sm:$0xf] }
 0x257   : > { %2884 = vmatmul.bf16.gmra.mxu1 %v8120_v62 }
 0x258   : > { %3053 = vmatmul.bf16.gmra.mxu2 %v8122_v56  ;;  %9798 = vst [vmem:[#allocation36_spill] sm:$0xff] %v8148_v40 }
 0x259   : > { %3222 = vmatmul.bf16.gmra.mxu3 %v8124_v42  ;;  %v8142_v42 = vor.u32 %v6815_v46, %v5907_v45  ;;  %v6619_v45 = vld [vmem:[%s7603_s8 + $0x230] sm:$0xf] }
 0x25b   : > { %v3014_v24 = vpop.f32.mrf.mxu2  ;;  %v2678_v35 = vpop.f32.mrf.mxu0 }
 0x25c   : > { %v3015_v23 = vadd.f32 %v3014_v24, %v2846_v59  ;;  %v3183_v43 = vpop.f32.mrf.mxu3  ;;  %v2847_v7 = vpop.f32.mrf.mxu1 }
 0x25d   : > { %v2848_v44 = vadd.f32 %v2847_v7, %v2678_v35  ;;  %v8146_v35 = vor.u32 %v6816_v36, %v5915_v11 }
 0x25e   : > { %v8132_v18 = vadd.f32 %v3183_v43, %v3015_v23  ;;  %v8144_v43 = vor.u32 %v6812_v27, %v5909_v34  ;;  %v6991_v27 = vld [vmem:[%s7603_s8 + $0x234] sm:$0xf0]  ;;  %v6429_v34 = vld [vmem:[%s7603_s8 + $0xb8] sm:$0xf0] }
 0x25f   : > { %9797 = vst [vmem:[#allocation35_spill] sm:$0xff] %v8146_v35  ;;  %v6620_v36 = vor.u32 %v6991_v27, %v6619_v45  ;;  %v6432_v20 = vor.u32 %v6942_v55, %v6429_v34  ;;  %v5931_v27 = vld [vmem:[%s7605_s9 + $0x2d0] sm:$0xf]  ;;  %v6821_v55 = vld [vmem:[%s7605_s9 + $0x2e4] sm:$0xf0] }
 0x260   : > { %v6818_v34 = vld [vmem:[%s7605_s9 + $0x2d4] sm:$0xf]  ;;  %v8174_v54 = vor.u32 %v6821_v55, %v5931_v27 }
 0x261   : > { %3322 = vmatpush.bf16.msrb.mxu0 %v6620_v36  ;;  %3829 = vmatpush.bf16.msrb.mxu3 %v6432_v20 }
 0x262   : > { %9799 = vst [vmem:[#allocation37_spill] sm:$0xff] %v8174_v54 }
 0x263   : > { %v3016_v56 = vpop.f32.mrf.mxu2  ;;  %v2681_v23 = vpop.f32.mrf.mxu0 }
 0x264   : > { %v3017_v59 = vadd.f32 %v3016_v56, %v2848_v44  ;;  %v3185_v24 = vpop.f32.mrf.mxu3  ;;  %v2850_v7 = vpop.f32.mrf.mxu1  ;;  %v6926_v56 = vld [vmem:[%s7603_s8 + $0x34] sm:$0xf]  ;;  %v6365_v44 = vld [vmem:[%s7603_s8 + $0x38] sm:$0xf0] }
 0x265   : > { %v2851_v16 = vadd.f32 %v2850_v7, %v2681_v23  ;;  %v6368_v46 = vor.u32 %v6926_v56, %v6365_v44 }
 0x266   : > { %v8150_v39 = vadd.f32 %v3185_v24, %v3017_v59  ;;  %2720 = vmatmul.bf16.gmra.mxu0 %v8142_v42 }
 0x267   : > { %2889 = vmatmul.bf16.gmra.mxu1 %v8144_v43  ;;  %3660 = vmatpush.bf16.msrb.mxu2 %v6368_v46  ;;  %v5941_v46 = vld [vmem:[%s7605_s9 + $0x2f0] sm:$0xf0] }
 0x268   : > { %3058 = vmatmul.bf16.gmra.mxu2 %v8146_v35  ;;  %v7007_v35 = vld [vmem:[%s7603_s8 + $0x2b4] sm:$0xf0] }
 0x269   : > { %3227 = vmatmul.bf16.gmra.mxu3 %v8148_v40  ;;  %v6683_v40 = vld [vmem:[%s7603_s8 + $0x2b0] sm:$0xf] }
 0x26a   : > { %v6684_v45 = vor.u32 %v7007_v35, %v6683_v40  ;;  %v8180_v35 = vor.u32 %v6819_v4, %v5941_v46  ;;  %v6824_v46 = vld [vmem:[%s7605_s9 + $0x304] sm:$0xf] }
 0x26b   : > { %v3019_v11 = vpop.f32.mrf.mxu2  ;;  %v2683_v23 = vpop.f32.mrf.mxu0 }
 0x26c   : > { %v3020_v59 = vadd.f32 %v3019_v11, %v2851_v16  ;;  %v3188_v24 = vpop.f32.mrf.mxu3  ;;  %v2852_v7 = vpop.f32.mrf.mxu1  ;;  %v5933_v16 = vld [vmem:[%s7605_s9 + $0x2e8] sm:$0xf0]  ;;  %v5939_v11 = vld [vmem:[%s7605_s9 + $0x2d8] sm:$0xf]  ;;  %3491 = vmatpush.bf16.msrb.mxu1 %v6684_v45  ;;  %9802 = vst [vmem:[#allocation40_spill] sm:$0xff] %v8180_v35 }
 0x26d   : > { %v2853_v44 = vadd.f32 %v2852_v7, %v2683_v23  ;;  %v8178_v23 = vor.u32 %v6822_v15, %v5939_v11  ;;  %v6827_v11 = vld [vmem:[%s7605_s9 + $0x314] sm:$0xf0] }
 0x26e   : > { %v8162_v56 = vadd.f32 %v3188_v24, %v3020_v59  ;;  %v8176_v24 = vor.u32 %v6818_v34, %v5933_v16  ;;  %v5955_v16 = vld [vmem:[%s7605_s9 + $0x300] sm:$0xf] }
 0x26f   : > { %9801 = vst [vmem:[#allocation39_spill] sm:$0xff] %v8178_v23 }
 0x270   : > { %9800 = vst [vmem:[#allocation38_spill] sm:$0xff] %v8176_v24 }
 0x273   : > { %v3021_v3 = vpop.f32.mrf.mxu2  ;;  %v2686_v59 = vpop.f32.mrf.mxu0 }
 0x274   : > { %v3022_v36 = vadd.f32 %v3021_v3, %v2853_v44  ;;  %v3190_v20 = vpop.f32.mrf.mxu3  ;;  %v2855_v40 = vpop.f32.mrf.mxu1 }
 0x275   : > { %v2856_v45 = vadd.f32 %v2855_v40, %v2686_v59  ;;  %v6828_v59 = vld [vmem:[%s7605_s9 + $0x31c] sm:$0xf0]  ;;  %v6825_v40 = vld [vmem:[%s7605_s9 + $0x30c] sm:$0xf] }
 0x276   : > { %v8182_v7 = vadd.f32 %v3190_v20, %v3022_v36  ;;  %2725 = vmatmul.bf16.gmra.mxu0 %v8174_v54  ;;  %v5957_v36 = vld [vmem:[%s7605_s9 + $0x318] sm:$0xf0]  ;;  %v5963_v20 = vld [vmem:[%s7605_s9 + $0x308] sm:$0xf] }
 0x277   : > { %2894 = vmatmul.bf16.gmra.mxu1 %v8176_v24  ;;  %v8198_v24 = vor.u32 %v6827_v11, %v5955_v16 }
 0x278   : > { %9803 = vst [vmem:[#allocation41_spill] sm:$0xff] %v8182_v7  ;;  %3063 = vmatmul.bf16.gmra.mxu2 %v8178_v23  ;;  %v8202_v7 = vor.u32 %v6828_v59, %v5963_v20  ;;  %v6830_v20 = vld [vmem:[%s7605_s9 + $0x334] sm:$0xf]  ;;  %v5981_v59 = vld [vmem:[%s7605_s9 + $0x348] sm:$0xf0] }
 0x279   : > { %3232 = vmatmul.bf16.gmra.mxu3 %v8180_v35  ;;  %9805 = vst [vmem:[#allocation43_spill] sm:$0xff] %v8198_v24 }
 0x27a   : > { %9807 = vst [vmem:[#allocation45_spill] sm:$0xff] %v8202_v7 }
 0x27b   : > { %v3024_v3 = vpop.f32.mrf.mxu2  ;;  %v2688_v44 = vpop.f32.mrf.mxu0 }
 0x27c   : > { %v3025_v4 = vadd.f32 %v3024_v3, %v2856_v45  ;;  %v3193_v15 = vpop.f32.mrf.mxu3  ;;  %v2857_v27 = vpop.f32.mrf.mxu1  ;;  %v8200_v3 = vor.u32 %v6824_v46, %v5957_v36  ;;  %v5979_v46 = vld [vmem:[%s7605_s9 + $0x330] sm:$0xf]  ;;  %v6833_v36 = vld [vmem:[%s7605_s9 + $0x344] sm:$0xf0] }
 0x27d   : > { %v2858_v34 = vadd.f32 %v2857_v27, %v2688_v44 }
 0x27e   : > { %v8188_v55 = vadd.f32 %v3193_v15, %v3025_v4  ;;  %9806 = vst [vmem:[#allocation44_spill] sm:$0xff] %v8200_v3  ;;  %v8204_v15 = vor.u32 %v6825_v40, %v5965_v53  ;;  %v5987_v40 = vld [vmem:[%s7605_s9 + $0x338] sm:$0xf] }
 0x280   : > { %9804 = vst [vmem:[#allocation42_spill] sm:$0xff] %v8188_v55 }
 0x281   : > { %9808 = vst [vmem:[#allocation46_spill] sm:$0xff] %v8204_v15 }
 0x283   : > { %v3026_v23 = vpop.f32.mrf.mxu2  ;;  %v2691_v45 = vpop.f32.mrf.mxu0 }
 0x284   : > { %v3027_v35 = vadd.f32 %v3026_v23, %v2858_v34  ;;  %v3195_v54 = vpop.f32.mrf.mxu3  ;;  %v2860_v4 = vpop.f32.mrf.mxu1 }
 0x285   : > { %v2861_v27 = vadd.f32 %v2860_v4, %v2691_v45  ;;  %v6834_v45 = vld [vmem:[%s7605_s9 + $0x34c] sm:$0xf0]  ;;  %v6831_v4 = vld [vmem:[%s7605_s9 + $0x33c] sm:$0xf] }
 0x286   : > { %v8206_v44 = vadd.f32 %v3195_v54, %v3027_v35  ;;  %2730 = vmatmul.bf16.gmra.mxu0 %v8198_v24  ;;  %v8222_v24 = vor.u32 %v6833_v36, %v5979_v46  ;;  %v8226_v55 = vor.u32 %v6834_v45, %v5987_v40  ;;  %v6836_v40 = vld [vmem:[%s7605_s9 + $0x364] sm:$0xf]  ;;  %v6005_v45 = vld [vmem:[%s7605_s9 + $0x378] sm:$0xf0] }
 0x287   : > { %2899 = vmatmul.bf16.gmra.mxu1 %v8200_v3  ;;  %v5989_v3 = vld [vmem:[%s7605_s9 + $0x350] sm:$0xf0] }
 0x288   : > { %9809 = vst [vmem:[#allocation47_spill] sm:$0xff] %v8206_v44  ;;  %3068 = vmatmul.bf16.gmra.mxu2 %v8202_v7 }
 0x289   : > { %3237 = vmatmul.bf16.gmra.mxu3 %v8204_v15  ;;  %9811 = vst [vmem:[#allocation49_spill] sm:$0xff] %v8222_v24 }
 0x28a   : > { %9813 = vst [vmem:[#allocation51_spill] sm:$0xff] %v8226_v55 }
 0x28b   : > { %v3029_v23 = vpop.f32.mrf.mxu2  ;;  %v2693_v16 = vpop.f32.mrf.mxu0 }
 0x28c   : > { %v3030_v53 = vadd.f32 %v3029_v23, %v2861_v27  ;;  %v3198_v34 = vpop.f32.mrf.mxu3  ;;  %v2862_v54 = vpop.f32.mrf.mxu1  ;;  %v8224_v23 = vor.u32 %v6830_v20, %v5981_v59  ;;  %v6003_v20 = vld [vmem:[%s7605_s9 + $0x360] sm:$0xf]  ;;  %v6839_v59 = vld [vmem:[%s7605_s9 + $0x374] sm:$0xf0] }
 0x28d   : > { %v2863_v11 = vadd.f32 %v2862_v54, %v2693_v16 }
 0x28e   : > { %v8212_v35 = vadd.f32 %v3198_v34, %v3030_v53  ;;  %9812 = vst [vmem:[#allocation50_spill] sm:$0xff] %v8224_v23  ;;  %v8228_v34 = vor.u32 %v6831_v4, %v5989_v3  ;;  %v6011_v4 = vld [vmem:[%s7605_s9 + $0x368] sm:$0xf] }
 0x290   : > { %9810 = vst [vmem:[#allocation48_spill] sm:$0xff] %v8212_v35 }
 0x291   : > { %9814 = vst [vmem:[#allocation52_spill] sm:$0xff] %v8228_v34 }
 0x293   : > { %v3031_v7 = vpop.f32.mrf.mxu2  ;;  %v2696_v27 = vpop.f32.mrf.mxu0 }
 0x294   : > { %v3032_v15 = vadd.f32 %v3031_v7, %v2863_v11  ;;  %v3200_v44 = vpop.f32.mrf.mxu3  ;;  %v2865_v53 = vpop.f32.mrf.mxu1 }
 0x295   : > { %v2866_v54 = vadd.f32 %v2865_v53, %v2696_v27  ;;  %v6840_v27 = vld [vmem:[%s7605_s9 + $0x37c] sm:$0xf0]  ;;  %v6837_v53 = vld [vmem:[%s7605_s9 + $0x36c] sm:$0xf] }
 0x296   : > { %v8230_v16 = vadd.f32 %v3200_v44, %v3032_v15  ;;  %2735 = vmatmul.bf16.gmra.mxu0 %v8222_v24 }
 0x297   : > { %2904 = vmatmul.bf16.gmra.mxu1 %v8224_v23  ;;  %v6013_v23 = vld [vmem:[%s7605_s9 + $0x380] sm:$0xf0] }
 0x298   : > { %9815 = vst [vmem:[#allocation53_spill] sm:$0xff] %v8230_v16  ;;  %3073 = vmatmul.bf16.gmra.mxu2 %v8226_v55  ;;  %v8252_v24 = vor.u32 %v6837_v53, %v6013_v23  ;;  %v6940_v23 = vld [vmem:[%s7603_s8 + $0xa4] sm:$0xf] }
 0x299   : > { %3242 = vmatmul.bf16.gmra.mxu3 %v8228_v34  ;;  %v8246_v34 = vor.u32 %v6839_v59, %v6003_v20  ;;  %v6611_v20 = vld [vmem:[%s7603_s8 + $0x220] sm:$0xf] }
 0x29a   : > { %9820 = vst [vmem:[#allocation58_spill] sm:$0xff] %v8252_v24 }
 0x29b   : > { %v3034_v7 = vpop.f32.mrf.mxu2  ;;  %v2698_v46 = vpop.f32.mrf.mxu0  ;;  %9817 = vst [vmem:[#allocation55_spill] sm:$0xff] %v8246_v34 }
 0x29c   : > { %v3035_v3 = vadd.f32 %v3034_v7, %v2866_v54  ;;  %v3203_v11 = vpop.f32.mrf.mxu3  ;;  %v2867_v15 = vpop.f32.mrf.mxu1 }
 0x29d   : > { %v2868_v36 = vadd.f32 %v2867_v15, %v2698_v46  ;;  %v8250_v46 = vor.u32 %v6840_v27, %v6011_v4 }
 0x29e   : > { %v8236_v44 = vadd.f32 %v3203_v11, %v3035_v3  ;;  %v8248_v11 = vor.u32 %v6836_v40, %v6005_v45  ;;  %v6989_v40 = vld [vmem:[%s7603_s8 + $0x224] sm:$0xf0]  ;;  %v6421_v45 = vld [vmem:[%s7603_s8 + $0xa8] sm:$0xf0] }
 0x29f   : > { %9819 = vst [vmem:[#allocation57_spill] sm:$0xff] %v8250_v46  ;;  %v6612_v27 = vor.u32 %v6989_v40, %v6611_v20  ;;  %v6424_v53 = vor.u32 %v6940_v23, %v6421_v45  ;;  %v6027_v40 = vld [vmem:[%s7605_s9 + $0x390] sm:$0xf]  ;;  %v6845_v23 = vld [vmem:[%s7605_s9 + $0x3a4] sm:$0xf0] }
 0x2a0   : > { %9816 = vst [vmem:[#allocation54_spill] sm:$0xff] %v8236_v44  ;;  %v6842_v45 = vld [vmem:[%s7605_s9 + $0x394] sm:$0xf]  ;;  %v8278_v35 = vor.u32 %v6845_v23, %v6027_v40 }
 0x2a1   : > { %9818 = vst [vmem:[#allocation56_spill] sm:$0xff] %v8248_v11  ;;  %3323 = vmatpush.bf16.msrb.mxu0 %v6612_v27  ;;  %3830 = vmatpush.bf16.msrb.mxu3 %v6424_v53 }
 0x2a2   : > { %9823 = vst [vmem:[#allocation61_spill] sm:$0xff] %v8278_v35 }
 0x2a3   : > { %v3036_v55 = vpop.f32.mrf.mxu2  ;;  %v2701_v3 = vpop.f32.mrf.mxu0 }
 0x2a4   : > { %v3037_v54 = vadd.f32 %v3036_v55, %v2868_v36  ;;  %v3205_v7 = vpop.f32.mrf.mxu3  ;;  %v2870_v15 = vpop.f32.mrf.mxu1  ;;  %v6924_v55 = vld [vmem:[%s7603_s8 + $0x24] sm:$0xf]  ;;  %v6357_v36 = vld [vmem:[%s7603_s8 + $0x28] sm:$0xf0] }
 0x2a5   : > { %v2871_v16 = vadd.f32 %v2870_v15, %v2701_v3  ;;  %v6360_v59 = vor.u32 %v6924_v55, %v6357_v36 }
 0x2a6   : > { %v8254_v44 = vadd.f32 %v3205_v7, %v3037_v54  ;;  %2740 = vmatmul.bf16.gmra.mxu0 %v8246_v34  ;;  %v6843_v34 = vld [vmem:[%s7605_s9 + $0x39c] sm:$0xf] }
 0x2a7   : > { %2909 = vmatmul.bf16.gmra.mxu1 %v8248_v11  ;;  %3661 = vmatpush.bf16.msrb.mxu2 %v6360_v59  ;;  %v6846_v11 = vld [vmem:[%s7605_s9 + $0x3ac] sm:$0xf0]  ;;  %v6037_v59 = vld [vmem:[%s7605_s9 + $0x3b0] sm:$0xf0] }
 0x2a8   : > { %9821 = vst [vmem:[#allocation59_spill] sm:$0xff] %v8254_v44  ;;  %3078 = vmatmul.bf16.gmra.mxu2 %v8250_v46  ;;  %v7005_v46 = vld [vmem:[%s7603_s8 + $0x2a4] sm:$0xf0] }
 0x2a9   : > { %3247 = vmatmul.bf16.gmra.mxu3 %v8252_v24  ;;  %v6675_v24 = vld [vmem:[%s7603_s8 + $0x2a0] sm:$0xf] }
 0x2aa   : > { %v6676_v20 = vor.u32 %v7005_v46, %v6675_v24  ;;  %v8284_v46 = vor.u32 %v6843_v34, %v6037_v59  ;;  %v6848_v59 = vld [vmem:[%s7605_s9 + $0x3c4] sm:$0xf] }
 0x2ab   : > { %v3039_v4 = vpop.f32.mrf.mxu2  ;;  %v2703_v3 = vpop.f32.mrf.mxu0 }
 0x2ac   : > { %v3040_v54 = vadd.f32 %v3039_v4, %v2871_v16  ;;  %v3208_v7 = vpop.f32.mrf.mxu3  ;;  %v2872_v15 = vpop.f32.mrf.mxu1  ;;  %v6029_v16 = vld [vmem:[%s7605_s9 + $0x3a8] sm:$0xf0]  ;;  %v6035_v4 = vld [vmem:[%s7605_s9 + $0x398] sm:$0xf]  ;;  %3492 = vmatpush.bf16.msrb.mxu1 %v6676_v20  ;;  %9826 = vst [vmem:[#allocation64_spill] sm:$0xff] %v8284_v46 }
 0x2ad   : > { %v2873_v36 = vadd.f32 %v2872_v15, %v2703_v3  ;;  %v8282_v3 = vor.u32 %v6846_v11, %v6035_v4  ;;  %v6851_v4 = vld [vmem:[%s7605_s9 + $0x3d4] sm:$0xf0] }
 0x2ae   : > { %v8266_v55 = vadd.f32 %v3208_v7, %v3040_v54  ;;  %v8280_v7 = vor.u32 %v6842_v45, %v6029_v16  ;;  %v6051_v16 = vld [vmem:[%s7605_s9 + $0x3c0] sm:$0xf] }
 0x2af   : > { %9825 = vst [vmem:[#allocation63_spill] sm:$0xff] %v8282_v3 }
 0x2b0   : > { %9822 = vst [vmem:[#allocation60_spill] sm:$0xff] %v8266_v55 }
 0x2b1   : > { %9824 = vst [vmem:[#allocation62_spill] sm:$0xff] %v8280_v7 }
 0x2b3   : > { %v3041_v44 = vpop.f32.mrf.mxu2  ;;  %v2706_v54 = vpop.f32.mrf.mxu0 }
 0x2b4   : > { %v3042_v27 = vadd.f32 %v3041_v44, %v2873_v36  ;;  %v3210_v53 = vpop.f32.mrf.mxu3  ;;  %v2875_v24 = vpop.f32.mrf.mxu1 }
 0x2b5   : > { %v2876_v20 = vadd.f32 %v2875_v24, %v2706_v54  ;;  %v6852_v54 = vld [vmem:[%s7605_s9 + $0x3dc] sm:$0xf0]  ;;  %v6849_v24 = vld [vmem:[%s7605_s9 + $0x3cc] sm:$0xf] }
 0x2b6   : > { %v8286_v15 = vadd.f32 %v3210_v53, %v3042_v27  ;;  %2745 = vmatmul.bf16.gmra.mxu0 %v8278_v35  ;;  %v6053_v27 = vld [vmem:[%s7605_s9 + $0x3d8] sm:$0xf0]  ;;  %v6059_v53 = vld [vmem:[%s7605_s9 + $0x3c8] sm:$0xf]  ;;  %v8302_v35 = vor.u32 %v6851_v4, %v6051_v16 }
 0x2b7   : > { %2914 = vmatmul.bf16.gmra.mxu1 %v8280_v7  ;;  %v6061_v7 = vld [vmem:[%s7605_s9 + $0x3e0] sm:$0xf0]  ;;  %v8306_v55 = vor.u32 %v6852_v54, %v6059_v53  ;;  %v6854_v53 = vld [vmem:[%s7605_s9 + $0x3f4] sm:$0xf]  ;;  %v6077_v54 = vld [vmem:[%s7605_s9 + $0x408] sm:$0xf0] }
 0x2b8   : > { %9827 = vst [vmem:[#allocation65_spill] sm:$0xff] %v8286_v15  ;;  %3083 = vmatmul.bf16.gmra.mxu2 %v8282_v3 }
 0x2b9   : > { %3252 = vmatmul.bf16.gmra.mxu3 %v8284_v46  ;;  %9829 = vst [vmem:[#allocation67_spill] sm:$0xff] %v8302_v35 }
 0x2ba   : > { %9831 = vst [vmem:[#allocation69_spill] sm:$0xff] %v8306_v55 }
 0x2bb   : > { %v3044_v44 = vpop.f32.mrf.mxu2  ;;  %v2708_v36 = vpop.f32.mrf.mxu0 }
 0x2bc   : > { %v3045_v34 = vadd.f32 %v3044_v44, %v2876_v20  ;;  %v3213_v11 = vpop.f32.mrf.mxu3  ;;  %v2877_v40 = vpop.f32.mrf.mxu1  ;;  %v8304_v44 = vor.u32 %v6848_v59, %v6053_v27  ;;  %v6075_v59 = vld [vmem:[%s7605_s9 + $0x3f0] sm:$0xf]  ;;  %v6857_v27 = vld [vmem:[%s7605_s9 + $0x404] sm:$0xf0] }
 0x2bd   : > { %v2878_v45 = vadd.f32 %v2877_v40, %v2708_v36 }
 0x2be   : > { %v8292_v23 = vadd.f32 %v3213_v11, %v3045_v34  ;;  %9830 = vst [vmem:[#allocation68_spill] sm:$0xff] %v8304_v44  ;;  %v8308_v11 = vor.u32 %v6849_v24, %v6061_v7  ;;  %v6083_v24 = vld [vmem:[%s7605_s9 + $0x3f8] sm:$0xf] }
 0x2c0   : > { %9828 = vst [vmem:[#allocation66_spill] sm:$0xff] %v8292_v23 }
 0x2c1   : > { %9832 = vst [vmem:[#allocation70_spill] sm:$0xff] %v8308_v11 }
 0x2c3   : > { %v3046_v3 = vpop.f32.mrf.mxu2  ;;  %v2711_v20 = vpop.f32.mrf.mxu0 }
 0x2c4   : > { %v3047_v46 = vadd.f32 %v3046_v3, %v2878_v45  ;;  %v3215_v15 = vpop.f32.mrf.mxu3  ;;  %v2880_v34 = vpop.f32.mrf.mxu1 }
 0x2c5   : > { %v2881_v40 = vadd.f32 %v2880_v34, %v2711_v20  ;;  %v6858_v20 = vld [vmem:[%s7605_s9 + $0x40c] sm:$0xf0]  ;;  %v6855_v34 = vld [vmem:[%s7605_s9 + $0x3fc] sm:$0xf] }
 0x2c6   : > { %v8310_v36 = vadd.f32 %v3215_v15, %v3047_v46  ;;  %2750 = vmatmul.bf16.gmra.mxu0 %v8302_v35  ;;  %v8326_v35 = vor.u32 %v6857_v27, %v6075_v59  ;;  %v8330_v23 = vor.u32 %v6858_v20, %v6083_v24  ;;  %v6860_v24 = vld [vmem:[%s7605_s9 + $0x424] sm:$0xf]  ;;  %v6101_v20 = vld [vmem:[%s7605_s9 + $0x438] sm:$0xf0] }
 0x2c7   : > { %2919 = vmatmul.bf16.gmra.mxu1 %v8304_v44  ;;  %v6085_v44 = vld [vmem:[%s7605_s9 + $0x410] sm:$0xf0] }
 0x2c8   : > { %9833 = vst [vmem:[#allocation71_spill] sm:$0xff] %v8310_v36  ;;  %3088 = vmatmul.bf16.gmra.mxu2 %v8306_v55 }
 0x2c9   : > { %3257 = vmatmul.bf16.gmra.mxu3 %v8308_v11  ;;  %9835 = vst [vmem:[#allocation73_spill] sm:$0xff] %v8326_v35 }
 0x2ca   : > { %9837 = vst [vmem:[#allocation75_spill] sm:$0xff] %v8330_v23 }
 0x2cb   : > { %v3049_v3 = vpop.f32.mrf.mxu2  ;;  %v2713_v16 = vpop.f32.mrf.mxu0 }
 0x2cc   : > { %v3050_v7 = vadd.f32 %v3049_v3, %v2881_v40  ;;  %v3218_v45 = vpop.f32.mrf.mxu3  ;;  %v2882_v46 = vpop.f32.mrf.mxu1  ;;  %v8328_v3 = vor.u32 %v6854_v53, %v6077_v54  ;;  %v6099_v53 = vld [vmem:[%s7605_s9 + $0x420] sm:$0xf]  ;;  %v6863_v54 = vld [vmem:[%s7605_s9 + $0x434] sm:$0xf0] }
 0x2cd   : > { %v2883_v4 = vadd.f32 %v2882_v46, %v2713_v16 }
 0x2ce   : > { %v8316_v15 = vadd.f32 %v3218_v45, %v3050_v7  ;;  %9836 = vst [vmem:[#allocation74_spill] sm:$0xff] %v8328_v3  ;;  %v8332_v45 = vor.u32 %v6855_v34, %v6085_v44  ;;  %v6107_v34 = vld [vmem:[%s7605_s9 + $0x428] sm:$0xf] }
 0x2d0   : > { %9834 = vst [vmem:[#allocation72_spill] sm:$0xff] %v8316_v15 }
 0x2d1   : > { %9838 = vst [vmem:[#allocation76_spill] sm:$0xff] %v8332_v45 }
 0x2d3   : > { %v3051_v55 = vpop.f32.mrf.mxu2  ;;  %v2716_v40 = vpop.f32.mrf.mxu0 }
 0x2d4   : > { %v3052_v11 = vadd.f32 %v3051_v55, %v2883_v4  ;;  %v3220_v36 = vpop.f32.mrf.mxu3  ;;  %v2885_v7 = vpop.f32.mrf.mxu1 }
 0x2d5   : > { %v2886_v46 = vadd.f32 %v2885_v7, %v2716_v40  ;;  %v6864_v40 = vld [vmem:[%s7605_s9 + $0x43c] sm:$0xf0]  ;;  %v6861_v7 = vld [vmem:[%s7605_s9 + $0x42c] sm:$0xf] }
 0x2d6   : > { %v8334_v16 = vadd.f32 %v3220_v36, %v3052_v11  ;;  %2755 = vmatmul.bf16.gmra.mxu0 %v8326_v35 }
 0x2d7   : > { %2924 = vmatmul.bf16.gmra.mxu1 %v8328_v3  ;;  %v6109_v3 = vld [vmem:[%s7605_s9 + $0x440] sm:$0xf0] }
 0x2d8   : > { %9839 = vst [vmem:[#allocation77_spill] sm:$0xff] %v8334_v16  ;;  %3093 = vmatmul.bf16.gmra.mxu2 %v8330_v23  ;;  %v8356_v35 = vor.u32 %v6861_v7, %v6109_v3  ;;  %v6938_v3 = vld [vmem:[%s7603_s8 + $0x94] sm:$0xf] }
 0x2d9   : > { %3262 = vmatmul.bf16.gmra.mxu3 %v8332_v45  ;;  %v8350_v45 = vor.u32 %v6863_v54, %v6099_v53  ;;  %v6603_v53 = vld [vmem:[%s7603_s8 + $0x210] sm:$0xf] }
 0x2da   : > { %9844 = vst [vmem:[#allocation82_spill] sm:$0xff] %v8356_v35 }
 0x2db   : > { %v3054_v55 = vpop.f32.mrf.mxu2  ;;  %v2718_v59 = vpop.f32.mrf.mxu0  ;;  %9841 = vst [vmem:[#allocation79_spill] sm:$0xff] %v8350_v45 }
 0x2dc   : > { %v3055_v44 = vadd.f32 %v3054_v55, %v2886_v46  ;;  %v3223_v4 = vpop.f32.mrf.mxu3  ;;  %v2887_v11 = vpop.f32.mrf.mxu1 }
 0x2dd   : > { %v2888_v27 = vadd.f32 %v2887_v11, %v2718_v59  ;;  %v8354_v59 = vor.u32 %v6864_v40, %v6107_v34 }
 0x2de   : > { %v8340_v36 = vadd.f32 %v3223_v4, %v3055_v44  ;;  %v8352_v4 = vor.u32 %v6860_v24, %v6101_v20  ;;  %v6987_v24 = vld [vmem:[%s7603_s8 + $0x214] sm:$0xf0]  ;;  %v6413_v20 = vld [vmem:[%s7603_s8 + $0x98] sm:$0xf0] }
 0x2df   : > { %9843 = vst [vmem:[#allocation81_spill] sm:$0xff] %v8354_v59  ;;  %v6604_v40 = vor.u32 %v6987_v24, %v6603_v53  ;;  %v6416_v7 = vor.u32 %v6938_v3, %v6413_v20  ;;  %v6123_v24 = vld [vmem:[%s7605_s9 + $0x450] sm:$0xf]  ;;  %v6869_v3 = vld [vmem:[%s7605_s9 + $0x464] sm:$0xf0] }
 0x2e0   : > { %9840 = vst [vmem:[#allocation78_spill] sm:$0xff] %v8340_v36  ;;  %v6866_v20 = vld [vmem:[%s7605_s9 + $0x454] sm:$0xf]  ;;  %v8382_v15 = vor.u32 %v6869_v3, %v6123_v24 }
 0x2e1   : > { %9842 = vst [vmem:[#allocation80_spill] sm:$0xff] %v8352_v4  ;;  %3324 = vmatpush.bf16.msrb.mxu0 %v6604_v40  ;;  %3831 = vmatpush.bf16.msrb.mxu3 %v6416_v7 }
 0x2e2   : > { %9847 = vst [vmem:[#allocation85_spill] sm:$0xff] %v8382_v15 }
 0x2e3   : > { %v3056_v23 = vpop.f32.mrf.mxu2  ;;  %v2721_v44 = vpop.f32.mrf.mxu0 }
 0x2e4   : > { %v3057_v46 = vadd.f32 %v3056_v23, %v2888_v27  ;;  %v3225_v55 = vpop.f32.mrf.mxu3  ;;  %v2890_v11 = vpop.f32.mrf.mxu1  ;;  %v6922_v23 = vld [vmem:[%s7603_s8 + $0x14] sm:$0xf]  ;;  %v6349_v27 = vld [vmem:[%s7603_s8 + $0x18] sm:$0xf0] }
 0x2e5   : > { %v2891_v16 = vadd.f32 %v2890_v11, %v2721_v44  ;;  %v6352_v54 = vor.u32 %v6922_v23, %v6349_v27 }
 0x2e6   : > { %v8358_v36 = vadd.f32 %v3225_v55, %v3057_v46  ;;  %2760 = vmatmul.bf16.gmra.mxu0 %v8350_v45  ;;  %v6867_v45 = vld [vmem:[%s7605_s9 + $0x45c] sm:$0xf] }
 0x2e7   : > { %2929 = vmatmul.bf16.gmra.mxu1 %v8352_v4  ;;  %3662 = vmatpush.bf16.msrb.mxu2 %v6352_v54  ;;  %v6870_v4 = vld [vmem:[%s7605_s9 + $0x46c] sm:$0xf0]  ;;  %v6133_v54 = vld [vmem:[%s7605_s9 + $0x470] sm:$0xf0] }
 0x2e8   : > { %9845 = vst [vmem:[#allocation83_spill] sm:$0xff] %v8358_v36  ;;  %3098 = vmatmul.bf16.gmra.mxu2 %v8354_v59  ;;  %v7003_v59 = vld [vmem:[%s7603_s8 + $0x294] sm:$0xf0] }
 0x2e9   : > { %3267 = vmatmul.bf16.gmra.mxu3 %v8356_v35  ;;  %v6667_v35 = vld [vmem:[%s7603_s8 + $0x290] sm:$0xf] }
 0x2ea   : > { %v6668_v53 = vor.u32 %v7003_v59, %v6667_v35  ;;  %v8388_v59 = vor.u32 %v6867_v45, %v6133_v54  ;;  %v6872_v54 = vld [vmem:[%s7605_s9 + $0x484] sm:$0xf] }
 0x2eb   : > { %v3059_v34 = vpop.f32.mrf.mxu2  ;;  %v2723_v44 = vpop.f32.mrf.mxu0 }
 0x2ec   : > { %v3060_v46 = vadd.f32 %v3059_v34, %v2891_v16  ;;  %v3228_v55 = vpop.f32.mrf.mxu3  ;;  %v2892_v11 = vpop.f32.mrf.mxu1  ;;  %v6125_v16 = vld [vmem:[%s7605_s9 + $0x468] sm:$0xf0]  ;;  %v6131_v34 = vld [vmem:[%s7605_s9 + $0x458] sm:$0xf]  ;;  %3493 = vmatpush.bf16.msrb.mxu1 %v6668_v53  ;;  %9850 = vst [vmem:[#allocation88_spill] sm:$0xff] %v8388_v59 }
 0x2ed   : > { %v2893_v27 = vadd.f32 %v2892_v11, %v2723_v44  ;;  %v8386_v44 = vor.u32 %v6870_v4, %v6131_v34  ;;  %v6875_v34 = vld [vmem:[%s7605_s9 + $0x494] sm:$0xf0] }
 0x2ee   : > { %v8370_v23 = vadd.f32 %v3228_v55, %v3060_v46  ;;  %v8384_v55 = vor.u32 %v6866_v20, %v6125_v16  ;;  %v6147_v16 = vld [vmem:[%s7605_s9 + $0x480] sm:$0xf] }
 0x2ef   : > { %9849 = vst [vmem:[#allocation87_spill] sm:$0xff] %v8386_v44 }
 0x2f0   : > { %9846 = vst [vmem:[#allocation84_spill] sm:$0xff] %v8370_v23 }
 0x2f1   : > { %9848 = vst [vmem:[#allocation86_spill] sm:$0xff] %v8384_v55 }
 0x2f3   : > { %v3061_v36 = vpop.f32.mrf.mxu2  ;;  %v2726_v46 = vpop.f32.mrf.mxu0 }
 0x2f4   : > { %v3062_v40 = vadd.f32 %v3061_v36, %v2893_v27  ;;  %v3230_v7 = vpop.f32.mrf.mxu3  ;;  %v2895_v35 = vpop.f32.mrf.mxu1 }
 0x2f5   : > { %v2896_v53 = vadd.f32 %v2895_v35, %v2726_v46  ;;  %v6876_v46 = vld [vmem:[%s7605_s9 + $0x49c] sm:$0xf0]  ;;  %v6873_v35 = vld [vmem:[%s7605_s9 + $0x48c] sm:$0xf] }
 0x2f6   : > { %v8390_v11 = vadd.f32 %v3230_v7, %v3062_v40  ;;  %2765 = vmatmul.bf16.gmra.mxu0 %v8382_v15  ;;  %v6149_v40 = vld [vmem:[%s7605_s9 + $0x498] sm:$0xf0]  ;;  %v6155_v7 = vld [vmem:[%s7605_s9 + $0x488] sm:$0xf]  ;;  %v8406_v15 = vor.u32 %v6875_v34, %v6147_v16 }
 0x2f7   : > { %2934 = vmatmul.bf16.gmra.mxu1 %v8384_v55  ;;  %v6157_v55 = vld [vmem:[%s7605_s9 + $0x4a0] sm:$0xf0]  ;;  %v8410_v23 = vor.u32 %v6876_v46, %v6155_v7  ;;  %v6878_v7 = vld [vmem:[%s7605_s9 + $0x4b4] sm:$0xf]  ;;  %v6173_v46 = vld [vmem:[%s7605_s9 + $0x4c8] sm:$0xf0] }
 0x2f8   : > { %9851 = vst [vmem:[#allocation89_spill] sm:$0xff] %v8390_v11  ;;  %3103 = vmatmul.bf16.gmra.mxu2 %v8386_v44 }
 0x2f9   : > { %3272 = vmatmul.bf16.gmra.mxu3 %v8388_v59  ;;  %9853 = vst [vmem:[#allocation91_spill] sm:$0xff] %v8406_v15 }
 0x2fa   : > { %9855 = vst [vmem:[#allocation93_spill] sm:$0xff] %v8410_v23 }
 0x2fb   : > { %v3064_v36 = vpop.f32.mrf.mxu2  ;;  %v2728_v27 = vpop.f32.mrf.mxu0 }
 0x2fc   : > { %v3065_v45 = vadd.f32 %v3064_v36, %v2896_v53  ;;  %v3233_v4 = vpop.f32.mrf.mxu3  ;;  %v2897_v24 = vpop.f32.mrf.mxu1  ;;  %v8408_v36 = vor.u32 %v6872_v54, %v6149_v40  ;;  %v6171_v54 = vld [vmem:[%s7605_s9 + $0x4b0] sm:$0xf]  ;;  %v6881_v40 = vld [vmem:[%s7605_s9 + $0x4c4] sm:$0xf0] }
 0x2fd   : > { %v2898_v20 = vadd.f32 %v2897_v24, %v2728_v27 }
 0x2fe   : > { %v8396_v3 = vadd.f32 %v3233_v4, %v3065_v45  ;;  %9854 = vst [vmem:[#allocation92_spill] sm:$0xff] %v8408_v36  ;;  %v8412_v4 = vor.u32 %v6873_v35, %v6157_v55  ;;  %v6179_v35 = vld [vmem:[%s7605_s9 + $0x4b8] sm:$0xf] }
 0x300   : > { %9852 = vst [vmem:[#allocation90_spill] sm:$0xff] %v8396_v3 }
 0x301   : > { %9856 = vst [vmem:[#allocation94_spill] sm:$0xff] %v8412_v4 }
 0x303   : > { %v3066_v44 = vpop.f32.mrf.mxu2  ;;  %v2731_v53 = vpop.f32.mrf.mxu0 }
 0x304   : > { %v3067_v59 = vadd.f32 %v3066_v44, %v2898_v20  ;;  %v3235_v11 = vpop.f32.mrf.mxu3  ;;  %v2900_v45 = vpop.f32.mrf.mxu1 }
 0x305   : > { %v2901_v24 = vadd.f32 %v2900_v45, %v2731_v53  ;;  %v6882_v53 = vld [vmem:[%s7605_s9 + $0x4cc] sm:$0xf0]  ;;  %v6879_v45 = vld [vmem:[%s7605_s9 + $0x4bc] sm:$0xf] }
 0x306   : > { %v8414_v27 = vadd.f32 %v3235_v11, %v3067_v59  ;;  %2770 = vmatmul.bf16.gmra.mxu0 %v8406_v15  ;;  %v8430_v15 = vor.u32 %v6881_v40, %v6171_v54  ;;  %v8434_v3 = vor.u32 %v6882_v53, %v6179_v35  ;;  %v6884_v35 = vld [vmem:[%s7605_s9 + $0x4e4] sm:$0xf]  ;;  %v6197_v53 = vld [vmem:[%s7605_s9 + $0x4f8] sm:$0xf0] }
 0x307   : > { %2939 = vmatmul.bf16.gmra.mxu1 %v8408_v36  ;;  %v6181_v36 = vld [vmem:[%s7605_s9 + $0x4d0] sm:$0xf0] }
 0x308   : > { %9857 = vst [vmem:[#allocation95_spill] sm:$0xff] %v8414_v27  ;;  %3108 = vmatmul.bf16.gmra.mxu2 %v8410_v23 }
 0x309   : > { %3277 = vmatmul.bf16.gmra.mxu3 %v8412_v4  ;;  %9859 = vst [vmem:[#allocation97_spill] sm:$0xff] %v8430_v15 }
 0x30a   : > { %9861 = vst [vmem:[#allocation99_spill] sm:$0xff] %v8434_v3 }
 0x30b   : > { %v3069_v44 = vpop.f32.mrf.mxu2  ;;  %v2733_v16 = vpop.f32.mrf.mxu0 }
 0x30c   : > { %v3070_v55 = vadd.f32 %v3069_v44, %v2901_v24  ;;  %v3238_v20 = vpop.f32.mrf.mxu3  ;;  %v2902_v59 = vpop.f32.mrf.mxu1  ;;  %v8432_v44 = vor.u32 %v6878_v7, %v6173_v46  ;;  %v6195_v7 = vld [vmem:[%s7605_s9 + $0x4e0] sm:$0xf]  ;;  %v6887_v46 = vld [vmem:[%s7605_s9 + $0x4f4] sm:$0xf0] }
 0x30d   : > { %v2903_v34 = vadd.f32 %v2902_v59, %v2733_v16 }
 0x30e   : > { %v8420_v11 = vadd.f32 %v3238_v20, %v3070_v55  ;;  %9860 = vst [vmem:[#allocation98_spill] sm:$0xff] %v8432_v44  ;;  %v8436_v20 = vor.u32 %v6879_v45, %v6181_v36  ;;  %v6203_v45 = vld [vmem:[%s7605_s9 + $0x4e8] sm:$0xf] }
 0x310   : > { %9858 = vst [vmem:[#allocation96_spill] sm:$0xff] %v8420_v11 }
 0x311   : > { %9862 = vst [vmem:[#allocation100_spill] sm:$0xff] %v8436_v20 }
 0x313   : > { %v3071_v23 = vpop.f32.mrf.mxu2  ;;  %v2736_v24 = vpop.f32.mrf.mxu0 }
 0x314   : > { %v3072_v4 = vadd.f32 %v3071_v23, %v2903_v34  ;;  %v3240_v27 = vpop.f32.mrf.mxu3  ;;  %v2905_v55 = vpop.f32.mrf.mxu1 }
 0x315   : > { %v2906_v59 = vadd.f32 %v2905_v55, %v2736_v24  ;;  %v6888_v24 = vld [vmem:[%s7605_s9 + $0x4fc] sm:$0xf0]  ;;  %v6885_v55 = vld [vmem:[%s7605_s9 + $0x4ec] sm:$0xf] }
 0x316   : > { %v8438_v16 = vadd.f32 %v3240_v27, %v3072_v4  ;;  %2775 = vmatmul.bf16.gmra.mxu0 %v8430_v15 }
 0x317   : > { %2944 = vmatmul.bf16.gmra.mxu1 %v8432_v44  ;;  %v6205_v44 = vld [vmem:[%s7605_s9 + $0x500] sm:$0xf0] }
 0x318   : > { %9863 = vst [vmem:[#allocation101_spill] sm:$0xff] %v8438_v16  ;;  %3113 = vmatmul.bf16.gmra.mxu2 %v8434_v3  ;;  %v8460_v15 = vor.u32 %v6885_v55, %v6205_v44  ;;  %v6936_v44 = vld [vmem:[%s7603_s8 + $0x84] sm:$0xf] }
 0x319   : > { %3282 = vmatmul.bf16.gmra.mxu3 %v8436_v20  ;;  %v8454_v20 = vor.u32 %v6887_v46, %v6195_v7  ;;  %v6595_v7 = vld [vmem:[%s7603_s8 + $0x200] sm:$0xf] }
 0x31a   : > { %9868 = vst [vmem:[#allocation106_spill] sm:$0xff] %v8460_v15 }
 0x31b   : > { %v3074_v23 = vpop.f32.mrf.mxu2  ;;  %v2738_v54 = vpop.f32.mrf.mxu0  ;;  %9865 = vst [vmem:[#allocation103_spill] sm:$0xff] %v8454_v20 }
 0x31c   : > { %v3075_v36 = vadd.f32 %v3074_v23, %v2906_v59  ;;  %v3243_v34 = vpop.f32.mrf.mxu3  ;;  %v2907_v4 = vpop.f32.mrf.mxu1 }
 0x31d   : > { %v2908_v40 = vadd.f32 %v2907_v4, %v2738_v54  ;;  %v8458_v54 = vor.u32 %v6888_v24, %v6203_v45 }
 0x31e   : > { %v8444_v27 = vadd.f32 %v3243_v34, %v3075_v36  ;;  %v8456_v34 = vor.u32 %v6884_v35, %v6197_v53  ;;  %v6985_v35 = vld [vmem:[%s7603_s8 + $0x204] sm:$0xf0]  ;;  %v6405_v53 = vld [vmem:[%s7603_s8 + $0x88] sm:$0xf0] }
 0x31f   : > { %9867 = vst [vmem:[#allocation105_spill] sm:$0xff] %v8458_v54  ;;  %v6596_v24 = vor.u32 %v6985_v35, %v6595_v7  ;;  %v6408_v55 = vor.u32 %v6936_v44, %v6405_v53  ;;  %v6219_v35 = vld [vmem:[%s7605_s9 + $0x510] sm:$0xf]  ;;  %v6893_v44 = vld [vmem:[%s7605_s9 + $0x524] sm:$0xf0] }
 0x320   : > { %9864 = vst [vmem:[#allocation102_spill] sm:$0xff] %v8444_v27  ;;  %v6890_v53 = vld [vmem:[%s7605_s9 + $0x514] sm:$0xf]  ;;  %v8486_v11 = vor.u32 %v6893_v44, %v6219_v35 }
 0x321   : > { %9866 = vst [vmem:[#allocation104_spill] sm:$0xff] %v8456_v34  ;;  %3325 = vmatpush.bf16.msrb.mxu0 %v6596_v24  ;;  %3832 = vmatpush.bf16.msrb.mxu3 %v6408_v55 }
 0x322   : > { %9871 = vst [vmem:[#allocation109_spill] sm:$0xff] %v8486_v11 }
 0x323   : > { %v3076_v3 = vpop.f32.mrf.mxu2  ;;  %v2741_v36 = vpop.f32.mrf.mxu0 }
 0x324   : > { %v3077_v59 = vadd.f32 %v3076_v3, %v2908_v40  ;;  %v3245_v23 = vpop.f32.mrf.mxu3  ;;  %v2910_v4 = vpop.f32.mrf.mxu1  ;;  %v6920_v3 = vld [vmem:[%s7603_s8 + $0x4] sm:$0xf]  ;;  %v6341_v40 = vld [vmem:[%s7603_s8 + $0x8] sm:$0xf0] }
 0x325   : > { %v2911_v16 = vadd.f32 %v2910_v4, %v2741_v36  ;;  %v6344_v46 = vor.u32 %v6920_v3, %v6341_v40 }
 0x326   : > { %v8462_v27 = vadd.f32 %v3245_v23, %v3077_v59  ;;  %2780 = vmatmul.bf16.gmra.mxu0 %v8454_v20  ;;  %v6891_v20 = vld [vmem:[%s7605_s9 + $0x51c] sm:$0xf] }
 0x327   : > { %2949 = vmatmul.bf16.gmra.mxu1 %v8456_v34  ;;  %3663 = vmatpush.bf16.msrb.mxu2 %v6344_v46  ;;  %v6894_v34 = vld [vmem:[%s7605_s9 + $0x52c] sm:$0xf0]  ;;  %v6229_v46 = vld [vmem:[%s7605_s9 + $0x530] sm:$0xf0] }
 0x328   : > { %9869 = vst [vmem:[#allocation107_spill] sm:$0xff] %v8462_v27  ;;  %3118 = vmatmul.bf16.gmra.mxu2 %v8458_v54  ;;  %v7001_v54 = vld [vmem:[%s7603_s8 + $0x284] sm:$0xf0] }
 0x329   : > { %3287 = vmatmul.bf16.gmra.mxu3 %v8460_v15  ;;  %v6659_v15 = vld [vmem:[%s7603_s8 + $0x280] sm:$0xf] }
 0x32a   : > { %v6660_v7 = vor.u32 %v7001_v54, %v6659_v15  ;;  %v8492_v54 = vor.u32 %v6891_v20, %v6229_v46  ;;  %v6896_v46 = vld [vmem:[%s7605_s9 + $0x544] sm:$0xf] }
 0x32b   : > { %v3079_v45 = vpop.f32.mrf.mxu2  ;;  %v2743_v36 = vpop.f32.mrf.mxu0 }
 0x32c   : > { %v3080_v59 = vadd.f32 %v3079_v45, %v2911_v16  ;;  %v3248_v23 = vpop.f32.mrf.mxu3  ;;  %v2912_v4 = vpop.f32.mrf.mxu1  ;;  %v6221_v16 = vld [vmem:[%s7605_s9 + $0x528] sm:$0xf0]  ;;  %v6227_v45 = vld [vmem:[%s7605_s9 + $0x518] sm:$0xf]  ;;  %3494 = vmatpush.bf16.msrb.mxu1 %v6660_v7  ;;  %9874 = vst [vmem:[#allocation112_spill] sm:$0xff] %v8492_v54 }
 0x32d   : > { %v2913_v40 = vadd.f32 %v2912_v4, %v2743_v36  ;;  %v8490_v36 = vor.u32 %v6894_v34, %v6227_v45  ;;  %v6899_v45 = vld [vmem:[%s7605_s9 + $0x554] sm:$0xf0] }
 0x32e   : > { %v8474_v3 = vadd.f32 %v3248_v23, %v3080_v59  ;;  %v8488_v23 = vor.u32 %v6890_v53, %v6221_v16  ;;  %v6243_v16 = vld [vmem:[%s7605_s9 + $0x540] sm:$0xf] }
 0x32f   : > { %9873 = vst [vmem:[#allocation111_spill] sm:$0xff] %v8490_v36 }
 0x330   : > { %9870 = vst [vmem:[#allocation108_spill] sm:$0xff] %v8474_v3 }
 0x331   : > { %9872 = vst [vmem:[#allocation110_spill] sm:$0xff] %v8488_v23 }
 0x333   : > { %v3081_v27 = vpop.f32.mrf.mxu2  ;;  %v2746_v59 = vpop.f32.mrf.mxu0 }
 0x334   : > { %v3082_v24 = vadd.f32 %v3081_v27, %v2913_v40  ;;  %v3250_v55 = vpop.f32.mrf.mxu3  ;;  %v2915_v15 = vpop.f32.mrf.mxu1 }
 0x335   : > { %v2916_v7 = vadd.f32 %v2915_v15, %v2746_v59  ;;  %v6900_v59 = vld [vmem:[%s7605_s9 + $0x55c] sm:$0xf0]  ;;  %v6897_v15 = vld [vmem:[%s7605_s9 + $0x54c] sm:$0xf] }
 0x336   : > { %v8494_v4 = vadd.f32 %v3250_v55, %v3082_v24  ;;  %2785 = vmatmul.bf16.gmra.mxu0 %v8486_v11  ;;  %v6245_v24 = vld [vmem:[%s7605_s9 + $0x558] sm:$0xf0]  ;;  %v6251_v55 = vld [vmem:[%s7605_s9 + $0x548] sm:$0xf]  ;;  %v8510_v11 = vor.u32 %v6899_v45, %v6243_v16 }
 0x337   : > { %2954 = vmatmul.bf16.gmra.mxu1 %v8488_v23  ;;  %v6253_v23 = vld [vmem:[%s7605_s9 + $0x560] sm:$0xf0]  ;;  %v8514_v3 = vor.u32 %v6900_v59, %v6251_v55  ;;  %v6902_v55 = vld [vmem:[%s7605_s9 + $0x574] sm:$0xf]  ;;  %v6269_v59 = vld [vmem:[%s7605_s9 + $0x588] sm:$0xf0] }
 0x338   : > { %9875 = vst [vmem:[#allocation113_spill] sm:$0xff] %v8494_v4  ;;  %3123 = vmatmul.bf16.gmra.mxu2 %v8490_v36 }
 0x339   : > { %3292 = vmatmul.bf16.gmra.mxu3 %v8492_v54  ;;  %9877 = vst [vmem:[#allocation115_spill] sm:$0xff] %v8510_v11 }
 0x33a   : > { %9879 = vst [vmem:[#allocation117_spill] sm:$0xff] %v8514_v3 }
 0x33b   : > { %v3084_v27 = vpop.f32.mrf.mxu2  ;;  %v2748_v40 = vpop.f32.mrf.mxu0 }
 0x33c   : > { %v3085_v20 = vadd.f32 %v3084_v27, %v2916_v7  ;;  %v3253_v34 = vpop.f32.mrf.mxu3  ;;  %v2917_v35 = vpop.f32.mrf.mxu1  ;;  %v8512_v27 = vor.u32 %v6896_v46, %v6245_v24  ;;  %v6267_v46 = vld [vmem:[%s7605_s9 + $0x570] sm:$0xf]  ;;  %v6905_v24 = vld [vmem:[%s7605_s9 + $0x584] sm:$0xf0] }
 0x33d   : > { %v2918_v53 = vadd.f32 %v2917_v35, %v2748_v40 }
 0x33e   : > { %v8500_v44 = vadd.f32 %v3253_v34, %v3085_v20  ;;  %9878 = vst [vmem:[#allocation116_spill] sm:$0xff] %v8512_v27  ;;  %v8516_v34 = vor.u32 %v6897_v15, %v6253_v23  ;;  %v6275_v15 = vld [vmem:[%s7605_s9 + $0x578] sm:$0xf] }
 0x340   : > { %9876 = vst [vmem:[#allocation114_spill] sm:$0xff] %v8500_v44 }
 0x341   : > { %9880 = vst [vmem:[#allocation118_spill] sm:$0xff] %v8516_v34 }
 0x343   : > { %v3086_v36 = vpop.f32.mrf.mxu2  ;;  %v2751_v7 = vpop.f32.mrf.mxu0 }
 0x344   : > { %v3087_v54 = vadd.f32 %v3086_v36, %v2918_v53  ;;  %v3255_v4 = vpop.f32.mrf.mxu3  ;;  %v2920_v20 = vpop.f32.mrf.mxu1 }
 0x345   : > { %v2921_v35 = vadd.f32 %v2920_v20, %v2751_v7  ;;  %v6906_v7 = vld [vmem:[%s7605_s9 + $0x58c] sm:$0xf0]  ;;  %v6903_v20 = vld [vmem:[%s7605_s9 + $0x57c] sm:$0xf] }
 0x346   : > { %v8518_v40 = vadd.f32 %v3255_v4, %v3087_v54  ;;  %2790 = vmatmul.bf16.gmra.mxu0 %v8510_v11  ;;  %v8534_v11 = vor.u32 %v6905_v24, %v6267_v46  ;;  %v8538_v44 = vor.u32 %v6906_v7, %v6275_v15  ;;  %v6908_v15 = vld [vmem:[%s7605_s9 + $0x5a4] sm:$0xf]  ;;  %v6293_v7 = vld [vmem:[%s7605_s9 + $0x5b8] sm:$0xf0] }
 0x347   : > { %2959 = vmatmul.bf16.gmra.mxu1 %v8512_v27  ;;  %v6277_v27 = vld [vmem:[%s7605_s9 + $0x590] sm:$0xf0] }
 0x348   : > { %9881 = vst [vmem:[#allocation119_spill] sm:$0xff] %v8518_v40  ;;  %3128 = vmatmul.bf16.gmra.mxu2 %v8514_v3 }
 0x349   : > { %3297 = vmatmul.bf16.gmra.mxu3 %v8516_v34  ;;  %9883 = vst [vmem:[#allocation121_spill] sm:$0xff] %v8534_v11 }
 0x34a   : > { %9885 = vst [vmem:[#allocation123_spill] sm:$0xff] %v8538_v44 }
 0x34b   : > { %v3089_v36 = vpop.f32.mrf.mxu2  ;;  %v2753_v16 = vpop.f32.mrf.mxu0 }
 0x34c   : > { %v3090_v23 = vadd.f32 %v3089_v36, %v2921_v35  ;;  %v3258_v53 = vpop.f32.mrf.mxu3  ;;  %v2922_v54 = vpop.f32.mrf.mxu1  ;;  %v8536_v36 = vor.u32 %v6902_v55, %v6269_v59  ;;  %v6291_v55 = vld [vmem:[%s7605_s9 + $0x5a0] sm:$0xf]  ;;  %v6911_v59 = vld [vmem:[%s7605_s9 + $0x5b4] sm:$0xf0] }
 0x34d   : > { %v2923_v45 = vadd.f32 %v2922_v54, %v2753_v16 }
 0x34e   : > { %v8524_v4 = vadd.f32 %v3258_v53, %v3090_v23  ;;  %9884 = vst [vmem:[#allocation122_spill] sm:$0xff] %v8536_v36  ;;  %v8540_v53 = vor.u32 %v6903_v20, %v6277_v27  ;;  %v6299_v20 = vld [vmem:[%s7605_s9 + $0x5a8] sm:$0xf] }
 0x350   : > { %9882 = vst [vmem:[#allocation120_spill] sm:$0xff] %v8524_v4 }
 0x351   : > { %9886 = vst [vmem:[#allocation124_spill] sm:$0xff] %v8540_v53 }
 0x353   : > { %v3091_v3 = vpop.f32.mrf.mxu2  ;;  %v2756_v35 = vpop.f32.mrf.mxu0 }
 0x354   : > { %v3092_v34 = vadd.f32 %v3091_v3, %v2923_v45  ;;  %v3260_v40 = vpop.f32.mrf.mxu3  ;;  %v2925_v23 = vpop.f32.mrf.mxu1 }
 0x355   : > { %v2926_v54 = vadd.f32 %v2925_v23, %v2756_v35  ;;  %v6912_v35 = vld [vmem:[%s7605_s9 + $0x5bc] sm:$0xf0]  ;;  %v6909_v23 = vld [vmem:[%s7605_s9 + $0x5ac] sm:$0xf] }
 0x356   : > { %v8542_v16 = vadd.f32 %v3260_v40, %v3092_v34  ;;  %2795 = vmatmul.bf16.gmra.mxu0 %v8534_v11 }
 0x357   : > { %2964 = vmatmul.bf16.gmra.mxu1 %v8536_v36  ;;  %v6301_v36 = vld [vmem:[%s7605_s9 + $0x5c0] sm:$0xf0] }
 0x358   : > { %9887 = vst [vmem:[#allocation125_spill] sm:$0xff] %v8542_v16  ;;  %3133 = vmatmul.bf16.gmra.mxu2 %v8538_v44  ;;  %v8564_v11 = vor.u32 %v6909_v23, %v6301_v36  ;;  %v7014_v36 = vld [vmem:[%s7603_s8 + $0x2f4] sm:$0xf] }
 0x359   : > { %3302 = vmatmul.bf16.gmra.mxu3 %v8540_v53  ;;  %v8558_v53 = vor.u32 %v6911_v59, %v6291_v55  ;;  %v6966_v55 = vld [vmem:[%s7603_s8 + $0x174] sm:$0xf] }
 0x35a   : > { %9892 = vst [vmem:[#allocation130_spill] sm:$0xff] %v8564_v11 }
 0x35b   : > { %v3094_v3 = vpop.f32.mrf.mxu2  ;;  %v2758_v46 = vpop.f32.mrf.mxu0  ;;  %9889 = vst [vmem:[#allocation127_spill] sm:$0xff] %v8558_v53 }
 0x35c   : > { %v3095_v27 = vadd.f32 %v3094_v3, %v2926_v54  ;;  %v3263_v45 = vpop.f32.mrf.mxu3  ;;  %v2927_v34 = vpop.f32.mrf.mxu1 }
 0x35d   : > { %v2928_v24 = vadd.f32 %v2927_v34, %v2758_v46  ;;  %v8562_v46 = vor.u32 %v6912_v35, %v6299_v20 }
 0x35e   : > { %v8548_v40 = vadd.f32 %v3263_v45, %v3095_v27  ;;  %v8560_v45 = vor.u32 %v6908_v15, %v6293_v7  ;;  %v6525_v15 = vld [vmem:[%s7603_s8 + $0x178] sm:$0xf0] }
 0x35f   : > { %9891 = vst [vmem:[#allocation129_spill] sm:$0xff] %v8562_v46  ;;  %v6717_v7 = vld [vmem:[%s7603_s8 + $0x2f8] sm:$0xf0]  ;;  %v6528_v35 = vor.u32 %v6966_v55, %v6525_v15  ;;  %v6315_v15 = vld [vmem:[%s7605_s9 + $0x5d0] sm:$0xf] }
 0x360   : > { %9888 = vst [vmem:[#allocation126_spill] sm:$0xff] %v8548_v40  ;;  %v6720_v23 = vor.u32 %v7014_v36, %v6717_v7  ;;  %v6917_v36 = vld [vmem:[%s7605_s9 + $0x5e4] sm:$0xf0]  ;;  %v6914_v7 = vld [vmem:[%s7605_s9 + $0x5d4] sm:$0xf] }
 0x361   : > { %9890 = vst [vmem:[#allocation128_spill] sm:$0xff] %v8560_v45  ;;  %3994 = vmatpush.bf16.msra.mxu0 %v6528_v35  ;;  %v8590_v4 = vor.u32 %v6917_v36, %v6315_v15 }
 0x362   : > { %4501 = vmatpush.bf16.msra.mxu3 %v6720_v23 }
 0x363   : > { %v3096_v44 = vpop.f32.mrf.mxu2  ;;  %v2761_v27 = vpop.f32.mrf.mxu0 }
 0x364   : > { %v3097_v54 = vadd.f32 %v3096_v44, %v2928_v24  ;;  %v3265_v3 = vpop.f32.mrf.mxu3  ;;  %v2930_v34 = vpop.f32.mrf.mxu1  ;;  %v6998_v44 = vld [vmem:[%s7603_s8 + $0x274] sm:$0xf]  ;;  %v6653_v24 = vld [vmem:[%s7603_s8 + $0x278] sm:$0xf0] }
 0x365   : > { %v2931_v16 = vadd.f32 %v2930_v34, %v2761_v27  ;;  %v6656_v59 = vor.u32 %v6998_v44, %v6653_v24 }
 0x366   : > { %v8566_v40 = vadd.f32 %v3265_v3, %v3097_v54  ;;  %2800 = vmatmul.bf16.gmra.mxu0 %v8558_v53  ;;  %v6915_v53 = vld [vmem:[%s7605_s9 + $0x5dc] sm:$0xf] }
 0x367   : > { %2969 = vmatmul.bf16.gmra.mxu1 %v8560_v45  ;;  %4332 = vmatpush.bf16.msra.mxu2 %v6656_v59  ;;  %v6918_v45 = vld [vmem:[%s7605_s9 + $0x5ec] sm:$0xf0]  ;;  %v6325_v59 = vld [vmem:[%s7605_s9 + $0x5f0] sm:$0xf0] }
 0x368   : > { %9893 = vst [vmem:[#allocation131_spill] sm:$0xff] %v8566_v40  ;;  %3138 = vmatmul.bf16.gmra.mxu2 %v8562_v46  ;;  %v6589_v46 = vld [vmem:[%s7603_s8 + $0x1f8] sm:$0xf0] }
 0x369   : > { %3307 = vmatmul.bf16.gmra.mxu3 %v8564_v11  ;;  %v6982_v11 = vld [vmem:[%s7603_s8 + $0x1f4] sm:$0xf] }
 0x36a   : > { %v6592_v55 = vor.u32 %v6982_v11, %v6589_v46  ;;  %v8596_v46 = vor.u32 %v6915_v53, %v6325_v59  ;;  %v6730_v59 = vld [vmem:[%s7605_s9 + $0x14] sm:$0xf] }
 0x36b   : > { %v3099_v20 = vpop.f32.mrf.mxu2  ;;  %v2763_v27 = vpop.f32.mrf.mxu0 }
 0x36c   : > { %v3100_v54 = vadd.f32 %v3099_v20, %v2931_v16  ;;  %v3268_v3 = vpop.f32.mrf.mxu3  ;;  %v2932_v34 = vpop.f32.mrf.mxu1  ;;  %v6317_v16 = vld [vmem:[%s7605_s9 + $0x5e8] sm:$0xf0]  ;;  %v6323_v20 = vld [vmem:[%s7605_s9 + $0x5d8] sm:$0xf]  ;;  %4163 = vmatpush.bf16.msra.mxu1 %v6592_v55  ;;  %9896 = vst [vmem:[#allocation134_spill] sm:$0xff] %v8596_v46 }
 0x36d   : > { %v2933_v24 = vadd.f32 %v2932_v34, %v2763_v27  ;;  %v8594_v27 = vor.u32 %v6918_v45, %v6323_v20  ;;  %v6733_v20 = vld [vmem:[%s7605_s9 + $0x24] sm:$0xf0] }
 0x36e   : > { %v8578_v44 = vadd.f32 %v3268_v3, %v3100_v54  ;;  %v8592_v3 = vor.u32 %v6914_v7, %v6317_v16  ;;  %v5587_v16 = vld [vmem:[%s7605_s9 + $0x10] sm:$0xf] }
 0x36f   : > { %9895 = vst [vmem:[#allocation133_spill] sm:$0xff] %v8594_v27 }
 0x370   : > { %9894 = vst [vmem:[#allocation132_spill] sm:$0xff] %v8592_v3 }
 0x373   : > { %v3101_v40 = vpop.f32.mrf.mxu2  ;;  %v2766_v54 = vpop.f32.mrf.mxu0 }
 0x374   : > { %v3102_v35 = vadd.f32 %v3101_v40, %v2933_v24  ;;  %v3270_v23 = vpop.f32.mrf.mxu3  ;;  %v2935_v11 = vpop.f32.mrf.mxu1 }
 0x375   : > { %v2936_v55 = vadd.f32 %v2935_v11, %v2766_v54  ;;  %v8610_v54 = vor.u32 %v6733_v20, %v5587_v16 }
 0x376   : > { %v8598_v34 = vadd.f32 %v3270_v23, %v3102_v35  ;;  %2805 = vmatmul.bf16.gmra.mxu0 %v8590_v4  ;;  %v5589_v35 = vld [vmem:[%s7605_s9 + $0x28] sm:$0xf0] }
 0x377   : > { %2974 = vmatmul.bf16.gmra.mxu1 %v8592_v3  ;;  %9897 = vst [vmem:[#allocation135_spill] sm:$0xff] %v8610_v54 }
 0x378   : > { %3143 = vmatmul.bf16.gmra.mxu2 %v8594_v27 }
 0x379   : > { %3312 = vmatmul.bf16.gmra.mxu3 %v8596_v46  ;;  %v8612_v46 = vor.u32 %v6730_v59, %v5589_v35  ;;  %v6739_v35 = vld [vmem:[%s7605_s9 + $0x54] sm:$0xf0] }
 0x37b   : > { %v3104_v40 = vpop.f32.mrf.mxu2  ;;  %v2768_v15 = vpop.f32.mrf.mxu0  ;;  %9898 = vst [vmem:[#allocation136_spill] sm:$0xff] %v8612_v46 }
 0x37c   : > { %v3105_v45 = vadd.f32 %v3104_v40, %v2936_v55  ;;  %v3273_v24 = vpop.f32.mrf.mxu3  ;;  %v2937_v36 = vpop.f32.mrf.mxu1 }
 0x37d   : > { %v2938_v7 = vadd.f32 %v2937_v36, %v2768_v15 }
 0x37e   : > { %v8604_v53 = vadd.f32 %v3273_v24, %v3105_v45 }
 0x383   : > { %v3106_v23 = vpop.f32.mrf.mxu2  ;;  %v2771_v27 = vpop.f32.mrf.mxu0 }
 0x384   : > { %v3107_v11 = vadd.f32 %v3106_v23, %v2938_v7  ;;  %v3275_v3 = vpop.f32.mrf.mxu3  ;;  %v2940_v55 = vpop.f32.mrf.mxu1  ;;  %v6736_v23 = vld [vmem:[%s7605_s9 + $0x44] sm:$0xf] }
 0x385   : > { %v2941_v45 = vadd.f32 %v2940_v55, %v2771_v27  ;;  %v5613_v27 = vld [vmem:[%s7605_s9 + $0x58] sm:$0xf0] }
 0x386   : > { %v8614_v40 = vadd.f32 %v3275_v3, %v3107_v11  ;;  %3326 = vmatmul.bf16.vlgmr.msrb.gmra.mxu0 %v8610_v54  ;;  %v5611_v3 = vld [vmem:[%s7605_s9 + $0x40] sm:$0xf] }
 0x387   : > { %3495 = vmatmul.bf16.vlgmr.msrb.gmra.mxu1 %v8612_v46  ;;  %v8626_v55 = vor.u32 %v6739_v35, %v5611_v3 }
 0x388   : > { %3664 = vmatmul.bf16.vlgmr.msrb.gmra.mxu2 %v7814_v48 }
 0x389   : > { %3833 = vmatmul.bf16.vlgmr.msrb.gmra.mxu3 %v7818_v52  ;;  %9899 = vst [vmem:[#allocation137_spill] sm:$0xff] %v8626_v55  ;;  %v8628_v52 = vor.u32 %v6736_v23, %v5613_v27  ;;  %v6742_v27 = vld [vmem:[%s7605_s9 + $0x74] sm:$0xf] }
 0x38b   : > { %v3109_v24 = vpop.f32.mrf.mxu2  ;;  %v2773_v7 = vpop.f32.mrf.mxu0  ;;  %9900 = vst [vmem:[#allocation138_spill] sm:$0xff] %v8628_v52 }
 0x38c   : > { %v3110_v15 = vadd.f32 %v3109_v24, %v2941_v45  ;;  %v3278_v36 = vpop.f32.mrf.mxu3  ;;  %v2942_v16 = vpop.f32.mrf.mxu1 }
 0x38d   : > { %v2943_v59 = vadd.f32 %v2942_v16, %v2773_v7 }
 0x38e   : > { %v8620_v20 = vadd.f32 %v3278_v36, %v3110_v15 }
 0x393   : > { %v3111_v11 = vpop.f32.mrf.mxu2  ;;  %v2776_v48 = vpop.f32.mrf.mxu0 }
 0x394   : > { %v3112_v46 = vadd.f32 %v3111_v11, %v2943_v59  ;;  %v3280_v54 = vpop.f32.mrf.mxu3  ;;  %v2945_v45 = vpop.f32.mrf.mxu1  ;;  %v5637_v11 = vld [vmem:[%s7605_s9 + $0x88] sm:$0xf0] }
 0x395   : > { %v2946_v15 = vadd.f32 %v2945_v45, %v2776_v48 }
 0x396   : > { %v8630_v24 = vadd.f32 %v3280_v54, %v3112_v46  ;;  %3331 = vmatmul.bf16.gmra.mxu0 %v8626_v55  ;;  %v5635_v46 = vld [vmem:[%s7605_s9 + $0x70] sm:$0xf]  ;;  %v6745_v54 = vld [vmem:[%s7605_s9 + $0x84] sm:$0xf0]  ;;  %v5659_v55 = vld [vmem:[%s7605_s9 + $0xa0] sm:$0xf] }
 0x397   : > { %3500 = vmatmul.bf16.gmra.mxu1 %v8628_v52  ;;  %v8642_v45 = vor.u32 %v6745_v54, %v5635_v46  ;;  %v6964_v46 = vld [vmem:[%s7603_s8 + $0x164] sm:$0xf] }
 0x398   : > { %9901 = vst [vmem:[#allocation139_spill] sm:$0xff] %v8630_v24  ;;  %3669 = vmatmul.bf16.gmra.mxu2 %v7836_v1  ;;  %v6748_v24 = vld [vmem:[%s7605_s9 + $0xa4] sm:$0xf] }
 0x399   : > { %3838 = vmatmul.bf16.gmra.mxu3 %v7838_v2  ;;  %9903 = vst [vmem:[#allocation141_spill] sm:$0xff] %v8642_v45 }
 0x39b   : > { %v3114_v36 = vpop.f32.mrf.mxu2  ;;  %v2778_v59 = vpop.f32.mrf.mxu0 }
 0x39c   : > { %v3115_v7 = vadd.f32 %v3114_v36, %v2946_v15  ;;  %v3283_v16 = vpop.f32.mrf.mxu3  ;;  %v2947_v3 = vpop.f32.mrf.mxu1  ;;  %v8644_v36 = vor.u32 %v6742_v27, %v5637_v11  ;;  %v7012_v27 = vld [vmem:[%s7603_s8 + $0x2e4] sm:$0xf]  ;;  %v6709_v11 = vld [vmem:[%s7603_s8 + $0x2e8] sm:$0xf0] }
 0x39d   : > { %v2948_v23 = vadd.f32 %v2947_v3, %v2778_v59  ;;  %v6996_v3 = vld [vmem:[%s7603_s8 + $0x264] sm:$0xf] }
 0x39e   : > { %v8636_v35 = vadd.f32 %v3283_v16, %v3115_v7  ;;  %9904 = vst [vmem:[#allocation142_spill] sm:$0xff] %v8644_v36 }
 0x3a0   : > { %9902 = vst [vmem:[#allocation140_spill] sm:$0xff] %v8636_v35  ;;  %v6751_v35 = vld [vmem:[%s7605_s9 + $0xb4] sm:$0xf0] }
 0x3a3   : > { %v3116_v48 = vpop.f32.mrf.mxu2  ;;  %v2781_v15 = vpop.f32.mrf.mxu0 }
 0x3a4   : > { %v3117_v1 = vadd.f32 %v3116_v48, %v2948_v23  ;;  %v3285_v2 = vpop.f32.mrf.mxu3  ;;  %v2950_v7 = vpop.f32.mrf.mxu1  ;;  %v6645_v23 = vld [vmem:[%s7603_s8 + $0x268] sm:$0xf0] }
 0x3a5   : > { %v2951_v59 = vadd.f32 %v2950_v7, %v2781_v15  ;;  %v6648_v54 = vor.u32 %v6996_v3, %v6645_v23  ;;  %v6517_v48 = vld [vmem:[%s7603_s8 + $0x168] sm:$0xf0]  ;;  %v6712_v15 = vor.u32 %v7012_v27, %v6709_v11  ;;  %v8666_v27 = vor.u32 %v6751_v35, %v5659_v55 }
 0x3a6   : > { %v8646_v16 = vadd.f32 %v3285_v2, %v3117_v1  ;;  %3336 = vmatmul.bf16.gmra.mxu0 %v8642_v45  ;;  %v6520_v2 = vor.u32 %v6964_v46, %v6517_v48  ;;  %v6980_v45 = vld [vmem:[%s7603_s8 + $0x1e4] sm:$0xf]  ;;  %v5661_v46 = vld [vmem:[%s7605_s9 + $0xb8] sm:$0xf0] }
 0x3a7   : > { %3505 = vmatmul.bf16.gmra.mxu1 %v8644_v36  ;;  %4333 = vmatpush.bf16.msra.mxu2 %v6648_v54 }
 0x3a8   : > { %9905 = vst [vmem:[#allocation143_spill] sm:$0xff] %v8646_v16  ;;  %3674 = vmatmul.bf16.gmra.mxu2 %v7856_v13  ;;  %3995 = vmatpush.bf16.msra.mxu0 %v6520_v2  ;;  %v6581_v16 = vld [vmem:[%s7603_s8 + $0x1e8] sm:$0xf0] }
 0x3a9   : > { %3843 = vmatmul.bf16.gmra.mxu3 %v7858_v14  ;;  %v6584_v52 = vor.u32 %v6980_v45, %v6581_v16 }
 0x3aa   : > { %4502 = vmatpush.bf16.msra.mxu3 %v6712_v15 }
 0x3ab   : > { %v3119_v1 = vpop.f32.mrf.mxu2  ;;  %v2783_v36 = vpop.f32.mrf.mxu0  ;;  %4164 = vmatpush.bf16.msra.mxu1 %v6584_v52 }
 0x3ac   : > { %v3120_v7 = vadd.f32 %v3119_v1, %v2951_v59  ;;  %v3288_v13 = vpop.f32.mrf.mxu3  ;;  %v2952_v14 = vpop.f32.mrf.mxu1  ;;  %v8668_v1 = vor.u32 %v6748_v24, %v5661_v46  ;;  %v5685_v46 = vld [vmem:[%s7605_s9 + $0xe8] sm:$0xf0] }
 0x3ad   : > { %v2953_v23 = vadd.f32 %v2952_v14, %v2783_v36  ;;  %v6757_v14 = vld [vmem:[%s7605_s9 + $0xe4] sm:$0xf0] }
 0x3ae   : > { %v8658_v3 = vadd.f32 %v3288_v13, %v3120_v7  ;;  %v5683_v13 = vld [vmem:[%s7605_s9 + $0xd0] sm:$0xf] }
 0x3b3   : > { %v3121_v48 = vpop.f32.mrf.mxu2  ;;  %v2786_v54 = vpop.f32.mrf.mxu0 }
 0x3b4   : > { %v3122_v59 = vadd.f32 %v3121_v48, %v2953_v23  ;;  %v3290_v11 = vpop.f32.mrf.mxu3  ;;  %v2955_v2 = vpop.f32.mrf.mxu1  ;;  %v6754_v23 = vld [vmem:[%s7605_s9 + $0xd4] sm:$0xf] }
 0x3b5   : > { %v2956_v45 = vadd.f32 %v2955_v2, %v2786_v54 }
 0x3b6   : > { %v8670_v36 = vadd.f32 %v3290_v11, %v3122_v59  ;;  %3341 = vmatmul.bf16.gmra.mxu0 %v8666_v27  ;;  %v8682_v59 = vor.u32 %v6757_v14, %v5683_v13 }
 0x3b7   : > { %3510 = vmatmul.bf16.gmra.mxu1 %v8668_v1 }
 0x3b8   : > { %3679 = vmatmul.bf16.gmra.mxu2 %v7884_v37  ;;  %9906 = vst [vmem:[#allocation144_spill] sm:$0xff] %v8682_v59 }
 0x3b9   : > { %3848 = vmatmul.bf16.gmra.mxu3 %v7886_v38  ;;  %v8684_v38 = vor.u32 %v6754_v23, %v5685_v46  ;;  %v5707_v23 = vld [vmem:[%s7605_s9 + $0x100] sm:$0xf]  ;;  %v6763_v46 = vld [vmem:[%s7605_s9 + $0x114] sm:$0xf0] }
 0x3bb   : > { %v3124_v55 = vpop.f32.mrf.mxu2  ;;  %v2788_v24 = vpop.f32.mrf.mxu0  ;;  %9907 = vst [vmem:[#allocation145_spill] sm:$0xff] %v8684_v38 }
 0x3bc   : > { %v3125_v52 = vadd.f32 %v3124_v55, %v2956_v45  ;;  %v3293_v35 = vpop.f32.mrf.mxu3  ;;  %v2957_v16 = vpop.f32.mrf.mxu1 }
 0x3bd   : > { %v2958_v7 = vadd.f32 %v2957_v16, %v2788_v24 }
 0x3be   : > { %v8676_v15 = vadd.f32 %v3293_v35, %v3125_v52 }
 0x3c3   : > { %v3126_v48 = vpop.f32.mrf.mxu2  ;;  %v2791_v37 = vpop.f32.mrf.mxu0 }
 0x3c4   : > { %v3127_v11 = vadd.f32 %v3126_v48, %v2958_v7  ;;  %v3295_v54 = vpop.f32.mrf.mxu3  ;;  %v2960_v2 = vpop.f32.mrf.mxu1  ;;  %v6760_v48 = vld [vmem:[%s7605_s9 + $0x104] sm:$0xf] }
 0x3c5   : > { %v2961_v55 = vadd.f32 %v2960_v2, %v2791_v37  ;;  %v8698_v37 = vor.u32 %v6763_v46, %v5707_v23 }
 0x3c6   : > { %v8686_v45 = vadd.f32 %v3295_v54, %v3127_v11  ;;  %3346 = vmatmul.bf16.gmra.mxu0 %v8682_v59  ;;  %v5709_v11 = vld [vmem:[%s7605_s9 + $0x118] sm:$0xf0] }
 0x3c7   : > { %3515 = vmatmul.bf16.gmra.mxu1 %v8684_v38  ;;  %9909 = vst [vmem:[#allocation147_spill] sm:$0xff] %v8698_v37 }
 0x3c8   : > { %3684 = vmatmul.bf16.gmra.mxu2 %v7904_v50 }
 0x3c9   : > { %3853 = vmatmul.bf16.gmra.mxu3 %v7906_v51  ;;  %v8700_v51 = vor.u32 %v6760_v48, %v5709_v11  ;;  %v6769_v11 = vld [vmem:[%s7605_s9 + $0x144] sm:$0xf0] }
 0x3cb   : > { %v3129_v52 = vpop.f32.mrf.mxu2  ;;  %v2793_v16 = vpop.f32.mrf.mxu0  ;;  %9910 = vst [vmem:[#allocation148_spill] sm:$0xff] %v8700_v51 }
 0x3cc   : > { %v3130_v35 = vadd.f32 %v3129_v52, %v2961_v55  ;;  %v3298_v24 = vpop.f32.mrf.mxu3  ;;  %v2962_v7 = vpop.f32.mrf.mxu1 }
 0x3cd   : > { %v2963_v14 = vadd.f32 %v2962_v7, %v2793_v16 }
 0x3ce   : > { %v8692_v13 = vadd.f32 %v3298_v24, %v3130_v35 }
 0x3d0   : > { %9908 = vst [vmem:[#allocation146_spill] sm:$0xff] %v8692_v13 }
 0x3d3   : > { %v3131_v54 = vpop.f32.mrf.mxu2  ;;  %v2796_v50 = vpop.f32.mrf.mxu0 }
 0x3d4   : > { %v3132_v2 = vadd.f32 %v3131_v54, %v2963_v14  ;;  %v3300_v38 = vpop.f32.mrf.mxu3  ;;  %v2965_v55 = vpop.f32.mrf.mxu1  ;;  %v6766_v54 = vld [vmem:[%s7605_s9 + $0x134] sm:$0xf] }
 0x3d5   : > { %v2966_v35 = vadd.f32 %v2965_v55, %v2796_v50 }
 0x3d6   : > { %v8702_v52 = vadd.f32 %v3300_v38, %v3132_v2  ;;  %3351 = vmatmul.bf16.gmra.mxu0 %v8698_v37  ;;  %v5731_v38 = vld [vmem:[%s7605_s9 + $0x130] sm:$0xf]  ;;  %v5733_v2 = vld [vmem:[%s7605_s9 + $0x148] sm:$0xf0] }
 0x3d7   : > { %3520 = vmatmul.bf16.gmra.mxu1 %v8700_v51  ;;  %v8714_v55 = vor.u32 %v6769_v11, %v5731_v38  ;;  %v6962_v38 = vld [vmem:[%s7603_s8 + $0x154] sm:$0xf] }
 0x3d8   : > { %9911 = vst [vmem:[#allocation149_spill] sm:$0xff] %v8702_v52  ;;  %3689 = vmatmul.bf16.gmra.mxu2 %v7924_v5 }
 0x3d9   : > { %3858 = vmatmul.bf16.gmra.mxu3 %v7926_v6  ;;  %9913 = vst [vmem:[#allocation151_spill] sm:$0xff] %v8714_v55 }
 0x3db   : > { %v3134_v24 = vpop.f32.mrf.mxu2  ;;  %v2798_v14 = vpop.f32.mrf.mxu0 }
 0x3dc   : > { %v3135_v16 = vadd.f32 %v3134_v24, %v2966_v35  ;;  %v3303_v7 = vpop.f32.mrf.mxu3  ;;  %v2967_v23 = vpop.f32.mrf.mxu1  ;;  %v8716_v35 = vor.u32 %v6766_v54, %v5733_v2 }
 0x3dd   : > { %v2968_v48 = vadd.f32 %v2967_v23, %v2798_v14  ;;  %v6994_v23 = vld [vmem:[%s7603_s8 + $0x254] sm:$0xf] }
 0x3de   : > { %v8708_v46 = vadd.f32 %v3303_v7, %v3135_v16  ;;  %9914 = vst [vmem:[#allocation152_spill] sm:$0xff] %v8716_v35 }
 0x3e0   : > { %9912 = vst [vmem:[#allocation150_spill] sm:$0xff] %v8708_v46  ;;  %v5757_v46 = vld [vmem:[%s7605_s9 + $0x178] sm:$0xf0] }
 0x3e3   : > { %v3136_v50 = vpop.f32.mrf.mxu2  ;;  %v2801_v51 = vpop.f32.mrf.mxu0 }
 0x3e4   : > { %v3137_v5 = vadd.f32 %v3136_v50, %v2968_v48  ;;  %v3305_v6 = vpop.f32.mrf.mxu3  ;;  %v2970_v24 = vpop.f32.mrf.mxu1  ;;  %v6637_v48 = vld [vmem:[%s7603_s8 + $0x258] sm:$0xf0] }
 0x3e5   : > { %v2971_v7 = vadd.f32 %v2970_v24, %v2801_v51  ;;  %v6640_v50 = vor.u32 %v6994_v23, %v6637_v48  ;;  %v6509_v51 = vld [vmem:[%s7603_s8 + $0x158] sm:$0xf0]  ;;  %v6775_v23 = vld [vmem:[%s7605_s9 + $0x174] sm:$0xf0]  ;;  %v6772_v48 = vld [vmem:[%s7605_s9 + $0x164] sm:$0xf] }
 0x3e6   : > { %v8718_v16 = vadd.f32 %v3305_v6, %v3137_v5  ;;  %3356 = vmatmul.bf16.gmra.mxu0 %v8714_v55  ;;  %v7010_v5 = vld [vmem:[%s7603_s8 + $0x2d4] sm:$0xf]  ;;  %v6701_v6 = vld [vmem:[%s7603_s8 + $0x2d8] sm:$0xf0]  ;;  %v6512_v24 = vor.u32 %v6962_v38, %v6509_v51 }
 0x3e7   : > { %3525 = vmatmul.bf16.gmra.mxu1 %v8716_v35  ;;  %v6704_v35 = vor.u32 %v7010_v5, %v6701_v6  ;;  %v6573_v55 = vld [vmem:[%s7603_s8 + $0x1d8] sm:$0xf0]  ;;  %4334 = vmatpush.bf16.msra.mxu2 %v6640_v50  ;;  %v8740_v5 = vor.u32 %v6772_v48, %v5757_v46 }
 0x3e8   : > { %9915 = vst [vmem:[#allocation153_spill] sm:$0xff] %v8718_v16  ;;  %3694 = vmatmul.bf16.gmra.mxu2 %v7944_v21  ;;  %3996 = vmatpush.bf16.msra.mxu0 %v6512_v24  ;;  %v6778_v24 = vld [vmem:[%s7605_s9 + $0x194] sm:$0xf] }
 0x3e9   : > { %3863 = vmatmul.bf16.gmra.mxu3 %v7946_v22  ;;  %v6978_v22 = vld [vmem:[%s7603_s8 + $0x1d4] sm:$0xf] }
 0x3ea   : > { %4503 = vmatpush.bf16.msra.mxu3 %v6704_v35 }
 0x3eb   : > { %v3139_v14 = vpop.f32.mrf.mxu2  ;;  %v2803_v2 = vpop.f32.mrf.mxu0 }
 0x3ec   : > { %v3140_v11 = vadd.f32 %v3139_v14, %v2971_v7  ;;  %v3308_v54 = vpop.f32.mrf.mxu3  ;;  %v2972_v21 = vpop.f32.mrf.mxu1  ;;  %v6576_v7 = vor.u32 %v6978_v22, %v6573_v55  ;;  %v5755_v14 = vld [vmem:[%s7605_s9 + $0x160] sm:$0xf]  ;;  %v5781_v22 = vld [vmem:[%s7605_s9 + $0x1a8] sm:$0xf0] }
 0x3ed   : > { %v2973_v37 = vadd.f32 %v2972_v21, %v2803_v2  ;;  %v8738_v59 = vor.u32 %v6775_v23, %v5755_v14  ;;  %v6781_v21 = vld [vmem:[%s7605_s9 + $0x1a4] sm:$0xf0] }
 0x3ee   : > { %v8732_v16 = vadd.f32 %v3308_v54, %v3140_v11  ;;  %4165 = vmatpush.bf16.msra.mxu1 %v6576_v7 }
 0x3f3   : > { %v3141_v52 = vpop.f32.mrf.mxu2  ;;  %v2806_v51 = vpop.f32.mrf.mxu0 }
 0x3f4   : > { %v3142_v13 = vadd.f32 %v3141_v52, %v2973_v37  ;;  %v3310_v38 = vpop.f32.mrf.mxu3  ;;  %v2975_v11 = vpop.f32.mrf.mxu1 }
 0x3f5   : > { %v2976_v35 = vadd.f32 %v2975_v11, %v2806_v51 }
 0x3f6   : > { %v8742_v55 = vadd.f32 %v3310_v38, %v3142_v13  ;;  %3361 = vmatmul.bf16.gmra.mxu0 %v8738_v59  ;;  %v5779_v13 = vld [vmem:[%s7605_s9 + $0x190] sm:$0xf]  ;;  %v8756_v38 = vor.u32 %v6778_v24, %v5781_v22  ;;  %v5803_v22 = vld [vmem:[%s7605_s9 + $0x1c0] sm:$0xf] }
 0x3f7   : > { %3530 = vmatmul.bf16.gmra.mxu1 %v8740_v5  ;;  %v8754_v14 = vor.u32 %v6781_v21, %v5779_v13  ;;  %v788_v21 = vld [vmem:[#allocation2 + $0xd8] sm:$0xff] }
 0x3f8   : > { %3699 = vmatmul.bf16.gmra.mxu2 %v7972_v57 }
 0x3f9   : > { %3868 = vmatmul.bf16.gmra.mxu3 %v7974_v58 }
 0x3fb   : > { %v3144_v37 = vpop.f32.mrf.mxu2  ;;  %v2808_v46 = vpop.f32.mrf.mxu0 }
 0x3fc   : > { %v3145_v52 = vadd.f32 %v3144_v37, %v2976_v35  ;;  %v3313_v54 = vpop.f32.mrf.mxu3  ;;  %v2977_v2 = vpop.f32.mrf.mxu1  ;;  %v786_v35 = vld [vmem:[#allocation2 + $0x2b0] sm:$0xff] }
 0x3fd   : > { %v2978_v6 = vadd.f32 %v2977_v2, %v2808_v46 }
 0x3fe   : > { %v8748_v50 = vadd.f32 %v3313_v54, %v3145_v52 }
 0x403   : > { %v3146_v7 = vpop.f32.mrf.mxu2  ;;  %v3327_v57 = vpop.f32.mrf.mxu0 }
 0x404   : > { %v3147_v23 = vadd.f32 %v3146_v7, %v2978_v6  ;;  %v3315_v48 = vpop.f32.mrf.mxu3  ;;  %v3328_v58 = vadd.f32 %v3327_v57, %v8004_v33  ;;  %v3496_v51 = vpop.f32.mrf.mxu1  ;;  %v6787_v7 = vld [vmem:[%s7605_s9 + $0x1d4] sm:$0xf0] }
 0x406   : > { %v8759_v11 = vadd.f32 %v3315_v48, %v3147_v23  ;;  %v3497_v37 = vadd.f32 %v3496_v51, %v3328_v58  ;;  %3366 = vmatmul.bf16.gmra.mxu0 %v8754_v14  ;;  %v6784_v48 = vld [vmem:[%s7605_s9 + $0x1c4] sm:$0xf]  ;;  %v8772_v58 = vor.u32 %v6787_v7, %v5803_v22  ;;  %v792_v7 = vld [vmem:[#allocation2 + $0x330] sm:$0xff] }
 0x407   : > { %3535 = vmatmul.bf16.gmra.mxu1 %v8756_v38 }
 0x408   : > { %3704 = vmatmul.bf16.gmra.mxu2 %v7992_v17  ;;  %v4670_v52 = vadd.f32 %v3497_v37, %v786_v35  ;;  %v5805_v17 = vld [vmem:[%s7605_s9 + $0x1d8] sm:$0xf0] }
 0x409   : > { %3873 = vmatmul.bf16.gmra.mxu3 %v7994_v19  ;;  %v8774_v35 = vor.u32 %v6784_v48, %v5805_v17  ;;  %v5827_v48 = vld [vmem:[%s7605_s9 + $0x1f0] sm:$0xf]  ;;  %v6793_v17 = vld [vmem:[%s7605_s9 + $0x204] sm:$0xf0] }
 0x40a   : > { %4798 = vst [vmem:[#allocation2 + $0x2b0] sm:$0xff] %v4670_v52 }
 0x40b   : > { %v3665_v33 = vpop.f32.mrf.mxu2  ;;  %v3329_v46 = vpop.f32.mrf.mxu0 }
 0x40c   : > { %v3834_v54 = vpop.f32.mrf.mxu3  ;;  %v3330_v6 = vadd.f32 %v3329_v46, %v8022_v12  ;;  %v3498_v13 = vpop.f32.mrf.mxu1 }
 0x40d   : > { %v8765_v2 = vadd.f32 %v3834_v54, %v3665_v33  ;;  %v790_v33 = vld [vmem:[#allocation2 + $0x50] sm:$0xff] }
 0x40e   : > { %v3499_v24 = vadd.f32 %v3498_v13, %v3330_v6 }
 0x410   : > { %v4672_v23 = vadd.f32 %v3499_v24, %v788_v21 }
 0x412   : > { %4800 = vst [vmem:[#allocation2 + $0xd8] sm:$0xff] %v4672_v23 }
 0x413   : > { %v3667_v57 = vpop.f32.mrf.mxu2  ;;  %v3332_v51 = vpop.f32.mrf.mxu0 }
 0x414   : > { %v3836_v19 = vpop.f32.mrf.mxu3  ;;  %v3333_v12 = vadd.f32 %v3332_v51, %v8028_v31  ;;  %v3501_v52 = vpop.f32.mrf.mxu1 }
 0x415   : > { %v8776_v37 = vadd.f32 %v3836_v19, %v3667_v57  ;;  %v6790_v19 = vld [vmem:[%s7605_s9 + $0x1f4] sm:$0xf] }
 0x416   : > { %v3502_v54 = vadd.f32 %v3501_v52, %v3333_v12  ;;  %3371 = vmatmul.bf16.gmra.mxu0 %v8772_v58  ;;  %v8790_v12 = vor.u32 %v6793_v17, %v5827_v48  ;;  %v6960_v17 = vld [vmem:[%s7603_s8 + $0x144] sm:$0xf] }
 0x417   : > { %3540 = vmatmul.bf16.gmra.mxu1 %v8774_v35 }
 0x418   : > { %3709 = vmatmul.bf16.gmra.mxu2 %v8014_v49  ;;  %v4674_v46 = vadd.f32 %v3502_v54, %v790_v33  ;;  %v5829_v49 = vld [vmem:[%s7605_s9 + $0x208] sm:$0xf0]  ;;  %9916 = vst [vmem:[#allocation154_spill] sm:$0xff] %v8790_v12 }
 0x419   : > { %3878 = vmatmul.bf16.gmra.mxu3 %v8016_v0  ;;  %v8792_v33 = vor.u32 %v6790_v19, %v5829_v49  ;;  %v7008_v19 = vld [vmem:[%s7603_s8 + $0x2c4] sm:$0xf] }
 0x41a   : > { %4802 = vst [vmem:[#allocation2 + $0x50] sm:$0xff] %v4674_v46 }
 0x41b   : > { %v3670_v6 = vpop.f32.mrf.mxu2  ;;  %v3334_v31 = vpop.f32.mrf.mxu0  ;;  %9917 = vst [vmem:[#allocation155_spill] sm:$0xff] %v8792_v33 }
 0x41c   : > { %v3839_v13 = vpop.f32.mrf.mxu3  ;;  %v3335_v24 = vadd.f32 %v3334_v31, %v8046_v28  ;;  %v3503_v22 = vpop.f32.mrf.mxu1 }
 0x41d   : > { %v8783_v21 = vadd.f32 %v3839_v13, %v3670_v6  ;;  %v794_v6 = vld [vmem:[#allocation2 + $0x380] sm:$0xff] }
 0x41e   : > { %v3504_v23 = vadd.f32 %v3503_v22, %v3335_v24  ;;  %v6992_v24 = vld [vmem:[%s7603_s8 + $0x244] sm:$0xf]  ;;  %v6629_v22 = vld [vmem:[%s7603_s8 + $0x248] sm:$0xf0] }
 0x41f   : > { %v6632_v48 = vor.u32 %v6992_v24, %v6629_v22  ;;  %v5851_v24 = vld [vmem:[%s7605_s9 + $0x220] sm:$0xf]  ;;  %v6799_v22 = vld [vmem:[%s7605_s9 + $0x234] sm:$0xf0] }
 0x420   : > { %v4676_v57 = vadd.f32 %v3504_v23, %v792_v7 }
 0x421   : > { %4335 = vmatpush.bf16.msra.mxu2 %v6632_v48 }
 0x422   : > { %4804 = vst [vmem:[#allocation2 + $0x330] sm:$0xff] %v4676_v57  ;;  %v6501_v57 = vld [vmem:[%s7603_s8 + $0x148] sm:$0xf0] }
 0x423   : > { %v3672_v51 = vpop.f32.mrf.mxu2  ;;  %v3337_v52 = vpop.f32.mrf.mxu0 }
 0x424   : > { %v3841_v0 = vpop.f32.mrf.mxu3  ;;  %v3338_v28 = vadd.f32 %v3337_v52, %v8058_v25  ;;  %v3506_v46 = vpop.f32.mrf.mxu1  ;;  %v6976_v52 = vld [vmem:[%s7603_s8 + $0x1c4] sm:$0xf] }
 0x425   : > { %v8794_v54 = vadd.f32 %v3841_v0, %v3672_v51  ;;  %v6693_v0 = vld [vmem:[%s7603_s8 + $0x2c8] sm:$0xf0] }
 0x426   : > { %v3507_v13 = vadd.f32 %v3506_v46, %v3338_v28  ;;  %3376 = vmatmul.bf16.gmra.mxu0 %v8790_v12  ;;  %v6565_v28 = vld [vmem:[%s7603_s8 + $0x1c8] sm:$0xf0]  ;;  %v796_v46 = vld [vmem:[#allocation2 + $0x118] sm:$0xff] }
 0x427   : > { %3545 = vmatmul.bf16.gmra.mxu1 %v8792_v33 }
 0x428   : > { %3714 = vmatmul.bf16.gmra.mxu2 %v8038_v47  ;;  %v4678_v31 = vadd.f32 %v3507_v13, %v794_v6  ;;  %v6696_v6 = vor.u32 %v7008_v19, %v6693_v0  ;;  %v6568_v13 = vor.u32 %v6976_v52, %v6565_v28 }
 0x429   : > { %3883 = vmatmul.bf16.gmra.mxu3 %v8040_v10  ;;  %v6504_v10 = vor.u32 %v6960_v17, %v6501_v57  ;;  %v8816_v17 = vor.u32 %v6799_v22, %v5851_v24  ;;  %v5875_v24 = vld [vmem:[%s7605_s9 + $0x250] sm:$0xf]  ;;  %v6805_v22 = vld [vmem:[%s7605_s9 + $0x264] sm:$0xf0] }
 0x42a   : > { %4806 = vst [vmem:[#allocation2 + $0x380] sm:$0xff] %v4678_v31  ;;  %4504 = vmatpush.bf16.msra.mxu3 %v6696_v6  ;;  %4166 = vmatpush.bf16.msra.mxu1 %v6568_v13  ;;  %v800_v13 = vld [vmem:[#allocation2 + $0x108] sm:$0xff] }
 0x42b   : > { %v3675_v25 = vpop.f32.mrf.mxu2  ;;  %v3339_v23 = vpop.f32.mrf.mxu0  ;;  %3997 = vmatpush.bf16.msra.mxu0 %v6504_v10 }
 0x42c   : > { %v3844_v7 = vpop.f32.mrf.mxu3  ;;  %v3340_v47 = vadd.f32 %v3339_v23, %v8078_v32  ;;  %v3508_v51 = vpop.f32.mrf.mxu1  ;;  %v5853_v32 = vld [vmem:[%s7605_s9 + $0x238] sm:$0xf0] }
 0x42d   : > { %v8806_v49 = vadd.f32 %v3844_v7, %v3675_v25  ;;  %v6796_v7 = vld [vmem:[%s7605_s9 + $0x224] sm:$0xf] }
 0x42e   : > { %v3509_v31 = vadd.f32 %v3508_v51, %v3340_v47  ;;  %v8818_v12 = vor.u32 %v6796_v7, %v5853_v32  ;;  %v798_v51 = vld [vmem:[#allocation2 + $0x320] sm:$0xff]  ;;  %v6802_v7 = vld [vmem:[%s7605_s9 + $0x254] sm:$0xf] }
 0x430   : > { %v4680_v25 = vadd.f32 %v3509_v31, %v796_v46 }
 0x432   : > { %4808 = vst [vmem:[#allocation2 + $0x118] sm:$0xff] %v4680_v25 }
 0x433   : > { %v3677_v23 = vpop.f32.mrf.mxu2  ;;  %v3342_v33 = vpop.f32.mrf.mxu0 }
 0x434   : > { %v3846_v57 = vpop.f32.mrf.mxu3  ;;  %v3343_v19 = vadd.f32 %v3342_v33, %v8084_v41  ;;  %v3511_v47 = vpop.f32.mrf.mxu1 }
 0x435   : > { %v8820_v48 = vadd.f32 %v3846_v57, %v3677_v23  ;;  %v8834_v23 = vor.u32 %v6805_v22, %v5875_v24  ;;  %v5899_v22 = vld [vmem:[%s7605_s9 + $0x280] sm:$0xf] }
 0x436   : > { %v3512_v10 = vadd.f32 %v3511_v47, %v3343_v19  ;;  %3381 = vmatmul.bf16.gmra.mxu0 %v8816_v17 }
 0x437   : > { %3550 = vmatmul.bf16.gmra.mxu1 %v8818_v12 }
 0x438   : > { %3719 = vmatmul.bf16.gmra.mxu2 %v8070_v26  ;;  %v4682_v0 = vadd.f32 %v3512_v10, %v798_v51  ;;  %v5877_v26 = vld [vmem:[%s7605_s9 + $0x268] sm:$0xf0]  ;;  %v802_v10 = vld [vmem:[#allocation2 + $0x2e0] sm:$0xff] }
 0x439   : > { %3888 = vmatmul.bf16.gmra.mxu3 %v8072_v61  ;;  %v8836_v19 = vor.u32 %v6802_v7, %v5877_v26  ;;  %v6808_v26 = vld [vmem:[%s7605_s9 + $0x284] sm:$0xf] }
 0x43a   : > { %4810 = vst [vmem:[#allocation2 + $0x320] sm:$0xff] %v4682_v0 }
 0x43b   : > { %v3680_v52 = vpop.f32.mrf.mxu2  ;;  %v3344_v41 = vpop.f32.mrf.mxu0 }
 0x43c   : > { %v3849_v28 = vpop.f32.mrf.mxu3  ;;  %v3345_v46 = vadd.f32 %v3344_v41, %v8102_v30  ;;  %v3513_v6 = vpop.f32.mrf.mxu1 }
 0x43d   : > { %v8827_v33 = vadd.f32 %v3849_v28, %v3680_v52 }
 0x43e   : > { %v3514_v31 = vadd.f32 %v3513_v6, %v3345_v46 }
 0x440   : > { %v4684_v25 = vadd.f32 %v3514_v31, %v800_v13  ;;  %v804_v31 = vld [vmem:[#allocation2 + $0x338] sm:$0xff] }
 0x442   : > { %4812 = vst [vmem:[#allocation2 + $0x108] sm:$0xff] %v4684_v25  ;;  %v6811_v25 = vld [vmem:[%s7605_s9 + $0x294] sm:$0xf0] }
 0x443   : > { %v3682_v32 = vpop.f32.mrf.mxu2  ;;  %v3347_v57 = vpop.f32.mrf.mxu0 }
 0x444   : > { %v3851_v61 = vpop.f32.mrf.mxu3  ;;  %v3348_v30 = vadd.f32 %v3347_v57, %v8108_v63  ;;  %v3516_v51 = vpop.f32.mrf.mxu1 }
 0x445   : > { %v8838_v47 = vadd.f32 %v3851_v61, %v3682_v32  ;;  %v8852_v61 = vor.u32 %v6811_v25, %v5899_v22  ;;  %v5923_v25 = vld [vmem:[%s7605_s9 + $0x2b0] sm:$0xf] }
 0x446   : > { %v3517_v0 = vadd.f32 %v3516_v51, %v3348_v30  ;;  %3386 = vmatmul.bf16.gmra.mxu0 %v8834_v23 }
 0x447   : > { %3555 = vmatmul.bf16.gmra.mxu1 %v8836_v19 }
 0x448   : > { %3724 = vmatmul.bf16.gmra.mxu2 %v8094_v60  ;;  %v4686_v52 = vadd.f32 %v3517_v0, %v802_v10  ;;  %v5901_v60 = vld [vmem:[%s7605_s9 + $0x298] sm:$0xf0]  ;;  %v806_v0 = vld [vmem:[#allocation2 + $0x80] sm:$0xff] }
 0x449   : > { %3893 = vmatmul.bf16.gmra.mxu3 %v8096_v9  ;;  %v8854_v30 = vor.u32 %v6808_v26, %v5901_v60  ;;  %v6814_v60 = vld [vmem:[%s7605_s9 + $0x2b4] sm:$0xf] }
 0x44a   : > { %4814 = vst [vmem:[#allocation2 + $0x2e0] sm:$0xff] %v4686_v52 }
 0x44b   : > { %v3685_v28 = vpop.f32.mrf.mxu2  ;;  %v3349_v63 = vpop.f32.mrf.mxu0 }
 0x44c   : > { %v3854_v41 = vpop.f32.mrf.mxu3  ;;  %v3350_v6 = vadd.f32 %v3349_v63, %v8126_v29  ;;  %v3518_v13 = vpop.f32.mrf.mxu1 }
 0x44d   : > { %v8845_v46 = vadd.f32 %v3854_v41, %v3685_v28 }
 0x44e   : > { %v3519_v24 = vadd.f32 %v3518_v13, %v3350_v6 }
 0x450   : > { %v4688_v7 = vadd.f32 %v3519_v24, %v804_v31  ;;  %v808_v24 = vld [vmem:[#allocation2 + $0x1b8] sm:$0xff] }
 0x452   : > { %4816 = vst [vmem:[#allocation2 + $0x338] sm:$0xff] %v4688_v7  ;;  %v6817_v7 = vld [vmem:[%s7605_s9 + $0x2c4] sm:$0xf0] }
 0x453   : > { %v3687_v32 = vpop.f32.mrf.mxu2  ;;  %v3352_v57 = vpop.f32.mrf.mxu0 }
 0x454   : > { %v3856_v9 = vpop.f32.mrf.mxu3  ;;  %v3353_v29 = vadd.f32 %v3352_v57, %v8132_v18  ;;  %v3521_v10 = vpop.f32.mrf.mxu1 }
 0x455   : > { %v8856_v51 = vadd.f32 %v3856_v9, %v3687_v32  ;;  %v8870_v9 = vor.u32 %v6817_v7, %v5923_v25  ;;  %v6493_v25 = vld [vmem:[%s7603_s8 + $0x138] sm:$0xf0]  ;;  %v7006_v7 = vld [vmem:[%s7603_s8 + $0x2b4] sm:$0xf] }
 0x456   : > { %v3522_v52 = vadd.f32 %v3521_v10, %v3353_v29  ;;  %3391 = vmatmul.bf16.gmra.mxu0 %v8852_v61 }
 0x457   : > { %3560 = vmatmul.bf16.gmra.mxu1 %v8854_v30 }
 0x458   : > { %3729 = vmatmul.bf16.gmra.mxu2 %v8118_v8  ;;  %v4690_v28 = vadd.f32 %v3522_v52, %v806_v0  ;;  %v5925_v8 = vld [vmem:[%s7605_s9 + $0x2c8] sm:$0xf0] }
 0x459   : > { %3898 = vmatmul.bf16.gmra.mxu3 %v8120_v62  ;;  %v8872_v29 = vor.u32 %v6814_v60, %v5925_v8  ;;  %v810_v52 = vld [vmem:[#allocation2 + $0x3e8] sm:$0xff] }
 0x45a   : > { %4818 = vst [vmem:[#allocation2 + $0x80] sm:$0xff] %v4690_v28 }
 0x45b   : > { %v3690_v41 = vpop.f32.mrf.mxu2  ;;  %v3354_v18 = vpop.f32.mrf.mxu0  ;;  %9918 = vst [vmem:[#allocation156_spill] sm:$0xff] %v8872_v29 }
 0x45c   : > { %v3859_v63 = vpop.f32.mrf.mxu3  ;;  %v3355_v13 = vadd.f32 %v3354_v18, %v8150_v39  ;;  %v3523_v31 = vpop.f32.mrf.mxu1  ;;  %v6621_v18 = vld [vmem:[%s7603_s8 + $0x238] sm:$0xf0] }
 0x45d   : > { %v8863_v6 = vadd.f32 %v3859_v63, %v3690_v41  ;;  %v6990_v63 = vld [vmem:[%s7603_s8 + $0x234] sm:$0xf] }
 0x45e   : > { %v3524_v22 = vadd.f32 %v3523_v31, %v3355_v13 }
 0x460   : > { %v4692_v26 = vadd.f32 %v3524_v22, %v808_v24  ;;  %v6624_v24 = vor.u32 %v6990_v63, %v6621_v18  ;;  %v6958_v22 = vld [vmem:[%s7603_s8 + $0x134] sm:$0xf]  ;;  %v6823_v63 = vld [vmem:[%s7605_s9 + $0x2f4] sm:$0xf0]  ;;  %v6820_v18 = vld [vmem:[%s7605_s9 + $0x2e4] sm:$0xf] }
 0x462   : > { %4820 = vst [vmem:[#allocation2 + $0x1b8] sm:$0xff] %v4692_v26  ;;  %4336 = vmatpush.bf16.msra.mxu2 %v6624_v24 }
 0x463   : > { %v3692_v32 = vpop.f32.mrf.mxu2  ;;  %v3357_v57 = vpop.f32.mrf.mxu0 }
 0x464   : > { %v3861_v62 = vpop.f32.mrf.mxu3  ;;  %v3358_v39 = vadd.f32 %v3357_v57, %v8162_v56  ;;  %v3526_v0 = vpop.f32.mrf.mxu1  ;;  %v6557_v57 = vld [vmem:[%s7603_s8 + $0x1b8] sm:$0xf0] }
 0x465   : > { %v8874_v10 = vadd.f32 %v3861_v62, %v3692_v32  ;;  %v6685_v32 = vld [vmem:[%s7603_s8 + $0x2b8] sm:$0xf0]  ;;  %v6974_v62 = vld [vmem:[%s7603_s8 + $0x1b4] sm:$0xf] }
 0x466   : > { %v3527_v28 = vadd.f32 %v3526_v0, %v3358_v39  ;;  %3396 = vmatmul.bf16.gmra.mxu0 %v8870_v9  ;;  %v812_v39 = vld [vmem:[#allocation2 + $0x290] sm:$0xff]  ;;  %v6688_v0 = vor.u32 %v7006_v7, %v6685_v32  ;;  %v9923_v7 = vld [vmem:[#allocation42_spill] sm:$0xff] }
 0x467   : > { %3565 = vmatmul.bf16.gmra.mxu1 %v8872_v29 }
 0x468   : > { %3734 = vmatmul.bf16.gmra.mxu2 %v8142_v42  ;;  %v4694_v41 = vadd.f32 %v3527_v28, %v810_v52  ;;  %v9919_v42 = vld [vmem:[#allocation41_spill] sm:$0xff]  ;;  %v6560_v52 = vor.u32 %v6974_v62, %v6557_v57  ;;  %4505 = vmatpush.bf16.msra.mxu3 %v6688_v0 }
 0x469   : > { %3903 = vmatmul.bf16.gmra.mxu3 %v8144_v43  ;;  %v6496_v43 = vor.u32 %v6958_v22, %v6493_v25  ;;  %v9924_v62 = vld [vmem:[#allocation37_spill] sm:$0xff] }
 0x46a   : > { %4822 = vst [vmem:[#allocation2 + $0x3e8] sm:$0xff] %v4694_v41  ;;  %v5947_v41 = vld [vmem:[%s7605_s9 + $0x2e0] sm:$0xf]  ;;  %4167 = vmatpush.bf16.msra.mxu1 %v6560_v52 }
 0x46b   : > { %v3695_v56 = vpop.f32.mrf.mxu2  ;;  %v3359_v31 = vpop.f32.mrf.mxu0  ;;  %3998 = vmatpush.bf16.msra.mxu0 %v6496_v43  ;;  %v8896_v22 = vor.u32 %v6823_v63, %v5947_v41  ;;  %v814_v43 = vld [vmem:[#allocation2 + $0x138] sm:$0xff]  ;;  %v9927_v63 = vld [vmem:[#allocation47_spill] sm:$0xff] }
 0x46c   : > { %v3864_v13 = vpop.f32.mrf.mxu3  ;;  %v3360_v60 = vadd.f32 %v3359_v31, %v9919_v42  ;;  %v3528_v8 = vpop.f32.mrf.mxu1 }
 0x46d   : > { %v8886_v26 = vadd.f32 %v3864_v13, %v3695_v56  ;;  %v5949_v13 = vld [vmem:[%s7605_s9 + $0x2f8] sm:$0xf0]  ;;  %9920 = vst [vmem:[#allocation41_spill] sm:$0xff] %v8896_v22 }
 0x46e   : > { %v3529_v28 = vadd.f32 %v3528_v8, %v3360_v60  ;;  %v8898_v29 = vor.u32 %v6820_v18, %v5949_v13  ;;  %v816_v13 = vld [vmem:[#allocation2 + $0x1c0] sm:$0xff] }
 0x470   : > { %v4696_v56 = vadd.f32 %v3529_v28, %v812_v39  ;;  %9921 = vst [vmem:[#allocation157_spill] sm:$0xff] %v8898_v29  ;;  %v9925_v39 = vld [vmem:[#allocation38_spill] sm:$0xff] }
 0x472   : > { %4824 = vst [vmem:[#allocation2 + $0x290] sm:$0xff] %v4696_v56 }
 0x473   : > { %v3697_v31 = vpop.f32.mrf.mxu2  ;;  %v3362_v42 = vpop.f32.mrf.mxu0 }
 0x474   : > { %v3866_v25 = vpop.f32.mrf.mxu3  ;;  %v3363_v60 = vadd.f32 %v3362_v42, %v9923_v7  ;;  %v3531_v8 = vpop.f32.mrf.mxu1  ;;  %v6829_v42 = vld [vmem:[%s7605_s9 + $0x324] sm:$0xf0] }
 0x475   : > { %v8900_v24 = vadd.f32 %v3866_v25, %v3697_v31  ;;  %v5971_v25 = vld [vmem:[%s7605_s9 + $0x310] sm:$0xf] }
 0x476   : > { %v3532_v32 = vadd.f32 %v3531_v8, %v3363_v60  ;;  %3401 = vmatmul.bf16.gmra.mxu0 %v8896_v22  ;;  %v6826_v60 = vld [vmem:[%s7605_s9 + $0x314] sm:$0xf]  ;;  %v5973_v8 = vld [vmem:[%s7605_s9 + $0x328] sm:$0xf0]  ;;  %v6043_v22 = vld [vmem:[%s7605_s9 + $0x3a0] sm:$0xf] }
 0x477   : > { %9922 = vst [vmem:[#allocation158_spill] sm:$0xff] %v8900_v24  ;;  %3570 = vmatmul.bf16.gmra.mxu1 %v8898_v29  ;;  %v818_v29 = vld [vmem:[#allocation2 + $0x100] sm:$0xff] }
 0x478   : > { %3739 = vmatmul.bf16.gmra.mxu2 %v9924_v62  ;;  %v4698_v57 = vadd.f32 %v3532_v32, %v814_v43  ;;  %v8914_v32 = vor.u32 %v6829_v42, %v5971_v25 }
 0x479   : > { %3908 = vmatmul.bf16.gmra.mxu3 %v9925_v39  ;;  %v8916_v39 = vor.u32 %v6826_v60, %v5973_v8  ;;  %v9935_v8 = vld [vmem:[#allocation53_spill] sm:$0xff] }
 0x47a   : > { %4826 = vst [vmem:[#allocation2 + $0x138] sm:$0xff] %v4698_v57 }
 0x47b   : > { %v3700_v0 = vpop.f32.mrf.mxu2  ;;  %v3364_v28 = vpop.f32.mrf.mxu0  ;;  %9928 = vst [vmem:[#allocation37_spill] sm:$0xff] %v8914_v32 }
 0x47c   : > { %v3869_v52 = vpop.f32.mrf.mxu3  ;;  %v3365_v56 = vadd.f32 %v3364_v28, %v9927_v63  ;;  %v3533_v18 = vpop.f32.mrf.mxu1  ;;  %9929 = vst [vmem:[#allocation38_spill] sm:$0xff] %v8916_v39 }
 0x47d   : > { %v8907_v41 = vadd.f32 %v3869_v52, %v3700_v0  ;;  %v9931_v52 = vld [vmem:[#allocation48_spill] sm:$0xff] }
 0x47e   : > { %v3534_v31 = vadd.f32 %v3533_v18, %v3365_v56  ;;  %v9932_v18 = vld [vmem:[#allocation43_spill] sm:$0xff] }
 0x47f   : > { %9926 = vst [vmem:[#allocation42_spill] sm:$0xff] %v8907_v41  ;;  %v6847_v41 = vld [vmem:[%s7605_s9 + $0x3b4] sm:$0xf0] }
 0x480   : > { %v4700_v7 = vadd.f32 %v3534_v31, %v816_v13  ;;  %v9933_v31 = vld [vmem:[#allocation44_spill] sm:$0xff] }
 0x482   : > { %4828 = vst [vmem:[#allocation2 + $0x1c0] sm:$0xff] %v4700_v7 }
 0x483   : > { %v3702_v43 = vpop.f32.mrf.mxu2  ;;  %v3367_v57 = vpop.f32.mrf.mxu0 }
 0x484   : > { %v3871_v62 = vpop.f32.mrf.mxu3  ;;  %v3368_v28 = vadd.f32 %v3367_v57, %v9931_v52  ;;  %v3536_v63 = vpop.f32.mrf.mxu1  ;;  %v820_v57 = vld [vmem:[#allocation2 + $0x158] sm:$0xff] }
 0x485   : > { %v8918_v0 = vadd.f32 %v3871_v62, %v3702_v43 }
 0x486   : > { %v3537_v56 = vadd.f32 %v3536_v63, %v3368_v28  ;;  %3406 = vmatmul.bf16.gmra.mxu0 %v8914_v32  ;;  %v5995_v28 = vld [vmem:[%s7605_s9 + $0x340] sm:$0xf]  ;;  %v6835_v63 = vld [vmem:[%s7605_s9 + $0x354] sm:$0xf0]  ;;  %v6832_v32 = vld [vmem:[%s7605_s9 + $0x344] sm:$0xf] }
 0x487   : > { %9930 = vst [vmem:[#allocation47_spill] sm:$0xff] %v8918_v0  ;;  %3575 = vmatmul.bf16.gmra.mxu1 %v8916_v39 }
 0x488   : > { %3744 = vmatmul.bf16.gmra.mxu2 %v9932_v18  ;;  %v4702_v13 = vadd.f32 %v3537_v56, %v818_v29  ;;  %v5997_v18 = vld [vmem:[%s7605_s9 + $0x358] sm:$0xf0]  ;;  %v8932_v56 = vor.u32 %v6835_v63, %v5995_v28 }
 0x489   : > { %3913 = vmatmul.bf16.gmra.mxu3 %v9933_v31  ;;  %v8934_v0 = vor.u32 %v6832_v32, %v5997_v18  ;;  %v9941_v32 = vld [vmem:[#allocation50_spill] sm:$0xff]  ;;  %v9943_v18 = vld [vmem:[#allocation59_spill] sm:$0xff] }
 0x48a   : > { %4830 = vst [vmem:[#allocation2 + $0x100] sm:$0xff] %v4702_v13 }
 0x48b   : > { %v3705_v25 = vpop.f32.mrf.mxu2  ;;  %v3369_v7 = vpop.f32.mrf.mxu0  ;;  %9936 = vst [vmem:[#allocation43_spill] sm:$0xff] %v8932_v56 }
 0x48c   : > { %v3874_v42 = vpop.f32.mrf.mxu3  ;;  %v3370_v43 = vadd.f32 %v3369_v7, %v9935_v8  ;;  %v3538_v62 = vpop.f32.mrf.mxu1  ;;  %9937 = vst [vmem:[#allocation44_spill] sm:$0xff] %v8934_v0 }
 0x48d   : > { %v8925_v60 = vadd.f32 %v3874_v42, %v3705_v25  ;;  %v9939_v42 = vld [vmem:[#allocation54_spill] sm:$0xff] }
 0x48e   : > { %v3539_v52 = vadd.f32 %v3538_v62, %v3370_v43 }
 0x48f   : > { %9934 = vst [vmem:[#allocation48_spill] sm:$0xff] %v8925_v60  ;;  %v822_v60 = vld [vmem:[#allocation2 + $0x218] sm:$0xff] }
 0x490   : > { %v4704_v39 = vadd.f32 %v3539_v52, %v820_v57 }
 0x492   : > { %4832 = vst [vmem:[#allocation2 + $0x158] sm:$0xff] %v4704_v39  ;;  %v9940_v39 = vld [vmem:[#allocation49_spill] sm:$0xff] }
 0x493   : > { %v3707_v29 = vpop.f32.mrf.mxu2  ;;  %v3372_v31 = vpop.f32.mrf.mxu0 }
 0x494   : > { %v3876_v13 = vpop.f32.mrf.mxu3  ;;  %v3373_v7 = vadd.f32 %v3372_v31, %v9939_v42  ;;  %v3541_v8 = vpop.f32.mrf.mxu1  ;;  %v824_v31 = vld [vmem:[#allocation2 + $0x8] sm:$0xff] }
 0x495   : > { %v8936_v25 = vadd.f32 %v3876_v13, %v3707_v29 }
 0x496   : > { %v3542_v43 = vadd.f32 %v3541_v8, %v3373_v7  ;;  %3411 = vmatmul.bf16.gmra.mxu0 %v8932_v56  ;;  %v6019_v7 = vld [vmem:[%s7605_s9 + $0x370] sm:$0xf]  ;;  %v6841_v8 = vld [vmem:[%s7605_s9 + $0x384] sm:$0xf0]  ;;  %v6838_v56 = vld [vmem:[%s7605_s9 + $0x374] sm:$0xf] }
 0x497   : > { %9938 = vst [vmem:[#allocation53_spill] sm:$0xff] %v8936_v25  ;;  %3580 = vmatmul.bf16.gmra.mxu1 %v8934_v0 }
 0x498   : > { %3749 = vmatmul.bf16.gmra.mxu2 %v9940_v39  ;;  %v4706_v62 = vadd.f32 %v3542_v43, %v822_v60  ;;  %v6021_v39 = vld [vmem:[%s7605_s9 + $0x388] sm:$0xf0]  ;;  %v8950_v43 = vor.u32 %v6841_v8, %v6019_v7  ;;  %v6988_v8 = vld [vmem:[%s7603_s8 + $0x224] sm:$0xf] }
 0x499   : > { %3918 = vmatmul.bf16.gmra.mxu3 %v9941_v32  ;;  %v9949_v7 = vld [vmem:[#allocation56_spill] sm:$0xff] }
 0x49a   : > { %4834 = vst [vmem:[#allocation2 + $0x218] sm:$0xff] %v4706_v62 }
 0x49b   : > { %v3710_v57 = vpop.f32.mrf.mxu2  ;;  %v3374_v28 = vpop.f32.mrf.mxu0  ;;  %9944 = vst [vmem:[#allocation49_spill] sm:$0xff] %v8950_v43 }
 0x49c   : > { %v3879_v52 = vpop.f32.mrf.mxu3  ;;  %v3375_v29 = vadd.f32 %v3374_v28, %v9943_v18  ;;  %v3543_v13 = vpop.f32.mrf.mxu1  ;;  %v9947_v28 = vld [vmem:[#allocation60_spill] sm:$0xff] }
 0x49d   : > { %v8943_v63 = vadd.f32 %v3879_v52, %v3710_v57  ;;  %v8952_v57 = vor.u32 %v6838_v56, %v6021_v39  ;;  %v6613_v39 = vld [vmem:[%s7603_s8 + $0x228] sm:$0xf0] }
 0x49e   : > { %v3544_v42 = vadd.f32 %v3543_v13, %v3375_v29  ;;  %v826_v13 = vld [vmem:[#allocation2 + $0x2a0] sm:$0xff] }
 0x49f   : > { %9942 = vst [vmem:[#allocation54_spill] sm:$0xff] %v8943_v63  ;;  %v828_v63 = vld [vmem:[#allocation2 + $0xa0] sm:$0xff] }
 0x4a0   : > { %v4708_v0 = vadd.f32 %v3544_v42, %v824_v31  ;;  %9945 = vst [vmem:[#allocation50_spill] sm:$0xff] %v8952_v57 }
 0x4a2   : > { %4836 = vst [vmem:[#allocation2 + $0x8] sm:$0xff] %v4708_v0  ;;  %v9948_v0 = vld [vmem:[#allocation55_spill] sm:$0xff] }
 0x4a3   : > { %v3712_v60 = vpop.f32.mrf.mxu2  ;;  %v3377_v32 = vpop.f32.mrf.mxu0 }
 0x4a4   : > { %v3881_v62 = vpop.f32.mrf.mxu3  ;;  %v3378_v18 = vadd.f32 %v3377_v32, %v9947_v28  ;;  %v3546_v29 = vpop.f32.mrf.mxu1  ;;  %v6616_v32 = vor.u32 %v6988_v8, %v6613_v39  ;;  %v6956_v28 = vld [vmem:[%s7603_s8 + $0x124] sm:$0xf] }
 0x4a5   : > { %v8954_v52 = vadd.f32 %v3881_v62, %v3712_v60 }
 0x4a6   : > { %v3547_v31 = vadd.f32 %v3546_v29, %v3378_v18  ;;  %3416 = vmatmul.bf16.gmra.mxu0 %v8950_v43  ;;  %v6485_v18 = vld [vmem:[%s7603_s8 + $0x128] sm:$0xf0]  ;;  %v7004_v29 = vld [vmem:[%s7603_s8 + $0x2a4] sm:$0xf]  ;;  %4337 = vmatpush.bf16.msra.mxu2 %v6616_v32 }
 0x4a7   : > { %9946 = vst [vmem:[#allocation59_spill] sm:$0xff] %v8954_v52  ;;  %3585 = vmatmul.bf16.gmra.mxu1 %v8952_v57  ;;  %v6972_v43 = vld [vmem:[%s7603_s8 + $0x1a4] sm:$0xf]  ;;  %v6549_v52 = vld [vmem:[%s7603_s8 + $0x1a8] sm:$0xf0] }
 0x4a8   : > { %3754 = vmatmul.bf16.gmra.mxu2 %v9948_v0  ;;  %v4710_v42 = vadd.f32 %v3547_v31, %v826_v13  ;;  %v9951_v13 = vld [vmem:[#allocation65_spill] sm:$0xff]  ;;  %v6552_v8 = vor.u32 %v6972_v43, %v6549_v52  ;;  %v9955_v43 = vld [vmem:[#allocation66_spill] sm:$0xff] }
 0x4a9   : > { %3923 = vmatmul.bf16.gmra.mxu3 %v9949_v7  ;;  %v6488_v7 = vor.u32 %v6956_v28, %v6485_v18  ;;  %v8976_v28 = vor.u32 %v6847_v41, %v6043_v22  ;;  %v9957_v41 = vld [vmem:[#allocation62_spill] sm:$0xff] }
 0x4aa   : > { %4838 = vst [vmem:[#allocation2 + $0x2a0] sm:$0xff] %v4710_v42  ;;  %v6677_v42 = vld [vmem:[%s7603_s8 + $0x2a8] sm:$0xf0]  ;;  %4168 = vmatpush.bf16.msra.mxu1 %v6552_v8  ;;  %v9959_v8 = vld [vmem:[#allocation71_spill] sm:$0xff] }
 0x4ab   : > { %v3715_v56 = vpop.f32.mrf.mxu2  ;;  %v3379_v62 = vpop.f32.mrf.mxu0  ;;  %v6680_v25 = vor.u32 %v7004_v29, %v6677_v42  ;;  %3999 = vmatpush.bf16.msra.mxu0 %v6488_v7  ;;  %9952 = vst [vmem:[#allocation55_spill] sm:$0xff] %v8976_v28 }
 0x4ac   : > { %v3884_v60 = vpop.f32.mrf.mxu3  ;;  %v3380_v31 = vadd.f32 %v3379_v62, %v9951_v13  ;;  %v3548_v0 = vpop.f32.mrf.mxu1  ;;  %v6045_v62 = vld [vmem:[%s7605_s9 + $0x3b8] sm:$0xf0] }
 0x4ad   : > { %v8966_v57 = vadd.f32 %v3884_v60, %v3715_v56  ;;  %4506 = vmatpush.bf16.msra.mxu3 %v6680_v25  ;;  %v6844_v60 = vld [vmem:[%s7605_s9 + $0x3a4] sm:$0xf] }
 0x4ae   : > { %v3549_v39 = vadd.f32 %v3548_v0, %v3380_v31  ;;  %v8978_v24 = vor.u32 %v6844_v60, %v6045_v62  ;;  %v830_v31 = vld [vmem:[#allocation2 + $0xb0] sm:$0xff] }
 0x4af   : > { %9950 = vst [vmem:[#allocation60_spill] sm:$0xff] %v8966_v57  ;;  %v832_v60 = vld [vmem:[#allocation2 + $0x1f0] sm:$0xff] }
 0x4b0   : > { %v4712_v56 = vadd.f32 %v3549_v39, %v828_v63  ;;  %9953 = vst [vmem:[#allocation56_spill] sm:$0xff] %v8978_v24  ;;  %v9956_v63 = vld [vmem:[#allocation61_spill] sm:$0xff] }
 0x4b2   : > { %4840 = vst [vmem:[#allocation2 + $0xa0] sm:$0xff] %v4712_v56 }
 0x4b3   : > { %v3717_v13 = vpop.f32.mrf.mxu2  ;;  %v3382_v57 = vpop.f32.mrf.mxu0 }
 0x4b4   : > { %v3886_v18 = vpop.f32.mrf.mxu3  ;;  %v3383_v52 = vadd.f32 %v3382_v57, %v9955_v43  ;;  %v3551_v29 = vpop.f32.mrf.mxu1 }
 0x4b5   : > { %v8980_v32 = vadd.f32 %v3886_v18, %v3717_v13  ;;  %v6067_v13 = vld [vmem:[%s7605_s9 + $0x3d0] sm:$0xf]  ;;  %v6853_v18 = vld [vmem:[%s7605_s9 + $0x3e4] sm:$0xf0] }
 0x4b6   : > { %v3552_v25 = vadd.f32 %v3551_v29, %v3383_v52  ;;  %3421 = vmatmul.bf16.gmra.mxu0 %v8976_v28  ;;  %v6850_v52 = vld [vmem:[%s7605_s9 + $0x3d4] sm:$0xf]  ;;  %v6069_v29 = vld [vmem:[%s7605_s9 + $0x3e8] sm:$0xf0]  ;;  %v6139_v28 = vld [vmem:[%s7605_s9 + $0x460] sm:$0xf] }
 0x4b7   : > { %9954 = vst [vmem:[#allocation65_spill] sm:$0xff] %v8980_v32  ;;  %3590 = vmatmul.bf16.gmra.mxu1 %v8978_v24  ;;  %v834_v24 = vld [vmem:[#allocation2 + $0x230] sm:$0xff] }
 0x4b8   : > { %3759 = vmatmul.bf16.gmra.mxu2 %v9956_v63  ;;  %v4714_v22 = vadd.f32 %v3552_v25, %v830_v31  ;;  %v8994_v25 = vor.u32 %v6853_v18, %v6067_v13 }
 0x4b9   : > { %3928 = vmatmul.bf16.gmra.mxu3 %v9957_v41  ;;  %v8996_v41 = vor.u32 %v6850_v52, %v6069_v29  ;;  %v9967_v29 = vld [vmem:[#allocation77_spill] sm:$0xff] }
 0x4ba   : > { %4842 = vst [vmem:[#allocation2 + $0xb0] sm:$0xff] %v4714_v22 }
 0x4bb   : > { %v3720_v0 = vpop.f32.mrf.mxu2  ;;  %v3384_v57 = vpop.f32.mrf.mxu0  ;;  %9960 = vst [vmem:[#allocation61_spill] sm:$0xff] %v8994_v25 }
 0x4bc   : > { %v3889_v7 = vpop.f32.mrf.mxu3  ;;  %v3385_v39 = vadd.f32 %v3384_v57, %v9959_v8  ;;  %v3553_v56 = vpop.f32.mrf.mxu1  ;;  %9961 = vst [vmem:[#allocation62_spill] sm:$0xff] %v8996_v41 }
 0x4bd   : > { %v8987_v42 = vadd.f32 %v3889_v7, %v3720_v0  ;;  %v9963_v7 = vld [vmem:[#allocation72_spill] sm:$0xff] }
 0x4be   : > { %v3554_v62 = vadd.f32 %v3553_v56, %v3385_v39  ;;  %v9964_v56 = vld [vmem:[#allocation67_spill] sm:$0xff] }
 0x4bf   : > { %9958 = vst [vmem:[#allocation66_spill] sm:$0xff] %v8987_v42  ;;  %v6871_v42 = vld [vmem:[%s7605_s9 + $0x474] sm:$0xf0] }
 0x4c0   : > { %v4716_v43 = vadd.f32 %v3554_v62, %v832_v60  ;;  %v9965_v62 = vld [vmem:[#allocation68_spill] sm:$0xff] }
 0x4c2   : > { %4844 = vst [vmem:[#allocation2 + $0x1f0] sm:$0xff] %v4716_v43 }
 0x4c3   : > { %v3722_v31 = vpop.f32.mrf.mxu2  ;;  %v3387_v22 = vpop.f32.mrf.mxu0 }
 0x4c4   : > { %v3891_v63 = vpop.f32.mrf.mxu3  ;;  %v3388_v57 = vadd.f32 %v3387_v22, %v9963_v7  ;;  %v3556_v8 = vpop.f32.mrf.mxu1  ;;  %v836_v22 = vld [vmem:[#allocation2 + $0x90] sm:$0xff] }
 0x4c5   : > { %v8998_v0 = vadd.f32 %v3891_v63, %v3722_v31 }
 0x4c6   : > { %v3557_v39 = vadd.f32 %v3556_v8, %v3388_v57  ;;  %3426 = vmatmul.bf16.gmra.mxu0 %v8994_v25  ;;  %v6091_v57 = vld [vmem:[%s7605_s9 + $0x400] sm:$0xf]  ;;  %v6859_v8 = vld [vmem:[%s7605_s9 + $0x414] sm:$0xf0]  ;;  %v6856_v25 = vld [vmem:[%s7605_s9 + $0x404] sm:$0xf] }
 0x4c7   : > { %9962 = vst [vmem:[#allocation71_spill] sm:$0xff] %v8998_v0  ;;  %3595 = vmatmul.bf16.gmra.mxu1 %v8996_v41 }
 0x4c8   : > { %3764 = vmatmul.bf16.gmra.mxu2 %v9964_v56  ;;  %v4718_v60 = vadd.f32 %v3557_v39, %v834_v24  ;;  %v6093_v56 = vld [vmem:[%s7605_s9 + $0x418] sm:$0xf0]  ;;  %v9012_v39 = vor.u32 %v6859_v8, %v6091_v57 }
 0x4c9   : > { %3933 = vmatmul.bf16.gmra.mxu3 %v9965_v62  ;;  %v9014_v0 = vor.u32 %v6856_v25, %v6093_v56  ;;  %v9973_v25 = vld [vmem:[#allocation74_spill] sm:$0xff]  ;;  %v9975_v56 = vld [vmem:[#allocation83_spill] sm:$0xff] }
 0x4ca   : > { %4846 = vst [vmem:[#allocation2 + $0x230] sm:$0xff] %v4718_v60 }
 0x4cb   : > { %v3725_v13 = vpop.f32.mrf.mxu2  ;;  %v3389_v43 = vpop.f32.mrf.mxu0  ;;  %9968 = vst [vmem:[#allocation67_spill] sm:$0xff] %v9012_v39 }
 0x4cc   : > { %v3894_v18 = vpop.f32.mrf.mxu3  ;;  %v3390_v31 = vadd.f32 %v3389_v43, %v9967_v29  ;;  %v3558_v63 = vpop.f32.mrf.mxu1  ;;  %9969 = vst [vmem:[#allocation68_spill] sm:$0xff] %v9014_v0 }
 0x4cd   : > { %v9005_v52 = vadd.f32 %v3894_v18, %v3725_v13  ;;  %v9971_v18 = vld [vmem:[#allocation78_spill] sm:$0xff] }
 0x4ce   : > { %v3559_v7 = vadd.f32 %v3558_v63, %v3390_v31 }
 0x4cf   : > { %9966 = vst [vmem:[#allocation72_spill] sm:$0xff] %v9005_v52  ;;  %v838_v52 = vld [vmem:[#allocation2 + $0x208] sm:$0xff] }
 0x4d0   : > { %v4720_v41 = vadd.f32 %v3559_v7, %v836_v22 }
 0x4d2   : > { %4848 = vst [vmem:[#allocation2 + $0x90] sm:$0xff] %v4720_v41  ;;  %v9972_v41 = vld [vmem:[#allocation73_spill] sm:$0xff] }
 0x4d3   : > { %v3727_v24 = vpop.f32.mrf.mxu2  ;;  %v3392_v62 = vpop.f32.mrf.mxu0 }
 0x4d4   : > { %v3896_v60 = vpop.f32.mrf.mxu3  ;;  %v3393_v43 = vadd.f32 %v3392_v62, %v9971_v18  ;;  %v3561_v29 = vpop.f32.mrf.mxu1  ;;  %v840_v62 = vld [vmem:[#allocation2 + $0x88] sm:$0xff] }
 0x4d5   : > { %v9016_v13 = vadd.f32 %v3896_v60, %v3727_v24 }
 0x4d6   : > { %v3562_v31 = vadd.f32 %v3561_v29, %v3393_v43  ;;  %3431 = vmatmul.bf16.gmra.mxu0 %v9012_v39  ;;  %v6115_v43 = vld [vmem:[%s7605_s9 + $0x430] sm:$0xf]  ;;  %v6865_v29 = vld [vmem:[%s7605_s9 + $0x444] sm:$0xf0]  ;;  %v6862_v39 = vld [vmem:[%s7605_s9 + $0x434] sm:$0xf] }
 0x4d7   : > { %9970 = vst [vmem:[#allocation77_spill] sm:$0xff] %v9016_v13  ;;  %3600 = vmatmul.bf16.gmra.mxu1 %v9014_v0 }
 0x4d8   : > { %3769 = vmatmul.bf16.gmra.mxu2 %v9972_v41  ;;  %v4722_v63 = vadd.f32 %v3562_v31, %v838_v52  ;;  %v6117_v41 = vld [vmem:[%s7605_s9 + $0x448] sm:$0xf0]  ;;  %v9030_v31 = vor.u32 %v6865_v29, %v6115_v43  ;;  %v6986_v29 = vld [vmem:[%s7603_s8 + $0x214] sm:$0xf] }
 0x4d9   : > { %3938 = vmatmul.bf16.gmra.mxu3 %v9973_v25  ;;  %v9981_v43 = vld [vmem:[#allocation80_spill] sm:$0xff] }
 0x4da   : > { %4850 = vst [vmem:[#allocation2 + $0x208] sm:$0xff] %v4722_v63 }
 0x4db   : > { %v3730_v22 = vpop.f32.mrf.mxu2  ;;  %v3394_v57 = vpop.f32.mrf.mxu0  ;;  %9976 = vst [vmem:[#allocation73_spill] sm:$0xff] %v9030_v31 }
 0x4dc   : > { %v3899_v7 = vpop.f32.mrf.mxu3  ;;  %v3395_v24 = vadd.f32 %v3394_v57, %v9975_v56  ;;  %v3563_v60 = vpop.f32.mrf.mxu1  ;;  %v9979_v57 = vld [vmem:[#allocation84_spill] sm:$0xff] }
 0x4dd   : > { %v9023_v8 = vadd.f32 %v3899_v7, %v3730_v22  ;;  %v9032_v22 = vor.u32 %v6862_v39, %v6117_v41  ;;  %v6605_v41 = vld [vmem:[%s7603_s8 + $0x218] sm:$0xf0] }
 0x4de   : > { %v3564_v18 = vadd.f32 %v3563_v60, %v3395_v24  ;;  %v842_v60 = vld [vmem:[#allocation2 + $0x358] sm:$0xff] }
 0x4df   : > { %9974 = vst [vmem:[#allocation78_spill] sm:$0xff] %v9023_v8  ;;  %v844_v8 = vld [vmem:[#allocation2 + $0x350] sm:$0xff] }
 0x4e0   : > { %v4724_v0 = vadd.f32 %v3564_v18, %v840_v62  ;;  %9977 = vst [vmem:[#allocation74_spill] sm:$0xff] %v9032_v22 }
 0x4e2   : > { %4852 = vst [vmem:[#allocation2 + $0x88] sm:$0xff] %v4724_v0  ;;  %v9980_v0 = vld [vmem:[#allocation79_spill] sm:$0xff] }
 0x4e3   : > { %v3732_v52 = vpop.f32.mrf.mxu2  ;;  %v3397_v25 = vpop.f32.mrf.mxu0 }
 0x4e4   : > { %v3901_v63 = vpop.f32.mrf.mxu3  ;;  %v3398_v56 = vadd.f32 %v3397_v25, %v9979_v57  ;;  %v3566_v24 = vpop.f32.mrf.mxu1  ;;  %v6608_v25 = vor.u32 %v6986_v29, %v6605_v41  ;;  %v6954_v57 = vld [vmem:[%s7603_s8 + $0x114] sm:$0xf] }
 0x4e5   : > { %v9034_v7 = vadd.f32 %v3901_v63, %v3732_v52 }
 0x4e6   : > { %v3567_v62 = vadd.f32 %v3566_v24, %v3398_v56  ;;  %3436 = vmatmul.bf16.gmra.mxu0 %v9030_v31  ;;  %v6477_v56 = vld [vmem:[%s7603_s8 + $0x118] sm:$0xf0]  ;;  %v7002_v24 = vld [vmem:[%s7603_s8 + $0x294] sm:$0xf]  ;;  %4338 = vmatpush.bf16.msra.mxu2 %v6608_v25 }
 0x4e7   : > { %9978 = vst [vmem:[#allocation83_spill] sm:$0xff] %v9034_v7  ;;  %3605 = vmatmul.bf16.gmra.mxu1 %v9032_v22  ;;  %v6970_v31 = vld [vmem:[%s7603_s8 + $0x194] sm:$0xf]  ;;  %v6541_v7 = vld [vmem:[%s7603_s8 + $0x198] sm:$0xf0] }
 0x4e8   : > { %3774 = vmatmul.bf16.gmra.mxu2 %v9980_v0  ;;  %v4726_v18 = vadd.f32 %v3567_v62, %v842_v60  ;;  %v9983_v60 = vld [vmem:[#allocation89_spill] sm:$0xff]  ;;  %v6544_v29 = vor.u32 %v6970_v31, %v6541_v7  ;;  %v9987_v31 = vld [vmem:[#allocation90_spill] sm:$0xff] }
 0x4e9   : > { %3943 = vmatmul.bf16.gmra.mxu3 %v9981_v43  ;;  %v6480_v43 = vor.u32 %v6954_v57, %v6477_v56  ;;  %v9056_v57 = vor.u32 %v6871_v42, %v6139_v28  ;;  %v9989_v42 = vld [vmem:[#allocation86_spill] sm:$0xff] }
 0x4ea   : > { %4854 = vst [vmem:[#allocation2 + $0x358] sm:$0xff] %v4726_v18  ;;  %v6669_v18 = vld [vmem:[%s7603_s8 + $0x298] sm:$0xf0]  ;;  %4169 = vmatpush.bf16.msra.mxu1 %v6544_v29  ;;  %v9991_v29 = vld [vmem:[#allocation95_spill] sm:$0xff] }
 0x4eb   : > { %v3735_v39 = vpop.f32.mrf.mxu2  ;;  %v3399_v63 = vpop.f32.mrf.mxu0  ;;  %v6672_v13 = vor.u32 %v7002_v24, %v6669_v18  ;;  %4000 = vmatpush.bf16.msra.mxu0 %v6480_v43  ;;  %9984 = vst [vmem:[#allocation79_spill] sm:$0xff] %v9056_v57 }
 0x4ec   : > { %v3904_v52 = vpop.f32.mrf.mxu3  ;;  %v3400_v62 = vadd.f32 %v3399_v63, %v9983_v60  ;;  %v3568_v0 = vpop.f32.mrf.mxu1  ;;  %v6141_v63 = vld [vmem:[%s7605_s9 + $0x478] sm:$0xf0] }
 0x4ed   : > { %v9046_v22 = vadd.f32 %v3904_v52, %v3735_v39  ;;  %4507 = vmatpush.bf16.msra.mxu3 %v6672_v13  ;;  %v6868_v52 = vld [vmem:[%s7605_s9 + $0x464] sm:$0xf] }
 0x4ee   : > { %v3569_v41 = vadd.f32 %v3568_v0, %v3400_v62  ;;  %v9058_v32 = vor.u32 %v6868_v52, %v6141_v63  ;;  %v846_v62 = vld [vmem:[#allocation2 + $0x1d8] sm:$0xff]  ;;  %v848_v52 = vld [vmem:[#allocation2 + $0x140] sm:$0xff] }
 0x4ef   : > { %9982 = vst [vmem:[#allocation84_spill] sm:$0xff] %v9046_v22 }
 0x4f0   : > { %v4728_v39 = vadd.f32 %v3569_v41, %v844_v8  ;;  %9985 = vst [vmem:[#allocation80_spill] sm:$0xff] %v9058_v32  ;;  %v9988_v8 = vld [vmem:[#allocation85_spill] sm:$0xff] }
 0x4f2   : > { %4856 = vst [vmem:[#allocation2 + $0x350] sm:$0xff] %v4728_v39 }
 0x4f3   : > { %v3737_v60 = vpop.f32.mrf.mxu2  ;;  %v3402_v22 = vpop.f32.mrf.mxu0 }
 0x4f4   : > { %v3906_v56 = vpop.f32.mrf.mxu3  ;;  %v3403_v7 = vadd.f32 %v3402_v22, %v9987_v31  ;;  %v3571_v24 = vpop.f32.mrf.mxu1 }
 0x4f5   : > { %v9060_v25 = vadd.f32 %v3906_v56, %v3737_v60  ;;  %v6163_v60 = vld [vmem:[%s7605_s9 + $0x490] sm:$0xf]  ;;  %v6877_v56 = vld [vmem:[%s7605_s9 + $0x4a4] sm:$0xf0] }
 0x4f6   : > { %v3572_v13 = vadd.f32 %v3571_v24, %v3403_v7  ;;  %3441 = vmatmul.bf16.gmra.mxu0 %v9056_v57  ;;  %v6874_v7 = vld [vmem:[%s7605_s9 + $0x494] sm:$0xf]  ;;  %v6165_v24 = vld [vmem:[%s7605_s9 + $0x4a8] sm:$0xf0]  ;;  %v6235_v57 = vld [vmem:[%s7605_s9 + $0x520] sm:$0xf] }
 0x4f7   : > { %9986 = vst [vmem:[#allocation89_spill] sm:$0xff] %v9060_v25  ;;  %3610 = vmatmul.bf16.gmra.mxu1 %v9058_v32  ;;  %v850_v32 = vld [vmem:[#allocation2 + $0x130] sm:$0xff] }
 0x4f8   : > { %3779 = vmatmul.bf16.gmra.mxu2 %v9988_v8  ;;  %v4730_v28 = vadd.f32 %v3572_v13, %v846_v62  ;;  %v9074_v13 = vor.u32 %v6877_v56, %v6163_v60 }
 0x4f9   : > { %3948 = vmatmul.bf16.gmra.mxu3 %v9989_v42  ;;  %v9076_v42 = vor.u32 %v6874_v7, %v6165_v24  ;;  %v9999_v24 = vld [vmem:[#allocation101_spill] sm:$0xff] }
 0x4fa   : > { %4858 = vst [vmem:[#allocation2 + $0x1d8] sm:$0xff] %v4730_v28 }
 0x4fb   : > { %v3740_v0 = vpop.f32.mrf.mxu2  ;;  %v3404_v22 = vpop.f32.mrf.mxu0  ;;  %9992 = vst [vmem:[#allocation85_spill] sm:$0xff] %v9074_v13 }
 0x4fc   : > { %v3909_v43 = vpop.f32.mrf.mxu3  ;;  %v3405_v41 = vadd.f32 %v3404_v22, %v9991_v29  ;;  %v3573_v39 = vpop.f32.mrf.mxu1  ;;  %9993 = vst [vmem:[#allocation86_spill] sm:$0xff] %v9076_v42 }
 0x4fd   : > { %v9067_v18 = vadd.f32 %v3909_v43, %v3740_v0  ;;  %v9995_v43 = vld [vmem:[#allocation96_spill] sm:$0xff] }
 0x4fe   : > { %v3574_v63 = vadd.f32 %v3573_v39, %v3405_v41  ;;  %v9996_v39 = vld [vmem:[#allocation91_spill] sm:$0xff] }
 0x4ff   : > { %9990 = vst [vmem:[#allocation90_spill] sm:$0xff] %v9067_v18  ;;  %v6895_v18 = vld [vmem:[%s7605_s9 + $0x534] sm:$0xf0] }
 0x500   : > { %v4732_v31 = vadd.f32 %v3574_v63, %v848_v52  ;;  %v9997_v63 = vld [vmem:[#allocation92_spill] sm:$0xff] }
 0x502   : > { %4860 = vst [vmem:[#allocation2 + $0x140] sm:$0xff] %v4732_v31 }
 0x503   : > { %v3742_v62 = vpop.f32.mrf.mxu2  ;;  %v3407_v28 = vpop.f32.mrf.mxu0 }
 0x504   : > { %v3911_v8 = vpop.f32.mrf.mxu3  ;;  %v3408_v22 = vadd.f32 %v3407_v28, %v9995_v43  ;;  %v3576_v29 = vpop.f32.mrf.mxu1  ;;  %v852_v28 = vld [vmem:[#allocation2 + $0x318] sm:$0xff] }
 0x505   : > { %v9078_v0 = vadd.f32 %v3911_v8, %v3742_v62 }
 0x506   : > { %v3577_v41 = vadd.f32 %v3576_v29, %v3408_v22  ;;  %3446 = vmatmul.bf16.gmra.mxu0 %v9074_v13  ;;  %v6187_v22 = vld [vmem:[%s7605_s9 + $0x4c0] sm:$0xf]  ;;  %v6883_v29 = vld [vmem:[%s7605_s9 + $0x4d4] sm:$0xf0]  ;;  %v6880_v13 = vld [vmem:[%s7605_s9 + $0x4c4] sm:$0xf] }
 0x507   : > { %9994 = vst [vmem:[#allocation95_spill] sm:$0xff] %v9078_v0  ;;  %3615 = vmatmul.bf16.gmra.mxu1 %v9076_v42 }
 0x508   : > { %3784 = vmatmul.bf16.gmra.mxu2 %v9996_v39  ;;  %v4734_v52 = vadd.f32 %v3577_v41, %v850_v32  ;;  %v6189_v39 = vld [vmem:[%s7605_s9 + $0x4d8] sm:$0xf0]  ;;  %v9092_v41 = vor.u32 %v6883_v29, %v6187_v22 }
 0x509   : > { %3953 = vmatmul.bf16.gmra.mxu3 %v9997_v63  ;;  %v9094_v0 = vor.u32 %v6880_v13, %v6189_v39  ;;  %v10005_v13 = vld [vmem:[#allocation98_spill] sm:$0xff]  ;;  %v10007_v39 = vld [vmem:[#allocation107_spill] sm:$0xff] }
 0x50a   : > { %4862 = vst [vmem:[#allocation2 + $0x130] sm:$0xff] %v4734_v52 }
 0x50b   : > { %v3745_v60 = vpop.f32.mrf.mxu2  ;;  %v3409_v31 = vpop.f32.mrf.mxu0  ;;  %10000 = vst [vmem:[#allocation91_spill] sm:$0xff] %v9092_v41 }
 0x50c   : > { %v3914_v56 = vpop.f32.mrf.mxu3  ;;  %v3410_v62 = vadd.f32 %v3409_v31, %v9999_v24  ;;  %v3578_v8 = vpop.f32.mrf.mxu1  ;;  %10001 = vst [vmem:[#allocation92_spill] sm:$0xff] %v9094_v0 }
 0x50d   : > { %v9085_v7 = vadd.f32 %v3914_v56, %v3745_v60  ;;  %v10003_v56 = vld [vmem:[#allocation102_spill] sm:$0xff] }
 0x50e   : > { %v3579_v43 = vadd.f32 %v3578_v8, %v3410_v62 }
 0x50f   : > { %9998 = vst [vmem:[#allocation96_spill] sm:$0xff] %v9085_v7  ;;  %v854_v7 = vld [vmem:[#allocation2 + $0x70] sm:$0xff] }
 0x510   : > { %v4736_v42 = vadd.f32 %v3579_v43, %v852_v28 }
 0x512   : > { %4864 = vst [vmem:[#allocation2 + $0x318] sm:$0xff] %v4736_v42  ;;  %v10004_v42 = vld [vmem:[#allocation97_spill] sm:$0xff] }
 0x513   : > { %v3747_v32 = vpop.f32.mrf.mxu2  ;;  %v3412_v63 = vpop.f32.mrf.mxu0 }
 0x514   : > { %v3916_v52 = vpop.f32.mrf.mxu3  ;;  %v3413_v31 = vadd.f32 %v3412_v63, %v10003_v56  ;;  %v3581_v24 = vpop.f32.mrf.mxu1  ;;  %v856_v63 = vld [vmem:[#allocation2 + $0xe0] sm:$0xff] }
 0x515   : > { %v9096_v60 = vadd.f32 %v3916_v52, %v3747_v32 }
 0x516   : > { %v3582_v62 = vadd.f32 %v3581_v24, %v3413_v31  ;;  %3451 = vmatmul.bf16.gmra.mxu0 %v9092_v41  ;;  %v6211_v31 = vld [vmem:[%s7605_s9 + $0x4f0] sm:$0xf]  ;;  %v6889_v24 = vld [vmem:[%s7605_s9 + $0x504] sm:$0xf0]  ;;  %v6886_v41 = vld [vmem:[%s7605_s9 + $0x4f4] sm:$0xf] }
 0x517   : > { %10002 = vst [vmem:[#allocation101_spill] sm:$0xff] %v9096_v60  ;;  %3620 = vmatmul.bf16.gmra.mxu1 %v9094_v0 }
 0x518   : > { %3789 = vmatmul.bf16.gmra.mxu2 %v10004_v42  ;;  %v4738_v8 = vadd.f32 %v3582_v62, %v854_v7  ;;  %v6213_v42 = vld [vmem:[%s7605_s9 + $0x508] sm:$0xf0]  ;;  %v9110_v62 = vor.u32 %v6889_v24, %v6211_v31  ;;  %v6984_v24 = vld [vmem:[%s7603_s8 + $0x204] sm:$0xf] }
 0x519   : > { %3958 = vmatmul.bf16.gmra.mxu3 %v10005_v13  ;;  %v10013_v31 = vld [vmem:[#allocation104_spill] sm:$0xff] }
 0x51a   : > { %4866 = vst [vmem:[#allocation2 + $0x70] sm:$0xff] %v4738_v8 }
 0x51b   : > { %v3750_v28 = vpop.f32.mrf.mxu2  ;;  %v3414_v22 = vpop.f32.mrf.mxu0  ;;  %10008 = vst [vmem:[#allocation97_spill] sm:$0xff] %v9110_v62 }
 0x51c   : > { %v3919_v43 = vpop.f32.mrf.mxu3  ;;  %v3415_v32 = vadd.f32 %v3414_v22, %v10007_v39  ;;  %v3583_v52 = vpop.f32.mrf.mxu1  ;;  %v10011_v22 = vld [vmem:[#allocation108_spill] sm:$0xff] }
 0x51d   : > { %v9103_v29 = vadd.f32 %v3919_v43, %v3750_v28  ;;  %v9112_v28 = vor.u32 %v6886_v41, %v6213_v42  ;;  %v6597_v42 = vld [vmem:[%s7603_s8 + $0x208] sm:$0xf0] }
 0x51e   : > { %v3584_v56 = vadd.f32 %v3583_v52, %v3415_v32  ;;  %v858_v52 = vld [vmem:[#allocation2 + $0x328] sm:$0xff] }
 0x51f   : > { %10006 = vst [vmem:[#allocation102_spill] sm:$0xff] %v9103_v29  ;;  %v860_v29 = vld [vmem:[#allocation2 + $0x3b8] sm:$0xff] }
 0x520   : > { %v4740_v0 = vadd.f32 %v3584_v56, %v856_v63  ;;  %10009 = vst [vmem:[#allocation98_spill] sm:$0xff] %v9112_v28 }
 0x522   : > { %4868 = vst [vmem:[#allocation2 + $0xe0] sm:$0xff] %v4740_v0  ;;  %v10012_v0 = vld [vmem:[#allocation103_spill] sm:$0xff] }
 0x523   : > { %v3752_v7 = vpop.f32.mrf.mxu2  ;;  %v3417_v13 = vpop.f32.mrf.mxu0 }
 0x524   : > { %v3921_v8 = vpop.f32.mrf.mxu3  ;;  %v3418_v39 = vadd.f32 %v3417_v13, %v10011_v22  ;;  %v3586_v32 = vpop.f32.mrf.mxu1  ;;  %v6600_v13 = vor.u32 %v6984_v24, %v6597_v42  ;;  %v6952_v22 = vld [vmem:[%s7603_s8 + $0x104] sm:$0xf] }
 0x525   : > { %v9114_v43 = vadd.f32 %v3921_v8, %v3752_v7 }
 0x526   : > { %v3587_v63 = vadd.f32 %v3586_v32, %v3418_v39  ;;  %3456 = vmatmul.bf16.gmra.mxu0 %v9110_v62  ;;  %v6469_v39 = vld [vmem:[%s7603_s8 + $0x108] sm:$0xf0]  ;;  %v7000_v32 = vld [vmem:[%s7603_s8 + $0x284] sm:$0xf]  ;;  %4339 = vmatpush.bf16.msra.mxu2 %v6600_v13 }
 0x527   : > { %10010 = vst [vmem:[#allocation107_spill] sm:$0xff] %v9114_v43  ;;  %3625 = vmatmul.bf16.gmra.mxu1 %v9112_v28  ;;  %v6968_v62 = vld [vmem:[%s7603_s8 + $0x184] sm:$0xf]  ;;  %v6533_v43 = vld [vmem:[%s7603_s8 + $0x188] sm:$0xf0] }
 0x528   : > { %3794 = vmatmul.bf16.gmra.mxu2 %v10012_v0  ;;  %v4742_v56 = vadd.f32 %v3587_v63, %v858_v52  ;;  %v10015_v52 = vld [vmem:[#allocation113_spill] sm:$0xff]  ;;  %v6536_v24 = vor.u32 %v6968_v62, %v6533_v43  ;;  %v10017_v62 = vld [vmem:[#allocation114_spill] sm:$0xff] }
 0x529   : > { %3963 = vmatmul.bf16.gmra.mxu3 %v10013_v31  ;;  %v6472_v31 = vor.u32 %v6952_v22, %v6469_v39  ;;  %v9136_v22 = vor.u32 %v6895_v18, %v6235_v57  ;;  %v10019_v18 = vld [vmem:[#allocation110_spill] sm:$0xff] }
 0x52a   : > { %4870 = vst [vmem:[#allocation2 + $0x328] sm:$0xff] %v4742_v56  ;;  %v6661_v56 = vld [vmem:[%s7603_s8 + $0x288] sm:$0xf0]  ;;  %4170 = vmatpush.bf16.msra.mxu1 %v6536_v24  ;;  %v10020_v24 = vld [vmem:[#allocation119_spill] sm:$0xff] }
 0x52b   : > { %v3755_v41 = vpop.f32.mrf.mxu2  ;;  %v3419_v8 = vpop.f32.mrf.mxu0  ;;  %v6664_v60 = vor.u32 %v7000_v32, %v6661_v56  ;;  %4001 = vmatpush.bf16.msra.mxu0 %v6472_v31 }
 0x52c   : > { %v3924_v7 = vpop.f32.mrf.mxu3  ;;  %v3420_v63 = vadd.f32 %v3419_v8, %v10015_v52  ;;  %v3588_v0 = vpop.f32.mrf.mxu1  ;;  %v6237_v8 = vld [vmem:[%s7605_s9 + $0x538] sm:$0xf0] }
 0x52d   : > { %v9126_v28 = vadd.f32 %v3924_v7, %v3755_v41  ;;  %4508 = vmatpush.bf16.msra.mxu3 %v6664_v60  ;;  %v6892_v7 = vld [vmem:[%s7605_s9 + $0x524] sm:$0xf] }
 0x52e   : > { %v3589_v42 = vadd.f32 %v3588_v0, %v3420_v63  ;;  %v9138_v25 = vor.u32 %v6892_v7, %v6237_v8  ;;  %v862_v63 = vld [vmem:[#allocation2 + $0x248] sm:$0xff]  ;;  %v864_v7 = vld [vmem:[#allocation2 + $0x20] sm:$0xff] }
 0x52f   : > { %10014 = vst [vmem:[#allocation108_spill] sm:$0xff] %v9126_v28 }
 0x530   : > { %v4744_v41 = vadd.f32 %v3589_v42, %v860_v29  ;;  %10016 = vst [vmem:[#allocation103_spill] sm:$0xff] %v9138_v25  ;;  %v10018_v29 = vld [vmem:[#allocation109_spill] sm:$0xff] }
 0x532   : > { %4872 = vst [vmem:[#allocation2 + $0x3b8] sm:$0xff] %v4744_v41 }
 0x533   : > { %v3757_v52 = vpop.f32.mrf.mxu2  ;;  %v3422_v28 = vpop.f32.mrf.mxu0 }
 0x534   : > { %v3926_v39 = vpop.f32.mrf.mxu3  ;;  %v3423_v43 = vadd.f32 %v3422_v28, %v10017_v62  ;;  %v3591_v32 = vpop.f32.mrf.mxu1 }
 0x535   : > { %v9140_v13 = vadd.f32 %v3926_v39, %v3757_v52  ;;  %v6259_v52 = vld [vmem:[%s7605_s9 + $0x550] sm:$0xf]  ;;  %v6901_v39 = vld [vmem:[%s7605_s9 + $0x564] sm:$0xf0] }
 0x536   : > { %v3592_v60 = vadd.f32 %v3591_v32, %v3423_v43  ;;  %3461 = vmatmul.bf16.gmra.mxu0 %v9136_v22  ;;  %v6898_v43 = vld [vmem:[%s7605_s9 + $0x554] sm:$0xf]  ;;  %v6261_v32 = vld [vmem:[%s7605_s9 + $0x568] sm:$0xf0] }
 0x537   : > { %3630 = vmatmul.bf16.gmra.mxu1 %v9138_v25  ;;  %v866_v25 = vld [vmem:[#allocation2 + $0x288] sm:$0xff] }
 0x538   : > { %3799 = vmatmul.bf16.gmra.mxu2 %v10018_v29  ;;  %v4746_v57 = vadd.f32 %v3592_v60, %v862_v63  ;;  %v9154_v60 = vor.u32 %v6901_v39, %v6259_v52 }
 0x539   : > { %3968 = vmatmul.bf16.gmra.mxu3 %v10019_v18  ;;  %v9156_v18 = vor.u32 %v6898_v43, %v6261_v32  ;;  %v10028_v32 = vld [vmem:[#allocation125_spill] sm:$0xff] }
 0x53a   : > { %4874 = vst [vmem:[#allocation2 + $0x248] sm:$0xff] %v4746_v57 }
 0x53b   : > { %v3760_v0 = vpop.f32.mrf.mxu2  ;;  %v3424_v28 = vpop.f32.mrf.mxu0  ;;  %10021 = vst [vmem:[#allocation104_spill] sm:$0xff] %v9154_v60 }
 0x53c   : > { %v3929_v31 = vpop.f32.mrf.mxu3  ;;  %v3425_v42 = vadd.f32 %v3424_v28, %v10020_v24  ;;  %v3593_v41 = vpop.f32.mrf.mxu1  ;;  %10022 = vst [vmem:[#allocation113_spill] sm:$0xff] %v9156_v18 }
 0x53d   : > { %v9147_v56 = vadd.f32 %v3929_v31, %v3760_v0  ;;  %v10024_v31 = vld [vmem:[#allocation120_spill] sm:$0xff] }
 0x53e   : > { %v3594_v8 = vadd.f32 %v3593_v41, %v3425_v42  ;;  %v10025_v41 = vld [vmem:[#allocation115_spill] sm:$0xff] }
 0x540   : > { %v4748_v62 = vadd.f32 %v3594_v8, %v864_v7  ;;  %v10026_v8 = vld [vmem:[#allocation116_spill] sm:$0xff] }
 0x542   : > { %4876 = vst [vmem:[#allocation2 + $0x20] sm:$0xff] %v4748_v62 }
 0x543   : > { %v3762_v63 = vpop.f32.mrf.mxu2  ;;  %v3427_v57 = vpop.f32.mrf.mxu0 }
 0x544   : > { %v3931_v29 = vpop.f32.mrf.mxu3  ;;  %v3428_v28 = vadd.f32 %v3427_v57, %v10024_v31  ;;  %v3596_v24 = vpop.f32.mrf.mxu1  ;;  %v868_v57 = vld [vmem:[#allocation2 + $0x3c8] sm:$0xff] }
 0x545   : > { %v9158_v0 = vadd.f32 %v3931_v29, %v3762_v63 }
 0x546   : > { %v3597_v42 = vadd.f32 %v3596_v24, %v3428_v28  ;;  %3466 = vmatmul.bf16.gmra.mxu0 %v9154_v60  ;;  %v6283_v28 = vld [vmem:[%s7605_s9 + $0x580] sm:$0xf]  ;;  %v6907_v24 = vld [vmem:[%s7605_s9 + $0x594] sm:$0xf0]  ;;  %v6904_v60 = vld [vmem:[%s7605_s9 + $0x584] sm:$0xf] }
 0x547   : > { %10023 = vst [vmem:[#allocation114_spill] sm:$0xff] %v9158_v0  ;;  %3635 = vmatmul.bf16.gmra.mxu1 %v9156_v18 }
 0x548   : > { %3804 = vmatmul.bf16.gmra.mxu2 %v10025_v41  ;;  %v4750_v7 = vadd.f32 %v3597_v42, %v866_v25  ;;  %v6285_v41 = vld [vmem:[%s7605_s9 + $0x598] sm:$0xf0]  ;;  %v9172_v42 = vor.u32 %v6907_v24, %v6283_v28 }
 0x549   : > { %3973 = vmatmul.bf16.gmra.mxu3 %v10026_v8  ;;  %v9174_v0 = vor.u32 %v6904_v60, %v6285_v41  ;;  %v10034_v60 = vld [vmem:[#allocation122_spill] sm:$0xff]  ;;  %v10035_v41 = vld [vmem:[#allocation131_spill] sm:$0xff] }
 0x54a   : > { %4878 = vst [vmem:[#allocation2 + $0x288] sm:$0xff] %v4750_v7 }
 0x54b   : > { %v3765_v52 = vpop.f32.mrf.mxu2  ;;  %v3429_v62 = vpop.f32.mrf.mxu0  ;;  %10029 = vst [vmem:[#allocation110_spill] sm:$0xff] %v9172_v42 }
 0x54c   : > { %v3934_v39 = vpop.f32.mrf.mxu3  ;;  %v3430_v63 = vadd.f32 %v3429_v62, %v10028_v32  ;;  %v3598_v29 = vpop.f32.mrf.mxu1  ;;  %10030 = vst [vmem:[#allocation119_spill] sm:$0xff] %v9174_v0 }
 0x54d   : > { %v9165_v43 = vadd.f32 %v3934_v39, %v3765_v52  ;;  %v10032_v39 = vld [vmem:[#allocation126_spill] sm:$0xff] }
 0x54e   : > { %v3599_v31 = vadd.f32 %v3598_v29, %v3430_v63 }
 0x54f   : > { %10027 = vst [vmem:[#allocation109_spill] sm:$0xff] %v9165_v43  ;;  %v870_v43 = vld [vmem:[#allocation2 + $0x2c8] sm:$0xff] }
 0x550   : > { %v4752_v18 = vadd.f32 %v3599_v31, %v868_v57 }
 0x552   : > { %4880 = vst [vmem:[#allocation2 + $0x3c8] sm:$0xff] %v4752_v18  ;;  %v10033_v18 = vld [vmem:[#allocation121_spill] sm:$0xff] }
 0x553   : > { %v3767_v25 = vpop.f32.mrf.mxu2  ;;  %v3432_v8 = vpop.f32.mrf.mxu0 }
 0x554   : > { %v3936_v7 = vpop.f32.mrf.mxu3  ;;  %v3433_v62 = vadd.f32 %v3432_v8, %v10032_v39  ;;  %v3601_v32 = vpop.f32.mrf.mxu1  ;;  %v872_v8 = vld [vmem:[#allocation2 + $0x3d8] sm:$0xff] }
 0x555   : > { %v9176_v52 = vadd.f32 %v3936_v7, %v3767_v25 }
 0x556   : > { %v3602_v63 = vadd.f32 %v3601_v32, %v3433_v62  ;;  %3471 = vmatmul.bf16.gmra.mxu0 %v9172_v42  ;;  %v6307_v62 = vld [vmem:[%s7605_s9 + $0x5b0] sm:$0xf]  ;;  %v6913_v32 = vld [vmem:[%s7605_s9 + $0x5c4] sm:$0xf0]  ;;  %v6910_v42 = vld [vmem:[%s7605_s9 + $0x5b4] sm:$0xf] }
 0x557   : > { %10031 = vst [vmem:[#allocation120_spill] sm:$0xff] %v9176_v52  ;;  %3640 = vmatmul.bf16.gmra.mxu1 %v9174_v0 }
 0x558   : > { %3809 = vmatmul.bf16.gmra.mxu2 %v10033_v18  ;;  %v4754_v29 = vadd.f32 %v3602_v63, %v870_v43  ;;  %v6309_v18 = vld [vmem:[%s7605_s9 + $0x5c8] sm:$0xf0]  ;;  %v9190_v63 = vor.u32 %v6913_v32, %v6307_v62 }
 0x559   : > { %3978 = vmatmul.bf16.gmra.mxu3 %v10034_v60  ;;  %v9192_v52 = vor.u32 %v6910_v42, %v6309_v18  ;;  %v10039_v42 = vld [vmem:[#allocation128_spill] sm:$0xff] }
 0x55a   : > { %4882 = vst [vmem:[#allocation2 + $0x2c8] sm:$0xff] %v4754_v29 }
 0x55b   : > { %v3770_v57 = vpop.f32.mrf.mxu2  ;;  %v3434_v28 = vpop.f32.mrf.mxu0  ;;  %10036 = vst [vmem:[#allocation115_spill] sm:$0xff] %v9190_v63 }
 0x55c   : > { %v3939_v31 = vpop.f32.mrf.mxu3  ;;  %v3435_v25 = vadd.f32 %v3434_v28, %v10035_v41  ;;  %v3603_v7 = vpop.f32.mrf.mxu1  ;;  %10037 = vst [vmem:[#allocation116_spill] sm:$0xff] %v9192_v52  ;;  %v874_v41 = vld [vmem:[#allocation2 + $0x1b0] sm:$0xff] }
 0x55d   : > { %v9183_v24 = vadd.f32 %v3939_v31, %v3770_v57 }
 0x55e   : > { %v3604_v39 = vadd.f32 %v3603_v7, %v3435_v25 }
 0x560   : > { %v4756_v0 = vadd.f32 %v3604_v39, %v872_v8 }
 0x562   : > { %4884 = vst [vmem:[#allocation2 + $0x3d8] sm:$0xff] %v4756_v0  ;;  %v10038_v0 = vld [vmem:[#allocation127_spill] sm:$0xff] }
 0x563   : > { %v3772_v43 = vpop.f32.mrf.mxu2  ;;  %v3437_v60 = vpop.f32.mrf.mxu0 }
 0x564   : > { %v3941_v29 = vpop.f32.mrf.mxu3  ;;  %v3438_v31 = vadd.f32 %v3437_v60, %v8578_v44  ;;  %v3606_v28 = vpop.f32.mrf.mxu1  ;;  %v6331_v60 = vld [vmem:[%s7605_s9 + $0x5e0] sm:$0xf] }
 0x565   : > { %v9194_v57 = vadd.f32 %v3941_v29, %v3772_v43  ;;  %v876_v43 = vld [vmem:[#allocation2 + $0x2d0] sm:$0xff] }
 0x566   : > { %v3607_v25 = vadd.f32 %v3606_v28, %v3438_v31  ;;  %3476 = vmatmul.bf16.gmra.mxu0 %v9190_v63  ;;  %v6919_v31 = vld [vmem:[%s7605_s9 + $0x5f4] sm:$0xf0] }
 0x567   : > { %3645 = vmatmul.bf16.gmra.mxu1 %v9192_v52  ;;  %v6916_v52 = vld [vmem:[%s7605_s9 + $0x5e4] sm:$0xf] }
 0x568   : > { %3814 = vmatmul.bf16.gmra.mxu2 %v10038_v0  ;;  %v4758_v7 = vadd.f32 %v3607_v25, %v874_v41  ;;  %v6333_v0 = vld [vmem:[%s7605_s9 + $0x5f8] sm:$0xf0]  ;;  %v9208_v25 = vor.u32 %v6919_v31, %v6331_v60 }
 0x569   : > { %3983 = vmatmul.bf16.gmra.mxu3 %v10039_v42  ;;  %v9210_v63 = vor.u32 %v6916_v52, %v6333_v0  ;;  %v880_v0 = vld [vmem:[#allocation2 + $0x198] sm:$0xff] }
 0x56a   : > { %4886 = vst [vmem:[#allocation2 + $0x1b0] sm:$0xff] %v4758_v7 }
 0x56b   : > { %v3775_v8 = vpop.f32.mrf.mxu2  ;;  %v3439_v44 = vpop.f32.mrf.mxu0  ;;  %10040 = vst [vmem:[#allocation125_spill] sm:$0xff] %v9208_v25 }
 0x56c   : > { %v3944_v39 = vpop.f32.mrf.mxu3  ;;  %v3440_v32 = vadd.f32 %v3439_v44, %v8598_v34  ;;  %v3608_v18 = vpop.f32.mrf.mxu1  ;;  %10041 = vst [vmem:[#allocation126_spill] sm:$0xff] %v9210_v63  ;;  %v878_v44 = vld [vmem:[#allocation2 + $0x58] sm:$0xff] }
 0x56d   : > { %v9201_v62 = vadd.f32 %v3944_v39, %v3775_v8 }
 0x56e   : > { %v3609_v29 = vadd.f32 %v3608_v18, %v3440_v32 }
 0x570   : > { %v4760_v28 = vadd.f32 %v3609_v29, %v876_v43  ;;  %v10042_v43 = vld [vmem:[#allocation132_spill] sm:$0xff] }
 0x572   : > { %4888 = vst [vmem:[#allocation2 + $0x2d0] sm:$0xff] %v4760_v28 }
 0x573   : > { %v3777_v41 = vpop.f32.mrf.mxu2  ;;  %v3442_v42 = vpop.f32.mrf.mxu0 }
 0x574   : > { %v3946_v7 = vpop.f32.mrf.mxu3  ;;  %v3443_v34 = vadd.f32 %v3442_v42, %v8604_v53  ;;  %v3611_v39 = vpop.f32.mrf.mxu1 }
 0x575   : > { %v9212_v8 = vadd.f32 %v3946_v7, %v3777_v41 }
 0x576   : > { %v3612_v32 = vadd.f32 %v3611_v39, %v3443_v34  ;;  %3481 = vmatmul.bf16.gmra.mxu0 %v9208_v25  ;;  %v10051_v25 = vld [vmem:[#allocation9_spill] sm:$0xff] }
 0x577   : > { %3650 = vmatmul.bf16.gmra.mxu1 %v9210_v63  ;;  %v10044_v63 = vld [vmem:[#allocation7_spill] sm:$0xff] }
 0x578   : > { %3819 = vmatmul.bf16.gmra.mxu2 %v8590_v4  ;;  %v4762_v18 = vadd.f32 %v3612_v32, %v878_v44 }
 0x579   : > { %3988 = vmatmul.bf16.gmra.mxu3 %v10042_v43 }
 0x57a   : > { %4890 = vst [vmem:[#allocation2 + $0x58] sm:$0xff] %v4762_v18  ;;  %v882_v18 = vld [vmem:[#allocation2 + $0x1f8] sm:$0xff] }
 0x57b   : > { %v3780_v29 = vpop.f32.mrf.mxu2  ;;  %v3444_v60 = vpop.f32.mrf.mxu0 }
 0x57c   : > { %v3949_v52 = vpop.f32.mrf.mxu3  ;;  %v3445_v53 = vadd.f32 %v3444_v60, %v8614_v40  ;;  %v3613_v28 = vpop.f32.mrf.mxu1  ;;  %v10046_v40 = vld [vmem:[#allocation135_spill] sm:$0xff]  ;;  %v10047_v60 = vld [vmem:[#allocation136_spill] sm:$0xff] }
 0x57d   : > { %v9219_v31 = vadd.f32 %v3949_v52, %v3780_v29  ;;  %v10045_v29 = vld [vmem:[#allocation8_spill] sm:$0xff] }
 0x57e   : > { %v3614_v41 = vadd.f32 %v3613_v28, %v3445_v53 }
 0x580   : > { %v4764_v7 = vadd.f32 %v3614_v41, %v880_v0 }
 0x582   : > { %4892 = vst [vmem:[#allocation2 + $0x198] sm:$0xff] %v4764_v7  ;;  %v10048_v7 = vld [vmem:[#allocation139_spill] sm:$0xff] }
 0x583   : > { %v3782_v42 = vpop.f32.mrf.mxu2  ;;  %v3447_v39 = vpop.f32.mrf.mxu0 }
 0x584   : > { %v3951_v34 = vpop.f32.mrf.mxu3  ;;  %v3448_v44 = vadd.f32 %v3447_v39, %v8620_v20  ;;  %v3616_v32 = vpop.f32.mrf.mxu1 }
 0x585   : > { %v9222_v4 = vadd.f32 %v3951_v34, %v3782_v42  ;;  %v884_v34 = vld [vmem:[#allocation2 + $0x398] sm:$0xff] }
 0x586   : > { %v3617_v43 = vadd.f32 %v3616_v32, %v3448_v44  ;;  %4002 = vmatmul.bf16.vlgmr.msra.gmra.mxu0 %v10044_v63 }
 0x587   : > { %10043 = vst [vmem:[#allocation121_spill] sm:$0xff] %v9222_v4  ;;  %4171 = vmatmul.bf16.vlgmr.msra.gmra.mxu1 %v10045_v29 }
 0x588   : > { %4340 = vmatmul.bf16.vlgmr.msra.gmra.mxu2 %v10046_v40  ;;  %v4766_v52 = vadd.f32 %v3617_v43, %v882_v18  ;;  %v10050_v18 = vld [vmem:[#allocation140_spill] sm:$0xff] }
 0x589   : > { %4509 = vmatmul.bf16.vlgmr.msra.gmra.mxu3 %v10047_v60  ;;  %v886_v60 = vld [vmem:[#allocation2 + $0x1a0] sm:$0xff] }
 0x58a   : > { %4894 = vst [vmem:[#allocation2 + $0x1f8] sm:$0xff] %v4766_v52 }
 0x58b   : > { %v3785_v53 = vpop.f32.mrf.mxu2  ;;  %v3449_v0 = vpop.f32.mrf.mxu0 }
 0x58c   : > { %v3954_v28 = vpop.f32.mrf.mxu3  ;;  %v3450_v20 = vadd.f32 %v3449_v0, %v10048_v7  ;;  %v3618_v42 = vpop.f32.mrf.mxu1  ;;  %v10054_v7 = vld [vmem:[#allocation138_spill] sm:$0xff] }
 0x58d   : > { %v9229_v41 = vadd.f32 %v3954_v28, %v3785_v53  ;;  %v10052_v53 = vld [vmem:[#allocation10_spill] sm:$0xff]  ;;  %v10053_v28 = vld [vmem:[#allocation137_spill] sm:$0xff] }
 0x58e   : > { %v3619_v39 = vadd.f32 %v3618_v42, %v3450_v20 }
 0x590   : > { %v4768_v44 = vadd.f32 %v3619_v39, %v884_v34 }
 0x592   : > { %4896 = vst [vmem:[#allocation2 + $0x398] sm:$0xff] %v4768_v44  ;;  %v10055_v44 = vld [vmem:[#allocation143_spill] sm:$0xff] }
 0x593   : > { %v3787_v63 = vpop.f32.mrf.mxu2  ;;  %v3452_v29 = vpop.f32.mrf.mxu0 }
 0x594   : > { %v3956_v32 = vpop.f32.mrf.mxu3  ;;  %v3453_v43 = vadd.f32 %v3452_v29, %v10050_v18  ;;  %v3621_v52 = vpop.f32.mrf.mxu1  ;;  %v888_v29 = vld [vmem:[#allocation2 + $0x258] sm:$0xff] }
 0x595   : > { %v9232_v40 = vadd.f32 %v3956_v32, %v3787_v63 }
 0x596   : > { %v3622_v4 = vadd.f32 %v3621_v52, %v3453_v43  ;;  %4007 = vmatmul.bf16.gmra.mxu0 %v10051_v25 }
 0x597   : > { %10049 = vst [vmem:[#allocation122_spill] sm:$0xff] %v9232_v40  ;;  %4176 = vmatmul.bf16.gmra.mxu1 %v10052_v53  ;;  %v10056_v40 = vld [vmem:[#allocation11_spill] sm:$0xff] }
 0x598   : > { %4345 = vmatmul.bf16.gmra.mxu2 %v10053_v28  ;;  %v4770_v0 = vadd.f32 %v3622_v4, %v886_v60 }
 0x599   : > { %4514 = vmatmul.bf16.gmra.mxu3 %v10054_v7 }
 0x59a   : > { %4898 = vst [vmem:[#allocation2 + $0x1a0] sm:$0xff] %v4770_v0  ;;  %v890_v0 = vld [vmem:[#allocation2 + $0xf0] sm:$0xff] }
 0x59b   : > { %v3790_v20 = vpop.f32.mrf.mxu2  ;;  %v3454_v34 = vpop.f32.mrf.mxu0 }
 0x59c   : > { %v3959_v42 = vpop.f32.mrf.mxu3  ;;  %v3455_v63 = vadd.f32 %v3454_v34, %v10055_v44  ;;  %v3623_v32 = vpop.f32.mrf.mxu1  ;;  %v10059_v44 = vld [vmem:[#allocation142_spill] sm:$0xff] }
 0x59d   : > { %v9239_v39 = vadd.f32 %v3959_v42, %v3790_v20  ;;  %v10057_v20 = vld [vmem:[#allocation12_spill] sm:$0xff]  ;;  %v10058_v42 = vld [vmem:[#allocation141_spill] sm:$0xff] }
 0x59e   : > { %v3624_v18 = vadd.f32 %v3623_v32, %v3455_v63 }
 0x5a0   : > { %v4772_v43 = vadd.f32 %v3624_v18, %v888_v29 }
 0x5a2   : > { %4900 = vst [vmem:[#allocation2 + $0x258] sm:$0xff] %v4772_v43 }
 0x5a3   : > { %v3792_v25 = vpop.f32.mrf.mxu2  ;;  %v3457_v53 = vpop.f32.mrf.mxu0 }
 0x5a4   : > { %v3961_v52 = vpop.f32.mrf.mxu3  ;;  %v3458_v4 = vadd.f32 %v3457_v53, %v8658_v3  ;;  %v3626_v60 = vpop.f32.mrf.mxu1 }
 0x5a5   : > { %v9242_v28 = vadd.f32 %v3961_v52, %v3792_v25  ;;  %v892_v25 = vld [vmem:[#allocation2 + $0x170] sm:$0xff] }
 0x5a6   : > { %v3627_v7 = vadd.f32 %v3626_v60, %v3458_v4  ;;  %4012 = vmatmul.bf16.gmra.mxu0 %v10056_v40 }
 0x5a7   : > { %4181 = vmatmul.bf16.gmra.mxu1 %v10057_v20 }
 0x5a8   : > { %4350 = vmatmul.bf16.gmra.mxu2 %v10058_v42  ;;  %v4774_v34 = vadd.f32 %v3627_v7, %v890_v0  ;;  %v894_v42 = vld [vmem:[#allocation2 + $0x250] sm:$0xff] }
 0x5a9   : > { %4519 = vmatmul.bf16.gmra.mxu3 %v10059_v44  ;;  %v10060_v44 = vld [vmem:[#allocation13_spill] sm:$0xff] }
 0x5aa   : > { %4902 = vst [vmem:[#allocation2 + $0xf0] sm:$0xff] %v4774_v34 }
 0x5ab   : > { %v3795_v63 = vpop.f32.mrf.mxu2  ;;  %v3459_v29 = vpop.f32.mrf.mxu0 }
 0x5ac   : > { %v3964_v32 = vpop.f32.mrf.mxu3  ;;  %v3460_v3 = vadd.f32 %v3459_v29, %v8670_v36  ;;  %v3628_v43 = vpop.f32.mrf.mxu1 }
 0x5ad   : > { %v9249_v18 = vadd.f32 %v3964_v32, %v3795_v63  ;;  %v10061_v63 = vld [vmem:[#allocation14_spill] sm:$0xff] }
 0x5ae   : > { %v3629_v52 = vadd.f32 %v3628_v43, %v3460_v3 }
 0x5b0   : > { %v4776_v53 = vadd.f32 %v3629_v52, %v892_v25  ;;  %v896_v52 = vld [vmem:[#allocation2 + $0xb8] sm:$0xff] }
 0x5b2   : > { %4904 = vst [vmem:[#allocation2 + $0x170] sm:$0xff] %v4776_v53 }
 0x5b3   : > { %v3797_v40 = vpop.f32.mrf.mxu2  ;;  %v3462_v60 = vpop.f32.mrf.mxu0 }
 0x5b4   : > { %v3966_v4 = vpop.f32.mrf.mxu3  ;;  %v3463_v0 = vadd.f32 %v3462_v60, %v8676_v15  ;;  %v3631_v7 = vpop.f32.mrf.mxu1 }
 0x5b5   : > { %v9252_v20 = vadd.f32 %v3966_v4, %v3797_v40 }
 0x5b6   : > { %v3632_v34 = vadd.f32 %v3631_v7, %v3463_v0  ;;  %4017 = vmatmul.bf16.gmra.mxu0 %v10060_v44  ;;  %v10063_v7 = vld [vmem:[#allocation146_spill] sm:$0xff] }
 0x5b7   : > { %4186 = vmatmul.bf16.gmra.mxu1 %v10061_v63  ;;  %v10064_v63 = vld [vmem:[#allocation15_spill] sm:$0xff] }
 0x5b8   : > { %4355 = vmatmul.bf16.gmra.mxu2 %v8666_v27  ;;  %v4778_v36 = vadd.f32 %v3632_v34, %v894_v42  ;;  %v898_v34 = vld [vmem:[#allocation2 + $0x78] sm:$0xff] }
 0x5b9   : > { %4524 = vmatmul.bf16.gmra.mxu3 %v8668_v1 }
 0x5ba   : > { %4906 = vst [vmem:[#allocation2 + $0x250] sm:$0xff] %v4778_v36  ;;  %v10065_v36 = vld [vmem:[#allocation16_spill] sm:$0xff] }
 0x5bb   : > { %v3800_v32 = vpop.f32.mrf.mxu2  ;;  %v3464_v3 = vpop.f32.mrf.mxu0 }
 0x5bc   : > { %v3969_v29 = vpop.f32.mrf.mxu3  ;;  %v3465_v15 = vadd.f32 %v3464_v3, %v8686_v45  ;;  %v3633_v25 = vpop.f32.mrf.mxu1  ;;  %v10066_v45 = vld [vmem:[#allocation144_spill] sm:$0xff] }
 0x5bd   : > { %v9259_v43 = vadd.f32 %v3969_v29, %v3800_v32  ;;  %v10067_v29 = vld [vmem:[#allocation145_spill] sm:$0xff] }
 0x5be   : > { %v3634_v53 = vadd.f32 %v3633_v25, %v3465_v15 }
 0x5c0   : > { %v4780_v40 = vadd.f32 %v3634_v53, %v896_v52  ;;  %v10068_v53 = vld [vmem:[#allocation149_spill] sm:$0xff] }
 0x5c2   : > { %4908 = vst [vmem:[#allocation2 + $0xb8] sm:$0xff] %v4780_v40 }
 0x5c3   : > { %v3802_v4 = vpop.f32.mrf.mxu2  ;;  %v3467_v0 = vpop.f32.mrf.mxu0 }
 0x5c4   : > { %v3971_v60 = vpop.f32.mrf.mxu3  ;;  %v3468_v1 = vadd.f32 %v3467_v0, %v10063_v7  ;;  %v3636_v42 = vpop.f32.mrf.mxu1 }
 0x5c5   : > { %v9262_v27 = vadd.f32 %v3971_v60, %v3802_v4  ;;  %v900_v60 = vld [vmem:[#allocation2 + $0x370] sm:$0xff] }
 0x5c6   : > { %v3637_v44 = vadd.f32 %v3636_v42, %v3468_v1  ;;  %4022 = vmatmul.bf16.gmra.mxu0 %v10064_v63 }
 0x5c7   : > { %10062 = vst [vmem:[#allocation131_spill] sm:$0xff] %v9262_v27  ;;  %4191 = vmatmul.bf16.gmra.mxu1 %v10065_v36  ;;  %v10071_v27 = vld [vmem:[#allocation17_spill] sm:$0xff] }
 0x5c8   : > { %4360 = vmatmul.bf16.gmra.mxu2 %v10066_v45  ;;  %v4782_v32 = vadd.f32 %v3637_v44, %v898_v34  ;;  %v10070_v34 = vld [vmem:[#allocation150_spill] sm:$0xff] }
 0x5c9   : > { %4529 = vmatmul.bf16.gmra.mxu3 %v10067_v29 }
 0x5ca   : > { %4910 = vst [vmem:[#allocation2 + $0x78] sm:$0xff] %v4782_v32  ;;  %v902_v32 = vld [vmem:[#allocation2 + $0x278] sm:$0xff] }
 0x5cb   : > { %v3805_v3 = vpop.f32.mrf.mxu2  ;;  %v3469_v25 = vpop.f32.mrf.mxu0 }
 0x5cc   : > { %v3974_v15 = vpop.f32.mrf.mxu3  ;;  %v3470_v40 = vadd.f32 %v3469_v25, %v10068_v53  ;;  %v3638_v4 = vpop.f32.mrf.mxu1  ;;  %v10074_v53 = vld [vmem:[#allocation148_spill] sm:$0xff] }
 0x5cd   : > { %v9269_v52 = vadd.f32 %v3974_v15, %v3805_v3  ;;  %v10072_v3 = vld [vmem:[#allocation18_spill] sm:$0xff]  ;;  %v10073_v15 = vld [vmem:[#allocation147_spill] sm:$0xff] }
 0x5ce   : > { %v3639_v0 = vadd.f32 %v3638_v4, %v3470_v40 }
 0x5d0   : > { %v4784_v7 = vadd.f32 %v3639_v0, %v900_v60 }
 0x5d2   : > { %4912 = vst [vmem:[#allocation2 + $0x370] sm:$0xff] %v4784_v7  ;;  %v10075_v7 = vld [vmem:[#allocation153_spill] sm:$0xff] }
 0x5d3   : > { %v3807_v1 = vpop.f32.mrf.mxu2  ;;  %v3472_v63 = vpop.f32.mrf.mxu0 }
 0x5d4   : > { %v3976_v42 = vpop.f32.mrf.mxu3  ;;  %v3473_v44 = vadd.f32 %v3472_v63, %v10070_v34  ;;  %v3641_v45 = vpop.f32.mrf.mxu1  ;;  %v904_v63 = vld [vmem:[#allocation2 + $0x228] sm:$0xff] }
 0x5d5   : > { %v9272_v36 = vadd.f32 %v3976_v42, %v3807_v1 }
 0x5d6   : > { %v3642_v29 = vadd.f32 %v3641_v45, %v3473_v44  ;;  %4027 = vmatmul.bf16.gmra.mxu0 %v10071_v27 }
 0x5d7   : > { %10069 = vst [vmem:[#allocation127_spill] sm:$0xff] %v9272_v36  ;;  %4196 = vmatmul.bf16.gmra.mxu1 %v10072_v3  ;;  %v10076_v36 = vld [vmem:[#allocation19_spill] sm:$0xff] }
 0x5d8   : > { %4365 = vmatmul.bf16.gmra.mxu2 %v10073_v15  ;;  %v4786_v25 = vadd.f32 %v3642_v29, %v902_v32 }
 0x5d9   : > { %4534 = vmatmul.bf16.gmra.mxu3 %v10074_v53 }
 0x5da   : > { %4914 = vst [vmem:[#allocation2 + $0x278] sm:$0xff] %v4786_v25  ;;  %v906_v25 = vld [vmem:[#allocation2 + $0x148] sm:$0xff] }
 0x5db   : > { %v3810_v40 = vpop.f32.mrf.mxu2  ;;  %v3474_v60 = vpop.f32.mrf.mxu0 }
 0x5dc   : > { %v3979_v4 = vpop.f32.mrf.mxu3  ;;  %v3475_v1 = vadd.f32 %v3474_v60, %v10075_v7  ;;  %v3643_v42 = vpop.f32.mrf.mxu1  ;;  %v10079_v7 = vld [vmem:[#allocation152_spill] sm:$0xff] }
 0x5dd   : > { %v9279_v0 = vadd.f32 %v3979_v4, %v3810_v40  ;;  %v10077_v40 = vld [vmem:[#allocation20_spill] sm:$0xff]  ;;  %v10078_v4 = vld [vmem:[#allocation151_spill] sm:$0xff] }
 0x5de   : > { %v3644_v34 = vadd.f32 %v3643_v42, %v3475_v1 }
 0x5e0   : > { %v4788_v44 = vadd.f32 %v3644_v34, %v904_v63 }
 0x5e2   : > { %4916 = vst [vmem:[#allocation2 + $0x228] sm:$0xff] %v4788_v44 }
 0x5e3   : > { %v3812_v27 = vpop.f32.mrf.mxu2  ;;  %v3477_v3 = vpop.f32.mrf.mxu0 }
 0x5e4   : > { %v3981_v45 = vpop.f32.mrf.mxu3  ;;  %v3478_v32 = vadd.f32 %v3477_v3, %v8732_v16  ;;  %v3646_v29 = vpop.f32.mrf.mxu1 }
 0x5e5   : > { %v9282_v15 = vadd.f32 %v3981_v45, %v3812_v27  ;;  %v908_v27 = vld [vmem:[#allocation2 + $0x68] sm:$0xff] }
 0x5e6   : > { %v3647_v53 = vadd.f32 %v3646_v29, %v3478_v32  ;;  %4032 = vmatmul.bf16.gmra.mxu0 %v10076_v36 }
 0x5e7   : > { %4201 = vmatmul.bf16.gmra.mxu1 %v10077_v40 }
 0x5e8   : > { %4370 = vmatmul.bf16.gmra.mxu2 %v10078_v4  ;;  %v4790_v60 = vadd.f32 %v3647_v53, %v906_v25  ;;  %v910_v4 = vld [vmem:[#allocation2 + $0x298] sm:$0xff] }
 0x5e9   : > { %4539 = vmatmul.bf16.gmra.mxu3 %v10079_v7  ;;  %v10080_v7 = vld [vmem:[#allocation21_spill] sm:$0xff] }
 0x5ea   : > { %4918 = vst [vmem:[#allocation2 + $0x148] sm:$0xff] %v4790_v60 }
 0x5eb   : > { %v3815_v1 = vpop.f32.mrf.mxu2  ;;  %v3479_v63 = vpop.f32.mrf.mxu0 }
 0x5ec   : > { %v3984_v42 = vpop.f32.mrf.mxu3  ;;  %v3480_v16 = vadd.f32 %v3479_v63, %v8742_v55  ;;  %v3648_v44 = vpop.f32.mrf.mxu1 }
 0x5ed   : > { %v9289_v34 = vadd.f32 %v3984_v42, %v3815_v1  ;;  %v10081_v1 = vld [vmem:[#allocation22_spill] sm:$0xff] }
 0x5ee   : > { %v3649_v45 = vadd.f32 %v3648_v44, %v3480_v16 }
 0x5f0   : > { %v4792_v3 = vadd.f32 %v3649_v45, %v908_v27  ;;  %v912_v45 = vld [vmem:[#allocation2 + $0x310] sm:$0xff] }
 0x5f2   : > { %4920 = vst [vmem:[#allocation2 + $0x68] sm:$0xff] %v4792_v3 }
 0x5f3   : > { %v3817_v36 = vpop.f32.mrf.mxu2  ;;  %v3482_v29 = vpop.f32.mrf.mxu0 }
 0x5f4   : > { %v3986_v32 = vpop.f32.mrf.mxu3  ;;  %v3483_v25 = vadd.f32 %v3482_v29, %v8748_v50  ;;  %v3651_v53 = vpop.f32.mrf.mxu1 }
 0x5f5   : > { %v9292_v40 = vadd.f32 %v3986_v32, %v3817_v36 }
 0x5f6   : > { %v3652_v60 = vadd.f32 %v3651_v53, %v3483_v25  ;;  %4037 = vmatmul.bf16.gmra.mxu0 %v10080_v7 }
 0x5f7   : > { %4206 = vmatmul.bf16.gmra.mxu1 %v10081_v1 }
 0x5f8   : > { %4375 = vmatmul.bf16.gmra.mxu2 %v8738_v59  ;;  %v4794_v55 = vadd.f32 %v3652_v60, %v910_v4  ;;  %v10082_v4 = vld [vmem:[#allocation23_spill] sm:$0xff]  ;;  %v10083_v60 = vld [vmem:[#allocation24_spill] sm:$0xff] }
 0x5f9   : > { %4544 = vmatmul.bf16.gmra.mxu3 %v8740_v5 }
 0x5fa   : > { %4922 = vst [vmem:[#allocation2 + $0x298] sm:$0xff] %v4794_v55 }
 0x5fb   : > { %v3820_v42 = vpop.f32.mrf.mxu2  ;;  %v3484_v16 = vpop.f32.mrf.mxu0 }
 0x5fc   : > { %v3989_v63 = vpop.f32.mrf.mxu3  ;;  %v3485_v50 = vadd.f32 %v3484_v16, %v8759_v11  ;;  %v3653_v27 = vpop.f32.mrf.mxu1 }
 0x5fd   : > { %v9299_v44 = vadd.f32 %v3989_v63, %v3820_v42  ;;  %v787_v63 = vld [vmem:[#allocation2 + $0x3b0] sm:$0xff] }
 0x5fe   : > { %v3654_v3 = vadd.f32 %v3653_v27, %v3485_v50 }
 0x600   : > { %v4796_v36 = vadd.f32 %v3654_v3, %v912_v45 }
 0x602   : > { %4924 = vst [vmem:[#allocation2 + $0x310] sm:$0xff] %v4796_v36 }
 0x603   : > { %v3822_v32 = vpop.f32.mrf.mxu2  ;;  %v4003_v25 = vpop.f32.mrf.mxu0 }
 0x604   : > { %v3991_v29 = vpop.f32.mrf.mxu3  ;;  %v4172_v53 = vpop.f32.mrf.mxu1  ;;  %v4004_v5 = vadd.f32 %v4003_v25, %v8765_v2 }
 0x605   : > { %v9302_v59 = vadd.f32 %v3991_v29, %v3822_v32 }
 0x606   : > { %4042 = vmatmul.bf16.gmra.mxu0 %v10082_v4  ;;  %v4173_v11 = vadd.f32 %v4172_v53, %v4004_v5  ;;  %v10084_v5 = vld [vmem:[#allocation25_spill] sm:$0xff] }
 0x607   : > { %4211 = vmatmul.bf16.gmra.mxu1 %v10083_v60  ;;  %v10085_v60 = vld [vmem:[#allocation26_spill] sm:$0xff] }
 0x608   : > { %4380 = vmatmul.bf16.gmra.mxu2 %v8754_v14  ;;  %v789_v14 = vld [vmem:[#allocation2 + $0x18] sm:$0xff] }
 0x609   : > { %4549 = vmatmul.bf16.gmra.mxu3 %v8756_v38 }
 0x60b   : > { %v4341_v7 = vpop.f32.mrf.mxu2  ;;  %v4005_v42 = vpop.f32.mrf.mxu0 }
 0x60c   : > { %v4342_v1 = vadd.f32 %v4341_v7, %v4173_v11  ;;  %v4510_v55 = vpop.f32.mrf.mxu3  ;;  %v4174_v16 = vpop.f32.mrf.mxu1  ;;  %v4006_v27 = vadd.f32 %v4005_v42, %v8776_v37  ;;  %v791_v42 = vld [vmem:[#allocation2 + $0x368] sm:$0xff] }
 0x60e   : > { %v4511_v50 = vadd.f32 %v4510_v55, %v4342_v1  ;;  %v4175_v2 = vadd.f32 %v4174_v16, %v4006_v27 }
 0x610   : > { %v4671_v45 = vadd.f32 %v4511_v50, %v787_v63 }
 0x612   : > { %4799 = vst [vmem:[#allocation2 + $0x3b0] sm:$0xff] %v4671_v45 }
 0x613   : > { %v4343_v3 = vpop.f32.mrf.mxu2  ;;  %v4008_v29 = vpop.f32.mrf.mxu0 }
 0x614   : > { %v4344_v36 = vadd.f32 %v4343_v3, %v4175_v2  ;;  %v4512_v32 = vpop.f32.mrf.mxu3  ;;  %v4177_v25 = vpop.f32.mrf.mxu1  ;;  %v4009_v53 = vadd.f32 %v4008_v29, %v8783_v21 }
 0x616   : > { %v4513_v38 = vadd.f32 %v4512_v32, %v4344_v36  ;;  %4047 = vmatmul.bf16.gmra.mxu0 %v10084_v5  ;;  %v4178_v37 = vadd.f32 %v4177_v25, %v4009_v53  ;;  %v793_v36 = vld [vmem:[#allocation2 + $0x48] sm:$0xff]  ;;  %v10088_v53 = vld [vmem:[#allocation154_spill] sm:$0xff] }
 0x617   : > { %4216 = vmatmul.bf16.gmra.mxu1 %v10085_v60 }
 0x618   : > { %v4673_v4 = vadd.f32 %v4513_v38, %v789_v14  ;;  %4385 = vmatmul.bf16.gmra.mxu2 %v8772_v58  ;;  %v10086_v14 = vld [vmem:[#allocation27_spill] sm:$0xff]  ;;  %v10087_v38 = vld [vmem:[#allocation28_spill] sm:$0xff] }
 0x619   : > { %4554 = vmatmul.bf16.gmra.mxu3 %v8774_v35 }
 0x61a   : > { %4801 = vst [vmem:[#allocation2 + $0x18] sm:$0xff] %v4673_v4 }
 0x61b   : > { %v4346_v11 = vpop.f32.mrf.mxu2  ;;  %v4010_v55 = vpop.f32.mrf.mxu0 }
 0x61c   : > { %v4347_v7 = vadd.f32 %v4346_v11, %v4178_v37  ;;  %v4515_v1 = vpop.f32.mrf.mxu3  ;;  %v4179_v63 = vpop.f32.mrf.mxu1  ;;  %v4011_v21 = vadd.f32 %v4010_v55, %v8794_v54  ;;  %v10089_v54 = vld [vmem:[#allocation155_spill] sm:$0xff] }
 0x61e   : > { %v4516_v16 = vadd.f32 %v4515_v1, %v4347_v7  ;;  %v4180_v27 = vadd.f32 %v4179_v63, %v4011_v21  ;;  %v795_v7 = vld [vmem:[#allocation2 + $0x110] sm:$0xff] }
 0x620   : > { %v4675_v50 = vadd.f32 %v4516_v16, %v791_v42 }
 0x622   : > { %4803 = vst [vmem:[#allocation2 + $0x368] sm:$0xff] %v4675_v50 }
 0x623   : > { %v4348_v45 = vpop.f32.mrf.mxu2  ;;  %v4013_v58 = vpop.f32.mrf.mxu0 }
 0x624   : > { %v4349_v2 = vadd.f32 %v4348_v45, %v4180_v27  ;;  %v4517_v3 = vpop.f32.mrf.mxu3  ;;  %v4182_v35 = vpop.f32.mrf.mxu1  ;;  %v4014_v29 = vadd.f32 %v4013_v58, %v8806_v49  ;;  %v797_v45 = vld [vmem:[#allocation2 + $0x98] sm:$0xff] }
 0x626   : > { %v4518_v32 = vadd.f32 %v4517_v3, %v4349_v2  ;;  %4052 = vmatmul.bf16.gmra.mxu0 %v10086_v14  ;;  %v4183_v5 = vadd.f32 %v4182_v35, %v4014_v29 }
 0x627   : > { %4221 = vmatmul.bf16.gmra.mxu1 %v10087_v38 }
 0x628   : > { %v4677_v25 = vadd.f32 %v4518_v32, %v793_v36  ;;  %4390 = vmatmul.bf16.gmra.mxu2 %v10088_v53  ;;  %v10090_v36 = vld [vmem:[#allocation29_spill] sm:$0xff]  ;;  %v10091_v32 = vld [vmem:[#allocation30_spill] sm:$0xff] }
 0x629   : > { %4559 = vmatmul.bf16.gmra.mxu3 %v10089_v54  ;;  %v799_v53 = vld [vmem:[#allocation2 + $0x150] sm:$0xff] }
 0x62a   : > { %4805 = vst [vmem:[#allocation2 + $0x48] sm:$0xff] %v4677_v25 }
 0x62b   : > { %v4351_v4 = vpop.f32.mrf.mxu2  ;;  %v4015_v11 = vpop.f32.mrf.mxu0 }
 0x62c   : > { %v4352_v60 = vadd.f32 %v4351_v4, %v4183_v5  ;;  %v4520_v37 = vpop.f32.mrf.mxu3  ;;  %v4184_v1 = vpop.f32.mrf.mxu1  ;;  %v4016_v49 = vadd.f32 %v4015_v11, %v8820_v48 }
 0x62e   : > { %v4521_v55 = vadd.f32 %v4520_v37, %v4352_v60  ;;  %v4185_v63 = vadd.f32 %v4184_v1, %v4016_v49  ;;  %v801_v1 = vld [vmem:[#allocation2 + $0x60] sm:$0xff] }
 0x630   : > { %v4679_v42 = vadd.f32 %v4521_v55, %v795_v7 }
 0x632   : > { %4807 = vst [vmem:[#allocation2 + $0x110] sm:$0xff] %v4679_v42  ;;  %v10092_v42 = vld [vmem:[#allocation31_spill] sm:$0xff] }
 0x633   : > { %v4353_v16 = vpop.f32.mrf.mxu2  ;;  %v4018_v27 = vpop.f32.mrf.mxu0 }
 0x634   : > { %v4354_v21 = vadd.f32 %v4353_v16, %v4185_v63  ;;  %v4522_v50 = vpop.f32.mrf.mxu3  ;;  %v4187_v2 = vpop.f32.mrf.mxu1  ;;  %v4019_v58 = vadd.f32 %v4018_v27, %v8827_v33  ;;  %v10093_v16 = vld [vmem:[#allocation32_spill] sm:$0xff] }
 0x636   : > { %v4523_v3 = vadd.f32 %v4522_v50, %v4354_v21  ;;  %4057 = vmatmul.bf16.gmra.mxu0 %v10090_v36  ;;  %v4188_v48 = vadd.f32 %v4187_v2, %v4019_v58  ;;  %v803_v2 = vld [vmem:[#allocation2 + $0x388] sm:$0xff] }
 0x637   : > { %4226 = vmatmul.bf16.gmra.mxu1 %v10091_v32 }
 0x638   : > { %v4681_v35 = vadd.f32 %v4523_v3, %v797_v45  ;;  %4395 = vmatmul.bf16.gmra.mxu2 %v8816_v17 }
 0x639   : > { %4564 = vmatmul.bf16.gmra.mxu3 %v8818_v12 }
 0x63a   : > { %4809 = vst [vmem:[#allocation2 + $0x98] sm:$0xff] %v4681_v35 }
 0x63b   : > { %v4356_v29 = vpop.f32.mrf.mxu2  ;;  %v4020_v38 = vpop.f32.mrf.mxu0 }
 0x63c   : > { %v4357_v14 = vadd.f32 %v4356_v29, %v4188_v48  ;;  %v4525_v25 = vpop.f32.mrf.mxu3  ;;  %v4189_v54 = vpop.f32.mrf.mxu1  ;;  %v4021_v33 = vadd.f32 %v4020_v38, %v8838_v47 }
 0x63e   : > { %v4526_v5 = vadd.f32 %v4525_v25, %v4357_v14  ;;  %v4190_v60 = vadd.f32 %v4189_v54, %v4021_v33  ;;  %v805_v14 = vld [vmem:[#allocation2 + $0x340] sm:$0xff] }
 0x640   : > { %v4683_v4 = vadd.f32 %v4526_v5, %v799_v53  ;;  %v10094_v53 = vld [vmem:[#allocation33_spill] sm:$0xff]  ;;  %v10095_v5 = vld [vmem:[#allocation34_spill] sm:$0xff] }
 0x642   : > { %4811 = vst [vmem:[#allocation2 + $0x150] sm:$0xff] %v4683_v4 }
 0x643   : > { %v4358_v37 = vpop.f32.mrf.mxu2  ;;  %v4023_v17 = vpop.f32.mrf.mxu0 }
 0x644   : > { %v4359_v11 = vadd.f32 %v4358_v37, %v4190_v60  ;;  %v4527_v7 = vpop.f32.mrf.mxu3  ;;  %v4192_v12 = vpop.f32.mrf.mxu1  ;;  %v4024_v49 = vadd.f32 %v4023_v17, %v8845_v46 }
 0x646   : > { %v4528_v55 = vadd.f32 %v4527_v7, %v4359_v11  ;;  %4062 = vmatmul.bf16.gmra.mxu0 %v10092_v42  ;;  %v4193_v47 = vadd.f32 %v4192_v12, %v4024_v49  ;;  %v807_v11 = vld [vmem:[#allocation2 + $0x1a8] sm:$0xff] }
 0x647   : > { %4231 = vmatmul.bf16.gmra.mxu1 %v10093_v16 }
 0x648   : > { %v4685_v63 = vadd.f32 %v4528_v55, %v801_v1  ;;  %4400 = vmatmul.bf16.gmra.mxu2 %v8834_v23 }
 0x649   : > { %4569 = vmatmul.bf16.gmra.mxu3 %v8836_v19 }
 0x64a   : > { %4813 = vst [vmem:[#allocation2 + $0x60] sm:$0xff] %v4685_v63  ;;  %v809_v63 = vld [vmem:[#allocation2 + $0x168] sm:$0xff] }
 0x64b   : > { %v4361_v21 = vpop.f32.mrf.mxu2  ;;  %v4025_v45 = vpop.f32.mrf.mxu0 }
 0x64c   : > { %v4362_v50 = vadd.f32 %v4361_v21, %v4193_v47  ;;  %v4530_v27 = vpop.f32.mrf.mxu3  ;;  %v4194_v3 = vpop.f32.mrf.mxu1  ;;  %v4026_v46 = vadd.f32 %v4025_v45, %v8856_v51  ;;  %v10096_v21 = vld [vmem:[#allocation35_spill] sm:$0xff] }
 0x64e   : > { %v4531_v58 = vadd.f32 %v4530_v27, %v4362_v50  ;;  %v4195_v35 = vadd.f32 %v4194_v3, %v4026_v46  ;;  %v10097_v27 = vld [vmem:[#allocation36_spill] sm:$0xff] }
 0x650   : > { %v4687_v36 = vadd.f32 %v4531_v58, %v803_v2 }
 0x652   : > { %4815 = vst [vmem:[#allocation2 + $0x388] sm:$0xff] %v4687_v36  ;;  %v811_v36 = vld [vmem:[#allocation2 + $0x2f8] sm:$0xff] }
 0x653   : > { %v4363_v32 = vpop.f32.mrf.mxu2  ;;  %v4028_v23 = vpop.f32.mrf.mxu0 }
 0x654   : > { %v4364_v48 = vadd.f32 %v4363_v32, %v4195_v35  ;;  %v4532_v29 = vpop.f32.mrf.mxu3  ;;  %v4197_v19 = vpop.f32.mrf.mxu1  ;;  %v4029_v38 = vadd.f32 %v4028_v23, %v8863_v6 }
 0x656   : > { %v4533_v25 = vadd.f32 %v4532_v29, %v4364_v48  ;;  %4067 = vmatmul.bf16.gmra.mxu0 %v10094_v53  ;;  %v4198_v51 = vadd.f32 %v4197_v19, %v4029_v38  ;;  %v10099_v48 = vld [vmem:[#allocation158_spill] sm:$0xff]  ;;  %v813_v38 = vld [vmem:[#allocation2 + $0x28] sm:$0xff] }
 0x657   : > { %4236 = vmatmul.bf16.gmra.mxu1 %v10095_v5  ;;  %v10100_v5 = vld [vmem:[#allocation42_spill] sm:$0xff] }
 0x658   : > { %v4689_v54 = vadd.f32 %v4533_v25, %v805_v14  ;;  %4405 = vmatmul.bf16.gmra.mxu2 %v8852_v61 }
 0x659   : > { %4574 = vmatmul.bf16.gmra.mxu3 %v8854_v30 }
 0x65a   : > { %4817 = vst [vmem:[#allocation2 + $0x340] sm:$0xff] %v4689_v54 }
 0x65b   : > { %v4366_v33 = vpop.f32.mrf.mxu2  ;;  %v4030_v37 = vpop.f32.mrf.mxu0 }
 0x65c   : > { %v4367_v4 = vadd.f32 %v4366_v33, %v4198_v51  ;;  %v4535_v60 = vpop.f32.mrf.mxu3  ;;  %v4199_v7 = vpop.f32.mrf.mxu1  ;;  %v4031_v6 = vadd.f32 %v4030_v37, %v8874_v10  ;;  %v10098_v10 = vld [vmem:[#allocation156_spill] sm:$0xff]  ;;  %v10101_v33 = vld [vmem:[#allocation39_spill] sm:$0xff]  ;;  %v10103_v37 = vld [vmem:[#allocation41_spill] sm:$0xff] }
 0x65e   : > { %v4536_v17 = vadd.f32 %v4535_v60, %v4367_v4  ;;  %v4200_v12 = vadd.f32 %v4199_v7, %v4031_v6  ;;  %v10102_v60 = vld [vmem:[#allocation40_spill] sm:$0xff] }
 0x660   : > { %v4691_v1 = vadd.f32 %v4536_v17, %v807_v11  ;;  %v10104_v11 = vld [vmem:[#allocation157_spill] sm:$0xff] }
 0x662   : > { %4819 = vst [vmem:[#allocation2 + $0x1a8] sm:$0xff] %v4691_v1 }
 0x663   : > { %v4368_v55 = vpop.f32.mrf.mxu2  ;;  %v4033_v61 = vpop.f32.mrf.mxu0 }
 0x664   : > { %v4369_v49 = vadd.f32 %v4368_v55, %v4200_v12  ;;  %v4537_v42 = vpop.f32.mrf.mxu3  ;;  %v4202_v30 = vpop.f32.mrf.mxu1  ;;  %v4034_v47 = vadd.f32 %v4033_v61, %v8886_v26  ;;  %v815_v55 = vld [vmem:[#allocation2 + $0xc0] sm:$0xff] }
 0x665   : > { %v10105_v61 = vld [vmem:[#allocation47_spill] sm:$0xff] }
 0x666   : > { %v4538_v16 = vadd.f32 %v4537_v42, %v4369_v49  ;;  %4072 = vmatmul.bf16.gmra.mxu0 %v10096_v21  ;;  %v4203_v45 = vadd.f32 %v4202_v30, %v4034_v47 }
 0x667   : > { %4241 = vmatmul.bf16.gmra.mxu1 %v10097_v27 }
 0x668   : > { %v4693_v50 = vadd.f32 %v4538_v16, %v809_v63  ;;  %4410 = vmatmul.bf16.gmra.mxu2 %v8870_v9 }
 0x669   : > { %4579 = vmatmul.bf16.gmra.mxu3 %v10098_v10  ;;  %v817_v10 = vld [vmem:[#allocation2 + $0x280] sm:$0xff] }
 0x66a   : > { %4821 = vst [vmem:[#allocation2 + $0x168] sm:$0xff] %v4693_v50 }
 0x66b   : > { %v4371_v2 = vpop.f32.mrf.mxu2  ;;  %v4035_v46 = vpop.f32.mrf.mxu0 }
 0x66c   : > { %v4372_v3 = vadd.f32 %v4371_v2, %v4203_v45  ;;  %v4540_v58 = vpop.f32.mrf.mxu3  ;;  %v4204_v35 = vpop.f32.mrf.mxu1  ;;  %v4036_v26 = vadd.f32 %v4035_v46, %v10099_v48  ;;  %v10107_v46 = vld [vmem:[#allocation45_spill] sm:$0xff]  ;;  %v10110_v48 = vld [vmem:[#allocation38_spill] sm:$0xff] }
 0x66e   : > { %v4541_v32 = vadd.f32 %v4540_v58, %v4372_v3  ;;  %v4205_v23 = vadd.f32 %v4204_v35, %v4036_v26  ;;  %v10106_v3 = vld [vmem:[#allocation48_spill] sm:$0xff]  ;;  %v10108_v35 = vld [vmem:[#allocation46_spill] sm:$0xff] }
 0x670   : > { %v4695_v29 = vadd.f32 %v4541_v32, %v811_v36  ;;  %v10109_v32 = vld [vmem:[#allocation37_spill] sm:$0xff] }
 0x672   : > { %4823 = vst [vmem:[#allocation2 + $0x2f8] sm:$0xff] %v4695_v29 }
 0x673   : > { %v4373_v14 = vpop.f32.mrf.mxu2  ;;  %v4038_v9 = vpop.f32.mrf.mxu0 }
 0x674   : > { %v4374_v19 = vadd.f32 %v4373_v14, %v4205_v23  ;;  %v4542_v25 = vpop.f32.mrf.mxu3  ;;  %v4207_v53 = vpop.f32.mrf.mxu1  ;;  %v4039_v51 = vadd.f32 %v4038_v9, %v10100_v5 }
 0x676   : > { %v4543_v54 = vadd.f32 %v4542_v25, %v4374_v19  ;;  %4077 = vmatmul.bf16.gmra.mxu0 %v10101_v33  ;;  %v4208_v7 = vadd.f32 %v4207_v53, %v4039_v51  ;;  %v819_v25 = vld [vmem:[#allocation2 + $0x3c0] sm:$0xff]  ;;  %v10111_v53 = vld [vmem:[#allocation53_spill] sm:$0xff] }
 0x677   : > { %4246 = vmatmul.bf16.gmra.mxu1 %v10102_v60 }
 0x678   : > { %v4697_v4 = vadd.f32 %v4543_v54, %v813_v38  ;;  %4415 = vmatmul.bf16.gmra.mxu2 %v10103_v37 }
 0x679   : > { %4584 = vmatmul.bf16.gmra.mxu3 %v10104_v11  ;;  %v821_v11 = vld [vmem:[#allocation2 + $0x3e0] sm:$0xff] }
 0x67a   : > { %4825 = vst [vmem:[#allocation2 + $0x28] sm:$0xff] %v4697_v4 }
 0x67b   : > { %v4376_v17 = vpop.f32.mrf.mxu2  ;;  %v4040_v12 = vpop.f32.mrf.mxu0 }
 0x67c   : > { %v4377_v6 = vadd.f32 %v4376_v17, %v4208_v7  ;;  %v4545_v1 = vpop.f32.mrf.mxu3  ;;  %v4209_v49 = vpop.f32.mrf.mxu1  ;;  %v4041_v63 = vadd.f32 %v4040_v12, %v10105_v61  ;;  %v10113_v12 = vld [vmem:[#allocation51_spill] sm:$0xff]  ;;  %v10116_v61 = vld [vmem:[#allocation44_spill] sm:$0xff] }
 0x67e   : > { %v4546_v42 = vadd.f32 %v4545_v1, %v4377_v6  ;;  %v4210_v16 = vadd.f32 %v4209_v49, %v4041_v63  ;;  %v10112_v6 = vld [vmem:[#allocation54_spill] sm:$0xff]  ;;  %v10114_v49 = vld [vmem:[#allocation52_spill] sm:$0xff] }
 0x680   : > { %v4699_v30 = vadd.f32 %v4546_v42, %v815_v55  ;;  %v10115_v42 = vld [vmem:[#allocation43_spill] sm:$0xff] }
 0x682   : > { %4827 = vst [vmem:[#allocation2 + $0xc0] sm:$0xff] %v4699_v30 }
 0x683   : > { %v4378_v47 = vpop.f32.mrf.mxu2  ;;  %v4043_v27 = vpop.f32.mrf.mxu0 }
 0x684   : > { %v4379_v21 = vadd.f32 %v4378_v47, %v4210_v16  ;;  %v4547_v50 = vpop.f32.mrf.mxu3  ;;  %v4212_v45 = vpop.f32.mrf.mxu1  ;;  %v4044_v58 = vadd.f32 %v4043_v27, %v10106_v3 }
 0x686   : > { %v4548_v2 = vadd.f32 %v4547_v50, %v4379_v21  ;;  %4082 = vmatmul.bf16.gmra.mxu0 %v10107_v46  ;;  %v4213_v26 = vadd.f32 %v4212_v45, %v4044_v58  ;;  %v823_v50 = vld [vmem:[#allocation2 + $0x3f8] sm:$0xff]  ;;  %v10117_v45 = vld [vmem:[#allocation59_spill] sm:$0xff] }
 0x687   : > { %4251 = vmatmul.bf16.gmra.mxu1 %v10108_v35 }
 0x688   : > { %v4701_v36 = vadd.f32 %v4548_v2, %v817_v10  ;;  %4420 = vmatmul.bf16.gmra.mxu2 %v10109_v32 }
 0x689   : > { %4589 = vmatmul.bf16.gmra.mxu3 %v10110_v48  ;;  %v825_v48 = vld [vmem:[#allocation2 + $0x128] sm:$0xff] }
 0x68a   : > { %4829 = vst [vmem:[#allocation2 + $0x280] sm:$0xff] %v4701_v36 }
 0x68b   : > { %v4381_v29 = vpop.f32.mrf.mxu2  ;;  %v4045_v19 = vpop.f32.mrf.mxu0 }
 0x68c   : > { %v4382_v23 = vadd.f32 %v4381_v29, %v4213_v26  ;;  %v4550_v14 = vpop.f32.mrf.mxu3  ;;  %v4214_v9 = vpop.f32.mrf.mxu1  ;;  %v4046_v54 = vadd.f32 %v4045_v19, %v10111_v53  ;;  %v10119_v19 = vld [vmem:[#allocation57_spill] sm:$0xff]  ;;  %v10122_v53 = vld [vmem:[#allocation50_spill] sm:$0xff] }
 0x68e   : > { %v4551_v38 = vadd.f32 %v4550_v14, %v4382_v23  ;;  %v4215_v51 = vadd.f32 %v4214_v9, %v4046_v54  ;;  %v10118_v23 = vld [vmem:[#allocation60_spill] sm:$0xff]  ;;  %v10120_v9 = vld [vmem:[#allocation58_spill] sm:$0xff] }
 0x690   : > { %v4703_v5 = vadd.f32 %v4551_v38, %v819_v25  ;;  %v10121_v38 = vld [vmem:[#allocation49_spill] sm:$0xff] }
 0x692   : > { %4831 = vst [vmem:[#allocation2 + $0x3c0] sm:$0xff] %v4703_v5 }
 0x693   : > { %v4383_v33 = vpop.f32.mrf.mxu2  ;;  %v4048_v37 = vpop.f32.mrf.mxu0 }
 0x694   : > { %v4384_v4 = vadd.f32 %v4383_v33, %v4215_v51  ;;  %v4552_v60 = vpop.f32.mrf.mxu3  ;;  %v4217_v7 = vpop.f32.mrf.mxu1  ;;  %v4049_v1 = vadd.f32 %v4048_v37, %v10112_v6 }
 0x696   : > { %v4553_v17 = vadd.f32 %v4552_v60, %v4384_v4  ;;  %4087 = vmatmul.bf16.gmra.mxu0 %v10113_v12  ;;  %v4218_v63 = vadd.f32 %v4217_v7, %v4049_v1  ;;  %v827_v60 = vld [vmem:[#allocation2 + $0x3f0] sm:$0xff] }
 0x697   : > { %4256 = vmatmul.bf16.gmra.mxu1 %v10114_v49  ;;  %v10123_v7 = vld [vmem:[#allocation65_spill] sm:$0xff] }
 0x698   : > { %v4705_v55 = vadd.f32 %v4553_v17, %v821_v11  ;;  %4425 = vmatmul.bf16.gmra.mxu2 %v10115_v42 }
 0x699   : > { %4594 = vmatmul.bf16.gmra.mxu3 %v10116_v61  ;;  %v829_v61 = vld [vmem:[#allocation2 + $0x2c0] sm:$0xff] }
 0x69a   : > { %4833 = vst [vmem:[#allocation2 + $0x3e0] sm:$0xff] %v4705_v55 }
 0x69b   : > { %v4386_v30 = vpop.f32.mrf.mxu2  ;;  %v4050_v21 = vpop.f32.mrf.mxu0 }
 0x69c   : > { %v4387_v16 = vadd.f32 %v4386_v30, %v4218_v63  ;;  %v4555_v47 = vpop.f32.mrf.mxu3  ;;  %v4219_v27 = vpop.f32.mrf.mxu1  ;;  %v4051_v2 = vadd.f32 %v4050_v21, %v10117_v45  ;;  %v10125_v21 = vld [vmem:[#allocation63_spill] sm:$0xff]  ;;  %v10128_v45 = vld [vmem:[#allocation56_spill] sm:$0xff] }
 0x69e   : > { %v4556_v10 = vadd.f32 %v4555_v47, %v4387_v16  ;;  %v4220_v58 = vadd.f32 %v4219_v27, %v4051_v2  ;;  %v10124_v16 = vld [vmem:[#allocation66_spill] sm:$0xff]  ;;  %v10126_v27 = vld [vmem:[#allocation64_spill] sm:$0xff] }
 0x6a0   : > { %v4707_v3 = vadd.f32 %v4556_v10, %v823_v50  ;;  %v10127_v10 = vld [vmem:[#allocation55_spill] sm:$0xff] }
 0x6a2   : > { %4835 = vst [vmem:[#allocation2 + $0x3f8] sm:$0xff] %v4707_v3 }
 0x6a3   : > { %v4388_v46 = vpop.f32.mrf.mxu2  ;;  %v4053_v32 = vpop.f32.mrf.mxu0 }
 0x6a4   : > { %v4389_v36 = vadd.f32 %v4388_v46, %v4220_v58  ;;  %v4557_v35 = vpop.f32.mrf.mxu3  ;;  %v4222_v26 = vpop.f32.mrf.mxu1  ;;  %v4054_v14 = vadd.f32 %v4053_v32, %v10118_v23 }
 0x6a6   : > { %v4558_v29 = vadd.f32 %v4557_v35, %v4389_v36  ;;  %4092 = vmatmul.bf16.gmra.mxu0 %v10119_v19  ;;  %v4223_v54 = vadd.f32 %v4222_v26, %v4054_v14  ;;  %v831_v35 = vld [vmem:[#allocation2 + $0x1e0] sm:$0xff] }
 0x6a7   : > { %4261 = vmatmul.bf16.gmra.mxu1 %v10120_v9  ;;  %v10129_v26 = vld [vmem:[#allocation71_spill] sm:$0xff] }
 0x6a8   : > { %v4709_v25 = vadd.f32 %v4558_v29, %v825_v48  ;;  %4430 = vmatmul.bf16.gmra.mxu2 %v10121_v38 }
 0x6a9   : > { %4599 = vmatmul.bf16.gmra.mxu3 %v10122_v53  ;;  %v833_v53 = vld [vmem:[#allocation2 + $0x10] sm:$0xff] }
 0x6aa   : > { %4837 = vst [vmem:[#allocation2 + $0x128] sm:$0xff] %v4709_v25 }
 0x6ab   : > { %v4391_v5 = vpop.f32.mrf.mxu2  ;;  %v4055_v4 = vpop.f32.mrf.mxu0 }
 0x6ac   : > { %v4392_v51 = vadd.f32 %v4391_v5, %v4223_v54  ;;  %v4560_v33 = vpop.f32.mrf.mxu3  ;;  %v4224_v37 = vpop.f32.mrf.mxu1  ;;  %v4056_v17 = vadd.f32 %v4055_v4, %v10123_v7  ;;  %v10131_v4 = vld [vmem:[#allocation69_spill] sm:$0xff]  ;;  %v10134_v7 = vld [vmem:[#allocation62_spill] sm:$0xff] }
 0x6ae   : > { %v4561_v11 = vadd.f32 %v4560_v33, %v4392_v51  ;;  %v4225_v1 = vadd.f32 %v4224_v37, %v4056_v17  ;;  %v10130_v51 = vld [vmem:[#allocation72_spill] sm:$0xff]  ;;  %v10132_v37 = vld [vmem:[#allocation70_spill] sm:$0xff] }
 0x6b0   : > { %v4711_v6 = vadd.f32 %v4561_v11, %v827_v60  ;;  %v10133_v11 = vld [vmem:[#allocation61_spill] sm:$0xff] }
 0x6b2   : > { %4839 = vst [vmem:[#allocation2 + $0x3f0] sm:$0xff] %v4711_v6 }
 0x6b3   : > { %v4393_v12 = vpop.f32.mrf.mxu2  ;;  %v4058_v42 = vpop.f32.mrf.mxu0 }
 0x6b4   : > { %v4394_v55 = vadd.f32 %v4393_v12, %v4225_v1  ;;  %v4562_v49 = vpop.f32.mrf.mxu3  ;;  %v4227_v63 = vpop.f32.mrf.mxu1  ;;  %v4059_v47 = vadd.f32 %v4058_v42, %v10124_v16 }
 0x6b6   : > { %v4563_v30 = vadd.f32 %v4562_v49, %v4394_v55  ;;  %4097 = vmatmul.bf16.gmra.mxu0 %v10125_v21  ;;  %v4228_v2 = vadd.f32 %v4227_v63, %v4059_v47  ;;  %v835_v49 = vld [vmem:[#allocation2 + $0x240] sm:$0xff]  ;;  %v10135_v63 = vld [vmem:[#allocation77_spill] sm:$0xff] }
 0x6b7   : > { %4266 = vmatmul.bf16.gmra.mxu1 %v10126_v27 }
 0x6b8   : > { %v4713_v50 = vadd.f32 %v4563_v30, %v829_v61  ;;  %4435 = vmatmul.bf16.gmra.mxu2 %v10127_v10 }
 0x6b9   : > { %4604 = vmatmul.bf16.gmra.mxu3 %v10128_v45  ;;  %v837_v45 = vld [vmem:[#allocation2 + $0x3a0] sm:$0xff] }
 0x6ba   : > { %4841 = vst [vmem:[#allocation2 + $0x2c0] sm:$0xff] %v4713_v50 }
 0x6bb   : > { %v4396_v3 = vpop.f32.mrf.mxu2  ;;  %v4060_v36 = vpop.f32.mrf.mxu0 }
 0x6bc   : > { %v4397_v58 = vadd.f32 %v4396_v3, %v4228_v2  ;;  %v4565_v46 = vpop.f32.mrf.mxu3  ;;  %v4229_v32 = vpop.f32.mrf.mxu1  ;;  %v4061_v29 = vadd.f32 %v4060_v36, %v10129_v26  ;;  %v10137_v36 = vld [vmem:[#allocation75_spill] sm:$0xff]  ;;  %v10140_v26 = vld [vmem:[#allocation68_spill] sm:$0xff] }
 0x6be   : > { %v4566_v48 = vadd.f32 %v4565_v46, %v4397_v58  ;;  %v4230_v14 = vadd.f32 %v4229_v32, %v4061_v29  ;;  %v10136_v58 = vld [vmem:[#allocation78_spill] sm:$0xff]  ;;  %v10138_v32 = vld [vmem:[#allocation76_spill] sm:$0xff] }
 0x6c0   : > { %v4715_v23 = vadd.f32 %v4566_v48, %v831_v35  ;;  %v10139_v48 = vld [vmem:[#allocation67_spill] sm:$0xff] }
 0x6c2   : > { %4843 = vst [vmem:[#allocation2 + $0x1e0] sm:$0xff] %v4715_v23 }
 0x6c3   : > { %v4398_v19 = vpop.f32.mrf.mxu2  ;;  %v4063_v38 = vpop.f32.mrf.mxu0 }
 0x6c4   : > { %v4399_v25 = vadd.f32 %v4398_v19, %v4230_v14  ;;  %v4567_v9 = vpop.f32.mrf.mxu3  ;;  %v4232_v54 = vpop.f32.mrf.mxu1  ;;  %v4064_v33 = vadd.f32 %v4063_v38, %v10130_v51 }
 0x6c6   : > { %v4568_v5 = vadd.f32 %v4567_v9, %v4399_v25  ;;  %4102 = vmatmul.bf16.gmra.mxu0 %v10131_v4  ;;  %v4233_v17 = vadd.f32 %v4232_v54, %v4064_v33  ;;  %v839_v9 = vld [vmem:[#allocation2 + $0xd0] sm:$0xff]  ;;  %v10141_v54 = vld [vmem:[#allocation83_spill] sm:$0xff] }
 0x6c7   : > { %4271 = vmatmul.bf16.gmra.mxu1 %v10132_v37 }
 0x6c8   : > { %v4717_v60 = vadd.f32 %v4568_v5, %v833_v53  ;;  %4440 = vmatmul.bf16.gmra.mxu2 %v10133_v11 }
 0x6c9   : > { %4609 = vmatmul.bf16.gmra.mxu3 %v10134_v7  ;;  %v841_v7 = vld [vmem:[#allocation2 + $0x2f0] sm:$0xff] }
 0x6ca   : > { %4845 = vst [vmem:[#allocation2 + $0x10] sm:$0xff] %v4717_v60 }
 0x6cb   : > { %v4401_v6 = vpop.f32.mrf.mxu2  ;;  %v4065_v55 = vpop.f32.mrf.mxu0 }
 0x6cc   : > { %v4402_v1 = vadd.f32 %v4401_v6, %v4233_v17  ;;  %v4570_v12 = vpop.f32.mrf.mxu3  ;;  %v4234_v42 = vpop.f32.mrf.mxu1  ;;  %v4066_v30 = vadd.f32 %v4065_v55, %v10135_v63  ;;  %v10143_v55 = vld [vmem:[#allocation81_spill] sm:$0xff]  ;;  %v10146_v63 = vld [vmem:[#allocation74_spill] sm:$0xff] }
 0x6ce   : > { %v4571_v61 = vadd.f32 %v4570_v12, %v4402_v1  ;;  %v4235_v47 = vadd.f32 %v4234_v42, %v4066_v30  ;;  %v10142_v1 = vld [vmem:[#allocation84_spill] sm:$0xff]  ;;  %v10144_v42 = vld [vmem:[#allocation82_spill] sm:$0xff] }
 0x6d0   : > { %v4719_v16 = vadd.f32 %v4571_v61, %v835_v49  ;;  %v10145_v61 = vld [vmem:[#allocation73_spill] sm:$0xff] }
 0x6d2   : > { %4847 = vst [vmem:[#allocation2 + $0x240] sm:$0xff] %v4719_v16 }
 0x6d3   : > { %v4403_v21 = vpop.f32.mrf.mxu2  ;;  %v4068_v10 = vpop.f32.mrf.mxu0 }
 0x6d4   : > { %v4404_v50 = vadd.f32 %v4403_v21, %v4235_v47  ;;  %v4572_v27 = vpop.f32.mrf.mxu3  ;;  %v4237_v2 = vpop.f32.mrf.mxu1  ;;  %v4069_v46 = vadd.f32 %v4068_v10, %v10136_v58 }
 0x6d6   : > { %v4573_v3 = vadd.f32 %v4572_v27, %v4404_v50  ;;  %4107 = vmatmul.bf16.gmra.mxu0 %v10137_v36  ;;  %v4238_v29 = vadd.f32 %v4237_v2, %v4069_v46  ;;  %v843_v27 = vld [vmem:[#allocation2 + $0x268] sm:$0xff]  ;;  %v10147_v2 = vld [vmem:[#allocation89_spill] sm:$0xff] }
 0x6d7   : > { %4276 = vmatmul.bf16.gmra.mxu1 %v10138_v32 }
 0x6d8   : > { %v4721_v35 = vadd.f32 %v4573_v3, %v837_v45  ;;  %4445 = vmatmul.bf16.gmra.mxu2 %v10139_v48 }
 0x6d9   : > { %4614 = vmatmul.bf16.gmra.mxu3 %v10140_v26  ;;  %v845_v26 = vld [vmem:[#allocation2 + $0x188] sm:$0xff] }
 0x6da   : > { %4849 = vst [vmem:[#allocation2 + $0x3a0] sm:$0xff] %v4721_v35 }
 0x6db   : > { %v4406_v23 = vpop.f32.mrf.mxu2  ;;  %v4070_v25 = vpop.f32.mrf.mxu0 }
 0x6dc   : > { %v4407_v14 = vadd.f32 %v4406_v23, %v4238_v29  ;;  %v4575_v19 = vpop.f32.mrf.mxu3  ;;  %v4239_v38 = vpop.f32.mrf.mxu1  ;;  %v4071_v5 = vadd.f32 %v4070_v25, %v10141_v54  ;;  %v10149_v25 = vld [vmem:[#allocation87_spill] sm:$0xff]  ;;  %v10152_v54 = vld [vmem:[#allocation80_spill] sm:$0xff] }
 0x6de   : > { %v4576_v53 = vadd.f32 %v4575_v19, %v4407_v14  ;;  %v4240_v33 = vadd.f32 %v4239_v38, %v4071_v5  ;;  %v10148_v14 = vld [vmem:[#allocation90_spill] sm:$0xff]  ;;  %v10150_v38 = vld [vmem:[#allocation88_spill] sm:$0xff] }
 0x6e0   : > { %v4723_v51 = vadd.f32 %v4576_v53, %v839_v9  ;;  %v10151_v53 = vld [vmem:[#allocation79_spill] sm:$0xff] }
 0x6e2   : > { %4851 = vst [vmem:[#allocation2 + $0xd0] sm:$0xff] %v4723_v51 }
 0x6e3   : > { %v4408_v4 = vpop.f32.mrf.mxu2  ;;  %v4073_v11 = vpop.f32.mrf.mxu0 }
 0x6e4   : > { %v4409_v60 = vadd.f32 %v4408_v4, %v4240_v33  ;;  %v4577_v37 = vpop.f32.mrf.mxu3  ;;  %v4242_v17 = vpop.f32.mrf.mxu1  ;;  %v4074_v12 = vadd.f32 %v4073_v11, %v10142_v1 }
 0x6e6   : > { %v4578_v6 = vadd.f32 %v4577_v37, %v4409_v60  ;;  %4112 = vmatmul.bf16.gmra.mxu0 %v10143_v55  ;;  %v4243_v30 = vadd.f32 %v4242_v17, %v4074_v12  ;;  %v847_v37 = vld [vmem:[#allocation2 + $0x30] sm:$0xff]  ;;  %v10153_v17 = vld [vmem:[#allocation95_spill] sm:$0xff] }
 0x6e7   : > { %4281 = vmatmul.bf16.gmra.mxu1 %v10144_v42 }
 0x6e8   : > { %v4725_v49 = vadd.f32 %v4578_v6, %v841_v7  ;;  %4450 = vmatmul.bf16.gmra.mxu2 %v10145_v61 }
 0x6e9   : > { %4619 = vmatmul.bf16.gmra.mxu3 %v10146_v63  ;;  %v849_v63 = vld [vmem:[#allocation2 + $0x2a8] sm:$0xff] }
 0x6ea   : > { %4853 = vst [vmem:[#allocation2 + $0x2f0] sm:$0xff] %v4725_v49 }
 0x6eb   : > { %v4411_v16 = vpop.f32.mrf.mxu2  ;;  %v4075_v50 = vpop.f32.mrf.mxu0 }
 0x6ec   : > { %v4412_v47 = vadd.f32 %v4411_v16, %v4243_v30  ;;  %v4580_v21 = vpop.f32.mrf.mxu3  ;;  %v4244_v10 = vpop.f32.mrf.mxu1  ;;  %v4076_v3 = vadd.f32 %v4075_v50, %v10147_v2  ;;  %v10155_v50 = vld [vmem:[#allocation93_spill] sm:$0xff]  ;;  %v10158_v2 = vld [vmem:[#allocation86_spill] sm:$0xff] }
 0x6ee   : > { %v4581_v45 = vadd.f32 %v4580_v21, %v4412_v47  ;;  %v4245_v46 = vadd.f32 %v4244_v10, %v4076_v3  ;;  %v10154_v47 = vld [vmem:[#allocation96_spill] sm:$0xff]  ;;  %v10156_v10 = vld [vmem:[#allocation94_spill] sm:$0xff] }
 0x6f0   : > { %v4727_v58 = vadd.f32 %v4581_v45, %v843_v27  ;;  %v10157_v45 = vld [vmem:[#allocation85_spill] sm:$0xff] }
 0x6f2   : > { %4855 = vst [vmem:[#allocation2 + $0x268] sm:$0xff] %v4727_v58 }
 0x6f3   : > { %v4413_v36 = vpop.f32.mrf.mxu2  ;;  %v4078_v48 = vpop.f32.mrf.mxu0 }
 0x6f4   : > { %v4414_v35 = vadd.f32 %v4413_v36, %v4245_v46  ;;  %v4582_v32 = vpop.f32.mrf.mxu3  ;;  %v4247_v29 = vpop.f32.mrf.mxu1  ;;  %v4079_v19 = vadd.f32 %v4078_v48, %v10148_v14 }
 0x6f6   : > { %v4583_v23 = vadd.f32 %v4582_v32, %v4414_v35  ;;  %4117 = vmatmul.bf16.gmra.mxu0 %v10149_v25  ;;  %v4248_v5 = vadd.f32 %v4247_v29, %v4079_v19  ;;  %v851_v32 = vld [vmem:[#allocation2 + $0x200] sm:$0xff]  ;;  %v10159_v29 = vld [vmem:[#allocation101_spill] sm:$0xff] }
 0x6f7   : > { %4286 = vmatmul.bf16.gmra.mxu1 %v10150_v38 }
 0x6f8   : > { %v4729_v9 = vadd.f32 %v4583_v23, %v845_v26  ;;  %4455 = vmatmul.bf16.gmra.mxu2 %v10151_v53 }
 0x6f9   : > { %4624 = vmatmul.bf16.gmra.mxu3 %v10152_v54  ;;  %v853_v54 = vld [vmem:[#allocation2 + $0x220] sm:$0xff] }
 0x6fa   : > { %4857 = vst [vmem:[#allocation2 + $0x188] sm:$0xff] %v4729_v9 }
 0x6fb   : > { %v4416_v51 = vpop.f32.mrf.mxu2  ;;  %v4080_v60 = vpop.f32.mrf.mxu0 }
 0x6fc   : > { %v4417_v33 = vadd.f32 %v4416_v51, %v4248_v5  ;;  %v4585_v4 = vpop.f32.mrf.mxu3  ;;  %v4249_v11 = vpop.f32.mrf.mxu1  ;;  %v4081_v6 = vadd.f32 %v4080_v60, %v10153_v17  ;;  %v10161_v60 = vld [vmem:[#allocation99_spill] sm:$0xff]  ;;  %v10164_v17 = vld [vmem:[#allocation92_spill] sm:$0xff] }
 0x6fe   : > { %v4586_v7 = vadd.f32 %v4585_v4, %v4417_v33  ;;  %v4250_v12 = vadd.f32 %v4249_v11, %v4081_v6  ;;  %v10160_v33 = vld [vmem:[#allocation102_spill] sm:$0xff]  ;;  %v10162_v11 = vld [vmem:[#allocation100_spill] sm:$0xff] }
 0x700   : > { %v4731_v1 = vadd.f32 %v4586_v7, %v847_v37  ;;  %v10163_v7 = vld [vmem:[#allocation91_spill] sm:$0xff] }
 0x702   : > { %4859 = vst [vmem:[#allocation2 + $0x30] sm:$0xff] %v4731_v1 }
 0x703   : > { %v4418_v55 = vpop.f32.mrf.mxu2  ;;  %v4083_v61 = vpop.f32.mrf.mxu0 }
 0x704   : > { %v4419_v49 = vadd.f32 %v4418_v55, %v4250_v12  ;;  %v4587_v42 = vpop.f32.mrf.mxu3  ;;  %v4252_v30 = vpop.f32.mrf.mxu1  ;;  %v4084_v21 = vadd.f32 %v4083_v61, %v10154_v47 }
 0x706   : > { %v4588_v16 = vadd.f32 %v4587_v42, %v4419_v49  ;;  %4122 = vmatmul.bf16.gmra.mxu0 %v10155_v50  ;;  %v4253_v3 = vadd.f32 %v4252_v30, %v4084_v21  ;;  %v855_v42 = vld [vmem:[#allocation2 + $0x300] sm:$0xff] }
 0x707   : > { %4291 = vmatmul.bf16.gmra.mxu1 %v10156_v10  ;;  %v10165_v30 = vld [vmem:[#allocation107_spill] sm:$0xff] }
 0x708   : > { %v4733_v27 = vadd.f32 %v4588_v16, %v849_v63  ;;  %4460 = vmatmul.bf16.gmra.mxu2 %v10157_v45 }
 0x709   : > { %4629 = vmatmul.bf16.gmra.mxu3 %v10158_v2  ;;  %v857_v2 = vld [vmem:[#allocation2 + $0x178] sm:$0xff] }
 0x70a   : > { %4861 = vst [vmem:[#allocation2 + $0x2a8] sm:$0xff] %v4733_v27 }
 0x70b   : > { %v4421_v58 = vpop.f32.mrf.mxu2  ;;  %v4085_v35 = vpop.f32.mrf.mxu0 }
 0x70c   : > { %v4422_v46 = vadd.f32 %v4421_v58, %v4253_v3  ;;  %v4590_v36 = vpop.f32.mrf.mxu3  ;;  %v4254_v48 = vpop.f32.mrf.mxu1  ;;  %v4086_v23 = vadd.f32 %v4085_v35, %v10159_v29  ;;  %v10167_v35 = vld [vmem:[#allocation105_spill] sm:$0xff]  ;;  %v10170_v29 = vld [vmem:[#allocation98_spill] sm:$0xff] }
 0x70e   : > { %v4591_v26 = vadd.f32 %v4590_v36, %v4422_v46  ;;  %v4255_v19 = vadd.f32 %v4254_v48, %v4086_v23  ;;  %v10166_v46 = vld [vmem:[#allocation108_spill] sm:$0xff]  ;;  %v10168_v48 = vld [vmem:[#allocation106_spill] sm:$0xff] }
 0x710   : > { %v4735_v14 = vadd.f32 %v4591_v26, %v851_v32  ;;  %v10169_v26 = vld [vmem:[#allocation97_spill] sm:$0xff] }
 0x712   : > { %4863 = vst [vmem:[#allocation2 + $0x200] sm:$0xff] %v4735_v14 }
 0x713   : > { %v4423_v25 = vpop.f32.mrf.mxu2  ;;  %v4088_v53 = vpop.f32.mrf.mxu0 }
 0x714   : > { %v4424_v9 = vadd.f32 %v4423_v25, %v4255_v19  ;;  %v4592_v38 = vpop.f32.mrf.mxu3  ;;  %v4257_v5 = vpop.f32.mrf.mxu1  ;;  %v4089_v4 = vadd.f32 %v4088_v53, %v10160_v33 }
 0x716   : > { %v4593_v51 = vadd.f32 %v4592_v38, %v4424_v9  ;;  %4127 = vmatmul.bf16.gmra.mxu0 %v10161_v60  ;;  %v4258_v6 = vadd.f32 %v4257_v5, %v4089_v4  ;;  %v859_v38 = vld [vmem:[#allocation2 + $0x260] sm:$0xff] }
 0x717   : > { %4296 = vmatmul.bf16.gmra.mxu1 %v10162_v11 }
 0x718   : > { %v4737_v37 = vadd.f32 %v4593_v51, %v853_v54  ;;  %4465 = vmatmul.bf16.gmra.mxu2 %v10163_v7  ;;  %v861_v7 = vld [vmem:[#allocation2 + $0x2b8] sm:$0xff] }
 0x719   : > { %4634 = vmatmul.bf16.gmra.mxu3 %v10164_v17 }
 0x71a   : > { %4865 = vst [vmem:[#allocation2 + $0x220] sm:$0xff] %v4737_v37 }
 0x71b   : > { %v4426_v1 = vpop.f32.mrf.mxu2  ;;  %v4090_v49 = vpop.f32.mrf.mxu0 }
 0x71c   : > { %v4427_v12 = vadd.f32 %v4426_v1, %v4258_v6  ;;  %v4595_v55 = vpop.f32.mrf.mxu3  ;;  %v4259_v61 = vpop.f32.mrf.mxu1  ;;  %v4091_v16 = vadd.f32 %v4090_v49, %v10165_v30  ;;  %v10172_v49 = vld [vmem:[#allocation112_spill] sm:$0xff] }
 0x71e   : > { %v4596_v63 = vadd.f32 %v4595_v55, %v4427_v12  ;;  %v4260_v21 = vadd.f32 %v4259_v61, %v4091_v16  ;;  %v10171_v12 = vld [vmem:[#allocation111_spill] sm:$0xff] }
 0x720   : > { %v4739_v47 = vadd.f32 %v4596_v63, %v855_v42 }
 0x722   : > { %4867 = vst [vmem:[#allocation2 + $0x300] sm:$0xff] %v4739_v47  ;;  %v863_v47 = vld [vmem:[#allocation2 + $0x40] sm:$0xff] }
 0x723   : > { %v4428_v50 = vpop.f32.mrf.mxu2  ;;  %v4093_v45 = vpop.f32.mrf.mxu0 }
 0x724   : > { %v4429_v27 = vadd.f32 %v4428_v50, %v4260_v21  ;;  %v4597_v10 = vpop.f32.mrf.mxu3  ;;  %v4262_v3 = vpop.f32.mrf.mxu1  ;;  %v4094_v36 = vadd.f32 %v4093_v45, %v10166_v46  ;;  %v865_v46 = vld [vmem:[#allocation2 + $0xe8] sm:$0xff] }
 0x726   : > { %v4598_v58 = vadd.f32 %v4597_v10, %v4429_v27  ;;  %4132 = vmatmul.bf16.gmra.mxu0 %v10167_v35  ;;  %v4263_v23 = vadd.f32 %v4262_v3, %v4094_v36  ;;  %v10174_v27 = vld [vmem:[#allocation114_spill] sm:$0xff] }
 0x727   : > { %4301 = vmatmul.bf16.gmra.mxu1 %v10168_v48 }
 0x728   : > { %v4741_v32 = vadd.f32 %v4598_v58, %v857_v2  ;;  %4470 = vmatmul.bf16.gmra.mxu2 %v10169_v26  ;;  %v10176_v26 = vld [vmem:[#allocation117_spill] sm:$0xff] }
 0x729   : > { %4639 = vmatmul.bf16.gmra.mxu3 %v10170_v29 }
 0x72a   : > { %4869 = vst [vmem:[#allocation2 + $0x178] sm:$0xff] %v4741_v32  ;;  %v10175_v32 = vld [vmem:[#allocation109_spill] sm:$0xff] }
 0x72b   : > { %v4431_v14 = vpop.f32.mrf.mxu2  ;;  %v4095_v9 = vpop.f32.mrf.mxu0 }
 0x72c   : > { %v4432_v19 = vadd.f32 %v4431_v14, %v4263_v23  ;;  %v4600_v25 = vpop.f32.mrf.mxu3  ;;  %v4264_v53 = vpop.f32.mrf.mxu1  ;;  %v4096_v5 = vadd.f32 %v4095_v9, %v9140_v13  ;;  %v10173_v13 = vld [vmem:[#allocation103_spill] sm:$0xff]  ;;  %v10177_v23 = vld [vmem:[#allocation118_spill] sm:$0xff]  ;;  %v10178_v14 = vld [vmem:[#allocation104_spill] sm:$0xff] }
 0x72e   : > { %v4601_v54 = vadd.f32 %v4600_v25, %v4432_v19  ;;  %v4265_v33 = vadd.f32 %v4264_v53, %v4096_v5  ;;  %v10179_v19 = vld [vmem:[#allocation113_spill] sm:$0xff]  ;;  %v867_v5 = vld [vmem:[#allocation2 + $0x3a8] sm:$0xff] }
 0x730   : > { %v4743_v51 = vadd.f32 %v4601_v54, %v859_v38 }
 0x732   : > { %4871 = vst [vmem:[#allocation2 + $0x260] sm:$0xff] %v4743_v51 }
 0x733   : > { %v4433_v4 = vpop.f32.mrf.mxu2  ;;  %v4098_v11 = vpop.f32.mrf.mxu0 }
 0x734   : > { %v4434_v60 = vadd.f32 %v4433_v4, %v4265_v33  ;;  %v4602_v37 = vpop.f32.mrf.mxu3  ;;  %v4267_v17 = vpop.f32.mrf.mxu1  ;;  %v4099_v1 = vadd.f32 %v4098_v11, %v9147_v56  ;;  %v10180_v4 = vld [vmem:[#allocation120_spill] sm:$0xff] }
 0x736   : > { %v4603_v6 = vadd.f32 %v4602_v37, %v4434_v60  ;;  %4137 = vmatmul.bf16.gmra.mxu0 %v10171_v12  ;;  %v4268_v42 = vadd.f32 %v4267_v17, %v4099_v1  ;;  %v869_v12 = vld [vmem:[#allocation2 + $0x160] sm:$0xff] }
 0x737   : > { %4306 = vmatmul.bf16.gmra.mxu1 %v10172_v49 }
 0x738   : > { %v4745_v55 = vadd.f32 %v4603_v6, %v861_v7  ;;  %4475 = vmatmul.bf16.gmra.mxu2 %v9136_v22 }
 0x739   : > { %4644 = vmatmul.bf16.gmra.mxu3 %v10173_v13 }
 0x73a   : > { %4873 = vst [vmem:[#allocation2 + $0x2b8] sm:$0xff] %v4745_v55 }
 0x73b   : > { %v4436_v61 = vpop.f32.mrf.mxu2  ;;  %v4100_v16 = vpop.f32.mrf.mxu0 }
 0x73c   : > { %v4437_v63 = vadd.f32 %v4436_v61, %v4268_v42  ;;  %v4605_v30 = vpop.f32.mrf.mxu3  ;;  %v4269_v21 = vpop.f32.mrf.mxu1  ;;  %v4101_v56 = vadd.f32 %v4100_v16, %v10174_v27  ;;  %v10181_v42 = vld [vmem:[#allocation123_spill] sm:$0xff] }
 0x73d   : > { %v10184_v16 = vld [vmem:[#allocation119_spill] sm:$0xff] }
 0x73e   : > { %v4606_v50 = vadd.f32 %v4605_v30, %v4437_v63  ;;  %v4270_v45 = vadd.f32 %v4269_v21, %v4101_v56  ;;  %v10182_v63 = vld [vmem:[#allocation124_spill] sm:$0xff]  ;;  %v10183_v30 = vld [vmem:[#allocation110_spill] sm:$0xff] }
 0x740   : > { %v4747_v10 = vadd.f32 %v4606_v50, %v863_v47 }
 0x742   : > { %4875 = vst [vmem:[#allocation2 + $0x40] sm:$0xff] %v4747_v10  ;;  %v871_v10 = vld [vmem:[#allocation2 + $0x210] sm:$0xff] }
 0x743   : > { %v4438_v2 = vpop.f32.mrf.mxu2  ;;  %v4103_v22 = vpop.f32.mrf.mxu0 }
 0x744   : > { %v4439_v3 = vadd.f32 %v4438_v2, %v4270_v45  ;;  %v4607_v58 = vpop.f32.mrf.mxu3  ;;  %v4272_v36 = vpop.f32.mrf.mxu1  ;;  %v4104_v48 = vadd.f32 %v4103_v22, %v10175_v32  ;;  %v873_v32 = vld [vmem:[#allocation2 + $0x1e8] sm:$0xff] }
 0x746   : > { %v4608_v35 = vadd.f32 %v4607_v58, %v4439_v3  ;;  %4142 = vmatmul.bf16.gmra.mxu0 %v10176_v26  ;;  %v4273_v25 = vadd.f32 %v4272_v36, %v4104_v48 }
 0x747   : > { %4311 = vmatmul.bf16.gmra.mxu1 %v10177_v23  ;;  %v10185_v23 = vld [vmem:[#allocation129_spill] sm:$0xff] }
 0x748   : > { %v4749_v29 = vadd.f32 %v4608_v35, %v865_v46  ;;  %4480 = vmatmul.bf16.gmra.mxu2 %v10178_v14 }
 0x749   : > { %4649 = vmatmul.bf16.gmra.mxu3 %v10179_v19  ;;  %v10186_v19 = vld [vmem:[#allocation130_spill] sm:$0xff] }
 0x74a   : > { %4877 = vst [vmem:[#allocation2 + $0xe8] sm:$0xff] %v4749_v29 }
 0x74b   : > { %v4441_v9 = vpop.f32.mrf.mxu2  ;;  %v4105_v54 = vpop.f32.mrf.mxu0 }
 0x74c   : > { %v4442_v38 = vadd.f32 %v4441_v9, %v4273_v25  ;;  %v4610_v53 = vpop.f32.mrf.mxu3  ;;  %v4274_v51 = vpop.f32.mrf.mxu1  ;;  %v4106_v60 = vadd.f32 %v4105_v54, %v10180_v4  ;;  %v10187_v25 = vld [vmem:[#allocation115_spill] sm:$0xff] }
 0x74e   : > { %v4611_v33 = vadd.f32 %v4610_v53, %v4442_v38  ;;  %v4275_v11 = vadd.f32 %v4274_v51, %v4106_v60  ;;  %v875_v51 = vld [vmem:[#allocation2 + $0x1c8] sm:$0xff] }
 0x750   : > { %v4751_v37 = vadd.f32 %v4611_v33, %v867_v5 }
 0x752   : > { %4879 = vst [vmem:[#allocation2 + $0x3a8] sm:$0xff] %v4751_v37 }
 0x753   : > { %v4443_v7 = vpop.f32.mrf.mxu2  ;;  %v4108_v1 = vpop.f32.mrf.mxu0 }
 0x754   : > { %v4444_v17 = vadd.f32 %v4443_v7, %v4275_v11  ;;  %v4612_v6 = vpop.f32.mrf.mxu3  ;;  %v4277_v55 = vpop.f32.mrf.mxu1  ;;  %v4109_v13 = vadd.f32 %v4108_v1, %v9183_v24  ;;  %v877_v1 = vld [vmem:[#allocation2 + $0x1d0] sm:$0xff] }
 0x756   : > { %v4613_v49 = vadd.f32 %v4612_v6, %v4444_v17  ;;  %4147 = vmatmul.bf16.gmra.mxu0 %v10181_v42  ;;  %v4278_v47 = vadd.f32 %v4277_v55, %v4109_v13  ;;  %v10189_v13 = vld [vmem:[#allocation133_spill] sm:$0xff] }
 0x757   : > { %4316 = vmatmul.bf16.gmra.mxu1 %v10182_v63  ;;  %v10191_v63 = vld [vmem:[#allocation125_spill] sm:$0xff] }
 0x758   : > { %v4753_v61 = vadd.f32 %v4613_v49, %v869_v12  ;;  %4485 = vmatmul.bf16.gmra.mxu2 %v10183_v30 }
 0x759   : > { %4654 = vmatmul.bf16.gmra.mxu3 %v10184_v16 }
 0x75a   : > { %4881 = vst [vmem:[#allocation2 + $0x160] sm:$0xff] %v4753_v61  ;;  %v10190_v61 = vld [vmem:[#allocation134_spill] sm:$0xff] }
 0x75b   : > { %v4446_v21 = vpop.f32.mrf.mxu2  ;;  %v4110_v56 = vpop.f32.mrf.mxu0 }
 0x75c   : > { %v4447_v50 = vadd.f32 %v4446_v21, %v4278_v47  ;;  %v4615_v27 = vpop.f32.mrf.mxu3  ;;  %v4279_v45 = vpop.f32.mrf.mxu1  ;;  %v4111_v24 = vadd.f32 %v4110_v56, %v9194_v57  ;;  %v10188_v57 = vld [vmem:[#allocation116_spill] sm:$0xff] }
 0x75e   : > { %v4616_v2 = vadd.f32 %v4615_v27, %v4447_v50  ;;  %v4280_v58 = vadd.f32 %v4279_v45, %v4111_v24  ;;  %v879_v27 = vld [vmem:[#allocation2 + $0x120] sm:$0xff]  ;;  %v10193_v45 = vld [vmem:[#allocation121_spill] sm:$0xff] }
 0x760   : > { %v4755_v3 = vadd.f32 %v4616_v2, %v871_v10 }
 0x762   : > { %4883 = vst [vmem:[#allocation2 + $0x210] sm:$0xff] %v4755_v3 }
 0x763   : > { %v4448_v22 = vpop.f32.mrf.mxu2  ;;  %v4113_v35 = vpop.f32.mrf.mxu0 }
 0x764   : > { %v4449_v46 = vadd.f32 %v4448_v22, %v4280_v58  ;;  %v4617_v36 = vpop.f32.mrf.mxu3  ;;  %v4282_v48 = vpop.f32.mrf.mxu1  ;;  %v4114_v29 = vadd.f32 %v4113_v35, %v9201_v62 }
 0x766   : > { %v4618_v26 = vadd.f32 %v4617_v36, %v4449_v46  ;;  %4152 = vmatmul.bf16.gmra.mxu0 %v10185_v23  ;;  %v4283_v9 = vadd.f32 %v4282_v48, %v4114_v29  ;;  %v881_v36 = vld [vmem:[#allocation2 + $0x2e8] sm:$0xff] }
 0x767   : > { %4321 = vmatmul.bf16.gmra.mxu1 %v10186_v19 }
 0x768   : > { %v4757_v14 = vadd.f32 %v4618_v26, %v873_v32  ;;  %4490 = vmatmul.bf16.gmra.mxu2 %v10187_v25 }
 0x769   : > { %4659 = vmatmul.bf16.gmra.mxu3 %v10188_v57  ;;  %v883_v57 = vld [vmem:[#allocation2 + $0x238] sm:$0xff] }
 0x76a   : > { %4885 = vst [vmem:[#allocation2 + $0x1e8] sm:$0xff] %v4757_v14 }
 0x76b   : > { %v4451_v38 = vpop.f32.mrf.mxu2  ;;  %v4115_v5 = vpop.f32.mrf.mxu0 }
 0x76c   : > { %v4452_v53 = vadd.f32 %v4451_v38, %v4283_v9  ;;  %v4620_v54 = vpop.f32.mrf.mxu3  ;;  %v4284_v33 = vpop.f32.mrf.mxu1  ;;  %v4116_v62 = vadd.f32 %v4115_v5, %v9212_v8  ;;  %v10192_v8 = vld [vmem:[#allocation126_spill] sm:$0xff] }
 0x76e   : > { %v4621_v4 = vadd.f32 %v4620_v54, %v4452_v53  ;;  %v4285_v37 = vadd.f32 %v4284_v33, %v4116_v62  ;;  %v10194_v53 = vld [vmem:[#allocation122_spill] sm:$0xff] }
 0x770   : > { %v4759_v60 = vadd.f32 %v4621_v4, %v875_v51 }
 0x772   : > { %4887 = vst [vmem:[#allocation2 + $0x1c8] sm:$0xff] %v4759_v60 }
 0x773   : > { %v4453_v11 = vpop.f32.mrf.mxu2  ;;  %v4118_v6 = vpop.f32.mrf.mxu0 }
 0x774   : > { %v4454_v7 = vadd.f32 %v4453_v11, %v4285_v37  ;;  %v4622_v17 = vpop.f32.mrf.mxu3  ;;  %v4287_v12 = vpop.f32.mrf.mxu1  ;;  %v4119_v49 = vadd.f32 %v4118_v6, %v9219_v31 }
 0x776   : > { %v4623_v55 = vadd.f32 %v4622_v17, %v4454_v7  ;;  %4157 = vmatmul.bf16.gmra.mxu0 %v10189_v13  ;;  %v4288_v30 = vadd.f32 %v4287_v12, %v4119_v49  ;;  %v887_v13 = vld [vmem:[#allocation2 + $0xa8] sm:$0xff] }
 0x777   : > { %4326 = vmatmul.bf16.gmra.mxu1 %v10190_v61 }
 0x778   : > { %v4761_v42 = vadd.f32 %v4623_v55, %v877_v1  ;;  %4495 = vmatmul.bf16.gmra.mxu2 %v10191_v63 }
 0x779   : > { %4664 = vmatmul.bf16.gmra.mxu3 %v10192_v8 }
 0x77a   : > { %4889 = vst [vmem:[#allocation2 + $0x1d0] sm:$0xff] %v4761_v42 }
 0x77b   : > { %v4456_v16 = vpop.f32.mrf.mxu2  ;;  %v4120_v50 = vpop.f32.mrf.mxu0 }
 0x77c   : > { %v4457_v47 = vadd.f32 %v4456_v16, %v4288_v30  ;;  %v4625_v21 = vpop.f32.mrf.mxu3  ;;  %v4289_v56 = vpop.f32.mrf.mxu1  ;;  %v4121_v31 = vadd.f32 %v4120_v50, %v10193_v45 }
 0x77e   : > { %v4626_v10 = vadd.f32 %v4625_v21, %v4457_v47  ;;  %v4290_v24 = vadd.f32 %v4289_v56, %v4121_v31 }
 0x780   : > { %v4763_v2 = vadd.f32 %v4626_v10, %v879_v27 }
 0x782   : > { %4891 = vst [vmem:[#allocation2 + $0x120] sm:$0xff] %v4763_v2 }
 0x783   : > { %v4458_v3 = vpop.f32.mrf.mxu2  ;;  %v4123_v46 = vpop.f32.mrf.mxu0 }
 0x784   : > { %v4459_v58 = vadd.f32 %v4458_v3, %v4290_v24  ;;  %v4627_v22 = vpop.f32.mrf.mxu3  ;;  %v4292_v35 = vpop.f32.mrf.mxu1  ;;  %v4124_v48 = vadd.f32 %v4123_v46, %v9229_v41  ;;  %v885_v41 = vld [vmem:[#allocation2 + $0x390] sm:$0xff] }
 0x786   : > { %v4628_v32 = vadd.f32 %v4627_v22, %v4459_v58  ;;  %v4293_v29 = vadd.f32 %v4292_v35, %v4124_v48 }
 0x788   : > { %v4765_v26 = vadd.f32 %v4628_v32, %v881_v36 }
 0x78a   : > { %4893 = vst [vmem:[#allocation2 + $0x2e8] sm:$0xff] %v4765_v26 }
 0x78b   : > { %v4461_v23 = vpop.f32.mrf.mxu2  ;;  %v4125_v25 = vpop.f32.mrf.mxu0 }
 0x78c   : > { %v4462_v14 = vadd.f32 %v4461_v23, %v4293_v29  ;;  %v4630_v19 = vpop.f32.mrf.mxu3  ;;  %v4294_v9 = vpop.f32.mrf.mxu1  ;;  %v4126_v54 = vadd.f32 %v4125_v25, %v10194_v53 }
 0x78e   : > { %v4631_v38 = vadd.f32 %v4630_v19, %v4462_v14  ;;  %v4295_v51 = vadd.f32 %v4294_v9, %v4126_v54 }
 0x790   : > { %v4767_v5 = vadd.f32 %v4631_v38, %v883_v57 }
 0x792   : > { %4895 = vst [vmem:[#allocation2 + $0x238] sm:$0xff] %v4767_v5 }
 0x793   : > { %v4463_v33 = vpop.f32.mrf.mxu2  ;;  %v4128_v60 = vpop.f32.mrf.mxu0 }
 0x794   : > { %v4464_v4 = vadd.f32 %v4463_v33, %v4295_v51  ;;  %v4632_v62 = vpop.f32.mrf.mxu3  ;;  %v4297_v37 = vpop.f32.mrf.mxu1  ;;  %v4129_v7 = vadd.f32 %v4128_v60, %v9239_v39  ;;  %v889_v39 = vld [vmem:[#allocation2 + $0x2d8] sm:$0xff] }
 0x796   : > { %v4633_v11 = vadd.f32 %v4632_v62, %v4464_v4  ;;  %v4298_v6 = vadd.f32 %v4297_v37, %v4129_v7  ;;  %v10195_v4 = vld [vmem:[#allocation131_spill] sm:$0xff] }
 0x798   : > { %v4769_v17 = vadd.f32 %v4633_v11, %v885_v41 }
 0x79a   : > { %4897 = vst [vmem:[#allocation2 + $0x390] sm:$0xff] %v4769_v17 }
 0x79b   : > { %v4466_v1 = vpop.f32.mrf.mxu2  ;;  %v4130_v49 = vpop.f32.mrf.mxu0 }
 0x79c   : > { %v4467_v12 = vadd.f32 %v4466_v1, %v4298_v6  ;;  %v4635_v55 = vpop.f32.mrf.mxu3  ;;  %v4299_v42 = vpop.f32.mrf.mxu1  ;;  %v4131_v63 = vadd.f32 %v4130_v49, %v9242_v28  ;;  %v891_v28 = vld [vmem:[#allocation2 + $0x180] sm:$0xff] }
 0x79e   : > { %v4636_v61 = vadd.f32 %v4635_v55, %v4467_v12  ;;  %v4300_v30 = vadd.f32 %v4299_v42, %v4131_v63 }
 0x7a0   : > { %v4771_v8 = vadd.f32 %v4636_v61, %v887_v13 }
 0x7a2   : > { %4899 = vst [vmem:[#allocation2 + $0xa8] sm:$0xff] %v4771_v8  ;;  %v899_v8 = vld [vmem:[#allocation2 + $0x308] sm:$0xff] }
 0x7a3   : > { %v4468_v16 = vpop.f32.mrf.mxu2  ;;  %v4133_v50 = vpop.f32.mrf.mxu0 }
 0x7a4   : > { %v4469_v47 = vadd.f32 %v4468_v16, %v4300_v30  ;;  %v4637_v21 = vpop.f32.mrf.mxu3  ;;  %v4302_v27 = vpop.f32.mrf.mxu1  ;;  %v4134_v10 = vadd.f32 %v4133_v50, %v9249_v18  ;;  %v893_v18 = vld [vmem:[#allocation2 + $0x3d0] sm:$0xff] }
 0x7a6   : > { %v4638_v56 = vadd.f32 %v4637_v21, %v4469_v47  ;;  %v4303_v31 = vadd.f32 %v4302_v27, %v4134_v10  ;;  %v10196_v47 = vld [vmem:[#allocation127_spill] sm:$0xff] }
 0x7a8   : > { %v4773_v45 = vadd.f32 %v4638_v56, %v889_v39 }
 0x7aa   : > { %4901 = vst [vmem:[#allocation2 + $0x2d8] sm:$0xff] %v4773_v45 }
 0x7ab   : > { %v4471_v2 = vpop.f32.mrf.mxu2  ;;  %v4135_v58 = vpop.f32.mrf.mxu0 }
 0x7ac   : > { %v4472_v24 = vadd.f32 %v4471_v2, %v4303_v31  ;;  %v4640_v3 = vpop.f32.mrf.mxu3  ;;  %v4304_v22 = vpop.f32.mrf.mxu1  ;;  %v4136_v36 = vadd.f32 %v4135_v58, %v9252_v20  ;;  %v895_v20 = vld [vmem:[#allocation2 + $0x378] sm:$0xff] }
 0x7ae   : > { %v4641_v46 = vadd.f32 %v4640_v3, %v4472_v24  ;;  %v4305_v32 = vadd.f32 %v4304_v22, %v4136_v36 }
 0x7b0   : > { %v4775_v35 = vadd.f32 %v4641_v46, %v891_v28 }
 0x7b2   : > { %4903 = vst [vmem:[#allocation2 + $0x180] sm:$0xff] %v4775_v35  ;;  %v903_v35 = vld [vmem:[#allocation2 + $0x360] sm:$0xff] }
 0x7b3   : > { %v4473_v48 = vpop.f32.mrf.mxu2  ;;  %v4138_v23 = vpop.f32.mrf.mxu0 }
 0x7b4   : > { %v4474_v26 = vadd.f32 %v4473_v48, %v4305_v32  ;;  %v4642_v29 = vpop.f32.mrf.mxu3  ;;  %v4307_v14 = vpop.f32.mrf.mxu1  ;;  %v4139_v25 = vadd.f32 %v4138_v23, %v9259_v43  ;;  %v897_v43 = vld [vmem:[#allocation2 + $0x38] sm:$0xff] }
 0x7b6   : > { %v4643_v19 = vadd.f32 %v4642_v29, %v4474_v26  ;;  %v4308_v9 = vadd.f32 %v4307_v14, %v4139_v25 }
 0x7b8   : > { %v4777_v57 = vadd.f32 %v4643_v19, %v893_v18 }
 0x7ba   : > { %4905 = vst [vmem:[#allocation2 + $0x3d0] sm:$0xff] %v4777_v57 }
 0x7bb   : > { %v4476_v38 = vpop.f32.mrf.mxu2  ;;  %v4140_v5 = vpop.f32.mrf.mxu0 }
 0x7bc   : > { %v4477_v53 = vadd.f32 %v4476_v38, %v4308_v9  ;;  %v4645_v54 = vpop.f32.mrf.mxu3  ;;  %v4309_v51 = vpop.f32.mrf.mxu1  ;;  %v4141_v62 = vadd.f32 %v4140_v5, %v10195_v4 }
 0x7be   : > { %v4646_v33 = vadd.f32 %v4645_v54, %v4477_v53  ;;  %v4310_v41 = vadd.f32 %v4309_v51, %v4141_v62 }
 0x7c0   : > { %v4779_v60 = vadd.f32 %v4646_v33, %v895_v20 }
 0x7c2   : > { %4907 = vst [vmem:[#allocation2 + $0x378] sm:$0xff] %v4779_v60 }
 0x7c3   : > { %v4478_v37 = vpop.f32.mrf.mxu2  ;;  %v4143_v17 = vpop.f32.mrf.mxu0 }
 0x7c4   : > { %v4479_v11 = vadd.f32 %v4478_v37, %v4310_v41  ;;  %v4647_v7 = vpop.f32.mrf.mxu3  ;;  %v4312_v6 = vpop.f32.mrf.mxu1  ;;  %v4144_v12 = vadd.f32 %v4143_v17, %v9269_v52  ;;  %v901_v52 = vld [vmem:[#allocation2 + $0xc8] sm:$0xff] }
 0x7c6   : > { %v4648_v1 = vadd.f32 %v4647_v7, %v4479_v11  ;;  %v4313_v49 = vadd.f32 %v4312_v6, %v4144_v12 }
 0x7c8   : > { %v4781_v55 = vadd.f32 %v4648_v1, %v897_v43 }
 0x7ca   : > { %4909 = vst [vmem:[#allocation2 + $0x38] sm:$0xff] %v4781_v55 }
 0x7cb   : > { %v4481_v13 = vpop.f32.mrf.mxu2  ;;  %v4145_v63 = vpop.f32.mrf.mxu0 }
 0x7cc   : > { %v4482_v42 = vadd.f32 %v4481_v13, %v4313_v49  ;;  %v4650_v61 = vpop.f32.mrf.mxu3  ;;  %v4314_v30 = vpop.f32.mrf.mxu1  ;;  %v4146_v21 = vadd.f32 %v4145_v63, %v10196_v47 }
 0x7ce   : > { %v4651_v16 = vadd.f32 %v4650_v61, %v4482_v42  ;;  %v4315_v39 = vadd.f32 %v4314_v30, %v4146_v21 }
 0x7d0   : > { %v4783_v50 = vadd.f32 %v4651_v16, %v899_v8 }
 0x7d2   : > { %4911 = vst [vmem:[#allocation2 + $0x308] sm:$0xff] %v4783_v50 }
 0x7d3   : > { %v4483_v27 = vpop.f32.mrf.mxu2  ;;  %v4148_v45 = vpop.f32.mrf.mxu0 }
 0x7d4   : > { %v4484_v56 = vadd.f32 %v4483_v27, %v4315_v39  ;;  %v4652_v10 = vpop.f32.mrf.mxu3  ;;  %v4317_v31 = vpop.f32.mrf.mxu1  ;;  %v4149_v24 = vadd.f32 %v4148_v45, %v9279_v0  ;;  %v905_v0 = vld [vmem:[#allocation2 + $0x348] sm:$0xff]  ;;  %v913_v27 = vld [vmem:[#allocation2 + $0x190] sm:$0xff] }
 0x7d6   : > { %v4653_v2 = vadd.f32 %v4652_v10, %v4484_v56  ;;  %v4318_v58 = vadd.f32 %v4317_v31, %v4149_v24 }
 0x7d8   : > { %v4785_v3 = vadd.f32 %v4653_v2, %v901_v52 }
 0x7da   : > { %4913 = vst [vmem:[#allocation2 + $0xc8] sm:$0xff] %v4785_v3 }
 0x7db   : > { %v4486_v28 = vpop.f32.mrf.mxu2  ;;  %v4150_v36 = vpop.f32.mrf.mxu0 }
 0x7dc   : > { %v4487_v22 = vadd.f32 %v4486_v28, %v4318_v58  ;;  %v4655_v46 = vpop.f32.mrf.mxu3  ;;  %v4319_v32 = vpop.f32.mrf.mxu1  ;;  %v4151_v26 = vadd.f32 %v4150_v36, %v9282_v15  ;;  %v907_v15 = vld [vmem:[#allocation2 + $0xf8] sm:$0xff] }
 0x7de   : > { %v4656_v48 = vadd.f32 %v4655_v46, %v4487_v22  ;;  %v4320_v23 = vadd.f32 %v4319_v32, %v4151_v26 }
 0x7e0   : > { %v4787_v29 = vadd.f32 %v4656_v48, %v903_v35 }
 0x7e2   : > { %4915 = vst [vmem:[#allocation2 + $0x360] sm:$0xff] %v4787_v29 }
 0x7e3   : > { %v4488_v18 = vpop.f32.mrf.mxu2  ;;  %v4153_v25 = vpop.f32.mrf.mxu0 }
 0x7e4   : > { %v4489_v14 = vadd.f32 %v4488_v18, %v4320_v23  ;;  %v4657_v19 = vpop.f32.mrf.mxu3  ;;  %v4322_v57 = vpop.f32.mrf.mxu1  ;;  %v4154_v38 = vadd.f32 %v4153_v25, %v9289_v34  ;;  %v909_v34 = vld [vmem:[#allocation2] sm:$0xff] }
 0x7e6   : > { %v4658_v9 = vadd.f32 %v4657_v19, %v4489_v14  ;;  %v4323_v54 = vadd.f32 %v4322_v57, %v4154_v38 }
 0x7e8   : > { %v4789_v53 = vadd.f32 %v4658_v9, %v905_v0 }
 0x7ea   : > { %4917 = vst [vmem:[#allocation2 + $0x348] sm:$0xff] %v4789_v53 }
 0x7eb   : > { %v4491_v5 = vpop.f32.mrf.mxu2  ;;  %v4155_v33 = vpop.f32.mrf.mxu0 }
 0x7ec   : > { %v4492_v20 = vadd.f32 %v4491_v5, %v4323_v54  ;;  %v4660_v51 = vpop.f32.mrf.mxu3  ;;  %v4324_v4 = vpop.f32.mrf.mxu1  ;;  %v4156_v60 = vadd.f32 %v4155_v33, %v9292_v40  ;;  %v911_v40 = vld [vmem:[#allocation2 + $0x270] sm:$0xff] }
 0x7ee   : > { %v4661_v62 = vadd.f32 %v4660_v51, %v4492_v20  ;;  %v4325_v37 = vadd.f32 %v4324_v4, %v4156_v60 }
 0x7f0   : > { %v4791_v41 = vadd.f32 %v4661_v62, %v907_v15 }
 0x7f2   : > { %4919 = vst [vmem:[#allocation2 + $0xf8] sm:$0xff] %v4791_v41 }
 0x7f3   : > { %v4493_v11 = vpop.f32.mrf.mxu2  ;;  %v4158_v43 = vpop.f32.mrf.mxu0 }
 0x7f4   : > { %v4494_v7 = vadd.f32 %v4493_v11, %v4325_v37  ;;  %v4662_v17 = vpop.f32.mrf.mxu3  ;;  %v4159_v1 = vadd.f32 %v4158_v43, %v9299_v44  ;;  %v4327_v12 = vpop.f32.mrf.mxu1 }
 0x7f6   : > { %v4663_v6 = vadd.f32 %v4662_v17, %v4494_v7  ;;  %v4328_v49 = vadd.f32 %v4327_v12, %v4159_v1 }
 0x7f8   : > { %v4793_v55 = vadd.f32 %v4663_v6, %v909_v34 }
 0x7fa   : > { %4921 = vst [vmem:[#allocation2] sm:$0xff] %v4793_v55 }
 0x7fb   : > { %v4496_v13 = vpop.f32.mrf.mxu2  ;;  %v4160_v63 = vpop.f32.mrf.mxu0 }
 0x7fc   : > { %v4497_v42 = vadd.f32 %v4496_v13, %v4328_v49  ;;  %v4665_v61 = vpop.f32.mrf.mxu3  ;;  %v4161_v30 = vadd.f32 %v4160_v63, %v9302_v59  ;;  %v4329_v47 = vpop.f32.mrf.mxu1 }
 0x7fe   : > { %v4666_v8 = vadd.f32 %v4665_v61, %v4497_v42  ;;  %v4330_v21 = vadd.f32 %v4329_v47, %v4161_v30 }
 0x800   : > { %v4795_v16 = vadd.f32 %v4666_v8, %v911_v40 }
 0x802   : > { %4923 = vst [vmem:[#allocation2 + $0x270] sm:$0xff] %v4795_v16 }
 0x803   : > { %v4498_v50 = vpop.f32.mrf.mxu2 }
 0x804   : > { %v4499_v39 = vadd.f32 %v4498_v50, %v4330_v21  ;;  %v4667_v44 = vpop.f32.mrf.mxu3 }
 0x806   : > { %v4668_v56 = vadd.f32 %v4667_v44, %v4499_v39  ;;  %4929 = sbr.rel (%p6721_p11) target bundleno = 2146 (0x862), region = 63 }
 0x808   : > { %v4797_v10 = vadd.f32 %v4668_v56, %v913_v27 }
 0x80a   : > { %4925 = vst [vmem:[#allocation2 + $0x190] sm:$0xff] %v4797_v10 }
 0x80b   : > { %v4930_v45 = vld [vmem:[#allocation2 + $0x2b0] sm:$0xff]  ;;  %v5058_v59 = vld [vmem:[%s9622_s2] sm:$0x3]  ;;  %v4932_v24 = vld [vmem:[#allocation2 + $0xd8] sm:$0xff] }
 0x80c   : > { %v4931_v52 = vld [vmem:[#allocation2 + $0x3b0] sm:$0xff]  ;;  %v9468_v31 = vperm.slane %v5058_v59, 0  ;;  %v9470_v2 = vperm.slane %v5058_v59, 1  ;;  %v4933_v3 = vld [vmem:[#allocation2 + $0x18] sm:$0xff]  ;;  %v4935_v28 = vld [vmem:[#allocation2 + $0x368] sm:$0xff] }
 0x80d   : > { %v4934_v58 = vld [vmem:[#allocation2 + $0x50] sm:$0xff]  ;;  %v4937_v46 = vld [vmem:[#allocation2 + $0x48] sm:$0xff]  ;;  %v4938_v14 = vld [vmem:[#allocation2 + $0x380] sm:$0xff] }
 0x80e   : > { %v4936_v22 = vld [vmem:[#allocation2 + $0x330] sm:$0xff]  ;;  %v5064_v36 = vadd.f32 %v9468_v31, %v4930_v45  ;;  %v5065_v35 = vadd.f32 %v9470_v2, %v4931_v52  ;;  %v5066_v32 = vadd.f32 %v9468_v31, %v4932_v24  ;;  %v5067_v48 = vadd.f32 %v9470_v2, %v4933_v3  ;;  %v4940_v38 = vld [vmem:[#allocation2 + $0x118] sm:$0xff]  ;;  %v4942_v33 = vld [vmem:[#allocation2 + $0x320] sm:$0xff] }
 0x80f   : > { %v5068_v26 = vadd.f32 %v9468_v31, %v4934_v58  ;;  %v5069_v29 = vadd.f32 %v9470_v2, %v4935_v28  ;;  %v5070_v23 = vadd.f32 %v9468_v31, %v4936_v22  ;;  %v5071_v18 = vadd.f32 %v9470_v2, %v4937_v46  ;;  %v4939_v19 = vld [vmem:[#allocation2 + $0x110] sm:$0xff]  ;;  %v4941_v53 = vld [vmem:[#allocation2 + $0x98] sm:$0xff]  ;;  %v4944_v37 = vld [vmem:[#allocation2 + $0x108] sm:$0xff] }
 0x810   : > { %v5192_v25 = vmax.f32 %v5064_v36, 0.0  ;;  %v5193_v0 = vmax.f32 %v5065_v35, 0.0  ;;  %v5194_v57 = vmax.f32 %v5066_v32, 0.0  ;;  %v5195_v9 = vmax.f32 %v5067_v48, 0.0  ;;  %v4943_v15 = vld [vmem:[#allocation2 + $0x150] sm:$0xff]  ;;  %v4945_v11 = vld [vmem:[#allocation2 + $0x60] sm:$0xff] }
 0x811   : > { %v5196_v54 = vmax.f32 %v5068_v26, 0.0  ;;  %v5197_v5 = vmax.f32 %v5069_v29, 0.0  ;;  %v5198_v20 = vmax.f32 %v5070_v23, 0.0  ;;  %v5199_v51 = vmax.f32 %v5071_v18, 0.0  ;;  %v4946_v6 = vld [vmem:[#allocation2 + $0x2e0] sm:$0xff]  ;;  %v4947_v13 = vld [vmem:[#allocation2 + $0x388] sm:$0xff] }
 0x812   : > { %v5320_v4 = vpack.c.bf16 %v5193_v0, %v5192_v25  ;;  %v5321_v62 = vpack.c.bf16 %v5195_v9, %v5194_v57  ;;  %v5072_v60 = vadd.f32 %v9468_v31, %v4938_v14  ;;  %v5073_v41 = vadd.f32 %v9470_v2, %v4939_v19  ;;  %v4948_v8 = vld [vmem:[#allocation2 + $0x338] sm:$0xff]  ;;  %v4949_v30 = vld [vmem:[#allocation2 + $0x340] sm:$0xff]  ;;  %v4951_v27 = vld [vmem:[#allocation2 + $0x1a8] sm:$0xff] }
 0x813   : > { %v5322_v7 = vpack.c.bf16 %v5197_v5, %v5196_v54  ;;  %v5323_v17 = vpack.c.bf16 %v5199_v51, %v5198_v20  ;;  %v5074_v43 = vadd.f32 %v9468_v31, %v4940_v38  ;;  %v5075_v34 = vadd.f32 %v9470_v2, %v4941_v53  ;;  %v4950_v39 = vld [vmem:[#allocation2 + $0x80] sm:$0xff]  ;;  %v4952_v52 = vld [vmem:[#allocation2 + $0x1b8] sm:$0xff]  ;;  %v4953_v59 = vld [vmem:[#allocation2 + $0x168] sm:$0xff] }
 0x814   : > { %5384 = vst [vmem:[#allocation4] sm:$0xff] %v5320_v4  ;;  %v5200_v1 = vmax.f32 %v5072_v60, 0.0  ;;  %v5201_v12 = vmax.f32 %v5073_v41, 0.0  ;;  %v5076_v55 = vadd.f32 %v9468_v31, %v4942_v33  ;;  %v5077_v49 = vadd.f32 %v9470_v2, %v4943_v15  ;;  %v4954_v22 = vld [vmem:[#allocation2 + $0x3e8] sm:$0xff]  ;;  %v4955_v48 = vld [vmem:[#allocation2 + $0x2f8] sm:$0xff]  ;;  %v4956_v14 = vld [vmem:[#allocation2 + $0x290] sm:$0xff] }
 0x815   : > { %5385 = vst [vmem:[#allocation4 + $0x8] sm:$0xff] %v5321_v62  ;;  %v5202_v42 = vmax.f32 %v5074_v43, 0.0  ;;  %v5203_v61 = vmax.f32 %v5075_v34, 0.0  ;;  %v5078_v63 = vadd.f32 %v9468_v31, %v4944_v37  ;;  %v5079_v40 = vadd.f32 %v9470_v2, %v4945_v11  ;;  %v4957_v19 = vld [vmem:[#allocation2 + $0x28] sm:$0xff]  ;;  %v4958_v38 = vld [vmem:[#allocation2 + $0x138] sm:$0xff]  ;;  %v4959_v53 = vld [vmem:[#allocation2 + $0xc0] sm:$0xff] }
 0x816   : > { %5386 = vst [vmem:[#allocation4 + $0x10] sm:$0xff] %v5322_v7  ;;  %v5324_v16 = vpack.c.bf16 %v5201_v12, %v5200_v1  ;;  %v5204_v47 = vmax.f32 %v5076_v55, 0.0  ;;  %v5205_v21 = vmax.f32 %v5077_v49, 0.0  ;;  %v5080_v50 = vadd.f32 %v9468_v31, %v4946_v6  ;;  %v4960_v33 = vld [vmem:[#allocation2 + $0x1c0] sm:$0xff]  ;;  %v4964_v49 = vld [vmem:[#allocation2 + $0x158] sm:$0xff] }
 0x817   : > { %5387 = vst [vmem:[#allocation4 + $0x18] sm:$0xff] %v5323_v17  ;;  %v5325_v44 = vpack.c.bf16 %v5203_v61, %v5202_v42  ;;  %v5206_v56 = vmax.f32 %v5078_v63, 0.0  ;;  %v5207_v10 = vmax.f32 %v5079_v40, 0.0  ;;  %v5081_v45 = vadd.f32 %v9470_v2, %v4947_v13  ;;  %v4961_v15 = vld [vmem:[#allocation2 + $0x280] sm:$0xff] }
 0x818   : > { %5388 = vst [vmem:[#allocation4 + $0x20] sm:$0xff] %v5324_v16  ;;  %v5326_v24 = vpack.c.bf16 %v5205_v21, %v5204_v47  ;;  %v5208_v3 = vmax.f32 %v5080_v50, 0.0  ;;  %v5082_v58 = vadd.f32 %v9468_v31, %v4948_v8  ;;  %v5083_v28 = vadd.f32 %v9470_v2, %v4949_v30  ;;  %v4962_v37 = vld [vmem:[#allocation2 + $0x100] sm:$0xff]  ;;  %v4966_v8 = vld [vmem:[#allocation2 + $0x218] sm:$0xff] }
 0x819   : > { %5389 = vst [vmem:[#allocation4 + $0x28] sm:$0xff] %v5325_v44  ;;  %v5327_v46 = vpack.c.bf16 %v5207_v10, %v5206_v56  ;;  %v5209_v36 = vmax.f32 %v5081_v45, 0.0  ;;  %v5084_v35 = vadd.f32 %v9468_v31, %v4950_v39  ;;  %v5085_v32 = vadd.f32 %v9470_v2, %v4951_v27  ;;  %v4963_v34 = vld [vmem:[#allocation2 + $0x3c0] sm:$0xff]  ;;  %v4967_v30 = vld [vmem:[#allocation2 + $0x3f8] sm:$0xff]  ;;  %v4968_v39 = vld [vmem:[#allocation2 + $0x8] sm:$0xff] }
 0x81a   : > { %5390 = vst [vmem:[#allocation4 + $0x30] sm:$0xff] %v5326_v24  ;;  %v5210_v26 = vmax.f32 %v5082_v58, 0.0  ;;  %v5211_v29 = vmax.f32 %v5083_v28, 0.0  ;;  %v5086_v23 = vadd.f32 %v9468_v31, %v4952_v52  ;;  %v5087_v18 = vadd.f32 %v9470_v2, %v4953_v59  ;;  %v4965_v13 = vld [vmem:[#allocation2 + $0x3e0] sm:$0xff]  ;;  %v4969_v27 = vld [vmem:[#allocation2 + $0x128] sm:$0xff]  ;;  %v4971_v28 = vld [vmem:[#allocation2 + $0x3f0] sm:$0xff] }
 0x81b   : > { %5391 = vst [vmem:[#allocation4 + $0x38] sm:$0xff] %v5327_v46  ;;  %v5328_v25 = vpack.c.bf16 %v5209_v36, %v5208_v3  ;;  %v5212_v0 = vmax.f32 %v5084_v35, 0.0  ;;  %v5213_v57 = vmax.f32 %v5085_v32, 0.0  ;;  %v5088_v9 = vadd.f32 %v9468_v31, %v4954_v22  ;;  %v4970_v52 = vld [vmem:[#allocation2 + $0x2a0] sm:$0xff] }
 0x81c   : > { %v5329_v54 = vpack.c.bf16 %v5211_v29, %v5210_v26  ;;  %v5214_v5 = vmax.f32 %v5086_v23, 0.0  ;;  %v5215_v20 = vmax.f32 %v5087_v18, 0.0  ;;  %v5089_v51 = vadd.f32 %v9470_v2, %v4955_v48  ;;  %v4972_v32 = vld [vmem:[#allocation2 + $0xa0] sm:$0xff] }
 0x81d   : > { %5392 = vst [vmem:[#allocation4 + $0x40] sm:$0xff] %v5328_v25  ;;  %v5330_v4 = vpack.c.bf16 %v5213_v57, %v5212_v0  ;;  %v5216_v62 = vmax.f32 %v5088_v9, 0.0  ;;  %v5090_v60 = vadd.f32 %v9468_v31, %v4956_v14  ;;  %v5091_v41 = vadd.f32 %v9470_v2, %v4957_v19  ;;  %v4973_v48 = vld [vmem:[#allocation2 + $0x2c0] sm:$0xff]  ;;  %v4974_v14 = vld [vmem:[#allocation2 + $0xb0] sm:$0xff] }
 0x81e   : > { %5393 = vst [vmem:[#allocation4 + $0x48] sm:$0xff] %v5329_v54  ;;  %v5331_v11 = vpack.c.bf16 %v5215_v20, %v5214_v5  ;;  %v5217_v7 = vmax.f32 %v5089_v51, 0.0  ;;  %v5092_v17 = vadd.f32 %v9468_v31, %v4958_v38  ;;  %v5093_v43 = vadd.f32 %v9470_v2, %v4959_v53  ;;  %v4975_v19 = vld [vmem:[#allocation2 + $0x1e0] sm:$0xff]  ;;  %v4976_v38 = vld [vmem:[#allocation2 + $0x1f0] sm:$0xff] }
 0x81f   : > { %5394 = vst [vmem:[#allocation4 + $0x50] sm:$0xff] %v5330_v4  ;;  %v5218_v6 = vmax.f32 %v5090_v60, 0.0  ;;  %v5219_v1 = vmax.f32 %v5091_v41, 0.0  ;;  %v5094_v12 = vadd.f32 %v9468_v31, %v4960_v33  ;;  %v5095_v55 = vadd.f32 %v9470_v2, %v4961_v15  ;;  %v4977_v53 = vld [vmem:[#allocation2 + $0x10] sm:$0xff]  ;;  %v4979_v41 = vld [vmem:[#allocation2 + $0x240] sm:$0xff] }
 0x820   : > { %5395 = vst [vmem:[#allocation4 + $0x58] sm:$0xff] %v5331_v11  ;;  %v5332_v42 = vpack.c.bf16 %v5217_v7, %v5216_v62  ;;  %v5220_v61 = vmax.f32 %v5092_v17, 0.0  ;;  %v5221_v63 = vmax.f32 %v5093_v43, 0.0  ;;  %v5096_v40 = vadd.f32 %v9468_v31, %v4962_v37  ;;  %v4978_v33 = vld [vmem:[#allocation2 + $0x230] sm:$0xff] }
 0x821   : > { %v5333_v16 = vpack.c.bf16 %v5219_v1, %v5218_v6  ;;  %v5222_v47 = vmax.f32 %v5094_v12, 0.0  ;;  %v5223_v21 = vmax.f32 %v5095_v55, 0.0  ;;  %v5097_v50 = vadd.f32 %v9470_v2, %v4963_v34  ;;  %v4980_v43 = vld [vmem:[#allocation2 + $0x90] sm:$0xff]  ;;  %v4981_v34 = vld [vmem:[#allocation2 + $0x3a0] sm:$0xff] }
 0x822   : > { %5396 = vst [vmem:[#allocation4 + $0x60] sm:$0xff] %v5332_v42  ;;  %v5334_v44 = vpack.c.bf16 %v5221_v63, %v5220_v61  ;;  %v5224_v56 = vmax.f32 %v5096_v40, 0.0  ;;  %v5098_v10 = vadd.f32 %v9468_v31, %v4964_v49  ;;  %v5099_v45 = vadd.f32 %v9470_v2, %v4965_v13  ;;  %v4982_v49 = vld [vmem:[#allocation2 + $0x208] sm:$0xff]  ;;  %v4983_v13 = vld [vmem:[#allocation2 + $0xd0] sm:$0xff] }
 0x823   : > { %5397 = vst [vmem:[#allocation4 + $0x68] sm:$0xff] %v5333_v16  ;;  %v5335_v59 = vpack.c.bf16 %v5223_v21, %v5222_v47  ;;  %v5225_v24 = vmax.f32 %v5097_v50, 0.0  ;;  %v5100_v3 = vadd.f32 %v9468_v31, %v4966_v8  ;;  %v5101_v58 = vadd.f32 %v9470_v2, %v4967_v30  ;;  %v4984_v8 = vld [vmem:[#allocation2 + $0x88] sm:$0xff]  ;;  %v4985_v30 = vld [vmem:[#allocation2 + $0x2f0] sm:$0xff] }
 0x824   : > { %5398 = vst [vmem:[#allocation4 + $0x70] sm:$0xff] %v5334_v44  ;;  %v5226_v22 = vmax.f32 %v5098_v10, 0.0  ;;  %v5227_v46 = vmax.f32 %v5099_v45, 0.0  ;;  %v5102_v36 = vadd.f32 %v9468_v31, %v4968_v39  ;;  %v5103_v35 = vadd.f32 %v9470_v2, %v4969_v27  ;;  %v4986_v39 = vld [vmem:[#allocation2 + $0x358] sm:$0xff]  ;;  %v4987_v45 = vld [vmem:[#allocation2 + $0x268] sm:$0xff] }
 0x825   : > { %5399 = vst [vmem:[#allocation4 + $0x78] sm:$0xff] %v5335_v59  ;;  %v5336_v26 = vpack.c.bf16 %v5225_v24, %v5224_v56  ;;  %v5228_v29 = vmax.f32 %v5100_v3, 0.0  ;;  %v5229_v23 = vmax.f32 %v5101_v58, 0.0  ;;  %v5104_v18 = vadd.f32 %v9468_v31, %v4970_v52  ;;  %v4988_v58 = vld [vmem:[#allocation2 + $0x350] sm:$0xff] }
 0x826   : > { %v5337_v25 = vpack.c.bf16 %v5227_v46, %v5226_v22  ;;  %v5230_v0 = vmax.f32 %v5102_v36, 0.0  ;;  %v5231_v57 = vmax.f32 %v5103_v35, 0.0  ;;  %v5105_v9 = vadd.f32 %v9470_v2, %v4971_v28  ;;  %v4989_v28 = vld [vmem:[#allocation2 + $0x188] sm:$0xff] }
 0x827   : > { %5400 = vst [vmem:[#allocation4 + $0x80] sm:$0xff] %v5336_v26  ;;  %v5338_v54 = vpack.c.bf16 %v5229_v23, %v5228_v29  ;;  %v5232_v5 = vmax.f32 %v5104_v18, 0.0  ;;  %v5106_v20 = vadd.f32 %v9468_v31, %v4972_v32  ;;  %v5107_v51 = vadd.f32 %v9470_v2, %v4973_v48  ;;  %v4990_v32 = vld [vmem:[#allocation2 + $0x1d8] sm:$0xff]  ;;  %v4991_v48 = vld [vmem:[#allocation2 + $0x30] sm:$0xff] }
 0x828   : > { %5401 = vst [vmem:[#allocation4 + $0x88] sm:$0xff] %v5337_v25  ;;  %v5339_v15 = vpack.c.bf16 %v5231_v57, %v5230_v0  ;;  %v5233_v4 = vmax.f32 %v5105_v9, 0.0  ;;  %v5108_v62 = vadd.f32 %v9468_v31, %v4974_v14  ;;  %v5109_v60 = vadd.f32 %v9470_v2, %v4975_v19  ;;  %v4992_v14 = vld [vmem:[#allocation2 + $0x140] sm:$0xff]  ;;  %v4993_v19 = vld [vmem:[#allocation2 + $0x2a8] sm:$0xff] }
 0x829   : > { %5402 = vst [vmem:[#allocation4 + $0x90] sm:$0xff] %v5338_v54  ;;  %v5234_v37 = vmax.f32 %v5106_v20, 0.0  ;;  %v5235_v11 = vmax.f32 %v5107_v51, 0.0  ;;  %v5110_v7 = vadd.f32 %v9468_v31, %v4976_v38  ;;  %v5111_v17 = vadd.f32 %v9470_v2, %v4977_v53  ;;  %v4994_v38 = vld [vmem:[#allocation2 + $0x130] sm:$0xff]  ;;  %v4995_v51 = vld [vmem:[#allocation2 + $0x200] sm:$0xff] }
 0x82a   : > { %5403 = vst [vmem:[#allocation4 + $0x98] sm:$0xff] %v5339_v15  ;;  %v5340_v6 = vpack.c.bf16 %v5233_v4, %v5232_v5  ;;  %v5236_v1 = vmax.f32 %v5108_v62, 0.0  ;;  %v5237_v12 = vmax.f32 %v5109_v60, 0.0  ;;  %v5112_v55 = vadd.f32 %v9468_v31, %v4978_v33  ;;  %v4996_v60 = vld [vmem:[#allocation2 + $0x318] sm:$0xff] }
 0x82b   : > { %v5341_v42 = vpack.c.bf16 %v5235_v11, %v5234_v37  ;;  %v5238_v61 = vmax.f32 %v5110_v7, 0.0  ;;  %v5239_v63 = vmax.f32 %v5111_v17, 0.0  ;;  %v5113_v40 = vadd.f32 %v9470_v2, %v4979_v41  ;;  %v4997_v41 = vld [vmem:[#allocation2 + $0x220] sm:$0xff] }
 0x82c   : > { %5404 = vst [vmem:[#allocation4 + $0xa0] sm:$0xff] %v5340_v6  ;;  %v5342_v16 = vpack.c.bf16 %v5237_v12, %v5236_v1  ;;  %v5240_v47 = vmax.f32 %v5112_v55, 0.0  ;;  %v5114_v21 = vadd.f32 %v9468_v31, %v4980_v43  ;;  %v5115_v50 = vadd.f32 %v9470_v2, %v4981_v34  ;;  %v4998_v43 = vld [vmem:[#allocation2 + $0x70] sm:$0xff]  ;;  %v4999_v34 = vld [vmem:[#allocation2 + $0x300] sm:$0xff] }
 0x82d   : > { %5405 = vst [vmem:[#allocation4 + $0xa8] sm:$0xff] %v5341_v42  ;;  %v5343_v27 = vpack.c.bf16 %v5239_v63, %v5238_v61  ;;  %v5241_v44 = vmax.f32 %v5113_v40, 0.0  ;;  %v5116_v56 = vadd.f32 %v9468_v31, %v4982_v49  ;;  %v5117_v10 = vadd.f32 %v9470_v2, %v4983_v13  ;;  %v5000_v49 = vld [vmem:[#allocation2 + $0xe0] sm:$0xff]  ;;  %v5001_v13 = vld [vmem:[#allocation2 + $0x178] sm:$0xff] }
 0x82e   : > { %5406 = vst [vmem:[#allocation4 + $0xb0] sm:$0xff] %v5342_v16  ;;  %v5242_v52 = vmax.f32 %v5114_v21, 0.0  ;;  %v5243_v59 = vmax.f32 %v5115_v50, 0.0  ;;  %v5118_v24 = vadd.f32 %v9468_v31, %v4984_v8  ;;  %v5119_v3 = vadd.f32 %v9470_v2, %v4985_v30  ;;  %v5002_v8 = vld [vmem:[#allocation2 + $0x328] sm:$0xff]  ;;  %v5003_v50 = vld [vmem:[#allocation2 + $0x260] sm:$0xff] }
 0x82f   : > { %5407 = vst [vmem:[#allocation4 + $0xb8] sm:$0xff] %v5343_v27  ;;  %v5344_v22 = vpack.c.bf16 %v5241_v44, %v5240_v47  ;;  %v5244_v46 = vmax.f32 %v5116_v56, 0.0  ;;  %v5245_v36 = vmax.f32 %v5117_v10, 0.0  ;;  %v5120_v35 = vadd.f32 %v9468_v31, %v4986_v39  ;;  %v5004_v10 = vld [vmem:[#allocation2 + $0x3b8] sm:$0xff] }
 0x830   : > { %v5345_v26 = vpack.c.bf16 %v5243_v59, %v5242_v52  ;;  %v5246_v29 = vmax.f32 %v5118_v24, 0.0  ;;  %v5247_v23 = vmax.f32 %v5119_v3, 0.0  ;;  %v5121_v18 = vadd.f32 %v9470_v2, %v4987_v45  ;;  %v5005_v45 = vld [vmem:[#allocation2 + $0x2b8] sm:$0xff] }
 0x831   : > { %5408 = vst [vmem:[#allocation4 + $0xc0] sm:$0xff] %v5344_v22  ;;  %v5346_v25 = vpack.c.bf16 %v5245_v36, %v5244_v46  ;;  %v5248_v0 = vmax.f32 %v5120_v35, 0.0  ;;  %v5122_v57 = vadd.f32 %v9468_v31, %v4988_v58  ;;  %v5123_v9 = vadd.f32 %v9470_v2, %v4989_v28  ;;  %v5006_v58 = vld [vmem:[#allocation2 + $0x248] sm:$0xff]  ;;  %v5007_v28 = vld [vmem:[#allocation2 + $0x40] sm:$0xff] }
 0x832   : > { %5409 = vst [vmem:[#allocation4 + $0xc8] sm:$0xff] %v5345_v26  ;;  %v5347_v53 = vpack.c.bf16 %v5247_v23, %v5246_v29  ;;  %v5249_v54 = vmax.f32 %v5121_v18, 0.0  ;;  %v5124_v5 = vadd.f32 %v9468_v31, %v4990_v32  ;;  %v5125_v20 = vadd.f32 %v9470_v2, %v4991_v48  ;;  %v5008_v32 = vld [vmem:[#allocation2 + $0x20] sm:$0xff]  ;;  %v5009_v48 = vld [vmem:[#allocation2 + $0xe8] sm:$0xff] }
 0x833   : > { %5410 = vst [vmem:[#allocation4 + $0xd0] sm:$0xff] %v5346_v25  ;;  %v5250_v33 = vmax.f32 %v5122_v57, 0.0  ;;  %v5251_v15 = vmax.f32 %v5123_v9, 0.0  ;;  %v5126_v4 = vadd.f32 %v9468_v31, %v4992_v14  ;;  %v5127_v62 = vadd.f32 %v9470_v2, %v4993_v19  ;;  %v5010_v14 = vld [vmem:[#allocation2 + $0x288] sm:$0xff] }
 0x834   : > { %5411 = vst [vmem:[#allocation4 + $0xd8] sm:$0xff] %v5347_v53  ;;  %v5348_v37 = vpack.c.bf16 %v5249_v54, %v5248_v0  ;;  %v5252_v11 = vmax.f32 %v5124_v5, 0.0  ;;  %v5253_v7 = vmax.f32 %v5125_v20, 0.0  ;;  %v5128_v17 = vadd.f32 %v9468_v31, %v4994_v38  ;;  %v5011_v9 = vld [vmem:[#allocation2 + $0x3a8] sm:$0xff] }
 0x835   : > { %v5349_v6 = vpack.c.bf16 %v5251_v15, %v5250_v33  ;;  %v5254_v1 = vmax.f32 %v5126_v4, 0.0  ;;  %v5255_v12 = vmax.f32 %v5127_v62, 0.0  ;;  %v5129_v55 = vadd.f32 %v9470_v2, %v4995_v51  ;;  %v5012_v20 = vld [vmem:[#allocation2 + $0x3c8] sm:$0xff]  ;;  %v5013_v51 = vld [vmem:[#allocation2 + $0x160] sm:$0xff] }
 0x836   : > { %5412 = vst [vmem:[#allocation4 + $0xe0] sm:$0xff] %v5348_v37  ;;  %v5350_v42 = vpack.c.bf16 %v5253_v7, %v5252_v11  ;;  %v5256_v61 = vmax.f32 %v5128_v17, 0.0  ;;  %v5130_v63 = vadd.f32 %v9468_v31, %v4996_v60  ;;  %v5131_v40 = vadd.f32 %v9470_v2, %v4997_v41  ;;  %v5014_v60 = vld [vmem:[#allocation2 + $0x2c8] sm:$0xff]  ;;  %v5015_v41 = vld [vmem:[#allocation2 + $0x210] sm:$0xff] }
 0x837   : > { %5413 = vst [vmem:[#allocation4 + $0xe8] sm:$0xff] %v5349_v6  ;;  %v5351_v30 = vpack.c.bf16 %v5255_v12, %v5254_v1  ;;  %v5257_v16 = vmax.f32 %v5129_v55, 0.0  ;;  %v5132_v47 = vadd.f32 %v9468_v31, %v4998_v43  ;;  %v5133_v21 = vadd.f32 %v9470_v2, %v4999_v34  ;;  %v5016_v43 = vld [vmem:[#allocation2 + $0x3d8] sm:$0xff]  ;;  %v5017_v34 = vld [vmem:[#allocation2 + $0x1e8] sm:$0xff] }
 0x838   : > { %5414 = vst [vmem:[#allocation4 + $0xf0] sm:$0xff] %v5350_v42  ;;  %v5258_v39 = vmax.f32 %v5130_v63, 0.0  ;;  %v5259_v27 = vmax.f32 %v5131_v40, 0.0  ;;  %v5134_v44 = vadd.f32 %v9468_v31, %v5000_v49  ;;  %v5135_v56 = vadd.f32 %v9470_v2, %v5001_v13  ;;  %v5018_v49 = vld [vmem:[#allocation2 + $0x1b0] sm:$0xff]  ;;  %v5019_v40 = vld [vmem:[#allocation2 + $0x1c8] sm:$0xff] }
 0x839   : > { %5415 = vst [vmem:[#allocation4 + $0xf8] sm:$0xff] %v5351_v30  ;;  %v5352_v52 = vpack.c.bf16 %v5257_v16, %v5256_v61  ;;  %v5260_v59 = vmax.f32 %v5132_v47, 0.0  ;;  %v5261_v24 = vmax.f32 %v5133_v21, 0.0  ;;  %v5136_v3 = vadd.f32 %v9468_v31, %v5002_v8  ;;  %v5020_v21 = vld [vmem:[#allocation2 + $0x2d0] sm:$0xff] }
 0x83a   : > { %v5353_v22 = vpack.c.bf16 %v5259_v27, %v5258_v39  ;;  %v5262_v46 = vmax.f32 %v5134_v44, 0.0  ;;  %v5263_v36 = vmax.f32 %v5135_v56, 0.0  ;;  %v5137_v35 = vadd.f32 %v9470_v2, %v5003_v50  ;;  %v5021_v50 = vld [vmem:[#allocation2 + $0x1d0] sm:$0xff] }
 0x83b   : > { %5416 = vst [vmem:[#allocation4 + $0x100] sm:$0xff] %v5352_v52  ;;  %v5354_v26 = vpack.c.bf16 %v5261_v24, %v5260_v59  ;;  %v5264_v29 = vmax.f32 %v5136_v3, 0.0  ;;  %v5138_v23 = vadd.f32 %v9468_v31, %v5004_v10  ;;  %v5139_v18 = vadd.f32 %v9470_v2, %v5005_v45  ;;  %v5022_v10 = vld [vmem:[#allocation2 + $0x58] sm:$0xff]  ;;  %v5023_v45 = vld [vmem:[#allocation2 + $0x120] sm:$0xff] }
 0x83c   : > { %5417 = vst [vmem:[#allocation4 + $0x108] sm:$0xff] %v5353_v22  ;;  %v5355_v19 = vpack.c.bf16 %v5263_v36, %v5262_v46  ;;  %v5265_v25 = vmax.f32 %v5137_v35, 0.0  ;;  %v5140_v0 = vadd.f32 %v9468_v31, %v5006_v58  ;;  %v5141_v57 = vadd.f32 %v9470_v2, %v5007_v28  ;;  %v5024_v58 = vld [vmem:[#allocation2 + $0x198] sm:$0xff]  ;;  %v5025_v28 = vld [vmem:[#allocation2 + $0x2e8] sm:$0xff] }
 0x83d   : > { %5418 = vst [vmem:[#allocation4 + $0x110] sm:$0xff] %v5354_v26  ;;  %v5266_v38 = vmax.f32 %v5138_v23, 0.0  ;;  %v5267_v53 = vmax.f32 %v5139_v18, 0.0  ;;  %v5142_v54 = vadd.f32 %v9468_v31, %v5008_v32  ;;  %v5143_v5 = vadd.f32 %v9470_v2, %v5009_v48  ;;  %v5026_v32 = vld [vmem:[#allocation2 + $0x1f8] sm:$0xff] }
 0x83e   : > { %5419 = vst [vmem:[#allocation4 + $0x118] sm:$0xff] %v5355_v19  ;;  %v5356_v33 = vpack.c.bf16 %v5265_v25, %v5264_v29  ;;  %v5268_v15 = vmax.f32 %v5140_v0, 0.0  ;;  %v5269_v4 = vmax.f32 %v5141_v57, 0.0  ;;  %v5144_v62 = vadd.f32 %v9468_v31, %v5010_v14  ;;  %v5027_v18 = vld [vmem:[#allocation2 + $0x238] sm:$0xff] }
 0x83f   : > { %v5357_v37 = vpack.c.bf16 %v5267_v53, %v5266_v38  ;;  %v5270_v11 = vmax.f32 %v5142_v54, 0.0  ;;  %v5271_v7 = vmax.f32 %v5143_v5, 0.0  ;;  %v5145_v17 = vadd.f32 %v9470_v2, %v5011_v9  ;;  %v5028_v57 = vld [vmem:[#allocation2 + $0x398] sm:$0xff]  ;;  %v5029_v9 = vld [vmem:[#allocation2 + $0x390] sm:$0xff] }
 0x840   : > { %5420 = vst [vmem:[#allocation4 + $0x120] sm:$0xff] %v5356_v33  ;;  %v5358_v6 = vpack.c.bf16 %v5269_v4, %v5268_v15  ;;  %v5272_v1 = vmax.f32 %v5144_v62, 0.0  ;;  %v5146_v12 = vadd.f32 %v9468_v31, %v5012_v20  ;;  %v5147_v55 = vadd.f32 %v9470_v2, %v5013_v51  ;;  %v5030_v20 = vld [vmem:[#allocation2 + $0x1a0] sm:$0xff]  ;;  %v5031_v51 = vld [vmem:[#allocation2 + $0xa8] sm:$0xff] }
 0x841   : > { %5421 = vst [vmem:[#allocation4 + $0x128] sm:$0xff] %v5357_v37  ;;  %v5359_v13 = vpack.c.bf16 %v5271_v7, %v5270_v11  ;;  %v5273_v42 = vmax.f32 %v5145_v17, 0.0  ;;  %v5148_v61 = vadd.f32 %v9468_v31, %v5014_v60  ;;  %v5149_v63 = vadd.f32 %v9470_v2, %v5015_v41  ;;  %v5032_v60 = vld [vmem:[#allocation2 + $0x258] sm:$0xff] }
 0x842   : > { %5422 = vst [vmem:[#allocation4 + $0x130] sm:$0xff] %v5358_v6  ;;  %v5274_v8 = vmax.f32 %v5146_v12, 0.0  ;;  %v5275_v30 = vmax.f32 %v5147_v55, 0.0  ;;  %v5150_v16 = vadd.f32 %v9468_v31, %v5016_v43  ;;  %v5151_v47 = vadd.f32 %v9470_v2, %v5017_v34  ;;  %v5033_v41 = vld [vmem:[#allocation2 + $0x2d8] sm:$0xff]  ;;  %v5034_v43 = vld [vmem:[#allocation2 + $0xf0] sm:$0xff]  ;;  %v5035_v55 = vld [vmem:[#allocation2 + $0x180] sm:$0xff] }
 0x843   : > { %5423 = vst [vmem:[#allocation4 + $0x138] sm:$0xff] %v5359_v13  ;;  %v5360_v39 = vpack.c.bf16 %v5273_v42, %v5272_v1  ;;  %v5276_v27 = vmax.f32 %v5148_v61, 0.0  ;;  %v5277_v44 = vmax.f32 %v5149_v63, 0.0  ;;  %v5152_v56 = vadd.f32 %v9468_v31, %v5018_v49  ;;  %v5036_v63 = vld [vmem:[#allocation2 + $0x170] sm:$0xff] }
 0x844   : > { %v5361_v52 = vpack.c.bf16 %v5275_v30, %v5274_v8  ;;  %v5278_v59 = vmax.f32 %v5150_v16, 0.0  ;;  %v5279_v24 = vmax.f32 %v5151_v47, 0.0  ;;  %v5153_v3 = vadd.f32 %v9470_v2, %v5019_v40  ;;  %v5037_v40 = vld [vmem:[#allocation2 + $0x3d0] sm:$0xff] }
 0x845   : > { %5424 = vst [vmem:[#allocation4 + $0x140] sm:$0xff] %v5360_v39  ;;  %v5362_v22 = vpack.c.bf16 %v5277_v44, %v5276_v27  ;;  %v5280_v46 = vmax.f32 %v5152_v56, 0.0  ;;  %v5154_v36 = vadd.f32 %v9468_v31, %v5020_v21  ;;  %v5155_v35 = vadd.f32 %v9470_v2, %v5021_v50  ;;  %v5038_v21 = vld [vmem:[#allocation2 + $0x250] sm:$0xff]  ;;  %v5039_v50 = vld [vmem:[#allocation2 + $0x378] sm:$0xff] }
 0x846   : > { %5425 = vst [vmem:[#allocation4 + $0x148] sm:$0xff] %v5361_v52  ;;  %v5363_v48 = vpack.c.bf16 %v5279_v24, %v5278_v59  ;;  %v5281_v26 = vmax.f32 %v5153_v3, 0.0  ;;  %v5156_v29 = vadd.f32 %v9468_v31, %v5022_v10  ;;  %v5157_v23 = vadd.f32 %v9470_v2, %v5023_v45  ;;  %v5040_v10 = vld [vmem:[#allocation2 + $0xb8] sm:$0xff] }
 0x847   : > { %5426 = vst [vmem:[#allocation4 + $0x150] sm:$0xff] %v5362_v22  ;;  %v5282_v14 = vmax.f32 %v5154_v36, 0.0  ;;  %v5283_v19 = vmax.f32 %v5155_v35, 0.0  ;;  %v5158_v25 = vadd.f32 %v9468_v31, %v5024_v58  ;;  %v5159_v0 = vadd.f32 %v9470_v2, %v5025_v28  ;;  %v5041_v45 = vld [vmem:[#allocation2 + $0x38] sm:$0xff]  ;;  %v5043_v35 = vld [vmem:[#allocation2 + $0x308] sm:$0xff] }
 0x848   : > { %5427 = vst [vmem:[#allocation4 + $0x158] sm:$0xff] %v5363_v48  ;;  %v5364_v38 = vpack.c.bf16 %v5281_v26, %v5280_v46  ;;  %v5284_v53 = vmax.f32 %v5156_v29, 0.0  ;;  %v5285_v54 = vmax.f32 %v5157_v23, 0.0  ;;  %v5160_v5 = vadd.f32 %v9468_v31, %v5026_v32  ;;  %v5042_v58 = vld [vmem:[#allocation2 + $0x78] sm:$0xff]  ;;  %v5044_v23 = vld [vmem:[#allocation2 + $0x370] sm:$0xff] }
 0x849   : > { %v5365_v33 = vpack.c.bf16 %v5283_v19, %v5282_v14  ;;  %v5286_v15 = vmax.f32 %v5158_v25, 0.0  ;;  %v5287_v4 = vmax.f32 %v5159_v0, 0.0  ;;  %v5161_v62 = vadd.f32 %v9470_v2, %v5027_v18  ;;  %v5045_v18 = vld [vmem:[#allocation2 + $0xc8] sm:$0xff] }
 0x84a   : > { %5428 = vst [vmem:[#allocation4 + $0x160] sm:$0xff] %v5364_v38  ;;  %v5366_v37 = vpack.c.bf16 %v5285_v54, %v5284_v53  ;;  %v5288_v11 = vmax.f32 %v5160_v5, 0.0  ;;  %v5162_v7 = vadd.f32 %v9468_v31, %v5028_v57  ;;  %v5163_v17 = vadd.f32 %v9470_v2, %v5029_v9  ;;  %v5046_v57 = vld [vmem:[#allocation2 + $0x278] sm:$0xff]  ;;  %v5047_v9 = vld [vmem:[#allocation2 + $0x360] sm:$0xff] }
 0x84b   : > { %5429 = vst [vmem:[#allocation4 + $0x168] sm:$0xff] %v5365_v33  ;;  %v5367_v34 = vpack.c.bf16 %v5287_v4, %v5286_v15  ;;  %v5289_v6 = vmax.f32 %v5161_v62, 0.0  ;;  %v5164_v1 = vadd.f32 %v9468_v31, %v5030_v20  ;;  %v5165_v12 = vadd.f32 %v9470_v2, %v5031_v51  ;;  %v5048_v20 = vld [vmem:[#allocation2 + $0x228] sm:$0xff] }
 0x84c   : > { %5430 = vst [vmem:[#allocation4 + $0x170] sm:$0xff] %v5366_v37  ;;  %v5290_v49 = vmax.f32 %v5162_v7, 0.0  ;;  %v5291_v13 = vmax.f32 %v5163_v17, 0.0  ;;  %v5166_v42 = vadd.f32 %v9468_v31, %v5032_v60  ;;  %v5167_v61 = vadd.f32 %v9470_v2, %v5033_v41  ;;  %v5049_v51 = vld [vmem:[#allocation2 + $0x348] sm:$0xff]  ;;  %v5051_v17 = vld [vmem:[#allocation2 + $0xf8] sm:$0xff] }
 0x84d   : > { %5431 = vst [vmem:[#allocation4 + $0x178] sm:$0xff] %v5367_v34  ;;  %v5368_v8 = vpack.c.bf16 %v5289_v6, %v5288_v11  ;;  %v5292_v30 = vmax.f32 %v5164_v1, 0.0  ;;  %v5293_v16 = vmax.f32 %v5165_v12, 0.0  ;;  %v5168_v47 = vadd.f32 %v9468_v31, %v5034_v43  ;;  %v5050_v60 = vld [vmem:[#allocation2 + $0x148] sm:$0xff] }
 0x84e   : > { %v5369_v39 = vpack.c.bf16 %v5291_v13, %v5290_v49  ;;  %v5294_v27 = vmax.f32 %v5166_v42, 0.0  ;;  %v5295_v44 = vmax.f32 %v5167_v61, 0.0  ;;  %v5169_v56 = vadd.f32 %v9470_v2, %v5035_v55  ;;  %v5052_v12 = vld [vmem:[#allocation2 + $0x68] sm:$0xff]  ;;  %v5053_v55 = vld [vmem:[#allocation2] sm:$0xff] }
 0x84f   : > { %5432 = vst [vmem:[#allocation4 + $0x180] sm:$0xff] %v5368_v8  ;;  %v5370_v52 = vpack.c.bf16 %v5293_v16, %v5292_v30  ;;  %v5296_v59 = vmax.f32 %v5168_v47, 0.0  ;;  %v5170_v24 = vadd.f32 %v9468_v31, %v5036_v63  ;;  %v5171_v3 = vadd.f32 %v9470_v2, %v5037_v40  ;;  %v5054_v63 = vld [vmem:[#allocation2 + $0x298] sm:$0xff]  ;;  %v5055_v40 = vld [vmem:[#allocation2 + $0x270] sm:$0xff] }
 0x850   : > { %5433 = vst [vmem:[#allocation4 + $0x188] sm:$0xff] %v5369_v39  ;;  %v5371_v28 = vpack.c.bf16 %v5295_v44, %v5294_v27  ;;  %v5297_v22 = vmax.f32 %v5169_v56, 0.0  ;;  %v5172_v46 = vadd.f32 %v9468_v31, %v5038_v21  ;;  %v5173_v36 = vadd.f32 %v9470_v2, %v5039_v50  ;;  %v5056_v21 = vld [vmem:[#allocation2 + $0x310] sm:$0xff] }
 0x851   : > { %5434 = vst [vmem:[#allocation4 + $0x190] sm:$0xff] %v5370_v52  ;;  %v5298_v32 = vmax.f32 %v5170_v24, 0.0  ;;  %v5299_v48 = vmax.f32 %v5171_v3, 0.0  ;;  %v5174_v26 = vadd.f32 %v9468_v31, %v5040_v10  ;;  %v5175_v29 = vadd.f32 %v9470_v2, %v5041_v45  ;;  %v5057_v50 = vld [vmem:[#allocation2 + $0x190] sm:$0xff] }
 0x852   : > { %5435 = vst [vmem:[#allocation4 + $0x198] sm:$0xff] %v5371_v28  ;;  %v5372_v14 = vpack.c.bf16 %v5297_v22, %v5296_v59  ;;  %v5300_v19 = vmax.f32 %v5172_v46, 0.0  ;;  %v5301_v25 = vmax.f32 %v5173_v36, 0.0  ;;  %v5176_v0 = vadd.f32 %v9468_v31, %v5042_v58 }
 0x853   : > { %v5373_v38 = vpack.c.bf16 %v5299_v48, %v5298_v32  ;;  %v5302_v53 = vmax.f32 %v5174_v26, 0.0  ;;  %v5303_v54 = vmax.f32 %v5175_v29, 0.0  ;;  %v5177_v5 = vadd.f32 %v9470_v2, %v5043_v35 }
 0x854   : > { %5436 = vst [vmem:[#allocation4 + $0x1a0] sm:$0xff] %v5372_v14  ;;  %v5374_v33 = vpack.c.bf16 %v5301_v25, %v5300_v19  ;;  %v5304_v15 = vmax.f32 %v5176_v0, 0.0  ;;  %v5178_v4 = vadd.f32 %v9468_v31, %v5044_v23  ;;  %v5179_v62 = vadd.f32 %v9470_v2, %v5045_v18 }
 0x855   : > { %5437 = vst [vmem:[#allocation4 + $0x1a8] sm:$0xff] %v5373_v38  ;;  %v5375_v41 = vpack.c.bf16 %v5303_v54, %v5302_v53  ;;  %v5305_v37 = vmax.f32 %v5177_v5, 0.0  ;;  %v5180_v11 = vadd.f32 %v9468_v31, %v5046_v57  ;;  %v5181_v7 = vadd.f32 %v9470_v2, %v5047_v9 }
 0x856   : > { %5438 = vst [vmem:[#allocation4 + $0x1b0] sm:$0xff] %v5374_v33  ;;  %v5306_v43 = vmax.f32 %v5178_v4, 0.0  ;;  %v5307_v34 = vmax.f32 %v5179_v62, 0.0  ;;  %v5182_v6 = vadd.f32 %v9468_v31, %v5048_v20  ;;  %v5183_v1 = vadd.f32 %v9470_v2, %v5049_v51 }
 0x857   : > { %5439 = vst [vmem:[#allocation4 + $0x1b8] sm:$0xff] %v5375_v41  ;;  %v5376_v49 = vpack.c.bf16 %v5305_v37, %v5304_v15  ;;  %v5308_v13 = vmax.f32 %v5180_v11, 0.0  ;;  %v5309_v42 = vmax.f32 %v5181_v7, 0.0  ;;  %v5184_v61 = vadd.f32 %v9468_v31, %v5050_v60 }
 0x858   : > { %v5377_v8 = vpack.c.bf16 %v5307_v34, %v5306_v43  ;;  %v5310_v30 = vmax.f32 %v5182_v6, 0.0  ;;  %v5311_v16 = vmax.f32 %v5183_v1, 0.0  ;;  %v5185_v47 = vadd.f32 %v9470_v2, %v5051_v17 }
 0x859   : > { %5440 = vst [vmem:[#allocation4 + $0x1c0] sm:$0xff] %v5376_v49  ;;  %v5378_v39 = vpack.c.bf16 %v5309_v42, %v5308_v13  ;;  %v5312_v27 = vmax.f32 %v5184_v61, 0.0  ;;  %v5186_v44 = vadd.f32 %v9468_v31, %v5052_v12  ;;  %v5187_v56 = vadd.f32 %v9470_v2, %v5053_v55 }
 0x85a   : > { %5441 = vst [vmem:[#allocation4 + $0x1c8] sm:$0xff] %v5377_v8  ;;  %v5379_v10 = vpack.c.bf16 %v5311_v16, %v5310_v30  ;;  %v5313_v45 = vmax.f32 %v5185_v47, 0.0  ;;  %v5188_v52 = vadd.f32 %v9468_v31, %v5054_v63  ;;  %v5189_v59 = vadd.f32 %v9470_v2, %v5055_v40 }
 0x85b   : > { %5442 = vst [vmem:[#allocation4 + $0x1d0] sm:$0xff] %v5378_v39  ;;  %v5314_v24 = vmax.f32 %v5186_v44, 0.0  ;;  %v5315_v3 = vmax.f32 %v5187_v56, 0.0  ;;  %v5190_v58 = vadd.f32 %v9468_v31, %v5056_v21  ;;  %v5191_v28 = vadd.f32 %v9470_v2, %v5057_v50 }
 0x85c   : > { %5443 = vst [vmem:[#allocation4 + $0x1d8] sm:$0xff] %v5379_v10  ;;  %v5380_v22 = vpack.c.bf16 %v5313_v45, %v5312_v27  ;;  %v5316_v46 = vmax.f32 %v5188_v52, 0.0  ;;  %v5317_v36 = vmax.f32 %v5189_v59, 0.0 }
 0x85d   : > { %v5381_v35 = vpack.c.bf16 %v5315_v3, %v5314_v24  ;;  %v5318_v32 = vmax.f32 %v5190_v58, 0.0  ;;  %v5319_v48 = vmax.f32 %v5191_v28, 0.0 }
 0x85e   : > { %5444 = vst [vmem:[#allocation4 + $0x1e0] sm:$0xff] %v5380_v22  ;;  %v5382_v26 = vpack.c.bf16 %v5317_v36, %v5316_v46 }
 0x85f   : > { %5445 = vst [vmem:[#allocation4 + $0x1e8] sm:$0xff] %v5381_v35  ;;  %v5383_v29 = vpack.c.bf16 %v5319_v48, %v5318_v32 }
 0x860   : > { %5446 = vst [vmem:[#allocation4 + $0x1f0] sm:$0xff] %v5382_v26 }
 0x861   : > { %5447 = vst [vmem:[#allocation4 + $0x1f8] sm:$0xff] %v5383_v29 }
 0x862 PF: > { %p7022_p12 = scmp.eq.s32.totalorder %s5560_s17, 5  ;;  %s5461_s19 = sshll.u32 %s9623_s3, 4  ;;  %s5462_s19 = int_to_ptr.hbm [resolvable:$true] %s5461_s19 }
 0x863   : > { %s7141_s20 = smov [#allocation4]   ;;  %s7142_s23 = smov 128  }
 0x864   : > { %s5459_s22 = sshll.u32 %s7141_s20, 4  ;;  %s7143_s24 = smov 8   ;;  %s5460_s22 = int_to_ptr.vmem [resolvable:$true] %s5459_s22 }
 0x865   : > { %7019 = dma.vmem_to_hbm [thread:$0]  (%p7022_p12), %s5460_s22, 8192, %s5462_s19, [#allocation5], %s7142_s23, %s7142_s23, %s7143_s24  }
 0x866   : > { %7117 = dma.done.wait (%p7022_p12), [#allocation5], 8192  }
 0x867   : > { %7119 = vsyncadd (%p7022_p12), [#allocation5], 4294959104 }
 0x868 PF: > { %s14_s16 = sadd.s32 1, %s7138_s16   ;;  %s10197_s12 = smov %s7126_s13 }
 0x869   : > { %p11_p13 = scmp.ge.s32.totalorder %s14_s16, 8   ;;  %s10198_s13 = smov %s7200_s21 }
 0x86a   : > { %s10199_s14 = smov %s7134_s15  ;;  %s10200_s15 = smov %s10202_s18 }
 0x86b   :  { %13 = sbr.rel (!%p11_p13) target bundleno = 3 (0x3), region = 102 }
 0x870   :  { %5478 = vsyncpa [#allocation5], 1 }
 0x871   :  { %5480 = vsyncpa [#allocation5 + $0x1], 1 }

</bundles_post_ra>
